<compile_context>
chip_gen: v7x
topology: tpu7x:2x2x1
jax: 0.10.0
libtpu: 0.0.40
codegen_flags: <defaults>
</compile_context>

<pallas_src>
import functools

import jax
import jax.numpy as jnp
from jax.experimental import pallas as pl
from jax.experimental.pallas import tpu as pltpu


def _round_up(v, m):
    return (v + m - 1) // m * m


# ----------------------------------------------------------------------------
# Fused forward kernel: one grid step == one image.
# ----------------------------------------------------------------------------
def fused_net_kernel(
    # per-image data
    p1_ref,    # [1, N, 9*Cin] bf16  conv1 im2col patches on the flat padded grid
    meta_ref,  # [1, 1, Nmeta] f32
    # shared constants
    mask_ref,  # [N, 1]  f32   1.0 at interior rows, 0.0 at border / pad rows
    pool_ref,  # [1, N]  bf16  1/(H*W) at interior rows (global average pool)
    # weights (bf16) and bias / fused BN-shift rows (f32)
    w1_ref,    # [9*Cin, C1]
    b1_ref,    # [1, C1]
    wa_ref,    # [9*C1, C1]   residual conv A
    ba_ref,    # [1, C1]
    wb_ref,    # [9*C1, C1]   residual conv B
    bb_ref,    # [1, C1]
    cuw_ref,   # [C1, 512]    1x1 expand
    cub_ref,   # [1, 512]
    cw_ref,    # [512, 128]   arch.fc folded into output head (col 0 live)
    m1w_ref,   # [Nmeta, 512] meta Linear1 (BN1 scale folded in)
    m1s_ref,   # [1, 512]     fused BN1 shift
    m2w_ref,   # [512, 256]   meta Linear2 (BN2 scale folded in)
    m2s_ref,   # [1, 256]     fused BN2 shift
    ow_ref,    # [256, 128]   output weights, meta part (col 0 live)
    ob_ref,    # [1, 128]     folded output bias (col 0 live)
    # output
    o_ref,     # [1, 1, 128]  logit in column 0
    *, wp: int,
):
    f32, bf16 = jnp.float32, jnp.bfloat16
    n_rows = mask_ref.shape[0]
    mask = mask_ref[...]                                   # [N, 1]

    def conv3x3(h, w_ref_, b_ref_):
        """3x3 'same' conv as ONE packed-K MXU matmul.

        `h` is the activation on the flat zero-padded grid ([N, C1], border
        rows zero).  Each tap is a static sublane rotation of `h` (XLU, free
        slot); the nine rotated copies are lane-concatenated (each piece is an
        exact 128-lane multiple) into a [N, 9*C1] patch block.  Wrap-around
        rows only ever land on border rows, which are masked downstream.
        """
        pieces = []
        for di in range(3):
            for dj in range(3):
                s = (di - 1) * wp + (dj - 1)   # flat-index offset of this tap
                piece = h if s == 0 else pltpu.roll(h, shift=(-s) % n_rows, axis=0)
                pieces.append(piece.astype(bf16))
        patch = jnp.concatenate(pieces, axis=1)            # [N, 9*C1] bf16
        return jnp.dot(patch, w_ref_[...], preferred_element_type=f32) + b_ref_[...]

    # ---- synthetic backbone ----
    # conv1 (Cin -> C1): patches pre-built in the wrapper (Cin=4 is too
    # lane-sparse to be worth touching in-kernel); border patch rows are zero.
    h1 = jnp.dot(p1_ref[0], w1_ref[...], preferred_element_type=f32) + b1_ref[...]
    h1 = jnp.maximum(h1, 0.0) * mask                       # [N, C1], border rows = 0

    # residual block
    h2 = jnp.maximum(conv3x3(h1, wa_ref, ba_ref), 0.0) * mask
    h3 = conv3x3(h2, wb_ref, bb_ref)                       # border junk pooled out below
    hres = jnp.maximum(h3 + h1, 0.0)

    # 1x1 expand C1 -> 512 + ReLU
    hu = jnp.dot(hres.astype(bf16), cuw_ref[...], preferred_element_type=f32)
    hu = jnp.maximum(hu + cub_ref[...], 0.0)               # [N, 512]

    # global average pool over the H*W interior rows (precomputed pooling row)
    feat = jnp.dot(pool_ref[...], hu.astype(bf16), preferred_element_type=f32)  # [1, 512]

    # cnn branch: arch.fc is folded into the output Linear at pack time.
    out = jnp.dot(feat.astype(bf16), cw_ref[...], preferred_element_type=f32)   # [1, 128]

    # ---- meta head (BatchNorm1d eval folded into weights; Dropout = identity) ----
    m = jnp.dot(meta_ref[0].astype(bf16), m1w_ref[...], preferred_element_type=f32)
    m = jnp.maximum(m + m1s_ref[...], 0.0)                 # [1, 512] (cols 500.. = 0)
    m = jnp.dot(m.astype(bf16), m2w_ref[...], preferred_element_type=f32)
    m = jnp.maximum(m + m2s_ref[...], 0.0)                 # [1, 256] (cols 250.. = 0)
    out = out + jnp.dot(m.astype(bf16), ow_ref[...], preferred_element_type=f32)

    o_ref[0] = out + ob_ref[...]                           # [1, 128], col 0 = logit


# ----------------------------------------------------------------------------
# Parameter init (deterministic, PyTorch-like uniform(-1/sqrt(fan_in), +))
# ----------------------------------------------------------------------------
def _init_linear(key, fan_in, fan_out):
    kw, kb = jax.random.split(key)
    bound = 1.0 / jnp.sqrt(float(fan_in))
    w = jax.random.uniform(kw, (fan_in, fan_out), jnp.float32, -bound, bound)
    b = jax.random.uniform(kb, (fan_out,), jnp.float32, -bound, bound)
    return w, b


def _init_conv3x3(key, c_in, c_out):
    kw, kb = jax.random.split(key)
    bound = 1.0 / jnp.sqrt(float(9 * c_in))
    w = jax.random.uniform(kw, (3, 3, c_in, c_out), jnp.float32, -bound, bound)
    b = jax.random.uniform(kb, (c_out,), jnp.float32, -bound, bound)
    return w, b


def _init_bn(key, n):
    k1, k2, k3, k4 = jax.random.split(key, 4)
    gamma = 1.0 + 0.1 * jax.random.normal(k1, (n,), jnp.float32)
    beta = 0.1 * jax.random.normal(k2, (n,), jnp.float32)
    mean = 0.1 * jax.random.normal(k3, (n,), jnp.float32)
    var = 0.5 + 0.5 * jnp.abs(jax.random.normal(k4, (n,), jnp.float32))
    return gamma, beta, mean, var


def init_params(key, c_in=4, n_meta=8, c1=128):
    ks = jax.random.split(key, 10)
    p = {}
    # synthetic ResNet backbone producing 512-d features
    p['conv1_w'], p['conv1_b'] = _init_conv3x3(ks[0], c_in, c1)
    p['resA_w'], p['resA_b'] = _init_conv3x3(ks[1], c1, c1)
    p['resB_w'], p['resB_b'] = _init_conv3x3(ks[2], c1, c1)
    p['conv_up_w'], p['conv_up_b'] = _init_linear(ks[3], c1, 512)      # 1x1 conv
    # arch.fc replaced by Linear(512, 500)
    p['fc_w'], p['fc_b'] = _init_linear(ks[4], 512, 500)
    # meta head
    p['m1_w'], p['m1_b'] = _init_linear(ks[5], n_meta, 500)
    p['bn1_g'], p['bn1_b'], p['bn1_m'], p['bn1_v'] = _init_bn(ks[6], 500)
    p['m2_w'], p['m2_b'] = _init_linear(ks[7], 500, 250)
    p['bn2_g'], p['bn2_b'], p['bn2_m'], p['bn2_v'] = _init_bn(ks[8], 250)
    # self.ouput = Linear(500 + 250, 1)
    p['out_w'], p['out_b'] = _init_linear(ks[9], 750, 1)
    return p


def _bn_fuse(bias, gamma, beta, mean, var, eps=1e-5):
    """Fold Linear bias + BatchNorm1d(eval) into per-column scale/shift."""
    s = gamma / jnp.sqrt(var + eps)
    shift = (bias - mean) * s + beta
    return s, shift


# ----------------------------------------------------------------------------
# Packing: fold BN scales + arch.fc, pad to lane-dense shapes, cast to bf16.
# ----------------------------------------------------------------------------
def pack_params(p):
    f32, bf16 = jnp.float32, jnp.bfloat16

    def row(v, n=None):
        v = jnp.asarray(v, f32).reshape(1, -1)
        if n is not None and v.shape[1] < n:
            v = jnp.pad(v, ((0, 0), (0, n - v.shape[1])))
        return v

    def pad2(w, rows, cols):
        return jnp.pad(w, ((0, rows - w.shape[0]), (0, cols - w.shape[1])))

    c_in = p['conv1_w'].shape[2]
    c1 = p['conv1_w'].shape[3]
    n_meta = p['m1_w'].shape[0]

    s1, sh1 = _bn_fuse(p['m1_b'], p['bn1_g'], p['bn1_b'], p['bn1_m'], p['bn1_v'])
    s2, sh2 = _bn_fuse(p['m2_b'], p['bn2_g'], p['bn2_b'], p['bn2_m'], p['bn2_v'])

    # arch.fc (512->500) folded into the cnn half of the output Linear.  Exact:
    # Net.forward has no nonlinearity between arch.fc and `ouput` (fold in f32).
    ow = p['out_w']                                              # [750, 1]
    cw = pad2(p['fc_w'] @ ow[:500], 512, 128).astype(bf16)       # [512, 128], col 0 live
    ob = jnp.zeros((1, 128), f32).at[0, 0].set(
        jnp.dot(p['fc_b'], ow[:500, 0]) + p['out_b'][0])

    m1w = pad2(p['m1_w'] * s1, n_meta, 512).astype(bf16)         # BN1 scale folded
    m2w = pad2(p['m2_w'] * s2, 512, 256).astype(bf16)            # rows 500.., cols 250.. = 0
    oww = jnp.zeros((256, 128), f32).at[:250, 0].set(ow[500:750, 0]).astype(bf16)

    return (
        p['conv1_w'].reshape(9 * c_in, c1).astype(bf16), row(p['conv1_b']),
        p['resA_w'].reshape(9 * c1, c1).astype(bf16),    row(p['resA_b']),
        p['resB_w'].reshape(9 * c1, c1).astype(bf16),    row(p['resB_b']),
        p['conv_up_w'].astype(bf16),                     row(p['conv_up_b']),
        cw,
        m1w, row(sh1, 512),
        m2w, row(sh2, 256),
        oww, ob,
    )


# ----------------------------------------------------------------------------
# Forward pass wrapper: conv1 im2col + mask/pool construction in XLA (tiny),
# then one fused pallas_call with a "parallel" batch grid.
# ----------------------------------------------------------------------------
def net_forward(packed, x_nchw, meta):
    f32, bf16 = jnp.float32, jnp.bfloat16
    x = jnp.transpose(x_nchw, (0, 2, 3, 1)).astype(f32)          # NCHW -> NHWC
    B, H, W, c_in = x.shape
    Hp = H + 2
    Wp = _round_up(W + 2, 8)       # flat row count N = Hp*Wp stays a multiple of 8
    N = Hp * Wp

    # conv1 im2col on the flat padded grid (border / pad rows are zero patches)
    xp = jnp.pad(x, ((0, 0), (1, 1), (1, 1), (0, 0)))
    patches = jnp.concatenate(
        [xp[:, i:i + H, j:j + W, :] for i in range(3) for j in range(3)], axis=-1)
    patches = jnp.pad(patches, ((0, 0), (1, 1), (1, Wp - 1 - W), (0, 0)))
    patches = patches.reshape(B, N, 9 * c_in).astype(bf16)       # [B, N, 36]

    # interior mask and pooling row for the flat padded grid
    rv = (jnp.arange(Hp) >= 1) & (jnp.arange(Hp) <= H)
    cv = (jnp.arange(Wp) >= 1) & (jnp.arange(Wp) <= W)
    interior = (rv[:, None] & cv[None, :]).reshape(N).astype(f32)
    mask = interior.reshape(N, 1)                                # [N, 1] f32
    pool = (interior / float(H * W)).reshape(1, N).astype(bf16)  # [1, N] bf16

    meta3 = meta.astype(f32).reshape(B, 1, -1)                   # [B, 1, Nmeta]

    def shared(a):
        zeros = (0,) * a.ndim
        return pl.BlockSpec(a.shape, lambda b: zeros)

    def per_img(a):
        tail = (0,) * (a.ndim - 1)
        return pl.BlockSpec((1,) + a.shape[1:], lambda b: (b,) + tail)

    operands = (patches, meta3, mask, pool) + tuple(packed)
    in_specs = [per_img(patches), per_img(meta3), shared(mask), shared(pool)]
    in_specs += [shared(w) for w in packed]

    out = pl.pallas_call(
        functools.partial(fused_net_kernel, wp=Wp),
        grid=(B,),
        in_specs=in_specs,
        out_specs=pl.BlockSpec((1, 1, 128), lambda b: (b, 0, 0)),
        out_shape=jax.ShapeDtypeStruct((B, 1, 128), f32),
        compiler_params=pltpu.CompilerParams(
            dimension_semantics=("parallel",)),   # v7x: one image per TensorCore
    )(*operands)
    return out[:, 0, :1]                                         # [B, 1] logit


# ----------------------------------------------------------------------------
# Pure-JAX f32 reference of the same forward (correctness anchor).
# ----------------------------------------------------------------------------
def reference_forward(p, x_nchw, meta):
    x = jnp.transpose(x_nchw, (0, 2, 3, 1)).astype(jnp.float32)
    _, H, W, _ = x.shape
    relu = jax.nn.relu

    def conv3x3(h, w, b):
        hp = jnp.pad(h, ((0, 0), (1, 1), (1, 1), (0, 0)))
        out = b
        for i in range(3):
            for j in range(3):
                out = out + jnp.einsum('bhwc,cd->bhwd', hp[:, i:i + H, j:j + W, :], w[i, j])
        return out

    h1 = relu(conv3x3(x, p['conv1_w'], p['conv1_b']))
    h2 = relu(conv3x3(h1, p['resA_w'], p['resA_b']))
    hres = relu(conv3x3(h2, p['resB_w'], p['resB_b']) + h1)
    hu = relu(jnp.einsum('bhwc,cd->bhwd', hres, p['conv_up_w']) + p['conv_up_b'])
    feat = hu.mean(axis=(1, 2))                                  # [B, 512]
    cnn = feat @ p['fc_w'] + p['fc_b']                           # [B, 500]

    def bn(z, g, be, mu, var, eps=1e-5):
        return (z - mu) / jnp.sqrt(var + eps) * g + be

    m = relu(bn(meta @ p['m1_w'] + p['m1_b'],
                p['bn1_g'], p['bn1_b'], p['bn1_m'], p['bn1_v']))
    m = relu(bn(m @ p['m2_w'] + p['m2_b'],
                p['bn2_g'], p['bn2_b'], p['bn2_m'], p['bn2_v']))
    features = jnp.concatenate([cnn, m], axis=1)                 # [B, 750]
    return features @ p['out_w'] + p['out_b']                    # [B, 1]


if __name__ == "__main__":
    key = jax.random.PRNGKey(0)
    kp, kx, km = jax.random.split(key, 3)

    B, C_IN, HW, N_META = 2, 4, 16, 8
    params = init_params(kp, c_in=C_IN, n_meta=N_META)
    packed = pack_params(params)
    x = jax.random.normal(kx, (B, C_IN, HW, HW), jnp.float32)    # NCHW, like PyTorch
    meta = jax.random.normal(km, (B, N_META), jnp.float32)

    out = jax.jit(net_forward)(packed, x, meta)
    out = jax.block_until_ready(out)
    assert out.shape == (B, 1), out.shape
    assert bool(jnp.all(jnp.isfinite(out)))

    # sanity-check the fused bf16 kernel against the f32 reference
    ref = reference_forward(params, x, meta)
    assert float(jnp.max(jnp.abs(out - ref))) < 2e-2, (out, ref)
    print("KERNEL_OK")
</pallas_src>

<mosaic_0001>
module attributes {stable_mosaic.version = 11 : i64} {
  func.func @fused_net_kernel(%arg0: i32, %arg1: memref<1x432x36xbf16, #tpu.memory_space<vmem>>, %arg2: memref<1x1x8xf32, #tpu.memory_space<vmem>>, %arg3: memref<432x1xf32, #tpu.memory_space<vmem>>, %arg4: memref<1x432xbf16, #tpu.memory_space<vmem>>, %arg5: memref<36x128xbf16, #tpu.memory_space<vmem>>, %arg6: memref<1x128xf32, #tpu.memory_space<vmem>>, %arg7: memref<1152x128xbf16, #tpu.memory_space<vmem>>, %arg8: memref<1x128xf32, #tpu.memory_space<vmem>>, %arg9: memref<1152x128xbf16, #tpu.memory_space<vmem>>, %arg10: memref<1x128xf32, #tpu.memory_space<vmem>>, %arg11: memref<128x512xbf16, #tpu.memory_space<vmem>>, %arg12: memref<1x512xf32, #tpu.memory_space<vmem>>, %arg13: memref<512x128xbf16, #tpu.memory_space<vmem>>, %arg14: memref<8x512xbf16, #tpu.memory_space<vmem>>, %arg15: memref<1x512xf32, #tpu.memory_space<vmem>>, %arg16: memref<512x256xbf16, #tpu.memory_space<vmem>>, %arg17: memref<1x256xf32, #tpu.memory_space<vmem>>, %arg18: memref<256x128xbf16, #tpu.memory_space<vmem>>, %arg19: memref<1x128xf32, #tpu.memory_space<vmem>>, %arg20: memref<1x1x128xf32, #tpu.memory_space<vmem>>) attributes {dimension_semantics = [#tpu.dimension_semantics<parallel>], iteration_bounds = array<i64: 2>, scalar_prefetch = 0 : i64, scratch_operands = 0 : i64, tpu.core_type = #tpu.core_type<tc>, window_params = [{transform_indices = @transform_0, window_bounds = array<i64: 1, 432, 36>}, {transform_indices = @transform_1, window_bounds = array<i64: 1, 1, 8>}, {pipeline_mode = #tpu.pipeline_mode<synchronous>, transform_indices = @transform_2, window_bounds = array<i64: 432, 1>}, {pipeline_mode = #tpu.pipeline_mode<synchronous>, transform_indices = @transform_3, window_bounds = array<i64: 1, 432>}, {pipeline_mode = #tpu.pipeline_mode<synchronous>, transform_indices = @transform_4, window_bounds = array<i64: 36, 128>}, {pipeline_mode = #tpu.pipeline_mode<synchronous>, transform_indices = @transform_5, window_bounds = array<i64: 1, 128>}, {pipeline_mode = #tpu.pipeline_mode<synchronous>, transform_indices = @transform_6, window_bounds = array<i64: 1152, 128>}, {pipeline_mode = #tpu.pipeline_mode<synchronous>, transform_indices = @transform_7, window_bounds = array<i64: 1, 128>}, {pipeline_mode = #tpu.pipeline_mode<synchronous>, transform_indices = @transform_8, window_bounds = array<i64: 1152, 128>}, {pipeline_mode = #tpu.pipeline_mode<synchronous>, transform_indices = @transform_9, window_bounds = array<i64: 1, 128>}, {pipeline_mode = #tpu.pipeline_mode<synchronous>, transform_indices = @transform_10, window_bounds = array<i64: 128, 512>}, {pipeline_mode = #tpu.pipeline_mode<synchronous>, transform_indices = @transform_11, window_bounds = array<i64: 1, 512>}, {pipeline_mode = #tpu.pipeline_mode<synchronous>, transform_indices = @transform_12, window_bounds = array<i64: 512, 128>}, {pipeline_mode = #tpu.pipeline_mode<synchronous>, transform_indices = @transform_13, window_bounds = array<i64: 8, 512>}, {pipeline_mode = #tpu.pipeline_mode<synchronous>, transform_indices = @transform_14, window_bounds = array<i64: 1, 512>}, {pipeline_mode = #tpu.pipeline_mode<synchronous>, transform_indices = @transform_15, window_bounds = array<i64: 512, 256>}, {pipeline_mode = #tpu.pipeline_mode<synchronous>, transform_indices = @transform_16, window_bounds = array<i64: 1, 256>}, {pipeline_mode = #tpu.pipeline_mode<synchronous>, transform_indices = @transform_17, window_bounds = array<i64: 256, 128>}, {pipeline_mode = #tpu.pipeline_mode<synchronous>, transform_indices = @transform_18, window_bounds = array<i64: 1, 128>}, {transform_indices = @transform_19, window_bounds = array<i64: 1, 1, 128>}]} {
    %c0 = arith.constant 0 : index
    %c0_0 = arith.constant 0 : index
    %0 = vector.load %arg3[%c0, %c0_0] : memref<432x1xf32, #tpu.memory_space<vmem>>, vector<432x1xf32>
    %c0_1 = arith.constant 0 : index
    %c0_2 = arith.constant 0 : index
    %c0_3 = arith.constant 0 : index
    %1 = vector.load %arg1[%c0_1, %c0_2, %c0_3] : memref<1x432x36xbf16, #tpu.memory_space<vmem>>, vector<1x432x36xbf16>
    %2 = vector.shape_cast %1 : vector<1x432x36xbf16> to vector<432x36xbf16>
    %c0_4 = arith.constant 0 : index
    %c0_5 = arith.constant 0 : index
    %3 = vector.load %arg5[%c0_4, %c0_5] : memref<36x128xbf16, #tpu.memory_space<vmem>>, vector<36x128xbf16>
    %cst = arith.constant dense<0.000000e+00> : vector<432x128xf32>
    %4 = tpu.matmul %2, %3, %cst {dimension_numbers = #tpu.dot_dimension_numbers<[1], [0], [0], [1], [0, 0, 1, 1], [], []>} : vector<432x36xbf16>, vector<36x128xbf16>, vector<432x128xf32> -> vector<432x128xf32>
    %c0_6 = arith.constant 0 : index
    %c0_7 = arith.constant 0 : index
    %5 = vector.load %arg6[%c0_6, %c0_7] : memref<1x128xf32, #tpu.memory_space<vmem>>, vector<1x128xf32>
    %6 = vector.broadcast %5 : vector<1x128xf32> to vector<432x128xf32>
    %7 = arith.addf %4, %6 : vector<432x128xf32>
    %cst_8 = arith.constant 0.000000e+00 : f32
    %8 = vector.broadcast %cst_8 : f32 to vector<432x128xf32>
    %9 = arith.maximumf %7, %8 : vector<432x128xf32>
    %10 = vector.broadcast %0 : vector<432x1xf32> to vector<432x128xf32>
    %11 = arith.mulf %9, %10 : vector<432x128xf32>
    %c25_i32 = arith.constant 25 : i32
    %12 = tpu.dynamic_rotate %11 by %c25_i32 dim 0 : vector<432x128xf32>, i32 -> vector<432x128xf32>
    %13 = arith.truncf %12 : vector<432x128xf32> to vector<432x128xbf16>
    %c24_i32 = arith.constant 24 : i32
    %14 = tpu.dynamic_rotate %11 by %c24_i32 dim 0 : vector<432x128xf32>, i32 -> vector<432x128xf32>
    %15 = arith.truncf %14 : vector<432x128xf32> to vector<432x128xbf16>
    %c23_i32 = arith.constant 23 : i32
    %16 = tpu.dynamic_rotate %11 by %c23_i32 dim 0 : vector<432x128xf32>, i32 -> vector<432x128xf32>
    %17 = arith.truncf %16 : vector<432x128xf32> to vector<432x128xbf16>
    %c1_i32 = arith.constant 1 : i32
    %18 = tpu.dynamic_rotate %11 by %c1_i32 dim 0 : vector<432x128xf32>, i32 -> vector<432x128xf32>
    %19 = arith.truncf %18 : vector<432x128xf32> to vector<432x128xbf16>
    %20 = arith.truncf %11 : vector<432x128xf32> to vector<432x128xbf16>
    %c431_i32 = arith.constant 431 : i32
    %21 = tpu.dynamic_rotate %11 by %c431_i32 dim 0 : vector<432x128xf32>, i32 -> vector<432x128xf32>
    %22 = arith.truncf %21 : vector<432x128xf32> to vector<432x128xbf16>
    %c409_i32 = arith.constant 409 : i32
    %23 = tpu.dynamic_rotate %11 by %c409_i32 dim 0 : vector<432x128xf32>, i32 -> vector<432x128xf32>
    %24 = arith.truncf %23 : vector<432x128xf32> to vector<432x128xbf16>
    %c408_i32 = arith.constant 408 : i32
    %25 = tpu.dynamic_rotate %11 by %c408_i32 dim 0 : vector<432x128xf32>, i32 -> vector<432x128xf32>
    %26 = arith.truncf %25 : vector<432x128xf32> to vector<432x128xbf16>
    %c407_i32 = arith.constant 407 : i32
    %27 = tpu.dynamic_rotate %11 by %c407_i32 dim 0 : vector<432x128xf32>, i32 -> vector<432x128xf32>
    %28 = arith.truncf %27 : vector<432x128xf32> to vector<432x128xbf16>
    %29 = tpu.concatenate %13, %15, %17, %19, %20, %22, %24, %26, %28 in 1 : vector<432x128xbf16>, vector<432x128xbf16>, vector<432x128xbf16>, vector<432x128xbf16>, vector<432x128xbf16>, vector<432x128xbf16>, vector<432x128xbf16>, vector<432x128xbf16>, vector<432x128xbf16> -> vector<432x1152xbf16>
    %c0_9 = arith.constant 0 : index
    %c0_10 = arith.constant 0 : index
    %30 = vector.load %arg7[%c0_9, %c0_10] : memref<1152x128xbf16, #tpu.memory_space<vmem>>, vector<1152x128xbf16>
    %cst_11 = arith.constant dense<0.000000e+00> : vector<432x128xf32>
    %31 = tpu.matmul %29, %30, %cst_11 {dimension_numbers = #tpu.dot_dimension_numbers<[1], [0], [0], [1], [0, 0, 1, 1], [], []>} : vector<432x1152xbf16>, vector<1152x128xbf16>, vector<432x128xf32> -> vector<432x128xf32>
    %c0_12 = arith.constant 0 : index
    %c0_13 = arith.constant 0 : index
    %32 = vector.load %arg8[%c0_12, %c0_13] : memref<1x128xf32, #tpu.memory_space<vmem>>, vector<1x128xf32>
    %33 = vector.broadcast %32 : vector<1x128xf32> to vector<432x128xf32>
    %34 = arith.addf %31, %33 : vector<432x128xf32>
    %cst_14 = arith.constant 0.000000e+00 : f32
    %35 = vector.broadcast %cst_14 : f32 to vector<432x128xf32>
    %36 = arith.maximumf %34, %35 : vector<432x128xf32>
    %37 = vector.broadcast %0 : vector<432x1xf32> to vector<432x128xf32>
    %38 = arith.mulf %36, %37 : vector<432x128xf32>
    %c25_i32_15 = arith.constant 25 : i32
    %39 = tpu.dynamic_rotate %38 by %c25_i32_15 dim 0 : vector<432x128xf32>, i32 -> vector<432x128xf32>
    %40 = arith.truncf %39 : vector<432x128xf32> to vector<432x128xbf16>
    %c24_i32_16 = arith.constant 24 : i32
    %41 = tpu.dynamic_rotate %38 by %c24_i32_16 dim 0 : vector<432x128xf32>, i32 -> vector<432x128xf32>
    %42 = arith.truncf %41 : vector<432x128xf32> to vector<432x128xbf16>
    %c23_i32_17 = arith.constant 23 : i32
    %43 = tpu.dynamic_rotate %38 by %c23_i32_17 dim 0 : vector<432x128xf32>, i32 -> vector<432x128xf32>
    %44 = arith.truncf %43 : vector<432x128xf32> to vector<432x128xbf16>
    %c1_i32_18 = arith.constant 1 : i32
    %45 = tpu.dynamic_rotate %38 by %c1_i32_18 dim 0 : vector<432x128xf32>, i32 -> vector<432x128xf32>
    %46 = arith.truncf %45 : vector<432x128xf32> to vector<432x128xbf16>
    %47 = arith.truncf %38 : vector<432x128xf32> to vector<432x128xbf16>
    %c431_i32_19 = arith.constant 431 : i32
    %48 = tpu.dynamic_rotate %38 by %c431_i32_19 dim 0 : vector<432x128xf32>, i32 -> vector<432x128xf32>
    %49 = arith.truncf %48 : vector<432x128xf32> to vector<432x128xbf16>
    %c409_i32_20 = arith.constant 409 : i32
    %50 = tpu.dynamic_rotate %38 by %c409_i32_20 dim 0 : vector<432x128xf32>, i32 -> vector<432x128xf32>
    %51 = arith.truncf %50 : vector<432x128xf32> to vector<432x128xbf16>
    %c408_i32_21 = arith.constant 408 : i32
    %52 = tpu.dynamic_rotate %38 by %c408_i32_21 dim 0 : vector<432x128xf32>, i32 -> vector<432x128xf32>
    %53 = arith.truncf %52 : vector<432x128xf32> to vector<432x128xbf16>
    %c407_i32_22 = arith.constant 407 : i32
    %54 = tpu.dynamic_rotate %38 by %c407_i32_22 dim 0 : vector<432x128xf32>, i32 -> vector<432x128xf32>
    %55 = arith.truncf %54 : vector<432x128xf32> to vector<432x128xbf16>
    %56 = tpu.concatenate %40, %42, %44, %46, %47, %49, %51, %53, %55 in 1 : vector<432x128xbf16>, vector<432x128xbf16>, vector<432x128xbf16>, vector<432x128xbf16>, vector<432x128xbf16>, vector<432x128xbf16>, vector<432x128xbf16>, vector<432x128xbf16>, vector<432x128xbf16> -> vector<432x1152xbf16>
    %c0_23 = arith.constant 0 : index
    %c0_24 = arith.constant 0 : index
    %57 = vector.load %arg9[%c0_23, %c0_24] : memref<1152x128xbf16, #tpu.memory_space<vmem>>, vector<1152x128xbf16>
    %cst_25 = arith.constant dense<0.000000e+00> : vector<432x128xf32>
    %58 = tpu.matmul %56, %57, %cst_25 {dimension_numbers = #tpu.dot_dimension_numbers<[1], [0], [0], [1], [0, 0, 1, 1], [], []>} : vector<432x1152xbf16>, vector<1152x128xbf16>, vector<432x128xf32> -> vector<432x128xf32>
    %c0_26 = arith.constant 0 : index
    %c0_27 = arith.constant 0 : index
    %59 = vector.load %arg10[%c0_26, %c0_27] : memref<1x128xf32, #tpu.memory_space<vmem>>, vector<1x128xf32>
    %60 = vector.broadcast %59 : vector<1x128xf32> to vector<432x128xf32>
    %61 = arith.addf %58, %60 : vector<432x128xf32>
    %62 = arith.addf %61, %11 : vector<432x128xf32>
    %cst_28 = arith.constant 0.000000e+00 : f32
    %63 = vector.broadcast %cst_28 : f32 to vector<432x128xf32>
    %64 = arith.maximumf %62, %63 : vector<432x128xf32>
    %65 = arith.truncf %64 : vector<432x128xf32> to vector<432x128xbf16>
    %c0_29 = arith.constant 0 : index
    %c0_30 = arith.constant 0 : index
    %66 = vector.load %arg11[%c0_29, %c0_30] : memref<128x512xbf16, #tpu.memory_space<vmem>>, vector<128x512xbf16>
    %cst_31 = arith.constant dense<0.000000e+00> : vector<432x512xf32>
    %67 = tpu.matmul %65, %66, %cst_31 {dimension_numbers = #tpu.dot_dimension_numbers<[1], [0], [0], [1], [0, 0, 1, 1], [], []>} : vector<432x128xbf16>, vector<128x512xbf16>, vector<432x512xf32> -> vector<432x512xf32>
    %c0_32 = arith.constant 0 : index
    %c0_33 = arith.constant 0 : index
    %68 = vector.load %arg12[%c0_32, %c0_33] : memref<1x512xf32, #tpu.memory_space<vmem>>, vector<1x512xf32>
    %69 = vector.broadcast %68 : vector<1x512xf32> to vector<432x512xf32>
    %70 = arith.addf %67, %69 : vector<432x512xf32>
    %cst_34 = arith.constant 0.000000e+00 : f32
    %71 = vector.broadcast %cst_34 : f32 to vector<432x512xf32>
    %72 = arith.maximumf %70, %71 : vector<432x512xf32>
    %c0_35 = arith.constant 0 : index
    %c0_36 = arith.constant 0 : index
    %73 = vector.load %arg4[%c0_35, %c0_36] : memref<1x432xbf16, #tpu.memory_space<vmem>>, vector<1x432xbf16>
    %74 = arith.truncf %72 : vector<432x512xf32> to vector<432x512xbf16>
    %cst_37 = arith.constant dense<0.000000e+00> : vector<1x512xf32>
    %75 = tpu.matmul %73, %74, %cst_37 {dimension_numbers = #tpu.dot_dimension_numbers<[1], [0], [0], [1], [0, 0, 1, 1], [], []>} : vector<1x432xbf16>, vector<432x512xbf16>, vector<1x512xf32> -> vector<1x512xf32>
    %76 = arith.truncf %75 : vector<1x512xf32> to vector<1x512xbf16>
    %c0_38 = arith.constant 0 : index
    %c0_39 = arith.constant 0 : index
    %77 = vector.load %arg13[%c0_38, %c0_39] : memref<512x128xbf16, #tpu.memory_space<vmem>>, vector<512x128xbf16>
    %cst_40 = arith.constant dense<0.000000e+00> : vector<1x128xf32>
    %78 = tpu.matmul %76, %77, %cst_40 {dimension_numbers = #tpu.dot_dimension_numbers<[1], [0], [0], [1], [0, 0, 1, 1], [], []>} : vector<1x512xbf16>, vector<512x128xbf16>, vector<1x128xf32> -> vector<1x128xf32>
    %c0_41 = arith.constant 0 : index
    %c0_42 = arith.constant 0 : index
    %c0_43 = arith.constant 0 : index
    %79 = vector.load %arg2[%c0_41, %c0_42, %c0_43] : memref<1x1x8xf32, #tpu.memory_space<vmem>>, vector<1x1x8xf32>
    %80 = vector.shape_cast %79 : vector<1x1x8xf32> to vector<1x8xf32>
    %81 = arith.truncf %80 : vector<1x8xf32> to vector<1x8xbf16>
    %c0_44 = arith.constant 0 : index
    %c0_45 = arith.constant 0 : index
    %82 = vector.load %arg14[%c0_44, %c0_45] : memref<8x512xbf16, #tpu.memory_space<vmem>>, vector<8x512xbf16>
    %cst_46 = arith.constant dense<0.000000e+00> : vector<1x512xf32>
    %83 = tpu.matmul %81, %82, %cst_46 {dimension_numbers = #tpu.dot_dimension_numbers<[1], [0], [0], [1], [0, 0, 1, 1], [], []>} : vector<1x8xbf16>, vector<8x512xbf16>, vector<1x512xf32> -> vector<1x512xf32>
    %c0_47 = arith.constant 0 : index
    %c0_48 = arith.constant 0 : index
    %84 = vector.load %arg15[%c0_47, %c0_48] : memref<1x512xf32, #tpu.memory_space<vmem>>, vector<1x512xf32>
    %85 = arith.addf %83, %84 : vector<1x512xf32>
    %cst_49 = arith.constant 0.000000e+00 : f32
    %86 = vector.broadcast %cst_49 : f32 to vector<1x512xf32>
    %87 = arith.maximumf %85, %86 : vector<1x512xf32>
    %88 = arith.truncf %87 : vector<1x512xf32> to vector<1x512xbf16>
    %c0_50 = arith.constant 0 : index
    %c0_51 = arith.constant 0 : index
    %89 = vector.load %arg16[%c0_50, %c0_51] : memref<512x256xbf16, #tpu.memory_space<vmem>>, vector<512x256xbf16>
    %cst_52 = arith.constant dense<0.000000e+00> : vector<1x256xf32>
    %90 = tpu.matmul %88, %89, %cst_52 {dimension_numbers = #tpu.dot_dimension_numbers<[1], [0], [0], [1], [0, 0, 1, 1], [], []>} : vector<1x512xbf16>, vector<512x256xbf16>, vector<1x256xf32> -> vector<1x256xf32>
    %c0_53 = arith.constant 0 : index
    %c0_54 = arith.constant 0 : index
    %91 = vector.load %arg17[%c0_53, %c0_54] : memref<1x256xf32, #tpu.memory_space<vmem>>, vector<1x256xf32>
    %92 = arith.addf %90, %91 : vector<1x256xf32>
    %cst_55 = arith.constant 0.000000e+00 : f32
    %93 = vector.broadcast %cst_55 : f32 to vector<1x256xf32>
    %94 = arith.maximumf %92, %93 : vector<1x256xf32>
    %95 = arith.truncf %94 : vector<1x256xf32> to vector<1x256xbf16>
    %c0_56 = arith.constant 0 : index
    %c0_57 = arith.constant 0 : index
    %96 = vector.load %arg18[%c0_56, %c0_57] : memref<256x128xbf16, #tpu.memory_space<vmem>>, vector<256x128xbf16>
    %cst_58 = arith.constant dense<0.000000e+00> : vector<1x128xf32>
    %97 = tpu.matmul %95, %96, %cst_58 {dimension_numbers = #tpu.dot_dimension_numbers<[1], [0], [0], [1], [0, 0, 1, 1], [], []>} : vector<1x256xbf16>, vector<256x128xbf16>, vector<1x128xf32> -> vector<1x128xf32>
    %98 = arith.addf %78, %97 : vector<1x128xf32>
    %c0_59 = arith.constant 0 : index
    %c0_60 = arith.constant 0 : index
    %99 = vector.load %arg19[%c0_59, %c0_60] : memref<1x128xf32, #tpu.memory_space<vmem>>, vector<1x128xf32>
    %100 = arith.addf %98, %99 : vector<1x128xf32>
    %c0_61 = arith.constant 0 : index
    %c0_62 = arith.constant 0 : index
    %c0_63 = arith.constant 0 : index
    %101 = vector.load %arg20[%c0_61, %c0_62, %c0_63] : memref<1x1x128xf32, #tpu.memory_space<vmem>>, vector<1x1x128xf32>
    %102 = vector.shape_cast %101 : vector<1x1x128xf32> to vector<1x128xf32>
    %103 = vector.shape_cast %100 : vector<1x128xf32> to vector<1x1x128xf32>
    tpu.vector_store %arg20[%c0_61, %c0_62, %c0_63], %103 {strides = array<i32>} : memref<1x1x128xf32, #tpu.memory_space<vmem>>, vector<1x1x128xf32>,
    return
  }
  func.func @transform_0(%arg0: i32) -> (i32, i32, i32) {
    %c0_i32 = arith.constant 0 : i32
    %c0_i32_0 = arith.constant 0 : i32
    %c0_i32_1 = arith.constant 0 : i32
    return %arg0, %c0_i32, %c0_i32_0 : i32, i32, i32
  }
  func.func @transform_1(%arg0: i32) -> (i32, i32, i32) {
    %c0_i32 = arith.constant 0 : i32
    %c0_i32_0 = arith.constant 0 : i32
    %c0_i32_1 = arith.constant 0 : i32
    return %arg0, %c0_i32, %c0_i32_0 : i32, i32, i32
  }
  func.func @transform_2(%arg0: i32) -> (i32, i32) {
    %c0_i32 = arith.constant 0 : i32
    %c0_i32_0 = arith.constant 0 : i32
    %c0_i32_1 = arith.constant 0 : i32
    return %c0_i32, %c0_i32_0 : i32, i32
  }
  func.func @transform_3(%arg0: i32) -> (i32, i32) {
    %c0_i32 = arith.constant 0 : i32
    %c0_i32_0 = arith.constant 0 : i32
    %c0_i32_1 = arith.constant 0 : i32
    return %c0_i32, %c0_i32_0 : i32, i32
  }
  func.func @transform_4(%arg0: i32) -> (i32, i32) {
    %c0_i32 = arith.constant 0 : i32
    %c0_i32_0 = arith.constant 0 : i32
    %c0_i32_1 = arith.constant 0 : i32
    return %c0_i32, %c0_i32_0 : i32, i32
  }
  func.func @transform_5(%arg0: i32) -> (i32, i32) {
    %c0_i32 = arith.constant 0 : i32
    %c0_i32_0 = arith.constant 0 : i32
    %c0_i32_1 = arith.constant 0 : i32
    return %c0_i32, %c0_i32_0 : i32, i32
  }
  func.func @transform_6(%arg0: i32) -> (i32, i32) {
    %c0_i32 = arith.constant 0 : i32
    %c0_i32_0 = arith.constant 0 : i32
    %c0_i32_1 = arith.constant 0 : i32
    return %c0_i32, %c0_i32_0 : i32, i32
  }
  func.func @transform_7(%arg0: i32) -> (i32, i32) {
    %c0_i32 = arith.constant 0 : i32
    %c0_i32_0 = arith.constant 0 : i32
    %c0_i32_1 = arith.constant 0 : i32
    return %c0_i32, %c0_i32_0 : i32, i32
  }
  func.func @transform_8(%arg0: i32) -> (i32, i32) {
    %c0_i32 = arith.constant 0 : i32
    %c0_i32_0 = arith.constant 0 : i32
    %c0_i32_1 = arith.constant 0 : i32
    return %c0_i32, %c0_i32_0 : i32, i32
  }
  func.func @transform_9(%arg0: i32) -> (i32, i32) {
    %c0_i32 = arith.constant 0 : i32
    %c0_i32_0 = arith.constant 0 : i32
    %c0_i32_1 = arith.constant 0 : i32
    return %c0_i32, %c0_i32_0 : i32, i32
  }
  func.func @transform_10(%arg0: i32) -> (i32, i32) {
    %c0_i32 = arith.constant 0 : i32
    %c0_i32_0 = arith.constant 0 : i32
    %c0_i32_1 = arith.constant 0 : i32
    return %c0_i32, %c0_i32_0 : i32, i32
  }
  func.func @transform_11(%arg0: i32) -> (i32, i32) {
    %c0_i32 = arith.constant 0 : i32
    %c0_i32_0 = arith.constant 0 : i32
    %c0_i32_1 = arith.constant 0 : i32
    return %c0_i32, %c0_i32_0 : i32, i32
  }
  func.func @transform_12(%arg0: i32) -> (i32, i32) {
    %c0_i32 = arith.constant 0 : i32
    %c0_i32_0 = arith.constant 0 : i32
    %c0_i32_1 = arith.constant 0 : i32
    return %c0_i32, %c0_i32_0 : i32, i32
  }
  func.func @transform_13(%arg0: i32) -> (i32, i32) {
    %c0_i32 = arith.constant 0 : i32
    %c0_i32_0 = arith.constant 0 : i32
    %c0_i32_1 = arith.constant 0 : i32
    return %c0_i32, %c0_i32_0 : i32, i32
  }
  func.func @transform_14(%arg0: i32) -> (i32, i32) {
    %c0_i32 = arith.constant 0 : i32
    %c0_i32_0 = arith.constant 0 : i32
    %c0_i32_1 = arith.constant 0 : i32
    return %c0_i32, %c0_i32_0 : i32, i32
  }
  func.func @transform_15(%arg0: i32) -> (i32, i32) {
    %c0_i32 = arith.constant 0 : i32
    %c0_i32_0 = arith.constant 0 : i32
    %c0_i32_1 = arith.constant 0 : i32
    return %c0_i32, %c0_i32_0 : i32, i32
  }
  func.func @transform_16(%arg0: i32) -> (i32, i32) {
    %c0_i32 = arith.constant 0 : i32
    %c0_i32_0 = arith.constant 0 : i32
    %c0_i32_1 = arith.constant 0 : i32
    return %c0_i32, %c0_i32_0 : i32, i32
  }
  func.func @transform_17(%arg0: i32) -> (i32, i32) {
    %c0_i32 = arith.constant 0 : i32
    %c0_i32_0 = arith.constant 0 : i32
    %c0_i32_1 = arith.constant 0 : i32
    return %c0_i32, %c0_i32_0 : i32, i32
  }
  func.func @transform_18(%arg0: i32) -> (i32, i32) {
    %c0_i32 = arith.constant 0 : i32
    %c0_i32_0 = arith.constant 0 : i32
    %c0_i32_1 = arith.constant 0 : i32
    return %c0_i32, %c0_i32_0 : i32, i32
  }
  func.func @transform_19(%arg0: i32) -> (i32, i32, i32) {
    %c0_i32 = arith.constant 0 : i32
    %c0_i32_0 = arith.constant 0 : i32
    %c0_i32_1 = arith.constant 0 : i32
    return %arg0, %c0_i32, %c0_i32_0 : i32, i32, i32
  }
}

</mosaic_0001>

<bundles_post_ra>
// kernel: net_forward.1
= control target key start
LH: loop header
LB: loop body
LE: loop exit
PB: predicated region body
PF: predicated region fallthrough
CT: control target
= control target key end

     0   :  { %s16774_s0 = inlined_call_operand.vmem [shape: bf16[2,432,36], index: 0, kind: input, shape index: {}]   ;;  %s16775_s1 = inlined_call_operand.vmem [shape: f32[2,1,8], index: 1, kind: input, shape index: {}]   ;;  %s16776_s2 = inlined_call_operand.vmem [shape: f32[432,1], index: 2, kind: input, shape index: {}]   ;;  %s16777_s3 = inlined_call_operand.vmem [shape: bf16[1,432], index: 3, kind: input, shape index: {}]   ;;  %s16778_s4 = inlined_call_operand.vmem [shape: bf16[36,128], index: 4, kind: input, shape index: {}]   ;;  %s16779_s5 = inlined_call_operand.vmem [shape: f32[1,128], index: 5, kind: input, shape index: {}]   ;;  %s16780_s6 = inlined_call_operand.vmem [shape: bf16[1152,128], index: 6, kind: input, shape index: {}]   ;;  %s16781_s7 = inlined_call_operand.vmem [shape: f32[1,128], index: 7, kind: input, shape index: {}]   ;;  %s16782_s8 = inlined_call_operand.vmem [shape: bf16[1152,128], index: 8, kind: input, shape index: {}]   ;;  %s16783_s9 = inlined_call_operand.vmem [shape: f32[1,128], index: 9, kind: input, shape index: {}]   ;;  %s16784_s10 = inlined_call_operand.vmem [shape: bf16[128,512], index: 10, kind: input, shape index: {}]   ;;  %s16785_s11 = inlined_call_operand.vmem [shape: f32[1,512], index: 11, kind: input, shape index: {}]   ;;  %s16786_s12 = inlined_call_operand.vmem [shape: bf16[512,128], index: 12, kind: input, shape index: {}]   ;;  %s16787_s13 = inlined_call_operand.vmem [shape: bf16[8,512], index: 13, kind: input, shape index: {}]   ;;  %s16788_s14 = inlined_call_operand.vmem [shape: f32[1,512], index: 14, kind: input, shape index: {}]   ;;  %s16789_s15 = inlined_call_operand.vmem [shape: bf16[512,256], index: 15, kind: input, shape index: {}]   ;;  %s16790_s16 = inlined_call_operand.vmem [shape: f32[1,256], index: 16, kind: input, shape index: {}]   ;;  %s16791_s17 = inlined_call_operand.vmem [shape: bf16[256,128], index: 17, kind: input, shape index: {}]   ;;  %s16792_s18 = inlined_call_operand.vmem [shape: f32[1,128], index: 18, kind: input, shape index: {}]   ;;  %s16793_s19 = inlined_call_operand.vmem [shape: f32[2,1,128], index: 19, kind: output, shape index: {}]  }
   0x1   :  { %17453 = sst [smem:[#allocation289_spill]] %s16774_s0  ;;  %s10681_s0 = smov 0  }
   0x2   :  { %17454 = sst [smem:[#allocation290_spill]] %s16775_s1 }
   0x3   :  { %17455 = sst [smem:[#allocation291_spill]] %s16776_s2 }
   0x4   :  { %17456 = sst [smem:[#allocation292_spill]] %s16777_s3 }
   0x5 LB: > { %s8789_s30 = sadd.s32 4294967295, %s10575_s0   ;;  %p8793_p0 = scmp.ge.s32.totalorder %s10575_s0, 1  ;;  %s10575_s0 = sphi %s10681_s0, %s29_s0  }
   0x6   : > { %p545_p1 = scmp.lt.s32.totalorder %s10575_s0, 3 }
   0x8   : > { %p546_p2 = pnand %p8793_p0, %p545_p1 }
   0xa   : > { %549 = sbr.rel (%p546_p2) target bundleno = 4180 (0x1054), region = 96 }
  0x11   : > { %v10197_v0 = vld [vmem:[%s16778_s4] sm:$0xff]   ;;  %v16795_v1 = vmov 0.0   ;;  %v10198_v2 = vld [vmem:[%s16778_s4 + $0x8] sm:$0xff]   ;;  %v10199_v3 = vld [vmem:[%s16778_s4 + $0x10] ss:$0 sps:$4 sm:$0x33]  }
  0x12   : > { %9322 = vmatprep.subr.bf16.mxu0 %v16795_v1  ;;  %vm10578_vm0 = vmmov 0   ;;  %p602_p3 = scmp.lt.s32.totalorder %s8789_s30, 1  ;;  %s17457_s3 = sld [smem:[#allocation291_spill]]  ;;  %vm966_vm1 = vcmask 1041408   ;;  %v16799_v6 = vmov 0   ;;  %vm884_vm2 = vcmask 293888  }
  0x13   : > { %9323 = vmatpush3.bf16.msra.mxu0 %v10197_v0  ;;  %9328 = vmatprep.mubr.msk.bf16.mxu0 %vm10578_vm0, %v16795_v1  ;;  %v968_v9 = vsel %vm966_vm1, %v10199_v3, 0  ;;  %s17458_s25 = sld [smem:[#allocation289_spill]]  ;;  %s18791_s21 = sld [smem:[#allocation292_spill]]  ;;  %vm7429_vm5 = vcmask 392192   ;;  %vm7705_vm6 = vcmask 1043456   ;;  %vm7701_vm7 = vcmask 64512  }
  0x14   : > { %9324 = vmatprep.subr.bf16.mxu0 %v16795_v1  ;;  %10196 = vset.pattern.permute.xlu1 %v16799_v6  ;;  %s18836_s30 = smov (!%p602_p3, %s8789_s30), 1  ;;  %s18828_s27 = sld [smem:[#allocation290_spill]] }
  0x15   : > { %10195 = vset.pattern.permute.xlu0 %v16799_v6  ;;  %2562 = vmatprep.subr.bf16.mxu1 %v16799_v6  ;;  %s10182_s1 = smul.u32 216, %s18836_s30 }
  0x17   : > { %9325 = vmatpush3.bf16.msra.mxu0 %v10198_v2 }
  0x18   : > { %v666_v4 = vld [vmem:[%s17457_s3 + $0x1a0] sm:$0xff]  ;;  %v664_v5 = vld [vmem:[%s17457_s3 + $0x190] sm:$0xff]  ;;  %v665_v8 = vld [vmem:[%s17457_s3 + $0x198] sm:$0xff]  ;;  %9326 = vmatprep.subr.bf16.mxu0 %v16795_v1 }
  0x19   : > { %1535 = vperm.xlu1 %10196, %v666_v4   ;;  %1525 = vperm.xlu0 %10195, %v664_v5   ;;  %v614_v7 = vld [vmem:[%s17457_s3] sm:$0xff]  ;;  %v615_v10 = vld [vmem:[%s17457_s3 + $0x8] sm:$0xff]  ;;  %s10727_s26 = scalar_lea.vmem %s17458_s25, %s10182_s1  ;;  %v617_v13 = vld [vmem:[%s17457_s3 + $0x18] sm:$0xff]  ;;  %s612_s1 = scalar_lea.vmem %s16793_s19, %s18836_s30 }
  0x1a   : > { %v10200_v11 = vld [vmem:[%s10727_s26] sm:$0xff]   ;;  %v667_v12 = vld [vmem:[%s17457_s3 + $0x1a8] sm:$0xff]  ;;  %v616_v14 = vld [vmem:[%s17457_s3 + $0x10] sm:$0xff] }
  0x1b   : > { %9327 = vmatpush3.bf16.msra.mxu0 %v968_v9  ;;  %v10201_v15 = vld [vmem:[%s10727_s26 + $0x8] sm:$0xff]   ;;  %v618_v17 = vld [vmem:[%s17457_s3 + $0x20] sm:$0xff]  ;;  %v621_v18 = vld [vmem:[%s17457_s3 + $0x38] sm:$0xff] }
  0x1c   : > { %4876 = vmatprep.subr.bf16.mxu0 %v16799_v6  ;;  %v619_v16 = vld [vmem:[%s17457_s3 + $0x28] sm:$0xff]  ;;  %v620_v19 = vld [vmem:[%s17457_s3 + $0x30] sm:$0xff]  ;;  %v622_v22 = vld [vmem:[%s17457_s3 + $0x40] sm:$0xff] }
  0x1d   : > { %1275 = vperm.xlu1 %10196, %v614_v7   ;;  %1530 = vperm.xlu0 %10195, %v665_v8   ;;  %v10202_v20 = vld [vmem:[%s10727_s26 + $0x10] sm:$0xff]   ;;  %v623_v21 = vld [vmem:[%s17457_s3 + $0x48] sm:$0xff]  ;;  %v625_v24 = vld [vmem:[%s17457_s3 + $0x58] sm:$0xff] }
  0x1e   : > { %9329 = vmatmul.mubr.msk.bf16.vlgmr.msra.gmra.mrb[0].mxu0 %vm884_vm2, %v10200_v11  ;;  %v624_v23 = vld [vmem:[%s17457_s3 + $0x50] sm:$0xff]  ;;  %v10203_v25 = vld [vmem:[%s10727_s26 + $0x18] sm:$0xff]   ;;  %v627_v26 = vld [vmem:[%s17457_s3 + $0x68] sm:$0xff] }
  0x1f   : > { %9332 = vmatprep.mubr.msk.bf16.mxu0 %vm10578_vm0, %v16795_v1  ;;  %v626_v27 = vld [vmem:[%s17457_s3 + $0x60] sm:$0xff]  ;;  %v628_v28 = vld [vmem:[%s17457_s3 + $0x70] sm:$0xff]  ;;  %v629_v29 = vld [vmem:[%s17457_s3 + $0x78] sm:$0xff] }
  0x20   : > { %v10204_v30 = vld [vmem:[%s10727_s26 + $0x20] sm:$0xff]   ;;  %v631_v31 = vld [vmem:[%s17457_s3 + $0x88] sm:$0xff]  ;;  %v632_v33 = vld [vmem:[%s17457_s3 + $0x90] sm:$0xff] }
  0x21   : > { %1280 = vperm.xlu1 %10196, %v615_v10   ;;  %1540 = vperm.xlu0 %10195, %v667_v12   ;;  %v630_v32 = vld [vmem:[%s17457_s3 + $0x80] sm:$0xff]  ;;  %v633_v34 = vld [vmem:[%s17457_s3 + $0x98] sm:$0xff]  ;;  %v10205_v35 = vld [vmem:[%s10727_s26 + $0x28] sm:$0xff]  }
  0x22   : > { %v634_v36 = vld [vmem:[%s17457_s3 + $0xa0] sm:$0xff]  ;;  %v635_v37 = vld [vmem:[%s17457_s3 + $0xa8] sm:$0xff]  ;;  %v636_v38 = vld [vmem:[%s17457_s3 + $0xb0] sm:$0xff] }
  0x23   : > { %v10206_v39 = vld [vmem:[%s10727_s26 + $0x30] sm:$0xff]   ;;  %v637_v40 = vld [vmem:[%s17457_s3 + $0xb8] sm:$0xff]  ;;  %v638_v41 = vld [vmem:[%s17457_s3 + $0xc0] sm:$0xff] }
  0x24   : > { %v10207_v42 = vld [vmem:[%s10727_s26 + $0x38] sm:$0xff]   ;;  %v639_v43 = vld [vmem:[%s17457_s3 + $0xc8] sm:$0xff]  ;;  %v640_v44 = vld [vmem:[%s17457_s3 + $0xd0] sm:$0xff] }
  0x25   : > { %1290 = vperm.xlu1 %10196, %v617_v13   ;;  %1285 = vperm.xlu0 %10195, %v616_v14   ;;  %v10208_v45 = vld [vmem:[%s10727_s26 + $0x40] sm:$0xff]   ;;  %v641_v46 = vld [vmem:[%s17457_s3 + $0xd8] sm:$0xff]  ;;  %v10209_v48 = vld [vmem:[%s10727_s26 + $0x48] sm:$0xff]  }
  0x26   : > { %9333 = vmatmul.mubr.msk.bf16.gmra.mrb[4].mxu0 %vm884_vm2, %v10201_v15  ;;  %v642_v47 = vld [vmem:[%s17457_s3 + $0xe0] sm:$0xff]  ;;  %v643_v49 = vld [vmem:[%s17457_s3 + $0xe8] sm:$0xff]  ;;  %v644_v50 = vld [vmem:[%s17457_s3 + $0xf0] sm:$0xff] }
  0x27   : > { %9336 = vmatprep.mubr.msk.bf16.mxu0 %vm10578_vm0, %v16795_v1  ;;  %v10210_v51 = vld [vmem:[%s10727_s26 + $0x50] sm:$0xff]   ;;  %v645_v52 = vld [vmem:[%s17457_s3 + $0xf8] sm:$0xff]  ;;  %v646_v54 = vld [vmem:[%s17457_s3 + $0x100] sm:$0xff] }
  0x28   : > { %v10211_v53 = vld [vmem:[%s10727_s26 + $0x58] sm:$0xff]   ;;  %v647_v55 = vld [vmem:[%s17457_s3 + $0x108] sm:$0xff]  ;;  %v10212_v56 = vld [vmem:[%s10727_s26 + $0x60] sm:$0xff]  }
  0x29   : > { %1300 = vperm.xlu1 %10196, %v619_v16   ;;  %1295 = vperm.xlu0 %10195, %v618_v17   ;;  %v648_v57 = vld [vmem:[%s17457_s3 + $0x110] sm:$0xff]  ;;  %v649_v58 = vld [vmem:[%s17457_s3 + $0x118] sm:$0xff]  ;;  %v10213_v59 = vld [vmem:[%s10727_s26 + $0x68] sm:$0xff]  }
  0x2a   : > { %v650_v60 = vld [vmem:[%s17457_s3 + $0x120] sm:$0xff]  ;;  %v651_v61 = vld [vmem:[%s17457_s3 + $0x128] sm:$0xff]  ;;  %v10214_v62 = vld [vmem:[%s10727_s26 + $0x70] sm:$0xff]  }
  0x2b   : > { %v652_v63 = vld [vmem:[%s17457_s3 + $0x130] sm:$0xff]  ;;  %v653_v0 = vld [vmem:[%s17457_s3 + $0x138] sm:$0xff]  ;;  %v654_v3 = vld [vmem:[%s17457_s3 + $0x140] sm:$0xff] }
  0x2c   : > { %v10215_v2 = vld [vmem:[%s10727_s26 + $0x78] sm:$0xff]   ;;  %v655_v4 = vld [vmem:[%s17457_s3 + $0x148] sm:$0xff]  ;;  %v10216_v5 = vld [vmem:[%s10727_s26 + $0x80] sm:$0xff]  }
  0x2d   : > { %1310 = vperm.xlu1 %10196, %v621_v18   ;;  %1305 = vperm.xlu0 %10195, %v620_v19   ;;  %v656_v7 = vld [vmem:[%s17457_s3 + $0x150] sm:$0xff]  ;;  %v657_v8 = vld [vmem:[%s17457_s3 + $0x158] sm:$0xff]  ;;  %v10217_v9 = vld [vmem:[%s10727_s26 + $0x88] sm:$0xff]  }
  0x2e   : > { %9337 = vmatmul.mubr.msk.bf16.gmra.mrb[8].mxu0 %vm884_vm2, %v10202_v20  ;;  %v658_v10 = vld [vmem:[%s17457_s3 + $0x160] sm:$0xff]  ;;  %v659_v11 = vld [vmem:[%s17457_s3 + $0x168] sm:$0xff]  ;;  %v10218_v12 = vld [vmem:[%s10727_s26 + $0x90] sm:$0xff]  }
  0x2f   : > { %9340 = vmatprep.mubr.msk.bf16.mxu0 %vm10578_vm0, %v16795_v1  ;;  %v660_v13 = vld [vmem:[%s17457_s3 + $0x170] sm:$0xff]  ;;  %v661_v14 = vld [vmem:[%s17457_s3 + $0x178] sm:$0xff]  ;;  %v662_v16 = vld [vmem:[%s17457_s3 + $0x180] sm:$0xff] }
  0x30   : > { %v10219_v15 = vld [vmem:[%s10727_s26 + $0x98] sm:$0xff]   ;;  %v663_v17 = vld [vmem:[%s17457_s3 + $0x188] sm:$0xff]  ;;  %v10220_v18 = vld [vmem:[%s10727_s26 + $0xa0] sm:$0xff]  }
  0x31   : > { %1320 = vperm.xlu1 %10196, %v623_v21   ;;  %1315 = vperm.xlu0 %10195, %v622_v22   ;;  %v10221_v19 = vld [vmem:[%s10727_s26 + $0xa8] sm:$0xff]   ;;  %v10222_v20 = vld [vmem:[%s10727_s26 + $0xb0] sm:$0xff]   ;;  %v10223_v21 = vld [vmem:[%s10727_s26 + $0xb8] sm:$0xff]  }
  0x32   : > { %v10224_v22 = vld [vmem:[%s10727_s26 + $0xc0] sm:$0xff]  }
  0x35   : > { %1330 = vperm.xlu1 %10196, %v625_v24   ;;  %1325 = vperm.xlu0 %10195, %v624_v23   ;;  %v10225_v23 = vld [vmem:[%s10727_s26 + $0xc8] sm:$0xff]  }
  0x36   : > { %9341 = vmatmul.mubr.msk.bf16.gmra.mrb[12].mxu0 %vm884_vm2, %v10203_v25  ;;  %v10226_v25 = vld [vmem:[%s10727_s26 + $0xd0] sm:$0xff]   ;;  %s609_s26 = scalar_lea.vmem %s18828_s27, %s18836_s30 }
  0x37   : > { %9344 = vmatprep.mubr.msk.bf16.mxu0 %vm10578_vm0, %v16795_v1 }
  0x39   : > { %1340 = vperm.xlu1 %10196, %v627_v26   ;;  %1335 = vperm.xlu0 %10195, %v626_v27  }
  0x3d   : > { %1350 = vperm.xlu1 %10196, %v629_v29   ;;  %1345 = vperm.xlu0 %10195, %v628_v28  }
  0x3e   : > { %9345 = vmatmul.mubr.msk.bf16.gmra.mrb[16].mxu0 %vm884_vm2, %v10204_v30 }
  0x3f   : > { %9348 = vmatprep.mubr.msk.bf16.mxu0 %vm10578_vm0, %v16795_v1 }
  0x41   : > { %1360 = vperm.xlu1 %10196, %v631_v31   ;;  %1355 = vperm.xlu0 %10195, %v630_v32  }
  0x45   : > { %1370 = vperm.xlu1 %10196, %v633_v34   ;;  %1365 = vperm.xlu0 %10195, %v632_v33   ;;  %v10996_v33 = vld [vmem:[%s16779_s5] ss:$0 sm:$0xff] }
  0x46   : > { %9349 = vmatmul.mubr.msk.bf16.gmra.mrb[20].mxu0 %vm884_vm2, %v10205_v35 }
  0x47   : > { %9352 = vmatprep.mubr.msk.bf16.mxu0 %vm10578_vm0, %v16795_v1 }
  0x49   : > { %1375 = vperm.xlu0 %10195, %v634_v36   ;;  %1380 = vperm.xlu1 %10196, %v635_v37  }
  0x4d   : > { %1385 = vperm.xlu0 %10195, %v636_v38   ;;  %1390 = vperm.xlu1 %10196, %v637_v40  }
  0x4e   : > { %9353 = vmatmul.mubr.msk.bf16.gmra.mrb[24].mxu0 %vm884_vm2, %v10206_v39 }
  0x4f   : > { %9356 = vmatprep.mubr.msk.bf16.mxu0 %vm10578_vm0, %v16795_v1 }
  0x51   : > { %1395 = vperm.xlu0 %10195, %v638_v41   ;;  %1400 = vperm.xlu1 %10196, %v639_v43   ;;  %v1651_v43 = vlaneseq }
  0x55   : > { %1405 = vperm.xlu0 %10195, %v640_v44   ;;  %1410 = vperm.xlu1 %10196, %v641_v46  }
  0x56   : > { %9357 = vmatmul.mubr.msk.bf16.gmra.mrb[28].mxu0 %vm884_vm2, %v10207_v42 }
  0x57   : > { %9360 = vmatprep.mubr.msk.bf16.mxu0 %vm10578_vm0, %v16795_v1 }
  0x59   : > { %1415 = vperm.xlu0 %10195, %v642_v47   ;;  %1420 = vperm.xlu1 %10196, %v643_v49  }
  0x5d   : > { %1425 = vperm.xlu0 %10195, %v644_v50   ;;  %1430 = vperm.xlu1 %10196, %v645_v52  }
  0x5e   : > { %9361 = vmatmul.mubr.msk.bf16.gmra.mrb[32].mxu0 %vm884_vm2, %v10208_v45 }
  0x5f   : > { %9364 = vmatprep.mubr.msk.bf16.mxu0 %vm10578_vm0, %v16795_v1 }
  0x61   : > { %1435 = vperm.xlu0 %10195, %v646_v54   ;;  %1440 = vperm.xlu1 %10196, %v647_v55  }
  0x65   : > { %1445 = vperm.xlu0 %10195, %v648_v57   ;;  %1450 = vperm.xlu1 %10196, %v649_v58  }
  0x66   : > { %9365 = vmatmul.mubr.msk.bf16.gmra.mrb[36].mxu0 %vm884_vm2, %v10209_v48 }
  0x67   : > { %9368 = vmatprep.mubr.msk.bf16.mxu0 %vm10578_vm0, %v16795_v1 }
  0x69   : > { %1455 = vperm.xlu0 %10195, %v650_v60   ;;  %1460 = vperm.xlu1 %10196, %v651_v61  }
  0x6d   : > { %1465 = vperm.xlu0 %10195, %v652_v63   ;;  %1470 = vperm.xlu1 %10196, %v653_v0  }
  0x6e   : > { %9369 = vmatmul.mubr.msk.bf16.gmra.mrb[40].mxu0 %vm884_vm2, %v10210_v51  ;;  %v11015_v51 = vshrl.u32 %v1651_v43, 7  ;;  %v10228_v43 = vld [vmem:[%s16780_s6 + $0x8] sm:$0xff]  }
  0x6f   : > { %9372 = vmatprep.mubr.msk.bf16.mxu0 %vm10578_vm0, %v16795_v1 }
  0x70   : > { %17469 = vst [vmem:[#allocation12_spill] sm:$0xff] %v11015_v51  ;;  %vm1653_vm3 = vcmp.lt.s32.totalorder %v11015_v51, 1  ;;  %vm1816_vm4 = vcmp.lt.s32.totalorder %v11015_v51, 7 }
  0x71   : > { %1475 = vperm.xlu0 %10195, %v654_v3   ;;  %1480 = vperm.xlu1 %10196, %v655_v4   ;;  %v10234_v4 = vld [vmem:[%s16780_s6 + $0x38] sm:$0xff]  }
  0x75   : > { %1485 = vperm.xlu0 %10195, %v656_v7   ;;  %1490 = vperm.xlu1 %10196, %v657_v8  }
  0x76   : > { %9373 = vmatmul.mubr.msk.bf16.gmra.mrb[44].mxu0 %vm884_vm2, %v10211_v53 }
  0x77   : > { %9376 = vmatprep.mubr.msk.bf16.mxu0 %vm10578_vm0, %v16795_v1 }
  0x79   : > { %1495 = vperm.xlu0 %10195, %v658_v10   ;;  %1500 = vperm.xlu1 %10196, %v659_v11  }
  0x7d   : > { %1505 = vperm.xlu0 %10195, %v660_v13   ;;  %1510 = vperm.xlu1 %10196, %v661_v14  }
  0x7e   : > { %9377 = vmatmul.mubr.msk.bf16.gmra.mrb[48].mxu0 %vm884_vm2, %v10212_v56 }
  0x7f   : > { %9380 = vmatprep.mubr.msk.bf16.mxu0 %vm10578_vm0, %v16795_v1 }
  0x81   : > { %1515 = vperm.xlu0 %10195, %v662_v16   ;;  %1520 = vperm.xlu1 %10196, %v663_v17  }
  0x86   : > { %9381 = vmatmul.mubr.msk.bf16.gmra.mrb[52].mxu0 %vm884_vm2, %v10213_v59 }
  0x87   : > { %9384 = vmatprep.mubr.msk.bf16.mxu0 %vm10578_vm0, %v16795_v1 }
  0x8e   : > { %9385 = vmatmul.mubr.msk.bf16.gmra.mrb[56].mxu0 %vm884_vm2, %v10214_v62 }
  0x8f   : > { %9388 = vmatprep.mubr.msk.bf16.mxu0 %vm10578_vm0, %v16795_v1 }
  0x96   : > { %9389 = vmatmul.mubr.msk.bf16.gmra.mrb[60].mxu0 %vm884_vm2, %v10215_v2 }
  0x97   : > { %9392 = vmatprep.mubr.msk.bf16.mxu0 %vm10578_vm0, %v16795_v1 }
  0x98   : > { %v10981_v24 = vpop.permute.xlu0 %1525  ;;  %v10984_v26 = vpop.permute.xlu1 %1535 }
  0x99   : > { %17459 = vst [vmem:[#allocation2_spill] sm:$0xff] %v10981_v24  ;;  %17460 = vst [vmem:[#allocation3_spill] sm:$0xff] %v10984_v26 }
  0x9c   : > { %v10987_v27 = vpop.permute.xlu0 %1530  ;;  %v10991_v30 = vpop.permute.xlu1 %1275 }
  0x9d   : > { %17461 = vst [vmem:[#allocation4_spill] sm:$0xff] %v10987_v27  ;;  %17462 = vst [vmem:[#allocation5_spill] sm:$0xff] %v10991_v30 }
  0x9e   : > { %9393 = vmatmul.mubr.msk.bf16.gmra.mrb[64].mxu0 %vm884_vm2, %v10216_v5 }
  0x9f   : > { %9396 = vmatprep.mubr.msk.bf16.mxu0 %vm10578_vm0, %v16795_v1 }
  0xa0   : > { %v10998_v34 = vpop.permute.xlu0 %1540  ;;  %v11001_v36 = vpop.permute.xlu1 %1280 }
  0xa1   : > { %17463 = vst [vmem:[#allocation6_spill] sm:$0xff] %v10998_v34  ;;  %17464 = vst [vmem:[#allocation7_spill] sm:$0xff] %v11001_v36 }
  0xa4   : > { %v11004_v42 = vpop.permute.xlu0 %1285  ;;  %v11007_v47 = vpop.permute.xlu1 %1290 }
  0xa5   : > { %17465 = vst [vmem:[#allocation8_spill] sm:$0xff] %v11004_v42  ;;  %17466 = vst [vmem:[#allocation9_spill] sm:$0xff] %v11007_v47 }
  0xa6   : > { %9397 = vmatmul.mubr.msk.bf16.gmra.mrb[68].mxu0 %vm884_vm2, %v10217_v9 }
  0xa7   : > { %9400 = vmatprep.mubr.msk.bf16.mxu0 %vm10578_vm0, %v16795_v1 }
  0xa8   : > { %v11024_v60 = vpop.permute.xlu0 %1295  ;;  %v11038_v3 = vpop.permute.xlu1 %1300 }
  0xa9   : > { %17471 = vst [vmem:[#allocation14_spill] sm:$0xff] %v11024_v60  ;;  %17472 = vst [vmem:[#allocation15_spill] sm:$0xff] %v11038_v3 }
  0xae   : > { %9401 = vmatmul.mubr.msk.bf16.gmra.mrb[72].mxu0 %vm884_vm2, %v10218_v12 }
  0xaf   : > { %9404 = vmatprep.mubr.msk.bf16.mxu0 %vm10578_vm0, %v16795_v1 }
  0xb6   : > { %9405 = vmatmul.mubr.msk.bf16.gmra.mrb[76].mxu0 %vm884_vm2, %v10219_v15 }
  0xb7   : > { %9408 = vmatprep.mubr.msk.bf16.mxu0 %vm10578_vm0, %v16795_v1 }
  0xbe   : > { %9409 = vmatmul.mubr.msk.bf16.gmra.mrb[80].mxu0 %vm884_vm2, %v10220_v18  ;;  %v11055_v18 = vpop.permute.xlu0 %1305 }
  0xbf   : > { %9412 = vmatprep.mubr.msk.bf16.mxu0 %vm10578_vm0, %v16795_v1  ;;  %17475 = vst [vmem:[#allocation18_spill] sm:$0xff] %v11055_v18 }
  0xc6   : > { %9413 = vmatmul.mubr.msk.bf16.gmra.mrb[84].mxu0 %vm884_vm2, %v10221_v19 }
  0xc7   : > { %9416 = vmatprep.mubr.msk.bf16.mxu0 %vm10578_vm0, %v16795_v1 }
  0xce   : > { %9417 = vmatmul.mubr.msk.bf16.gmra.mrb[88].mxu0 %vm884_vm2, %v10222_v20 }
  0xcf   : > { %9420 = vmatprep.mubr.msk.bf16.mxu0 %vm10578_vm0, %v16795_v1 }
  0xd6   : > { %9421 = vmatmul.mubr.msk.bf16.gmra.mrb[92].mxu0 %vm884_vm2, %v10223_v21 }
  0xd7   : > { %9424 = vmatprep.mubr.msk.bf16.mxu0 %vm10578_vm0, %v16795_v1 }
  0xde   : > { %9425 = vmatmul.mubr.msk.bf16.gmra.mrb[96].mxu0 %vm884_vm2, %v10224_v22 }
  0xdf   : > { %9428 = vmatprep.mubr.msk.bf16.mxu0 %vm10578_vm0, %v16795_v1 }
  0xe6   : > { %9429 = vmatmul.mubr.msk.bf16.gmra.mrb[100].mxu0 %vm884_vm2, %v10225_v23 }
  0xe7   : > { %9432 = vmatprep.mubr.msk.bf16.mxu0 %vm10578_vm0, %v16795_v1 }
  0xee   : > { %9433 = vmatmul.mubr.msk.bf16.gmra.mrb[104].mxu0 %vm884_vm2, %v10226_v25  ;;  %v10227_v25 = vld [vmem:[%s16780_s6] sm:$0xff]  }
  0xef   : > { %2563 = vmatpush1.bf16.msra.mxu1 %v10227_v25 }
  0xf0   : > { %2564 = vmatprep.subr.bf16.mxu1 %v16799_v6 }
  0xf1   : > { %v10989_v28 = vpop.f32.mrb[0].mxu0 }
  0xf2   : > { %v9330_v29 = vpop.f32.mrb[1].mxu0 }
  0xf3   : > { %v1007_v31 = vpop.f32.mrb[2].mxu0  ;;  %2565 = vmatpush1.bf16.msra.mxu1 %v10228_v43 }
  0xf4   : > { %v9331_v32 = vpop.f32.mrb[3].mxu0  ;;  %v1008_v35 = vadd.f32 %v10996_v33, %v1007_v31  ;;  %2566 = vmatprep.subr.bf16.mxu1 %v16799_v6 }
  0xf5   : > { %v11079_v32 = vpop.permute.xlu1 %1310 }
  0xf6   : > { %v1220_v38 = vmax.f32 %v1008_v35, 0.0  ;;  %17478 = vst [vmem:[#allocation21_spill] sm:$0xff] %v11079_v32 }
  0xf8   : > { %v11010_v48 = vmul.f32 %v11001_v36, %v1220_v38  ;;  %v10238_v36 = vld [vmem:[%s16780_s6 + $0x58] sm:$0xff]  }
  0xf9   : > { %v1012_v37 = vpop.f32.mrb[4].mxu0 }
  0xfa   : > { %v1013_v39 = vadd.f32 %v10996_v33, %v1012_v37  ;;  %v9334_v40 = vpop.f32.mrb[5].mxu0  ;;  %17467 = vst [vmem:[#allocation10_spill] sm:$0xff] %v11010_v48  ;;  %v16798_v57 = vrot.slane %v11010_v48, 7 }
  0xfb   : > { %v1015_v41 = vpop.f32.mrb[6].mxu0 }
  0xfc   : > { %v1016_v44 = vadd.f32 %v10996_v33, %v1015_v41  ;;  %v9335_v45 = vpop.f32.mrb[7].mxu0  ;;  %v1221_v46 = vmax.f32 %v1013_v39, 0.0 }
  0xfe   : > { %v11013_v49 = vmul.f32 %v11004_v42, %v1221_v46  ;;  %v1222_v50 = vmax.f32 %v1016_v44, 0.0 }
 0x100   : > { %17468 = vst [vmem:[#allocation11_spill] sm:$0xff] %v11013_v49  ;;  %v11018_v52 = vmul.f32 %v11007_v47, %v1222_v50  ;;  %v1599_v53 = vrot.slane %v11013_v49, 7  ;;  %v16797_v13 = vrot.slane %v11013_v49, 1 }
 0x101   : > { %v1020_v54 = vpop.f32.mrb[8].mxu0 }
 0x102   : > { %17470 = vst [vmem:[#allocation13_spill] sm:$0xff] %v11018_v52  ;;  %v1021_v55 = vadd.f32 %v10996_v33, %v1020_v54  ;;  %v9338_v56 = vpop.f32.mrb[9].mxu0  ;;  %v1600_v58 = vrot.slane %v11018_v52, 7  ;;  %v11032_v0 = vsel %vm1653_vm3, %v16798_v57, %v1599_v53  ;;  %v1765_v8 = vrot.slane %v11018_v52, 1 }
 0x103   : > { %v1023_v59 = vpop.f32.mrb[10].mxu0  ;;  %v11100_v56 = vpop.permute.xlu0 %1315 }
 0x104   : > { %v1024_v61 = vadd.f32 %v10996_v33, %v1023_v59  ;;  %v9339_v62 = vpop.f32.mrb[11].mxu0  ;;  %v1223_v63 = vmax.f32 %v1021_v55, 0.0  ;;  %v11036_v2 = vsel %vm1653_vm3, %v1599_v53, %v1600_v58  ;;  %v11061_v19 = vsel %vm1816_vm4, %v16797_v13, %v1765_v8  ;;  %17481 = vst [vmem:[#allocation24_spill] sm:$0xff] %v11100_v56 }
 0x105   : > { %17476 = vst [vmem:[#allocation19_spill] sm:$0xff] %v11061_v19 }
 0x106   : > { %v11043_v5 = vmul.f32 %v11024_v60, %v1223_v63  ;;  %v1224_v7 = vmax.f32 %v1024_v61, 0.0 }
 0x108   : > { %17473 = vst [vmem:[#allocation16_spill] sm:$0xff] %v11043_v5  ;;  %v11047_v9 = vmul.f32 %v11038_v3, %v1224_v7  ;;  %v1601_v10 = vrot.slane %v11043_v5, 7  ;;  %v1766_v11 = vrot.slane %v11043_v5, 1  ;;  %v10229_v7 = vld [vmem:[%s16780_s6 + $0x10] sm:$0xff]  }
 0x109   : > { %v1028_v12 = vpop.f32.mrb[12].mxu0  ;;  %2567 = vmatpush1.bf16.msra.mxu1 %v10229_v7  ;;  %v10231_v7 = vld [vmem:[%s16780_s6 + $0x20] sm:$0xff]  }
 0x10a   : > { %17474 = vst [vmem:[#allocation17_spill] sm:$0xff] %v11047_v9  ;;  %v1029_v14 = vadd.f32 %v10996_v33, %v1028_v12  ;;  %v9342_v15 = vpop.f32.mrb[13].mxu0  ;;  %v1602_v16 = vrot.slane %v11047_v9, 7  ;;  %v11065_v20 = vsel %vm1816_vm4, %v1765_v8, %v1766_v11  ;;  %v11073_v29 = vsel %vm1653_vm3, %v1600_v58, %v1601_v10  ;;  %2568 = vmatprep.subr.bf16.mxu1 %v16799_v6 }
 0x10b   : > { %v1031_v17 = vpop.f32.mrb[14].mxu0  ;;  %17477 = vst [vmem:[#allocation20_spill] sm:$0xff] %v11065_v20  ;;  %v1767_v40 = vrot.slane %v11047_v9, 1 }
 0x10c   : > { %v1032_v21 = vadd.f32 %v10996_v33, %v1031_v17  ;;  %v9343_v22 = vpop.f32.mrb[15].mxu0  ;;  %v1225_v23 = vmax.f32 %v1029_v14, 0.0  ;;  %v11077_v31 = vsel %vm1653_vm3, %v1601_v10, %v1602_v16 }
 0x10d   : > { %v11105_v58 = vsel %vm1816_vm4, %v1766_v11, %v1767_v40  ;;  %v11123_v11 = vpop.permute.xlu1 %1320  ;;  %v10230_v22 = vld [vmem:[%s16780_s6 + $0x18] sm:$0xff]  }
 0x10e   : > { %v11086_v38 = vmul.f32 %v11055_v18, %v1225_v23  ;;  %v1226_v39 = vmax.f32 %v1032_v21, 0.0  ;;  %17482 = vst [vmem:[#allocation25_spill] sm:$0xff] %v11105_v58  ;;  %17484 = vst [vmem:[#allocation27_spill] sm:$0xff] %v11123_v11  ;;  %2569 = vmatpush1.bf16.msra.mxu1 %v10230_v22  ;;  %v10242_v58 = vld [vmem:[%s16780_s6 + $0x78] sm:$0xff]  }
 0x10f   : > { %2570 = vmatprep.subr.bf16.mxu1 %v16799_v6 }
 0x110   : > { %17479 = vst [vmem:[#allocation22_spill] sm:$0xff] %v11086_v38  ;;  %v11091_v41 = vmul.f32 %v11079_v32, %v1226_v39  ;;  %v1603_v44 = vrot.slane %v11086_v38, 7  ;;  %v1768_v45 = vrot.slane %v11086_v38, 1  ;;  %v10236_v32 = vld [vmem:[%s16780_s6 + $0x48] sm:$0xff]  }
 0x111   : > { %v1036_v46 = vpop.f32.mrb[16].mxu0  ;;  %v11167_v22 = vpop.permute.xlu1 %1330 }
 0x112   : > { %17480 = vst [vmem:[#allocation23_spill] sm:$0xff] %v11091_v41  ;;  %v1037_v50 = vadd.f32 %v10996_v33, %v1036_v46  ;;  %v9346_v53 = vpop.f32.mrb[17].mxu0  ;;  %v1604_v54 = vrot.slane %v11091_v41, 7  ;;  %v11109_v59 = vsel %vm1816_vm4, %v1767_v40, %v1768_v45  ;;  %v11117_v8 = vsel %vm1653_vm3, %v1602_v16, %v1603_v44  ;;  %17490 = vst [vmem:[#allocation33_spill] sm:$0xff] %v11167_v22 }
 0x113   : > { %v1039_v55 = vpop.f32.mrb[18].mxu0  ;;  %17483 = vst [vmem:[#allocation26_spill] sm:$0xff] %v11109_v59  ;;  %v1769_v16 = vrot.slane %v11091_v41, 1  ;;  %2571 = vmatpush1.bf16.msra.mxu1 %v10231_v7 }
 0x114   : > { %v1040_v61 = vadd.f32 %v10996_v33, %v1039_v55  ;;  %v9347_v62 = vpop.f32.mrb[19].mxu0  ;;  %v1227_v63 = vmax.f32 %v1037_v50, 0.0  ;;  %v11121_v10 = vsel %vm1653_vm3, %v1603_v44, %v1604_v54  ;;  %v11144_v50 = vpop.permute.xlu0 %1325  ;;  %2572 = vmatprep.subr.bf16.mxu1 %v16799_v6 }
 0x115   : > { %17487 = vst [vmem:[#allocation30_spill] sm:$0xff] %v11144_v50  ;;  %v11149_v53 = vsel %vm1816_vm4, %v1768_v45, %v1769_v16  ;;  %v11211_v35 = vpop.permute.xlu1 %1340 }
 0x116   : > { %v11130_v15 = vmul.f32 %v11100_v56, %v1227_v63  ;;  %v1228_v17 = vmax.f32 %v1040_v61, 0.0  ;;  %17488 = vst [vmem:[#allocation31_spill] sm:$0xff] %v11149_v53  ;;  %17496 = vst [vmem:[#allocation39_spill] sm:$0xff] %v11211_v35 }
 0x118   : > { %17485 = vst [vmem:[#allocation28_spill] sm:$0xff] %v11130_v15  ;;  %v11135_v21 = vmul.f32 %v11123_v11, %v1228_v17  ;;  %v1605_v23 = vrot.slane %v11130_v15, 7  ;;  %v1770_v25 = vrot.slane %v11130_v15, 1  ;;  %v11188_v37 = vpop.permute.xlu0 %1335 }
 0x119   : > { %v1044_v39 = vpop.f32.mrb[20].mxu0  ;;  %17493 = vst [vmem:[#allocation36_spill] sm:$0xff] %v11188_v37  ;;  %v11255_v56 = vpop.permute.xlu1 %1350 }
 0x11a   : > { %17486 = vst [vmem:[#allocation29_spill] sm:$0xff] %v11135_v21  ;;  %v1045_v40 = vadd.f32 %v10996_v33, %v1044_v39  ;;  %v9350_v43 = vpop.f32.mrb[21].mxu0  ;;  %v1606_v44 = vrot.slane %v11135_v21, 7  ;;  %v11153_v55 = vsel %vm1816_vm4, %v1769_v16, %v1770_v25  ;;  %v11161_v17 = vsel %vm1653_vm3, %v1604_v54, %v1605_v23  ;;  %17503 = vst [vmem:[#allocation45_spill] sm:$0xff] %v11255_v56 }
 0x11b   : > { %v1047_v46 = vpop.f32.mrb[22].mxu0  ;;  %17489 = vst [vmem:[#allocation32_spill] sm:$0xff] %v11153_v55  ;;  %v1771_v54 = vrot.slane %v11135_v21, 1 }
 0x11c   : > { %v1048_v61 = vadd.f32 %v10996_v33, %v1047_v46  ;;  %v9351_v62 = vpop.f32.mrb[23].mxu0  ;;  %v1229_v63 = vmax.f32 %v1045_v40, 0.0  ;;  %v11165_v45 = vsel %vm1653_vm3, %v1605_v23, %v1606_v44  ;;  %v10232_v46 = vld [vmem:[%s16780_s6 + $0x28] sm:$0xff]  }
 0x11d   : > { %2573 = vmatpush1.bf16.msra.mxu1 %v10232_v46  ;;  %v10233_v46 = vld [vmem:[%s16780_s6 + $0x30] sm:$0xff]   ;;  %v11299_v42 = vpop.permute.xlu1 %1360 }
 0x11e   : > { %v11174_v40 = vmul.f32 %v11144_v50, %v1229_v63  ;;  %v1230_v43 = vmax.f32 %v1048_v61, 0.0  ;;  %2574 = vmatprep.subr.bf16.mxu1 %v16799_v6  ;;  %17509 = vst [vmem:[#allocation51_spill] sm:$0xff] %v11299_v42 }
 0x120   : > { %17491 = vst [vmem:[#allocation34_spill] sm:$0xff] %v11174_v40  ;;  %v11179_v23 = vmul.f32 %v11167_v22, %v1230_v43  ;;  %v1607_v62 = vrot.slane %v11174_v40, 7  ;;  %v1772_v1 = vrot.slane %v11174_v40, 1  ;;  %v11193_v43 = vsel %vm1816_vm4, %v1770_v25, %v1771_v54 }
 0x121   : > { %v1052_v39 = vpop.f32.mrb[24].mxu0  ;;  %17494 = vst [vmem:[#allocation37_spill] sm:$0xff] %v11193_v43  ;;  %2575 = vmatpush1.bf16.msra.mxu1 %v10233_v46  ;;  %v10240_v43 = vld [vmem:[%s16780_s6 + $0x68] sm:$0xff]  }
 0x122   : > { %17492 = vst [vmem:[#allocation35_spill] sm:$0xff] %v11179_v23  ;;  %v1053_v63 = vadd.f32 %v10996_v33, %v1052_v39  ;;  %v9354_v61 = vpop.f32.mrb[25].mxu0  ;;  %v1608_v7 = vrot.slane %v11179_v23, 7  ;;  %v11197_v16 = vsel %vm1816_vm4, %v1771_v54, %v1772_v1  ;;  %v11205_v13 = vsel %vm1653_vm3, %v1606_v44, %v1607_v62  ;;  %2576 = vmatprep.subr.bf16.mxu1 %v16799_v6 }
 0x123   : > { %v1055_v14 = vpop.f32.mrb[26].mxu0  ;;  %17495 = vst [vmem:[#allocation38_spill] sm:$0xff] %v11197_v16  ;;  %v1773_v44 = vrot.slane %v11179_v23, 1  ;;  %v11343_v16 = vpop.permute.xlu1 %1370 }
 0x124   : > { %v1056_v12 = vadd.f32 %v10996_v33, %v1055_v14  ;;  %v9355_v39 = vpop.f32.mrb[27].mxu0  ;;  %v1231_v61 = vmax.f32 %v1053_v63, 0.0  ;;  %v11209_v25 = vsel %vm1653_vm3, %v1607_v62, %v1608_v7  ;;  %17515 = vst [vmem:[#allocation57_spill] sm:$0xff] %v11343_v16 }
 0x125   : > { %2577 = vmatpush1.bf16.msra.mxu1 %v10234_v4  ;;  %v10235_v4 = vld [vmem:[%s16780_s6 + $0x40] sm:$0xff]   ;;  %v17783_v51 = vpack.c.bf16 %v11209_v25, %v11205_v13 }
 0x126   : > { %v11218_v63 = vmul.f32 %v11188_v37, %v1231_v61  ;;  %v1232_v39 = vmax.f32 %v1056_v12, 0.0  ;;  %v11232_v37 = vpop.permute.xlu0 %1345 }
 0x127   : > { %17499 = vst [vmem:[#allocation42_spill] sm:$0xff] %v11232_v37  ;;  %v11387_v59 = vpop.permute.xlu1 %1380 }
 0x128   : > { %17497 = vst [vmem:[#allocation40_spill] sm:$0xff] %v11218_v63  ;;  %v11223_v62 = vmul.f32 %v11211_v35, %v1232_v39  ;;  %v1609_v54 = vrot.slane %v11218_v63, 7  ;;  %v1774_v14 = vrot.slane %v11218_v63, 1  ;;  %v17500_v39 = vmov 0   ;;  %17523 = vst [vmem:[#allocation65_spill] sm:$0xff] %v11387_v59 }
 0x129   : > { %v1060_v57 = vpop.f32.mrb[28].mxu0  ;;  %2578 = vmatprep.subr.bf16.mxu1 %v17500_v39  ;;  %v11237_v35 = vsel %vm1816_vm4, %v1772_v1, %v1773_v44 }
 0x12a   : > { %17498 = vst [vmem:[#allocation41_spill] sm:$0xff] %v11223_v62  ;;  %v1061_v61 = vadd.f32 %v10996_v33, %v1060_v57  ;;  %v9358_v12 = vpop.f32.mrb[29].mxu0  ;;  %v1610_v46 = vrot.slane %v11223_v62, 7  ;;  %17501 = vst [vmem:[#allocation43_spill] sm:$0xff] %v11237_v35  ;;  %v11241_v22 = vsel %vm1816_vm4, %v1773_v44, %v1774_v14  ;;  %v11249_v11 = vsel %vm1653_vm3, %v1608_v7, %v1609_v54  ;;  %v11276_v3 = vpop.permute.xlu0 %1355 }
 0x12b   : > { %v1063_v6 = vpop.f32.mrb[30].mxu0  ;;  %17502 = vst [vmem:[#allocation44_spill] sm:$0xff] %v11241_v22  ;;  %2579 = vmatpush1.bf16.msra.mxu1 %v10235_v4  ;;  %v1775_v7 = vrot.slane %v11223_v62, 1  ;;  %17506 = vst [vmem:[#allocation48_spill] sm:$0xff] %v11276_v3 }
 0x12c   : > { %v1064_v50 = vadd.f32 %v10996_v33, %v1063_v6  ;;  %v9359_v57 = vpop.f32.mrb[31].mxu0  ;;  %v1233_v12 = vmax.f32 %v1061_v61, 0.0  ;;  %v11253_v1 = vsel %vm1653_vm3, %v1609_v54, %v1610_v46  ;;  %2580 = vmatprep.subr.bf16.mxu1 %v17500_v39 }
 0x12e   : > { %v11262_v61 = vmul.f32 %v11232_v37, %v1233_v12  ;;  %v1234_v57 = vmax.f32 %v1064_v50, 0.0 }
 0x12f   : > { %2581 = vmatpush1.bf16.msra.mxu1 %v10236_v32  ;;  %v10237_v32 = vld [vmem:[%s16780_s6 + $0x50] sm:$0xff]  }
 0x130   : > { %17504 = vst [vmem:[#allocation46_spill] sm:$0xff] %v11262_v61  ;;  %v11267_v54 = vmul.f32 %v11255_v56, %v1234_v57  ;;  %v1611_v44 = vrot.slane %v11262_v61, 7  ;;  %v1776_v6 = vrot.slane %v11262_v61, 1  ;;  %2582 = vmatprep.subr.bf16.mxu1 %v17500_v39  ;;  %v11281_v57 = vsel %vm1816_vm4, %v1774_v14, %v1775_v7 }
 0x131   : > { %v1068_v18 = vpop.f32.mrb[32].mxu0  ;;  %17507 = vst [vmem:[#allocation49_spill] sm:$0xff] %v11281_v57  ;;  %v11320_v57 = vpop.permute.xlu0 %1365 }
 0x132   : > { %17505 = vst [vmem:[#allocation47_spill] sm:$0xff] %v11267_v54  ;;  %v1069_v12 = vadd.f32 %v10996_v33, %v1068_v18  ;;  %v9362_v50 = vpop.f32.mrb[33].mxu0  ;;  %v1612_v4 = vrot.slane %v11267_v54, 7  ;;  %v11285_v56 = vsel %vm1816_vm4, %v1775_v7, %v1776_v6  ;;  %v11293_v47 = vsel %vm1653_vm3, %v1610_v46, %v1611_v44  ;;  %17512 = vst [vmem:[#allocation54_spill] sm:$0xff] %v11320_v57 }
 0x133   : > { %v1071_v37 = vpop.f32.mrb[34].mxu0  ;;  %17508 = vst [vmem:[#allocation50_spill] sm:$0xff] %v11285_v56  ;;  %2583 = vmatpush1.bf16.msra.mxu1 %v10237_v32  ;;  %v1777_v46 = vrot.slane %v11267_v54, 1 }
 0x134   : > { %v1072_v60 = vadd.f32 %v10996_v33, %v1071_v37  ;;  %v9363_v18 = vpop.f32.mrb[35].mxu0  ;;  %v1235_v50 = vmax.f32 %v1069_v12, 0.0  ;;  %v11297_v14 = vsel %vm1653_vm3, %v1611_v44, %v1612_v4  ;;  %2584 = vmatprep.subr.bf16.mxu1 %v17500_v39 }
 0x136   : > { %v11306_v12 = vmul.f32 %v11276_v3, %v1235_v50  ;;  %v1236_v18 = vmax.f32 %v1072_v60, 0.0 }
 0x137   : > { %2585 = vmatpush1.bf16.msra.mxu1 %v10238_v36  ;;  %v10239_v36 = vld [vmem:[%s16780_s6 + $0x60] sm:$0xff]  }
 0x138   : > { %17510 = vst [vmem:[#allocation52_spill] sm:$0xff] %v11306_v12  ;;  %v11311_v44 = vmul.f32 %v11299_v42, %v1236_v18  ;;  %v1613_v7 = vrot.slane %v11306_v12, 7  ;;  %v1778_v37 = vrot.slane %v11306_v12, 1  ;;  %2586 = vmatprep.subr.bf16.mxu1 %v17500_v39  ;;  %v11325_v18 = vsel %vm1816_vm4, %v1776_v6, %v1777_v46 }
 0x139   : > { %v1076_v56 = vpop.f32.mrb[36].mxu0  ;;  %17513 = vst [vmem:[#allocation55_spill] sm:$0xff] %v11325_v18  ;;  %v11364_v18 = vpop.permute.xlu0 %1375 }
 0x13a   : > { %17511 = vst [vmem:[#allocation53_spill] sm:$0xff] %v11311_v44  ;;  %v1077_v50 = vadd.f32 %v10996_v33, %v1076_v56  ;;  %v9366_v60 = vpop.f32.mrb[37].mxu0  ;;  %v1614_v32 = vrot.slane %v11311_v44, 7  ;;  %v11329_v42 = vsel %vm1816_vm4, %v1777_v46, %v1778_v37  ;;  %v11337_v35 = vsel %vm1653_vm3, %v1612_v4, %v1613_v7  ;;  %17518 = vst [vmem:[#allocation60_spill] sm:$0xff] %v11364_v18 }
 0x13b   : > { %v1079_v3 = vpop.f32.mrb[38].mxu0  ;;  %17514 = vst [vmem:[#allocation56_spill] sm:$0xff] %v11329_v42  ;;  %2587 = vmatpush1.bf16.msra.mxu1 %v10239_v36  ;;  %v1779_v4 = vrot.slane %v11311_v44, 1 }
 0x13c   : > { %v1080_v22 = vadd.f32 %v10996_v33, %v1079_v3  ;;  %v9367_v56 = vpop.f32.mrb[39].mxu0  ;;  %v1237_v60 = vmax.f32 %v1077_v50, 0.0  ;;  %v11341_v6 = vsel %vm1653_vm3, %v1613_v7, %v1614_v32  ;;  %2588 = vmatprep.subr.bf16.mxu1 %v17500_v39 }
 0x13e   : > { %v11350_v50 = vmul.f32 %v11320_v57, %v1237_v60  ;;  %v1238_v56 = vmax.f32 %v1080_v22, 0.0 }
 0x13f   : > { %2589 = vmatpush1.bf16.msra.mxu1 %v10240_v43  ;;  %v10241_v43 = vld [vmem:[%s16780_s6 + $0x70] sm:$0xff]  }
 0x140   : > { %17516 = vst [vmem:[#allocation58_spill] sm:$0xff] %v11350_v50  ;;  %v11355_v7 = vmul.f32 %v11343_v16, %v1238_v56  ;;  %v1615_v46 = vrot.slane %v11350_v50, 7  ;;  %v1780_v3 = vrot.slane %v11350_v50, 1  ;;  %2590 = vmatprep.subr.bf16.mxu1 %v17500_v39  ;;  %v11369_v56 = vsel %vm1816_vm4, %v1778_v37, %v1779_v4 }
 0x141   : > { %v1084_v42 = vpop.f32.mrb[40].mxu0  ;;  %17519 = vst [vmem:[#allocation61_spill] sm:$0xff] %v11369_v56  ;;  %v11408_v56 = vpop.permute.xlu0 %1385 }
 0x142   : > { %17517 = vst [vmem:[#allocation59_spill] sm:$0xff] %v11355_v7  ;;  %v1085_v60 = vadd.f32 %v10996_v33, %v1084_v42  ;;  %v9370_v22 = vpop.f32.mrb[41].mxu0  ;;  %v1616_v36 = vrot.slane %v11355_v7, 7  ;;  %v11373_v16 = vsel %vm1816_vm4, %v1779_v4, %v1780_v3  ;;  %v11381_v53 = vsel %vm1653_vm3, %v1614_v32, %v1615_v46  ;;  %17526 = vst [vmem:[#allocation68_spill] sm:$0xff] %v11408_v56 }
 0x143   : > { %v1087_v57 = vpop.f32.mrb[42].mxu0  ;;  %17520 = vst [vmem:[#allocation62_spill] sm:$0xff] %v11373_v16  ;;  %17521 = vst [vmem:[#allocation63_spill] sm:$0xff] %v11381_v53  ;;  %2591 = vmatpush1.bf16.msra.mxu1 %v10241_v43  ;;  %v1781_v32 = vrot.slane %v11355_v7, 1 }
 0x144   : > { %v1088_v55 = vadd.f32 %v10996_v33, %v1087_v57  ;;  %v9371_v42 = vpop.f32.mrb[43].mxu0  ;;  %v1239_v22 = vmax.f32 %v1085_v60, 0.0  ;;  %v11385_v37 = vsel %vm1653_vm3, %v1615_v46, %v1616_v36  ;;  %2592 = vmatprep.subr.bf16.mxu1 %v17500_v39 }
 0x145   : > { %17522 = vst [vmem:[#allocation64_spill] sm:$0xff] %v11385_v37  ;;  %v11428_v37 = vpop.permute.xlu1 %1390 }
 0x146   : > { %v11394_v60 = vmul.f32 %v11364_v18, %v1239_v22  ;;  %v1240_v42 = vmax.f32 %v1088_v55, 0.0  ;;  %17531 = vst [vmem:[#allocation73_spill] sm:$0xff] %v11428_v37 }
 0x147   : > { %2593 = vmatpush1.bf16.msra.mxu1 %v10242_v58 }
 0x148   : > { %17524 = vst [vmem:[#allocation66_spill] sm:$0xff] %v11394_v60  ;;  %v11399_v46 = vmul.f32 %v11387_v59, %v1240_v42  ;;  %v1617_v4 = vrot.slane %v11394_v60, 7  ;;  %v1782_v57 = vrot.slane %v11394_v60, 1  ;;  %2811 = vmatprep.subr.bf16.mxu1 %v17500_v39  ;;  %v11413_v42 = vsel %vm1816_vm4, %v1780_v3, %v1781_v32 }
 0x149   : > { %v1092_v16 = vpop.f32.mrb[44].mxu0  ;;  %17527 = vst [vmem:[#allocation69_spill] sm:$0xff] %v11413_v42  ;;  %v11464_v42 = vpop.permute.xlu1 %1400 }
 0x14a   : > { %17525 = vst [vmem:[#allocation67_spill] sm:$0xff] %v11399_v46  ;;  %v1093_v22 = vadd.f32 %v10996_v33, %v1092_v16  ;;  %v9374_v55 = vpop.f32.mrb[45].mxu0  ;;  %v1618_v43 = vrot.slane %v11399_v46, 7  ;;  %v11417_v59 = vsel %vm1816_vm4, %v1781_v32, %v1782_v57  ;;  %v11422_v58 = vsel %vm1653_vm3, %v1616_v36, %v1617_v4  ;;  %17539 = vst [vmem:[#allocation81_spill] sm:$0xff] %v11464_v42 }
 0x14b   : > { %v1095_v18 = vpop.f32.mrb[46].mxu0  ;;  %17528 = vst [vmem:[#allocation70_spill] sm:$0xff] %v11417_v59  ;;  %17529 = vst [vmem:[#allocation71_spill] sm:$0xff] %v11422_v58  ;;  %v11445_v59 = vpop.permute.xlu0 %1395 }
 0x14c   : > { %v1096_v20 = vadd.f32 %v10996_v33, %v1095_v18  ;;  %v9375_v16 = vpop.f32.mrb[47].mxu0  ;;  %v1241_v55 = vmax.f32 %v1093_v22, 0.0  ;;  %v11426_v19 = vsel %vm1653_vm3, %v1617_v4, %v1618_v43  ;;  %17534 = vst [vmem:[#allocation76_spill] sm:$0xff] %v11445_v59 }
 0x14d   : > { %17530 = vst [vmem:[#allocation72_spill] sm:$0xff] %v11426_v19  ;;  %v1783_v16 = vrot.slane %v11399_v46, 1 }
 0x14e   : > { %v11435_v18 = vmul.f32 %v11408_v56, %v1241_v55  ;;  %v1242_v22 = vmax.f32 %v1096_v20, 0.0 }
 0x14f   : > { %v11449_v20 = vsel %vm1816_vm4, %v1782_v57, %v1783_v16 }
 0x150   : > { %17532 = vst [vmem:[#allocation74_spill] sm:$0xff] %v11435_v18  ;;  %v11439_v36 = vmul.f32 %v11428_v37, %v1242_v22  ;;  %v1619_v4 = vrot.slane %v11435_v18, 7  ;;  %v1784_v60 = vrot.slane %v11435_v18, 1  ;;  %17535 = vst [vmem:[#allocation77_spill] sm:$0xff] %v11449_v20  ;;  %v11500_v20 = vpop.permute.xlu1 %1410 }
 0x151   : > { %v1100_v7 = vpop.f32.mrb[48].mxu0  ;;  %17547 = vst [vmem:[#allocation89_spill] sm:$0xff] %v11500_v20 }
 0x152   : > { %17533 = vst [vmem:[#allocation75_spill] sm:$0xff] %v11439_v36  ;;  %v1101_v53 = vadd.f32 %v10996_v33, %v1100_v7  ;;  %v9378_v3 = vpop.f32.mrb[49].mxu0  ;;  %v1620_v19 = vrot.slane %v11439_v36, 7  ;;  %v11453_v55 = vsel %vm1816_vm4, %v1783_v16, %v1784_v60  ;;  %v11458_v7 = vsel %vm1653_vm3, %v1618_v43, %v1619_v4 }
 0x153   : > { %v1103_v32 = vpop.f32.mrb[50].mxu0  ;;  %17536 = vst [vmem:[#allocation78_spill] sm:$0xff] %v11453_v55  ;;  %17537 = vst [vmem:[#allocation79_spill] sm:$0xff] %v11458_v7  ;;  %v11481_v55 = vpop.permute.xlu0 %1405 }
 0x154   : > { %v1104_v22 = vadd.f32 %v10996_v33, %v1103_v32  ;;  %v9379_v37 = vpop.f32.mrb[51].mxu0  ;;  %v1243_v56 = vmax.f32 %v1101_v53, 0.0  ;;  %v11462_v3 = vsel %vm1653_vm3, %v1619_v4, %v1620_v19  ;;  %17542 = vst [vmem:[#allocation84_spill] sm:$0xff] %v11481_v55 }
 0x155   : > { %17538 = vst [vmem:[#allocation80_spill] sm:$0xff] %v11462_v3  ;;  %v1785_v37 = vrot.slane %v11439_v36, 1 }
 0x156   : > { %v11471_v32 = vmul.f32 %v11445_v59, %v1243_v56  ;;  %v1244_v53 = vmax.f32 %v1104_v22, 0.0 }
 0x157   : > { %v11485_v56 = vsel %vm1816_vm4, %v1784_v60, %v1785_v37 }
 0x158   : > { %17540 = vst [vmem:[#allocation82_spill] sm:$0xff] %v11471_v32  ;;  %v11475_v43 = vmul.f32 %v11464_v42, %v1244_v53  ;;  %v1621_v4 = vrot.slane %v11471_v32, 7  ;;  %v1786_v18 = vrot.slane %v11471_v32, 1  ;;  %17543 = vst [vmem:[#allocation85_spill] sm:$0xff] %v11485_v56  ;;  %v11536_v56 = vpop.permute.xlu1 %1420 }
 0x159   : > { %v1108_v46 = vpop.f32.mrb[52].mxu0  ;;  %17555 = vst [vmem:[#allocation97_spill] sm:$0xff] %v11536_v56 }
 0x15a   : > { %17541 = vst [vmem:[#allocation83_spill] sm:$0xff] %v11475_v43  ;;  %v1109_v58 = vadd.f32 %v10996_v33, %v1108_v46  ;;  %v9382_v57 = vpop.f32.mrb[53].mxu0  ;;  %v1622_v3 = vrot.slane %v11475_v43, 7  ;;  %v11489_v22 = vsel %vm1816_vm4, %v1785_v37, %v1786_v18  ;;  %v11494_v46 = vsel %vm1653_vm3, %v1620_v19, %v1621_v4 }
 0x15b   : > { %v1111_v16 = vpop.f32.mrb[54].mxu0  ;;  %17544 = vst [vmem:[#allocation86_spill] sm:$0xff] %v11489_v22  ;;  %17545 = vst [vmem:[#allocation87_spill] sm:$0xff] %v11494_v46  ;;  %v11517_v22 = vpop.permute.xlu0 %1415 }
 0x15c   : > { %v1112_v53 = vadd.f32 %v10996_v33, %v1111_v16  ;;  %v9383_v42 = vpop.f32.mrb[55].mxu0  ;;  %v1245_v59 = vmax.f32 %v1109_v58, 0.0  ;;  %v11498_v57 = vsel %vm1653_vm3, %v1621_v4, %v1622_v3  ;;  %v1787_v58 = vrot.slane %v11475_v43, 1  ;;  %17550 = vst [vmem:[#allocation92_spill] sm:$0xff] %v11517_v22 }
 0x15d   : > { %17546 = vst [vmem:[#allocation88_spill] sm:$0xff] %v11498_v57 }
 0x15e   : > { %v11507_v16 = vmul.f32 %v11481_v55, %v1245_v59  ;;  %v1246_v42 = vmax.f32 %v1112_v53, 0.0  ;;  %v11521_v59 = vsel %vm1816_vm4, %v1786_v18, %v1787_v58 }
 0x15f   : > { %17551 = vst [vmem:[#allocation93_spill] sm:$0xff] %v11521_v59  ;;  %v11572_v59 = vpop.permute.xlu1 %1430 }
 0x160   : > { %17548 = vst [vmem:[#allocation90_spill] sm:$0xff] %v11507_v16  ;;  %v11511_v19 = vmul.f32 %v11500_v20, %v1246_v42  ;;  %v1623_v4 = vrot.slane %v11507_v16, 7  ;;  %v1788_v32 = vrot.slane %v11507_v16, 1  ;;  %17563 = vst [vmem:[#allocation105_spill] sm:$0xff] %v11572_v59 }
 0x161   : > { %v1116_v36 = vpop.f32.mrb[56].mxu0 }
 0x162   : > { %17549 = vst [vmem:[#allocation91_spill] sm:$0xff] %v11511_v19  ;;  %v1117_v7 = vadd.f32 %v10996_v33, %v1116_v36  ;;  %v9386_v60 = vpop.f32.mrb[57].mxu0  ;;  %v1624_v57 = vrot.slane %v11511_v19, 7  ;;  %v11525_v53 = vsel %vm1816_vm4, %v1787_v58, %v1788_v32  ;;  %v11530_v36 = vsel %vm1653_vm3, %v1622_v3, %v1623_v4 }
 0x163   : > { %v1119_v37 = vpop.f32.mrb[58].mxu0  ;;  %17552 = vst [vmem:[#allocation94_spill] sm:$0xff] %v11525_v53  ;;  %17553 = vst [vmem:[#allocation95_spill] sm:$0xff] %v11530_v36  ;;  %v11553_v53 = vpop.permute.xlu0 %1425 }
 0x164   : > { %v1120_v42 = vadd.f32 %v10996_v33, %v1119_v37  ;;  %v9387_v20 = vpop.f32.mrb[59].mxu0  ;;  %v1247_v55 = vmax.f32 %v1117_v7, 0.0  ;;  %v11534_v60 = vsel %vm1653_vm3, %v1623_v4, %v1624_v57  ;;  %v1789_v7 = vrot.slane %v11511_v19, 1  ;;  %17558 = vst [vmem:[#allocation100_spill] sm:$0xff] %v11553_v53 }
 0x165   : > { %17554 = vst [vmem:[#allocation96_spill] sm:$0xff] %v11534_v60 }
 0x166   : > { %v11543_v37 = vmul.f32 %v11517_v22, %v1247_v55  ;;  %v1248_v20 = vmax.f32 %v1120_v42, 0.0  ;;  %v11557_v55 = vsel %vm1816_vm4, %v1788_v32, %v1789_v7 }
 0x167   : > { %17559 = vst [vmem:[#allocation101_spill] sm:$0xff] %v11557_v55  ;;  %v11608_v55 = vpop.permute.xlu1 %1440 }
 0x168   : > { %17556 = vst [vmem:[#allocation98_spill] sm:$0xff] %v11543_v37  ;;  %v11547_v3 = vmul.f32 %v11536_v56, %v1248_v20  ;;  %v1625_v4 = vrot.slane %v11543_v37, 7  ;;  %v1790_v16 = vrot.slane %v11543_v37, 1  ;;  %17571 = vst [vmem:[#allocation113_spill] sm:$0xff] %v11608_v55 }
 0x169   : > { %v1124_v43 = vpop.f32.mrb[60].mxu0 }
 0x16a   : > { %17557 = vst [vmem:[#allocation99_spill] sm:$0xff] %v11547_v3  ;;  %v1125_v46 = vadd.f32 %v10996_v33, %v1124_v43  ;;  %v9390_v18 = vpop.f32.mrb[61].mxu0  ;;  %v1626_v60 = vrot.slane %v11547_v3, 7  ;;  %v11561_v42 = vsel %vm1816_vm4, %v1789_v7, %v1790_v16  ;;  %v11566_v43 = vsel %vm1653_vm3, %v1624_v57, %v1625_v4 }
 0x16b   : > { %v1127_v58 = vpop.f32.mrb[62].mxu0  ;;  %17560 = vst [vmem:[#allocation102_spill] sm:$0xff] %v11561_v42  ;;  %17561 = vst [vmem:[#allocation103_spill] sm:$0xff] %v11566_v43  ;;  %v11589_v42 = vpop.permute.xlu0 %1435 }
 0x16c   : > { %v1128_v20 = vadd.f32 %v10996_v33, %v1127_v58  ;;  %v9391_v56 = vpop.f32.mrb[63].mxu0  ;;  %v1249_v22 = vmax.f32 %v1125_v46, 0.0  ;;  %v11570_v18 = vsel %vm1653_vm3, %v1625_v4, %v1626_v60  ;;  %v1791_v46 = vrot.slane %v11547_v3, 1  ;;  %17566 = vst [vmem:[#allocation108_spill] sm:$0xff] %v11589_v42 }
 0x16d   : > { %17562 = vst [vmem:[#allocation104_spill] sm:$0xff] %v11570_v18 }
 0x16e   : > { %v11579_v58 = vmul.f32 %v11553_v53, %v1249_v22  ;;  %v1250_v56 = vmax.f32 %v1128_v20, 0.0  ;;  %v11593_v22 = vsel %vm1816_vm4, %v1790_v16, %v1791_v46 }
 0x16f   : > { %17567 = vst [vmem:[#allocation109_spill] sm:$0xff] %v11593_v22  ;;  %v11644_v22 = vpop.permute.xlu1 %1450 }
 0x170   : > { %17564 = vst [vmem:[#allocation106_spill] sm:$0xff] %v11579_v58  ;;  %v11583_v57 = vmul.f32 %v11572_v59, %v1250_v56  ;;  %v1627_v4 = vrot.slane %v11579_v58, 7  ;;  %v1792_v37 = vrot.slane %v11579_v58, 1  ;;  %17579 = vst [vmem:[#allocation121_spill] sm:$0xff] %v11644_v22 }
 0x171   : > { %v1132_v19 = vpop.f32.mrb[64].mxu0 }
 0x172   : > { %17565 = vst [vmem:[#allocation107_spill] sm:$0xff] %v11583_v57  ;;  %v1133_v36 = vadd.f32 %v10996_v33, %v1132_v19  ;;  %v9394_v32 = vpop.f32.mrb[65].mxu0  ;;  %v1628_v18 = vrot.slane %v11583_v57, 7  ;;  %v11597_v20 = vsel %vm1816_vm4, %v1791_v46, %v1792_v37  ;;  %v11602_v19 = vsel %vm1653_vm3, %v1626_v60, %v1627_v4 }
 0x173   : > { %v1135_v7 = vpop.f32.mrb[66].mxu0  ;;  %17568 = vst [vmem:[#allocation110_spill] sm:$0xff] %v11597_v20  ;;  %17569 = vst [vmem:[#allocation111_spill] sm:$0xff] %v11602_v19  ;;  %v11625_v20 = vpop.permute.xlu0 %1445 }
 0x174   : > { %v1136_v56 = vadd.f32 %v10996_v33, %v1135_v7  ;;  %v9395_v59 = vpop.f32.mrb[67].mxu0  ;;  %v1251_v53 = vmax.f32 %v1133_v36, 0.0  ;;  %v11606_v32 = vsel %vm1653_vm3, %v1627_v4, %v1628_v18  ;;  %v1793_v36 = vrot.slane %v11583_v57, 1  ;;  %17574 = vst [vmem:[#allocation116_spill] sm:$0xff] %v11625_v20 }
 0x175   : > { %17570 = vst [vmem:[#allocation112_spill] sm:$0xff] %v11606_v32 }
 0x176   : > { %v11615_v7 = vmul.f32 %v11589_v42, %v1251_v53  ;;  %v1252_v59 = vmax.f32 %v1136_v56, 0.0  ;;  %v11629_v53 = vsel %vm1816_vm4, %v1792_v37, %v1793_v36 }
 0x177   : > { %17575 = vst [vmem:[#allocation117_spill] sm:$0xff] %v11629_v53  ;;  %v11680_v53 = vpop.permute.xlu1 %1460 }
 0x178   : > { %17572 = vst [vmem:[#allocation114_spill] sm:$0xff] %v11615_v7  ;;  %v11619_v60 = vmul.f32 %v11608_v55, %v1252_v59  ;;  %v1629_v4 = vrot.slane %v11615_v7, 7  ;;  %v1794_v58 = vrot.slane %v11615_v7, 1  ;;  %17587 = vst [vmem:[#allocation129_spill] sm:$0xff] %v11680_v53 }
 0x179   : > { %v1140_v3 = vpop.f32.mrb[68].mxu0 }
 0x17a   : > { %17573 = vst [vmem:[#allocation115_spill] sm:$0xff] %v11619_v60  ;;  %v1141_v43 = vadd.f32 %v10996_v33, %v1140_v3  ;;  %v9398_v16 = vpop.f32.mrb[69].mxu0  ;;  %v1630_v32 = vrot.slane %v11619_v60, 7  ;;  %v11633_v56 = vsel %vm1816_vm4, %v1793_v36, %v1794_v58  ;;  %v11638_v3 = vsel %vm1653_vm3, %v1628_v18, %v1629_v4 }
 0x17b   : > { %v1143_v46 = vpop.f32.mrb[70].mxu0  ;;  %17576 = vst [vmem:[#allocation118_spill] sm:$0xff] %v11633_v56  ;;  %17577 = vst [vmem:[#allocation119_spill] sm:$0xff] %v11638_v3  ;;  %v11661_v56 = vpop.permute.xlu0 %1455 }
 0x17c   : > { %v1144_v59 = vadd.f32 %v10996_v33, %v1143_v46  ;;  %v9399_v55 = vpop.f32.mrb[71].mxu0  ;;  %v1253_v42 = vmax.f32 %v1141_v43, 0.0  ;;  %v11642_v16 = vsel %vm1653_vm3, %v1629_v4, %v1630_v32  ;;  %v1795_v43 = vrot.slane %v11619_v60, 1  ;;  %17582 = vst [vmem:[#allocation124_spill] sm:$0xff] %v11661_v56 }
 0x17d   : > { %17578 = vst [vmem:[#allocation120_spill] sm:$0xff] %v11642_v16 }
 0x17e   : > { %v11651_v46 = vmul.f32 %v11625_v20, %v1253_v42  ;;  %v1254_v55 = vmax.f32 %v1144_v59, 0.0  ;;  %v11665_v42 = vsel %vm1816_vm4, %v1794_v58, %v1795_v43 }
 0x17f   : > { %17583 = vst [vmem:[#allocation125_spill] sm:$0xff] %v11665_v42  ;;  %v11716_v42 = vpop.permute.xlu1 %1470 }
 0x180   : > { %17580 = vst [vmem:[#allocation122_spill] sm:$0xff] %v11651_v46  ;;  %v11655_v18 = vmul.f32 %v11644_v22, %v1254_v55  ;;  %v1631_v4 = vrot.slane %v11651_v46, 7  ;;  %v1796_v7 = vrot.slane %v11651_v46, 1  ;;  %17595 = vst [vmem:[#allocation137_spill] sm:$0xff] %v11716_v42 }
 0x181   : > { %v1148_v57 = vpop.f32.mrb[72].mxu0 }
 0x182   : > { %17581 = vst [vmem:[#allocation123_spill] sm:$0xff] %v11655_v18  ;;  %v1149_v19 = vadd.f32 %v10996_v33, %v1148_v57  ;;  %v9402_v37 = vpop.f32.mrb[73].mxu0  ;;  %v1632_v16 = vrot.slane %v11655_v18, 7  ;;  %v11669_v59 = vsel %vm1816_vm4, %v1795_v43, %v1796_v7  ;;  %v11674_v57 = vsel %vm1653_vm3, %v1630_v32, %v1631_v4 }
 0x183   : > { %v1151_v36 = vpop.f32.mrb[74].mxu0  ;;  %17584 = vst [vmem:[#allocation126_spill] sm:$0xff] %v11669_v59  ;;  %17585 = vst [vmem:[#allocation127_spill] sm:$0xff] %v11674_v57  ;;  %v11697_v59 = vpop.permute.xlu0 %1465 }
 0x184   : > { %v1152_v55 = vadd.f32 %v10996_v33, %v1151_v36  ;;  %v9403_v22 = vpop.f32.mrb[75].mxu0  ;;  %v1255_v20 = vmax.f32 %v1149_v19, 0.0  ;;  %v11678_v37 = vsel %vm1653_vm3, %v1631_v4, %v1632_v16  ;;  %v1797_v19 = vrot.slane %v11655_v18, 1  ;;  %17590 = vst [vmem:[#allocation132_spill] sm:$0xff] %v11697_v59 }
 0x185   : > { %17586 = vst [vmem:[#allocation128_spill] sm:$0xff] %v11678_v37 }
 0x186   : > { %v11687_v36 = vmul.f32 %v11661_v56, %v1255_v20  ;;  %v1256_v22 = vmax.f32 %v1152_v55, 0.0  ;;  %v11701_v20 = vsel %vm1816_vm4, %v1796_v7, %v1797_v19 }
 0x187   : > { %17591 = vst [vmem:[#allocation133_spill] sm:$0xff] %v11701_v20  ;;  %v11752_v20 = vpop.permute.xlu1 %1480 }
 0x188   : > { %17588 = vst [vmem:[#allocation130_spill] sm:$0xff] %v11687_v36  ;;  %v11691_v32 = vmul.f32 %v11680_v53, %v1256_v22  ;;  %v1633_v4 = vrot.slane %v11687_v36, 7  ;;  %v1798_v46 = vrot.slane %v11687_v36, 1  ;;  %17603 = vst [vmem:[#allocation145_spill] sm:$0xff] %v11752_v20 }
 0x189   : > { %v1156_v60 = vpop.f32.mrb[76].mxu0 }
 0x18a   : > { %17589 = vst [vmem:[#allocation131_spill] sm:$0xff] %v11691_v32  ;;  %v1157_v3 = vadd.f32 %v10996_v33, %v1156_v60  ;;  %v9406_v58 = vpop.f32.mrb[77].mxu0  ;;  %v1634_v37 = vrot.slane %v11691_v32, 7  ;;  %v11705_v55 = vsel %vm1816_vm4, %v1797_v19, %v1798_v46  ;;  %v11710_v60 = vsel %vm1653_vm3, %v1632_v16, %v1633_v4 }
 0x18b   : > { %v1159_v43 = vpop.f32.mrb[78].mxu0  ;;  %17592 = vst [vmem:[#allocation134_spill] sm:$0xff] %v11705_v55  ;;  %17593 = vst [vmem:[#allocation135_spill] sm:$0xff] %v11710_v60  ;;  %v11733_v55 = vpop.permute.xlu0 %1475 }
 0x18c   : > { %v1160_v22 = vadd.f32 %v10996_v33, %v1159_v43  ;;  %v9407_v53 = vpop.f32.mrb[79].mxu0  ;;  %v1257_v56 = vmax.f32 %v1157_v3, 0.0  ;;  %v11714_v58 = vsel %vm1653_vm3, %v1633_v4, %v1634_v37  ;;  %v1799_v3 = vrot.slane %v11691_v32, 1  ;;  %17598 = vst [vmem:[#allocation140_spill] sm:$0xff] %v11733_v55 }
 0x18d   : > { %17594 = vst [vmem:[#allocation136_spill] sm:$0xff] %v11714_v58 }
 0x18e   : > { %v11723_v43 = vmul.f32 %v11697_v59, %v1257_v56  ;;  %v1258_v53 = vmax.f32 %v1160_v22, 0.0  ;;  %v11737_v56 = vsel %vm1816_vm4, %v1798_v46, %v1799_v3 }
 0x18f   : > { %17599 = vst [vmem:[#allocation141_spill] sm:$0xff] %v11737_v56  ;;  %v11788_v56 = vpop.permute.xlu1 %1490 }
 0x190   : > { %17596 = vst [vmem:[#allocation138_spill] sm:$0xff] %v11723_v43  ;;  %v11727_v16 = vmul.f32 %v11716_v42, %v1258_v53  ;;  %v1635_v4 = vrot.slane %v11723_v43, 7  ;;  %v1800_v36 = vrot.slane %v11723_v43, 1  ;;  %17611 = vst [vmem:[#allocation153_spill] sm:$0xff] %v11788_v56 }
 0x191   : > { %v1164_v18 = vpop.f32.mrb[80].mxu0 }
 0x192   : > { %17597 = vst [vmem:[#allocation139_spill] sm:$0xff] %v11727_v16  ;;  %v1165_v57 = vadd.f32 %v10996_v33, %v1164_v18  ;;  %v9410_v7 = vpop.f32.mrb[81].mxu0  ;;  %v1636_v58 = vrot.slane %v11727_v16, 7  ;;  %v11741_v22 = vsel %vm1816_vm4, %v1799_v3, %v1800_v36  ;;  %v11746_v18 = vsel %vm1653_vm3, %v1634_v37, %v1635_v4 }
 0x193   : > { %v1167_v19 = vpop.f32.mrb[82].mxu0  ;;  %17600 = vst [vmem:[#allocation142_spill] sm:$0xff] %v11741_v22  ;;  %17601 = vst [vmem:[#allocation143_spill] sm:$0xff] %v11746_v18  ;;  %v11769_v22 = vpop.permute.xlu0 %1485 }
 0x194   : > { %v1168_v53 = vadd.f32 %v10996_v33, %v1167_v19  ;;  %v9411_v42 = vpop.f32.mrb[83].mxu0  ;;  %v1259_v59 = vmax.f32 %v1165_v57, 0.0  ;;  %v11750_v7 = vsel %vm1653_vm3, %v1635_v4, %v1636_v58  ;;  %v1801_v57 = vrot.slane %v11727_v16, 1  ;;  %17606 = vst [vmem:[#allocation148_spill] sm:$0xff] %v11769_v22 }
 0x195   : > { %17602 = vst [vmem:[#allocation144_spill] sm:$0xff] %v11750_v7 }
 0x196   : > { %v11759_v19 = vmul.f32 %v11733_v55, %v1259_v59  ;;  %v1260_v42 = vmax.f32 %v1168_v53, 0.0  ;;  %v11773_v59 = vsel %vm1816_vm4, %v1800_v36, %v1801_v57 }
 0x197   : > { %17607 = vst [vmem:[#allocation149_spill] sm:$0xff] %v11773_v59 }
 0x198   : > { %17604 = vst [vmem:[#allocation146_spill] sm:$0xff] %v11759_v19  ;;  %v11763_v37 = vmul.f32 %v11752_v20, %v1260_v42  ;;  %v1637_v4 = vrot.slane %v11759_v19, 7  ;;  %v1802_v43 = vrot.slane %v11759_v19, 1 }
 0x199   : > { %v1172_v32 = vpop.f32.mrb[84].mxu0 }
 0x19a   : > { %17605 = vst [vmem:[#allocation147_spill] sm:$0xff] %v11763_v37  ;;  %v1173_v60 = vadd.f32 %v10996_v33, %v1172_v32  ;;  %v9414_v46 = vpop.f32.mrb[85].mxu0  ;;  %v1638_v7 = vrot.slane %v11763_v37, 7  ;;  %v11777_v53 = vsel %vm1816_vm4, %v1801_v57, %v1802_v43  ;;  %v11782_v32 = vsel %vm1653_vm3, %v1636_v58, %v1637_v4 }
 0x19b   : > { %v1175_v3 = vpop.f32.mrb[86].mxu0  ;;  %17608 = vst [vmem:[#allocation150_spill] sm:$0xff] %v11777_v53  ;;  %17609 = vst [vmem:[#allocation151_spill] sm:$0xff] %v11782_v32  ;;  %v11805_v53 = vpop.permute.xlu0 %1495 }
 0x19c   : > { %v1176_v42 = vadd.f32 %v10996_v33, %v1175_v3  ;;  %v9415_v20 = vpop.f32.mrb[87].mxu0  ;;  %v1261_v55 = vmax.f32 %v1173_v60, 0.0  ;;  %v11786_v46 = vsel %vm1653_vm3, %v1637_v4, %v1638_v7  ;;  %v1803_v60 = vrot.slane %v11763_v37, 1  ;;  %17614 = vst [vmem:[#allocation156_spill] sm:$0xff] %v11805_v53 }
 0x19d   : > { %17610 = vst [vmem:[#allocation152_spill] sm:$0xff] %v11786_v46 }
 0x19e   : > { %v11795_v3 = vmul.f32 %v11769_v22, %v1261_v55  ;;  %v1262_v20 = vmax.f32 %v1176_v42, 0.0  ;;  %v11809_v55 = vsel %vm1816_vm4, %v1802_v43, %v1803_v60  ;;  %v11829_v22 = vpop.permute.xlu1 %1500 }
 0x19f   : > { %17615 = vst [vmem:[#allocation157_spill] sm:$0xff] %v11809_v55  ;;  %17619 = vst [vmem:[#allocation161_spill] sm:$0xff] %v11829_v22 }
 0x1a0   : > { %17612 = vst [vmem:[#allocation154_spill] sm:$0xff] %v11795_v3  ;;  %v11799_v58 = vmul.f32 %v11788_v56, %v1262_v20  ;;  %v1639_v4 = vrot.slane %v11795_v3, 7  ;;  %v1804_v19 = vrot.slane %v11795_v3, 1  ;;  %v11818_v20 = vld [vmem:[%s16779_s5] ss:$0 sm:$0xff] }
 0x1a1   : > { %v1180_v16 = vpop.f32.mrb[88].mxu0 }
 0x1a2   : > { %17613 = vst [vmem:[#allocation155_spill] sm:$0xff] %v11799_v58  ;;  %v1181_v18 = vadd.f32 %v10996_v33, %v1180_v16  ;;  %v9418_v36 = vpop.f32.mrb[89].mxu0  ;;  %v1640_v46 = vrot.slane %v11799_v58, 7  ;;  %v11813_v42 = vsel %vm1816_vm4, %v1803_v60, %v1804_v19  ;;  %v11823_v56 = vsel %vm1653_vm3, %v1638_v7, %v1639_v4  ;;  %v11865_v55 = vpop.permute.xlu1 %1510 }
 0x1a3   : > { %v1183_v57 = vpop.f32.mrb[90].mxu0  ;;  %17616 = vst [vmem:[#allocation158_spill] sm:$0xff] %v11813_v42  ;;  %17617 = vst [vmem:[#allocation159_spill] sm:$0xff] %v11823_v56  ;;  %v11846_v42 = vpop.permute.xlu0 %1505 }
 0x1a4   : > { %v1184_v33 = vadd.f32 %v11818_v20, %v1183_v57  ;;  %v9419_v16 = vpop.f32.mrb[91].mxu0  ;;  %v1263_v36 = vmax.f32 %v1181_v18, 0.0  ;;  %v11827_v43 = vsel %vm1653_vm3, %v1639_v4, %v1640_v46  ;;  %17622 = vst [vmem:[#allocation164_spill] sm:$0xff] %v11846_v42  ;;  %17627 = vst [vmem:[#allocation169_spill] sm:$0xff] %v11865_v55 }
 0x1a5   : > { %17618 = vst [vmem:[#allocation160_spill] sm:$0xff] %v11827_v43  ;;  %v1805_v16 = vrot.slane %v11799_v58, 1 }
 0x1a6   : > { %v11836_v57 = vmul.f32 %v11805_v53, %v1263_v36  ;;  %v1264_v18 = vmax.f32 %v1184_v33, 0.0 }
 0x1a7   : > { %v11850_v33 = vsel %vm1816_vm4, %v1804_v19, %v1805_v16 }
 0x1a8   : > { %17620 = vst [vmem:[#allocation162_spill] sm:$0xff] %v11836_v57  ;;  %v11840_v7 = vmul.f32 %v11829_v22, %v1264_v18  ;;  %v1641_v4 = vrot.slane %v11836_v57, 7  ;;  %v1806_v3 = vrot.slane %v11836_v57, 1  ;;  %17623 = vst [vmem:[#allocation165_spill] sm:$0xff] %v11850_v33  ;;  %v11901_v33 = vpop.permute.xlu1 %1520 }
 0x1a9   : > { %v1188_v37 = vpop.f32.mrb[92].mxu0  ;;  %17634 = vst [vmem:[#allocation176_spill] sm:$0xff] %v11901_v33 }
 0x1aa   : > { %17621 = vst [vmem:[#allocation163_spill] sm:$0xff] %v11840_v7  ;;  %v1189_v32 = vadd.f32 %v11818_v20, %v1188_v37  ;;  %v9422_v60 = vpop.f32.mrb[93].mxu0  ;;  %v1642_v43 = vrot.slane %v11840_v7, 7  ;;  %v11854_v36 = vsel %vm1816_vm4, %v1805_v16, %v1806_v3  ;;  %v11859_v37 = vsel %vm1653_vm3, %v1640_v46, %v1641_v4 }
 0x1ab   : > { %v1191_v59 = vpop.f32.mrb[94].mxu0  ;;  %17624 = vst [vmem:[#allocation166_spill] sm:$0xff] %v11854_v36  ;;  %17625 = vst [vmem:[#allocation167_spill] sm:$0xff] %v11859_v37  ;;  %v11882_v36 = vpop.permute.xlu0 %1515 }
 0x1ac   : > { %v1192_v18 = vadd.f32 %v11818_v20, %v1191_v59  ;;  %v9423_v22 = vpop.f32.mrb[95].mxu0  ;;  %v1265_v53 = vmax.f32 %v1189_v32, 0.0  ;;  %v11863_v60 = vsel %vm1653_vm3, %v1641_v4, %v1642_v43  ;;  %v1807_v32 = vrot.slane %v11840_v7, 1  ;;  %17630 = vst [vmem:[#allocation172_spill] sm:$0xff] %v11882_v36 }
 0x1ad   : > { %17626 = vst [vmem:[#allocation168_spill] sm:$0xff] %v11863_v60 }
 0x1ae   : > { %v11872_v59 = vmul.f32 %v11846_v42, %v1265_v53  ;;  %v1266_v22 = vmax.f32 %v1192_v18, 0.0  ;;  %v11886_v53 = vsel %vm1816_vm4, %v1806_v3, %v1807_v32 }
 0x1af   : > { %17631 = vst [vmem:[#allocation173_spill] sm:$0xff] %v11886_v53 }
 0x1b0   : > { %17628 = vst [vmem:[#allocation170_spill] sm:$0xff] %v11872_v59  ;;  %v11876_v46 = vmul.f32 %v11865_v55, %v1266_v22  ;;  %v1643_v4 = vrot.slane %v11872_v59, 7  ;;  %v1808_v57 = vrot.slane %v11872_v59, 1 }
 0x1b1   : > { %v1196_v58 = vpop.f32.mrb[96].mxu0 }
 0x1b2   : > { %17629 = vst [vmem:[#allocation171_spill] sm:$0xff] %v11876_v46  ;;  %v9426_v56 = vpop.f32.mrb[97].mxu0  ;;  %v1197_v19 = vadd.f32 %v11818_v20, %v1196_v58  ;;  %v1644_v60 = vrot.slane %v11876_v46, 7  ;;  %v11890_v18 = vsel %vm1816_vm4, %v1807_v32, %v1808_v57 }
 0x1b3   : > { %v1199_v16 = vpop.f32.mrb[98].mxu0  ;;  %17632 = vst [vmem:[#allocation174_spill] sm:$0xff] %v11890_v18  ;;  %v11895_v56 = vsel %vm1653_vm3, %v1642_v43, %v1643_v4 }
 0x1b4   : > { %v9427_v22 = vpop.f32.mrb[99].mxu0  ;;  %v1267_v55 = vmax.f32 %v1197_v19, 0.0  ;;  %v1200_v42 = vadd.f32 %v11818_v20, %v1199_v16  ;;  %v11899_v58 = vsel %vm1653_vm3, %v1643_v4, %v1644_v60 }
 0x1b5   : > { %17633 = vst [vmem:[#allocation175_spill] sm:$0xff] %v11899_v58  ;;  %v1809_v22 = vrot.slane %v11876_v46, 1 }
 0x1b6   : > { %v11908_v19 = vmul.f32 %v11882_v36, %v1267_v55  ;;  %v1268_v16 = vmax.f32 %v1200_v42, 0.0 }
 0x1b7   : > { %v11920_v55 = vsel %vm1816_vm4, %v1808_v57, %v1809_v22 }
 0x1b8   : > { %17635 = vst [vmem:[#allocation177_spill] sm:$0xff] %v11908_v19  ;;  %v11912_v43 = vmul.f32 %v11901_v33, %v1268_v16  ;;  %v1645_v4 = vrot.slane %v11908_v19, 7  ;;  %v1810_v59 = vrot.slane %v11908_v19, 1  ;;  %17637 = vst [vmem:[#allocation179_spill] sm:$0xff] %v11920_v55 }
 0x1b9   : > { %v1204_v7 = vpop.f32.mrb[100].mxu0 }
 0x1ba   : > { %17636 = vst [vmem:[#allocation178_spill] sm:$0xff] %v11912_v43  ;;  %v1205_v37 = vadd.f32 %v11818_v20, %v1204_v7  ;;  %v9430_v3 = vpop.f32.mrb[101].mxu0  ;;  %v1646_v58 = vrot.slane %v11912_v43, 7  ;;  %v11924_v42 = vsel %vm1816_vm4, %v1809_v22, %v1810_v59  ;;  %v11929_v18 = vsel %vm1653_vm3, %v1644_v60, %v1645_v4 }
 0x1bb   : > { %v1207_v32 = vpop.f32.mrb[102].mxu0  ;;  %17638 = vst [vmem:[#allocation180_spill] sm:$0xff] %v11924_v42  ;;  %v1811_v60 = vrot.slane %v11912_v43, 1 }
 0x1bc   : > { %v1269_v16 = vmax.f32 %v1205_v37, 0.0  ;;  %v1208_v33 = vadd.f32 %v11818_v20, %v1207_v32  ;;  %v9431_v36 = vpop.f32.mrb[103].mxu0  ;;  %v11933_v7 = vsel %vm1653_vm3, %v1645_v4, %v1646_v58  ;;  %v1005_v37 = vadd.f32 %v11818_v20, %v10989_v28 }
 0x1bd   : > { %17639 = vst [vmem:[#allocation181_spill] sm:$0xff] %v11933_v7 }
 0x1be   : > { %v11942_v32 = vmul.f32 %v10981_v24, %v1269_v16  ;;  %v1270_v36 = vmax.f32 %v1208_v33, 0.0  ;;  %v1219_v7 = vmax.f32 %v1005_v37, 0.0  ;;  %v11954_v33 = vsel %vm1816_vm4, %v1810_v59, %v1811_v60 }
 0x1bf   : > { %17642 = vst [vmem:[#allocation184_spill] sm:$0xff] %v11954_v33 }
 0x1c0   : > { %17640 = vst [vmem:[#allocation182_spill] sm:$0xff] %v11942_v32  ;;  %v11946_v22 = vmul.f32 %v10987_v27, %v1270_v36  ;;  %v1647_v4 = vrot.slane %v11942_v32, 7  ;;  %v1812_v53 = vrot.slane %v11942_v32, 1 }
 0x1c1   : > { %v1212_v57 = vpop.f32.mrb[104].mxu0 }
 0x1c2   : > { %17641 = vst [vmem:[#allocation183_spill] sm:$0xff] %v11946_v22  ;;  %v1213_v3 = vadd.f32 %v11818_v20, %v1212_v57  ;;  %v9434_v42 = vpop.f32.mrb[105].mxu0  ;;  %v1648_v28 = vrot.slane %v11946_v22, 7  ;;  %v11958_v16 = vsel %vm1816_vm4, %v1811_v60, %v1812_v53  ;;  %v11974_v60 = vmul.f32 %v10991_v30, %v1219_v7 }
 0x1c3   : > { %v1215_v55 = vpop.f32.mrb[106].mxu0  ;;  %17643 = vst [vmem:[#allocation185_spill] sm:$0xff] %v11958_v16  ;;  %v11967_v42 = vsel %vm1653_vm3, %v1646_v58, %v1647_v4  ;;  %v1813_v57 = vrot.slane %v11946_v22, 1  ;;  %v17730_v16 = vld [vmem:[#allocation135_spill] sm:$0xff] }
 0x1c4   : > { %v1271_v36 = vmax.f32 %v1213_v3, 0.0  ;;  %v1216_v27 = vadd.f32 %v11818_v20, %v1215_v55  ;;  %v9435_v24 = vpop.f32.mrb[107].mxu0  ;;  %v11963_v37 = vsel %vm1653_vm3, %v1647_v4, %v1648_v28  ;;  %17645 = vst [vmem:[#allocation187_spill] sm:$0xff] %v11974_v60 }
 0x1c5   : > { %17644 = vst [vmem:[#allocation186_spill] sm:$0xff] %v11963_v37 }
 0x1c6   : > { %v11977_v20 = vmul.f32 %v10984_v26, %v1271_v36  ;;  %v1272_v24 = vmax.f32 %v1216_v27, 0.0 }
 0x1c8   : > { %17646 = vst [vmem:[#allocation188_spill] sm:$0xff] %v11977_v20  ;;  %v11980_v55 = vmul.f32 %v10998_v34, %v1272_v24  ;;  %v11984_v58 = vpack.c.bf16 %v11977_v20, %v11946_v22  ;;  %v1649_v3 = vrot.slane %v11977_v20, 7  ;;  %v1814_v4 = vrot.slane %v11977_v20, 1 }
 0x1c9   : > { %v17068_v24 = vrot.slane %v11974_v60, 1  ;;  %v12050_v20 = vpack.c.bf16 %v11013_v49, %v11010_v48 }
 0x1ca   : > { %17647 = vst [vmem:[#allocation189_spill] sm:$0xff] %v11980_v55  ;;  %17648 = vst [vmem:[#allocation190_spill] sm:$0xff] %v11984_v58  ;;  %2594 = vmatprep.mubr.bf16.mxu1 %v11984_v58  ;;  %v11992_v7 = vsel %vm1653_vm3, %v1648_v28, %v1649_v3  ;;  %v1650_v27 = vrot.slane %v11980_v55, 7  ;;  %v1815_v36 = vrot.slane %v11980_v55, 1  ;;  %v12003_v34 = vsel %vm1816_vm4, %v1813_v57, %v1814_v4 }
 0x1cb   : > { %17649 = vst [vmem:[#allocation191_spill] sm:$0xff] %v11992_v7  ;;  %v11999_v59 = vpack.c.bf16 %v11992_v7, %v11963_v37  ;;  %17651 = vst [vmem:[#allocation193_spill] sm:$0xff] %v12003_v34  ;;  %v12007_v26 = vpack.c.bf16 %v11974_v60, %v11980_v55  ;;  %v12026_v55 = vsel %vm1816_vm4, %v1812_v53, %v1813_v57  ;;  %v17742_v37 = vld [vmem:[#allocation151_spill] sm:$0xff] }
 0x1cc   : > { %v12011_v28 = vsel %vm1653_vm3, %v1649_v3, %v1650_v27  ;;  %v12015_v30 = vsel %vm1816_vm4, %v1814_v4, %v1815_v36  ;;  %v12021_v58 = vsel %vm1816_vm4, %v1815_v36, %v17068_v24  ;;  %17656 = vst [vmem:[#allocation198_spill] sm:$0xff] %v12026_v55  ;;  %v1597_v3 = vrot.slane %v11974_v60, 7  ;;  %v10243_v4 = vld [vmem:[%s16780_s6 + $0x80] sm:$0xff]   ;;  %17658 = vst [vmem:[#allocation200_spill] sm:$0xff] %v12050_v20 }
 0x1cd   : > { %17650 = vst [vmem:[#allocation192_spill] sm:$0xff] %v11999_v59  ;;  %17652 = vst [vmem:[#allocation194_spill] sm:$0xff] %v12007_v26  ;;  %2595 = vmatmul.mubr.bf16.vlgmr.msra.gmra.mrb[0].mxu1 %v11999_v59  ;;  %v17659_v24 = vrot.slane %v11010_v48, 7  ;;  %v12066_v36 = vpack.c.bf16 %v11043_v5, %v11018_v52  ;;  %v12108_v59 = vpack.c.bf16 %v11174_v40, %v11135_v21  ;;  %v17706_v21 = vld [vmem:[#allocation103_spill] sm:$0xff] }
 0x1ce   : > { %17653 = vst [vmem:[#allocation195_spill] sm:$0xff] %v12011_v28  ;;  %17654 = vst [vmem:[#allocation196_spill] sm:$0xff] %v12015_v30  ;;  %2602 = vmatprep.mubr.bf16.mxu1 %v12007_v26  ;;  %v12041_v53 = vsel %vm1653_vm3, %v1650_v27, %v1597_v3  ;;  %2812 = vmatpush1.bf16.msra.mxu1 %v10243_v4  ;;  %v10246_v26 = vld [vmem:[%s16780_s6 + $0x98] sm:$0xff]   ;;  %v17724_v52 = vld [vmem:[#allocation127_spill] sm:$0xff] }
 0x1cf   : > { %17655 = vst [vmem:[#allocation197_spill] sm:$0xff] %v12021_v58  ;;  %2813 = vmatprep.subr.bf16.mxu1 %v17500_v39  ;;  %v12046_v57 = vpack.c.bf16 %v12041_v53, %v12011_v28  ;;  %v12058_v27 = vsel %vm1653_vm3, %v1597_v3, %v17659_v24  ;;  %17661 = vst [vmem:[#allocation202_spill] sm:$0xff] %v12066_v36  ;;  %v12076_v24 = vpack.c.bf16 %v11073_v29, %v11036_v2  ;;  %v17736_v28 = vld [vmem:[#allocation143_spill] sm:$0xff] }
 0x1d0   : > { %v12062_v4 = vpack.c.bf16 %v11032_v0, %v12058_v27  ;;  %v12080_v3 = vpack.c.bf16 %v11086_v38, %v11047_v9  ;;  %17667 = vst [vmem:[#allocation208_spill] sm:$0xff] %v12108_v59  ;;  %v17718_v9 = vld [vmem:[#allocation119_spill] sm:$0xff] }
 0x1d1   : > { %17657 = vst [vmem:[#allocation199_spill] sm:$0xff] %v12046_v57  ;;  %17662 = vst [vmem:[#allocation203_spill] sm:$0xff] %v12076_v24 }
 0x1d2   : > { %17660 = vst [vmem:[#allocation201_spill] sm:$0xff] %v12062_v4  ;;  %17663 = vst [vmem:[#allocation204_spill] sm:$0xff] %v12080_v3 }
 0x1d5   : > { %2603 = vmatmul.mubr.bf16.gmra.mrb[4].mxu1 %v12046_v57  ;;  %v12094_v57 = vpack.c.bf16 %v11130_v15, %v11091_v41  ;;  %v17712_v41 = vld [vmem:[#allocation111_spill] sm:$0xff] }
 0x1d6   : > { %2610 = vmatprep.mubr.bf16.mxu1 %v12050_v20  ;;  %v10244_v20 = vld [vmem:[%s16780_s6 + $0x88] sm:$0xff]  }
 0x1d7   : > { %2814 = vmatpush1.bf16.msra.mxu1 %v10244_v20  ;;  %v12090_v20 = vpack.c.bf16 %v11117_v8, %v11077_v31  ;;  %17665 = vst [vmem:[#allocation206_spill] sm:$0xff] %v12094_v57 }
 0x1d8   : > { %2815 = vmatprep.subr.bf16.mxu1 %v17500_v39 }
 0x1d9   : > { %17664 = vst [vmem:[#allocation205_spill] sm:$0xff] %v12090_v20 }
 0x1dd   : > { %2611 = vmatmul.mubr.bf16.gmra.mrb[8].mxu1 %v12062_v4  ;;  %v10245_v4 = vld [vmem:[%s16780_s6 + $0x90] sm:$0xff]  }
 0x1de   : > { %2618 = vmatprep.mubr.bf16.mxu1 %v12066_v36  ;;  %2816 = vmatpush1.bf16.msra.mxu1 %v10245_v4  ;;  %v12104_v4 = vpack.c.bf16 %v11161_v17, %v11121_v10  ;;  %v17679_v36 = vld [vmem:[#allocation66_spill] sm:$0xff] }
 0x1df   : > { %2817 = vmatprep.subr.bf16.mxu1 %v17500_v39 }
 0x1e0   : > { %17666 = vst [vmem:[#allocation207_spill] sm:$0xff] %v12104_v4 }
 0x1e2   : > { %2818 = vmatpush1.bf16.msra.mxu1 %v10246_v26  ;;  %v10248_v26 = vld [vmem:[%s16780_s6 + $0xa8] sm:$0xff]  }
 0x1e3   : > { %2819 = vmatprep.subr.bf16.mxu1 %v17500_v39 }
 0x1e5   : > { %2619 = vmatmul.mubr.bf16.gmra.mrb[12].mxu1 %v12076_v24  ;;  %v17678_v24 = vld [vmem:[#allocation59_spill] sm:$0xff] }
 0x1e6   : > { %2626 = vmatprep.mubr.bf16.mxu1 %v12080_v3  ;;  %v12126_v3 = vpack.c.bf16 %v11218_v63, %v11179_v23  ;;  %v12198_v22 = vpack.c.bf16 %v17679_v36, %v17678_v24  ;;  %v17684_v24 = vld [vmem:[#allocation67_spill] sm:$0xff] }
 0x1e7   : > { %v17700_v23 = vld [vmem:[#allocation95_spill] sm:$0xff] }
 0x1e8   : > { %17669 = vst [vmem:[#allocation210_spill] sm:$0xff] %v12126_v3  ;;  %17680 = vst [vmem:[#allocation217_spill] sm:$0xff] %v12198_v22 }
 0x1ed   : > { %2627 = vmatmul.mubr.bf16.gmra.mrb[16].mxu1 %v12090_v20  ;;  %v10247_v20 = vld [vmem:[%s16780_s6 + $0xa0] sm:$0xff]  }
 0x1ee   : > { %2634 = vmatprep.mubr.bf16.mxu1 %v12094_v57  ;;  %2820 = vmatpush1.bf16.msra.mxu1 %v10247_v20  ;;  %v12121_v57 = vpack.c.bf16 %v11205_v13, %v11165_v45  ;;  %v10249_v20 = vld [vmem:[%s16780_s6 + $0xb0] sm:$0xff]   ;;  %v10264_v13 = vld [vmem:[%s16780_s6 + $0x128] sm:$0xff]  }
 0x1ef   : > { %2821 = vmatprep.subr.bf16.mxu1 %v17500_v39 }
 0x1f0   : > { %17668 = vst [vmem:[#allocation209_spill] sm:$0xff] %v12121_v57 }
 0x1f2   : > { %2822 = vmatpush1.bf16.msra.mxu1 %v10248_v26  ;;  %v10250_v26 = vld [vmem:[%s16780_s6 + $0xb8] sm:$0xff]  }
 0x1f3   : > { %2823 = vmatprep.subr.bf16.mxu1 %v17500_v39 }
 0x1f5   : > { %2635 = vmatmul.mubr.bf16.gmra.mrb[20].mxu1 %v12104_v4  ;;  %v12144_v4 = vpack.c.bf16 %v11262_v61, %v11223_v62  ;;  %v17693_v61 = vld [vmem:[#allocation80_spill] sm:$0xff]  ;;  %v17694_v62 = vld [vmem:[#allocation87_spill] sm:$0xff] }
 0x1f6   : > { %2642 = vmatprep.mubr.bf16.mxu1 %v12108_v59  ;;  %2824 = vmatpush1.bf16.msra.mxu1 %v10249_v20  ;;  %v12139_v59 = vpack.c.bf16 %v11249_v11, %v11209_v25  ;;  %v10251_v20 = vld [vmem:[%s16780_s6 + $0xc0] sm:$0xff]  }
 0x1f7   : > { %2825 = vmatprep.subr.bf16.mxu1 %v17500_v39  ;;  %17671 = vst [vmem:[#allocation212_spill] sm:$0xff] %v12144_v4  ;;  %v17788_v25 = vld [vmem:[#allocation38_spill] sm:$0xff] }
 0x1f8   : > { %17670 = vst [vmem:[#allocation211_spill] sm:$0xff] %v12139_v59 }
 0x1fa   : > { %2826 = vmatpush1.bf16.msra.mxu1 %v10250_v26  ;;  %v10252_v26 = vld [vmem:[%s16780_s6 + $0xc8] sm:$0xff]  }
 0x1fb   : > { %2827 = vmatprep.subr.bf16.mxu1 %v17500_v39 }
 0x1fd   : > { %2643 = vmatmul.mubr.bf16.gmra.mrb[24].mxu1 %v12121_v57  ;;  %v12162_v57 = vpack.c.bf16 %v11306_v12, %v11267_v54  ;;  %v17690_v12 = vld [vmem:[#allocation75_spill] sm:$0xff] }
 0x1fe   : > { %2650 = vmatprep.mubr.bf16.mxu1 %v12126_v3  ;;  %2828 = vmatpush1.bf16.msra.mxu1 %v10251_v20  ;;  %v12157_v3 = vpack.c.bf16 %v11293_v47, %v11253_v1  ;;  %v10253_v20 = vld [vmem:[%s16780_s6 + $0xd0] sm:$0xff]  }
 0x1ff   : > { %2829 = vmatprep.subr.bf16.mxu1 %v17500_v39  ;;  %17673 = vst [vmem:[#allocation214_spill] sm:$0xff] %v12162_v57 }
 0x200   : > { %17672 = vst [vmem:[#allocation213_spill] sm:$0xff] %v12157_v3 }
 0x202   : > { %2830 = vmatpush1.bf16.msra.mxu1 %v10252_v26  ;;  %v10254_v26 = vld [vmem:[%s16780_s6 + $0xd8] sm:$0xff]  }
 0x203   : > { %2831 = vmatprep.subr.bf16.mxu1 %v17500_v39 }
 0x205   : > { %2651 = vmatmul.mubr.bf16.gmra.mrb[28].mxu1 %v12139_v59  ;;  %v12180_v59 = vpack.c.bf16 %v11350_v50, %v11311_v44  ;;  %v17685_v50 = vld [vmem:[#allocation74_spill] sm:$0xff] }
 0x206   : > { %2658 = vmatprep.mubr.bf16.mxu1 %v12144_v4  ;;  %2832 = vmatpush1.bf16.msra.mxu1 %v10253_v20  ;;  %v12175_v4 = vpack.c.bf16 %v11337_v35, %v11297_v14  ;;  %v10255_v20 = vld [vmem:[%s16780_s6 + $0xe0] sm:$0xff]   ;;  %v12216_v44 = vpack.c.bf16 %v17685_v50, %v17684_v24  ;;  %v12232_v50 = vpack.c.bf16 %v17694_v62, %v17693_v61  ;;  %v17696_v24 = vld [vmem:[#allocation83_spill] sm:$0xff] }
 0x207   : > { %2833 = vmatprep.subr.bf16.mxu1 %v17500_v39  ;;  %17675 = vst [vmem:[#allocation216_spill] sm:$0xff] %v12180_v59 }
 0x208   : > { %17674 = vst [vmem:[#allocation215_spill] sm:$0xff] %v12175_v4  ;;  %17695 = vst [vmem:[#allocation80_spill] sm:$0xff] %v12232_v50 }
 0x20a   : > { %2834 = vmatpush1.bf16.msra.mxu1 %v10254_v26  ;;  %v10256_v26 = vld [vmem:[%s16780_s6 + $0xe8] sm:$0xff]  }
 0x20b   : > { %2835 = vmatprep.subr.bf16.mxu1 %v17500_v39 }
 0x20d   : > { %2659 = vmatmul.mubr.bf16.gmra.mrb[32].mxu1 %v12157_v3 }
 0x20e   : > { %2666 = vmatprep.mubr.bf16.mxu1 %v12162_v57  ;;  %2836 = vmatpush1.bf16.msra.mxu1 %v10255_v20  ;;  %v17676_v57 = vld [vmem:[#allocation63_spill] sm:$0xff]  ;;  %v10257_v20 = vld [vmem:[%s16780_s6 + $0xf0] sm:$0xff]  }
 0x20f   : > { %2837 = vmatprep.subr.bf16.mxu1 %v17500_v39  ;;  %v12193_v3 = vpack.c.bf16 %v17676_v57, %v11341_v6 }
 0x211   : > { %17677 = vst [vmem:[#allocation63_spill] sm:$0xff] %v12193_v3 }
 0x212   : > { %2838 = vmatpush1.bf16.msra.mxu1 %v10256_v26  ;;  %v10258_v26 = vld [vmem:[%s16780_s6 + $0xf8] sm:$0xff]  }
 0x213   : > { %2839 = vmatprep.subr.bf16.mxu1 %v17500_v39 }
 0x215   : > { %2667 = vmatmul.mubr.bf16.gmra.mrb[36].mxu1 %v12175_v4  ;;  %v17682_v4 = vld [vmem:[#allocation71_spill] sm:$0xff] }
 0x216   : > { %2674 = vmatprep.mubr.bf16.mxu1 %v12180_v59  ;;  %2840 = vmatpush1.bf16.msra.mxu1 %v10257_v20  ;;  %v17681_v59 = vld [vmem:[#allocation64_spill] sm:$0xff]  ;;  %17686 = vst [vmem:[#allocation71_spill] sm:$0xff] %v12216_v44 }
 0x217   : > { %2841 = vmatprep.subr.bf16.mxu1 %v17500_v39  ;;  %v12211_v36 = vpack.c.bf16 %v17682_v4, %v17681_v59  ;;  %v17687_v20 = vld [vmem:[#allocation72_spill] sm:$0xff] }
 0x219   : > { %17683 = vst [vmem:[#allocation64_spill] sm:$0xff] %v12211_v36 }
 0x21a   : > { %2842 = vmatpush1.bf16.msra.mxu1 %v10258_v26  ;;  %v17691_v26 = vld [vmem:[#allocation82_spill] sm:$0xff] }
 0x21b   : > { %3060 = vmatprep.subr.bf16.mxu1 %v17500_v39  ;;  %v12226_v54 = vpack.c.bf16 %v17691_v26, %v17690_v12  ;;  %v17702_v12 = vld [vmem:[#allocation91_spill] sm:$0xff] }
 0x21d   : > { %2675 = vmatmul.mubr.bf16.gmra.mrb[40].mxu1 %v12193_v3 }
 0x21e   : > { %2682 = vmatprep.mubr.bf16.mxu1 %v12198_v22  ;;  %v17688_v22 = vld [vmem:[#allocation79_spill] sm:$0xff] }
 0x21f   : > { %v12222_v3 = vpack.c.bf16 %v17688_v22, %v17687_v20  ;;  %17692 = vst [vmem:[#allocation79_spill] sm:$0xff] %v12226_v54 }
 0x221   : > { %17689 = vst [vmem:[#allocation72_spill] sm:$0xff] %v12222_v3 }
 0x225   : > { %2683 = vmatmul.mubr.bf16.gmra.mrb[44].mxu1 %v12211_v36  ;;  %v17697_v36 = vld [vmem:[#allocation90_spill] sm:$0xff] }
 0x226   : > { %2690 = vmatprep.mubr.bf16.mxu1 %v12216_v44  ;;  %v12236_v63 = vpack.c.bf16 %v17697_v36, %v17696_v24  ;;  %v17699_v44 = vld [vmem:[#allocation88_spill] sm:$0xff]  ;;  %v17708_v24 = vld [vmem:[#allocation99_spill] sm:$0xff] }
 0x227   : > { %v12242_v26 = vpack.c.bf16 %v17700_v23, %v17699_v44 }
 0x228   : > { %17698 = vst [vmem:[#allocation87_spill] sm:$0xff] %v12236_v63 }
 0x229   : > { %17701 = vst [vmem:[#allocation88_spill] sm:$0xff] %v12242_v26 }
 0x22d   : > { %2691 = vmatmul.mubr.bf16.gmra.mrb[48].mxu1 %v12222_v3  ;;  %v17703_v3 = vld [vmem:[#allocation98_spill] sm:$0xff] }
 0x22e   : > { %2698 = vmatprep.mubr.bf16.mxu1 %v12226_v54  ;;  %v12246_v40 = vpack.c.bf16 %v17703_v3, %v17702_v12  ;;  %v17705_v54 = vld [vmem:[#allocation96_spill] sm:$0xff]  ;;  %v17714_v12 = vld [vmem:[#allocation107_spill] sm:$0xff] }
 0x22f   : > { %v12252_v36 = vpack.c.bf16 %v17706_v21, %v17705_v54 }
 0x230   : > { %17704 = vst [vmem:[#allocation95_spill] sm:$0xff] %v12246_v40 }
 0x231   : > { %17707 = vst [vmem:[#allocation96_spill] sm:$0xff] %v12252_v36 }
 0x235   : > { %2699 = vmatmul.mubr.bf16.gmra.mrb[52].mxu1 %v12232_v50  ;;  %v17709_v50 = vld [vmem:[#allocation106_spill] sm:$0xff] }
 0x236   : > { %2706 = vmatprep.mubr.bf16.mxu1 %v12236_v63  ;;  %v12256_v15 = vpack.c.bf16 %v17709_v50, %v17708_v24  ;;  %v17711_v63 = vld [vmem:[#allocation104_spill] sm:$0xff]  ;;  %v17720_v24 = vld [vmem:[#allocation115_spill] sm:$0xff] }
 0x237   : > { %v12262_v3 = vpack.c.bf16 %v17712_v41, %v17711_v63 }
 0x238   : > { %17710 = vst [vmem:[#allocation103_spill] sm:$0xff] %v12256_v15 }
 0x239   : > { %17713 = vst [vmem:[#allocation104_spill] sm:$0xff] %v12262_v3 }
 0x23d   : > { %2707 = vmatmul.mubr.bf16.gmra.mrb[56].mxu1 %v12242_v26  ;;  %v17715_v26 = vld [vmem:[#allocation114_spill] sm:$0xff] }
 0x23e   : > { %2714 = vmatprep.mubr.bf16.mxu1 %v12246_v40  ;;  %v12266_v38 = vpack.c.bf16 %v17715_v26, %v17714_v12  ;;  %v17717_v40 = vld [vmem:[#allocation112_spill] sm:$0xff]  ;;  %v17726_v12 = vld [vmem:[#allocation123_spill] sm:$0xff] }
 0x23f   : > { %v12272_v50 = vpack.c.bf16 %v17718_v9, %v17717_v40 }
 0x240   : > { %17716 = vst [vmem:[#allocation111_spill] sm:$0xff] %v12266_v38 }
 0x241   : > { %17719 = vst [vmem:[#allocation112_spill] sm:$0xff] %v12272_v50 }
 0x245   : > { %2715 = vmatmul.mubr.bf16.gmra.mrb[60].mxu1 %v12252_v36  ;;  %v17721_v36 = vld [vmem:[#allocation122_spill] sm:$0xff] }
 0x246   : > { %2722 = vmatprep.mubr.bf16.mxu1 %v12256_v15  ;;  %v12276_v5 = vpack.c.bf16 %v17721_v36, %v17720_v24  ;;  %v17723_v15 = vld [vmem:[#allocation120_spill] sm:$0xff]  ;;  %v17732_v24 = vld [vmem:[#allocation131_spill] sm:$0xff] }
 0x247   : > { %v12282_v26 = vpack.c.bf16 %v17724_v52, %v17723_v15 }
 0x248   : > { %17722 = vst [vmem:[#allocation119_spill] sm:$0xff] %v12276_v5 }
 0x249   : > { %17725 = vst [vmem:[#allocation120_spill] sm:$0xff] %v12282_v26 }
 0x24d   : > { %2723 = vmatmul.mubr.bf16.gmra.mrb[64].mxu1 %v12262_v3  ;;  %v17727_v3 = vld [vmem:[#allocation130_spill] sm:$0xff] }
 0x24e   : > { %2730 = vmatprep.mubr.bf16.mxu1 %v12266_v38  ;;  %v12286_v55 = vpack.c.bf16 %v17727_v3, %v17726_v12  ;;  %v17729_v38 = vld [vmem:[#allocation128_spill] sm:$0xff]  ;;  %v17738_v12 = vld [vmem:[#allocation139_spill] sm:$0xff] }
 0x24f   : > { %v12292_v36 = vpack.c.bf16 %v17730_v16, %v17729_v38 }
 0x250   : > { %17728 = vst [vmem:[#allocation127_spill] sm:$0xff] %v12286_v55 }
 0x251   : > { %17731 = vst [vmem:[#allocation128_spill] sm:$0xff] %v12292_v36 }
 0x255   : > { %2731 = vmatmul.mubr.bf16.gmra.mrb[68].mxu1 %v12272_v50  ;;  %v17733_v50 = vld [vmem:[#allocation138_spill] sm:$0xff] }
 0x256   : > { %2738 = vmatprep.mubr.bf16.mxu1 %v12276_v5  ;;  %v12296_v7 = vpack.c.bf16 %v17733_v50, %v17732_v24  ;;  %v17735_v5 = vld [vmem:[#allocation136_spill] sm:$0xff]  ;;  %v17744_v24 = vld [vmem:[#allocation147_spill] sm:$0xff] }
 0x257   : > { %v12302_v3 = vpack.c.bf16 %v17736_v28, %v17735_v5  ;;  %v17748_v28 = vld [vmem:[#allocation159_spill] sm:$0xff] }
 0x258   : > { %17734 = vst [vmem:[#allocation218_spill] sm:$0xff] %v12296_v7 }
 0x259   : > { %17737 = vst [vmem:[#allocation219_spill] sm:$0xff] %v12302_v3 }
 0x25d   : > { %2739 = vmatmul.mubr.bf16.gmra.mrb[72].mxu1 %v12282_v26  ;;  %v17739_v26 = vld [vmem:[#allocation146_spill] sm:$0xff] }
 0x25e   : > { %2746 = vmatprep.mubr.bf16.mxu1 %v12286_v55  ;;  %v12306_v33 = vpack.c.bf16 %v17739_v26, %v17738_v12  ;;  %v17741_v55 = vld [vmem:[#allocation144_spill] sm:$0xff]  ;;  %v17750_v12 = vld [vmem:[#allocation155_spill] sm:$0xff] }
 0x25f   : > { %v12312_v50 = vpack.c.bf16 %v17742_v37, %v17741_v55  ;;  %v17754_v37 = vld [vmem:[#allocation167_spill] sm:$0xff] }
 0x260   : > { %17740 = vst [vmem:[#allocation220_spill] sm:$0xff] %v12306_v33 }
 0x261   : > { %17743 = vst [vmem:[#allocation221_spill] sm:$0xff] %v12312_v50 }
 0x265   : > { %2747 = vmatmul.mubr.bf16.gmra.mrb[76].mxu1 %v12292_v36  ;;  %v17745_v36 = vld [vmem:[#allocation154_spill] sm:$0xff] }
 0x266   : > { %2754 = vmatprep.mubr.bf16.mxu1 %v12296_v7  ;;  %v12316_v16 = vpack.c.bf16 %v17745_v36, %v17744_v24  ;;  %v17747_v7 = vld [vmem:[#allocation152_spill] sm:$0xff]  ;;  %v17756_v24 = vld [vmem:[#allocation163_spill] sm:$0xff] }
 0x267   : > { %v12322_v26 = vpack.c.bf16 %v17748_v28, %v17747_v7 }
 0x268   : > { %17746 = vst [vmem:[#allocation222_spill] sm:$0xff] %v12316_v16 }
 0x269   : > { %17749 = vst [vmem:[#allocation152_spill] sm:$0xff] %v12322_v26 }
 0x26d   : > { %2755 = vmatmul.mubr.bf16.gmra.mrb[80].mxu1 %v12302_v3  ;;  %v17751_v3 = vld [vmem:[#allocation162_spill] sm:$0xff] }
 0x26e   : > { %2762 = vmatprep.mubr.bf16.mxu1 %v12306_v33  ;;  %v12326_v5 = vpack.c.bf16 %v17751_v3, %v17750_v12  ;;  %v17753_v33 = vld [vmem:[#allocation160_spill] sm:$0xff] }
 0x26f   : > { %v12332_v36 = vpack.c.bf16 %v17754_v37, %v17753_v33 }
 0x270   : > { %17752 = vst [vmem:[#allocation159_spill] sm:$0xff] %v12326_v5 }
 0x271   : > { %17755 = vst [vmem:[#allocation160_spill] sm:$0xff] %v12332_v36 }
 0x275   : > { %2763 = vmatmul.mubr.bf16.gmra.mrb[84].mxu1 %v12312_v50  ;;  %v17757_v50 = vld [vmem:[#allocation170_spill] sm:$0xff] }
 0x276   : > { %2770 = vmatprep.mubr.bf16.mxu1 %v12316_v16  ;;  %v12336_v55 = vpack.c.bf16 %v17757_v50, %v17756_v24  ;;  %v17759_v16 = vld [vmem:[#allocation168_spill] sm:$0xff]  ;;  %v17873_v24 = vld [vmem:[#allocation191_spill] sm:$0xff] }
 0x277   : > { %v12342_v3 = vpack.c.bf16 %v11895_v56, %v17759_v16 }
 0x278   : > { %17758 = vst [vmem:[#allocation167_spill] sm:$0xff] %v12336_v55 }
 0x279   : > { %17760 = vst [vmem:[#allocation168_spill] sm:$0xff] %v12342_v3 }
 0x27d   : > { %2771 = vmatmul.mubr.bf16.gmra.mrb[88].mxu1 %v12322_v26  ;;  %v12346_v26 = vpack.c.bf16 %v11908_v19, %v11876_v46 }
 0x27e   : > { %2778 = vmatprep.mubr.bf16.mxu1 %v12326_v5  ;;  %v17762_v5 = vld [vmem:[#allocation175_spill] sm:$0xff] }
 0x27f   : > { %17761 = vst [vmem:[#allocation223_spill] sm:$0xff] %v12346_v26  ;;  %v12352_v50 = vpack.c.bf16 %v11929_v18, %v17762_v5 }
 0x281   : > { %17763 = vst [vmem:[#allocation175_spill] sm:$0xff] %v12352_v50 }
 0x285   : > { %2779 = vmatmul.mubr.bf16.gmra.mrb[92].mxu1 %v12332_v36  ;;  %v12356_v36 = vpack.c.bf16 %v11942_v32, %v11912_v43  ;;  %v10259_v32 = vld [vmem:[%s16780_s6 + $0x100] sm:$0xff]  }
 0x286   : > { %2786 = vmatprep.mubr.bf16.mxu1 %v12336_v55  ;;  %v17765_v55 = vld [vmem:[#allocation181_spill] sm:$0xff] }
 0x287   : > { %17764 = vst [vmem:[#allocation224_spill] sm:$0xff] %v12356_v36  ;;  %v12362_v19 = vpack.c.bf16 %v11967_v42, %v17765_v55 }
 0x289   : > { %17766 = vst [vmem:[#allocation181_spill] sm:$0xff] %v12362_v19 }
 0x28d   : > { %2787 = vmatmul.mubr.bf16.gmra.mrb[96].mxu1 %v12342_v3  ;;  %v1898_v3 = vpack.c.bf16 %v12058_v27, %v12041_v53  ;;  %v17769_v53 = vrot.slane %v11974_v60, 1 }
 0x28e   : > { %2794 = vmatprep.mubr.bf16.mxu1 %v12346_v26  ;;  %v12369_v26 = vpack.c.bf16 %v12015_v30, %v12003_v34 }
 0x290   : > { %17767 = vst [vmem:[#allocation225_spill] sm:$0xff] %v12369_v26 }
 0x295   : > { %2795 = vmatmul.mubr.bf16.gmra.mrb[100].mxu1 %v12352_v50  ;;  %v17768_v50 = vpack.c.bf16 %v11036_v2, %v11032_v0  ;;  %v17771_v0 = vpack.c.bf16 %v11077_v31, %v11073_v29  ;;  %v17772_v2 = vrot.slane %v11013_v49, 1  ;;  %v10260_v29 = vld [vmem:[%s16780_s6 + $0x108] sm:$0xff]   ;;  %v17776_v31 = vld [vmem:[#allocation20_spill] sm:$0xff] }
 0x296   : > { %2802 = vmatprep.mubr.bf16.mxu1 %v12356_v36  ;;  %v1763_v36 = vrot.slane %v11010_v48, 1 }
 0x298   : > { %v12384_v27 = vsel %vm1816_vm4, %v17769_v53, %v1763_v36 }
 0x29d   : > { %2803 = vmatmul.mubr.bf16.gmra.mrb[104].mxu1 %v12362_v19  ;;  %v17836_v19 = vld [vmem:[#allocation135_spill] sm:$0xff] }
 0x29e   : > { %2843 = vmatprep.mubr.bf16.mxu1 %v1898_v3  ;;  %v12388_v3 = vpack.c.bf16 %v12384_v27, %v12021_v58  ;;  %v17842_v58 = vld [vmem:[#allocation143_spill] sm:$0xff] }
 0x2a0   : > { %17770 = vst [vmem:[#allocation226_spill] sm:$0xff] %v12388_v3 }
 0x2a5   : > { %2844 = vmatmul.mubr.bf16.vlgmr.msra.gmra.mrb[0].mxu1 %v12369_v26  ;;  %v17775_v26 = vpack.c.bf16 %v11121_v10, %v11117_v8  ;;  %v10261_v8 = vld [vmem:[%s16780_s6 + $0x110] sm:$0xff]   ;;  %v17780_v10 = vld [vmem:[#allocation26_spill] sm:$0xff] }
 0x2a6   : > { %2851 = vmatprep.mubr.bf16.mxu1 %v17768_v50  ;;  %3061 = vmatpush1.bf16.msra.mxu1 %v10259_v32  ;;  %v12398_v50 = vsel %vm1816_vm4, %v1763_v36, %v17772_v2  ;;  %v17773_v32 = vld [vmem:[#allocation19_spill] sm:$0xff]  ;;  %v17777_v36 = vld [vmem:[#allocation25_spill] sm:$0xff]  ;;  %v17779_v2 = vpack.c.bf16 %v11165_v45, %v11161_v17  ;;  %v17784_v45 = vld [vmem:[#allocation32_spill] sm:$0xff] }
 0x2a7   : > { %3062 = vmatprep.subr.bf16.mxu1 %v17500_v39  ;;  %v12402_v53 = vpack.c.bf16 %v17773_v32, %v12398_v50  ;;  %v10262_v17 = vld [vmem:[%s16780_s6 + $0x118] sm:$0xff]  }
 0x2a9   : > { %17774 = vst [vmem:[#allocation19_spill] sm:$0xff] %v12402_v53 }
 0x2aa   : > { %3063 = vmatpush1.bf16.msra.mxu1 %v10260_v29 }
 0x2ab   : > { %3064 = vmatprep.subr.bf16.mxu1 %v17500_v39 }
 0x2ad   : > { %2852 = vmatmul.mubr.bf16.gmra.mrb[4].mxu1 %v12388_v3 }
 0x2ae   : > { %2859 = vmatprep.mubr.bf16.mxu1 %v17771_v0  ;;  %v12414_v0 = vpack.c.bf16 %v17777_v36, %v17776_v31  ;;  %3065 = vmatpush1.bf16.msra.mxu1 %v10261_v8 }
 0x2af   : > { %3066 = vmatprep.subr.bf16.mxu1 %v17500_v39 }
 0x2b0   : > { %17778 = vst [vmem:[#allocation20_spill] sm:$0xff] %v12414_v0 }
 0x2b2   : > { %3067 = vmatpush1.bf16.msra.mxu1 %v10262_v17  ;;  %v17789_v17 = vld [vmem:[#allocation43_spill] sm:$0xff] }
 0x2b3   : > { %3068 = vmatprep.subr.bf16.mxu1 %v17500_v39  ;;  %v12453_v3 = vpack.c.bf16 %v17789_v17, %v17788_v25 }
 0x2b5   : > { %2860 = vmatmul.mubr.bf16.gmra.mrb[8].mxu1 %v12402_v53  ;;  %v10263_v53 = vld [vmem:[%s16780_s6 + $0x120] sm:$0xff]  }
 0x2b6   : > { %2867 = vmatprep.mubr.bf16.mxu1 %v17775_v26  ;;  %v17781_v26 = vld [vmem:[#allocation31_spill] sm:$0xff]  ;;  %3069 = vmatpush1.bf16.msra.mxu1 %v10263_v53  ;;  %v10266_v53 = vld [vmem:[%s16780_s6 + $0x138] sm:$0xff]  }
 0x2b7   : > { %v12426_v29 = vpack.c.bf16 %v17781_v26, %v17780_v10  ;;  %3070 = vmatprep.subr.bf16.mxu1 %v17500_v39  ;;  %17790 = vst [vmem:[#allocation31_spill] sm:$0xff] %v12453_v3 }
 0x2b9   : > { %17782 = vst [vmem:[#allocation25_spill] sm:$0xff] %v12426_v29 }
 0x2ba   : > { %3071 = vmatpush1.bf16.msra.mxu1 %v10264_v13  ;;  %v17793_v13 = vld [vmem:[#allocation49_spill] sm:$0xff] }
 0x2bb   : > { %3072 = vmatprep.subr.bf16.mxu1 %v17500_v39 }
 0x2bd   : > { %2868 = vmatmul.mubr.bf16.gmra.mrb[12].mxu1 %v12414_v0 }
 0x2be   : > { %2875 = vmatprep.mubr.bf16.mxu1 %v17779_v2  ;;  %v17785_v2 = vld [vmem:[#allocation37_spill] sm:$0xff] }
 0x2bf   : > { %v12438_v8 = vpack.c.bf16 %v17785_v2, %v17784_v45 }
 0x2c1   : > { %17786 = vst [vmem:[#allocation26_spill] sm:$0xff] %v12438_v8 }
 0x2c5   : > { %2876 = vmatmul.mubr.bf16.gmra.mrb[16].mxu1 %v12426_v29  ;;  %v17816_v29 = vld [vmem:[#allocation86_spill] sm:$0xff] }
 0x2c6   : > { %2883 = vmatprep.mubr.bf16.mxu1 %v17783_v51  ;;  %v17787_v51 = vpack.c.bf16 %v11253_v1, %v11249_v11  ;;  %v10265_v11 = vld [vmem:[%s16780_s6 + $0x130] sm:$0xff]   ;;  %v17791_v1 = vpack.c.bf16 %v11297_v14, %v11293_v47  ;;  %v10267_v47 = vld [vmem:[%s16780_s6 + $0x140] sm:$0xff]   ;;  %v17795_v14 = vpack.c.bf16 %v11341_v6, %v11337_v35  ;;  %v17799_v6 = vpack.c.bf16 %v17681_v59, %v17676_v57 }
 0x2c7   : > { %3073 = vmatpush1.bf16.msra.mxu1 %v10265_v11  ;;  %v10268_v11 = vld [vmem:[%s16780_s6 + $0x148] sm:$0xff]   ;;  %v10269_v35 = vld [vmem:[%s16780_s6 + $0x150] sm:$0xff]   ;;  %v10271_v59 = vld [vmem:[%s16780_s6 + $0x160] sm:$0xff]   ;;  %v17803_v57 = vpack.c.bf16 %v17687_v20, %v17682_v4  ;;  %v17807_v20 = vpack.c.bf16 %v17693_v61, %v17688_v22  ;;  %v17811_v61 = vpack.c.bf16 %v17699_v44, %v17694_v62  ;;  %v17819_v62 = vpack.c.bf16 %v17711_v63, %v17706_v21 }
 0x2c8   : > { %3074 = vmatprep.subr.bf16.mxu1 %v17500_v39  ;;  %v10273_v4 = vld [vmem:[%s16780_s6 + $0x170] sm:$0xff]   ;;  %v17812_v22 = vld [vmem:[#allocation78_spill] sm:$0xff]  ;;  %v17827_v21 = vpack.c.bf16 %v17723_v15, %v17718_v9 }
 0x2c9   : > { %v17820_v44 = vld [vmem:[#allocation94_spill] sm:$0xff] }
 0x2ca   : > { %v17828_v63 = vld [vmem:[#allocation110_spill] sm:$0xff] }
 0x2cb   : > { %3075 = vmatpush1.bf16.msra.mxu1 %v10266_v53  ;;  %v17797_v53 = vld [vmem:[#allocation55_spill] sm:$0xff]  ;;  %v17838_v15 = vld [vmem:[#allocation126_spill] sm:$0xff] }
 0x2cc   : > { %3076 = vmatprep.subr.bf16.mxu1 %v17500_v39 }
 0x2cd   : > { %2884 = vmatmul.mubr.bf16.gmra.mrb[20].mxu1 %v12438_v8 }
 0x2ce   : > { %2891 = vmatprep.mubr.bf16.mxu1 %v17787_v51  ;;  %v17792_v51 = vld [vmem:[#allocation44_spill] sm:$0xff] }
 0x2cf   : > { %v12469_v8 = vpack.c.bf16 %v17793_v13, %v17792_v51  ;;  %3077 = vmatpush1.bf16.msra.mxu1 %v10267_v47  ;;  %v10270_v47 = vld [vmem:[%s16780_s6 + $0x158] sm:$0xff]  }
 0x2d0   : > { %3078 = vmatprep.subr.bf16.mxu1 %v17500_v39 }
 0x2d1   : > { %17794 = vst [vmem:[#allocation32_spill] sm:$0xff] %v12469_v8 }
 0x2d3   : > { %3079 = vmatpush1.bf16.msra.mxu1 %v10268_v11  ;;  %v17801_v11 = vld [vmem:[#allocation61_spill] sm:$0xff] }
 0x2d4   : > { %3080 = vmatprep.subr.bf16.mxu1 %v17500_v39 }
 0x2d5   : > { %2892 = vmatmul.mubr.bf16.gmra.mrb[24].mxu1 %v12453_v3 }
 0x2d6   : > { %2899 = vmatprep.mubr.bf16.mxu1 %v17791_v1  ;;  %v17796_v1 = vld [vmem:[#allocation50_spill] sm:$0xff] }
 0x2d7   : > { %v12485_v3 = vpack.c.bf16 %v17797_v53, %v17796_v1  ;;  %3081 = vmatpush1.bf16.msra.mxu1 %v10269_v35  ;;  %v10272_v35 = vld [vmem:[%s16780_s6 + $0x168] sm:$0xff]  }
 0x2d8   : > { %3082 = vmatprep.subr.bf16.mxu1 %v17500_v39 }
 0x2d9   : > { %17798 = vst [vmem:[#allocation37_spill] sm:$0xff] %v12485_v3 }
 0x2db   : > { %3083 = vmatpush1.bf16.msra.mxu1 %v10270_v47  ;;  %v17805_v47 = vld [vmem:[#allocation69_spill] sm:$0xff] }
 0x2dc   : > { %3084 = vmatprep.subr.bf16.mxu1 %v17500_v39 }
 0x2dd   : > { %2900 = vmatmul.mubr.bf16.gmra.mrb[28].mxu1 %v12469_v8 }
 0x2de   : > { %2907 = vmatprep.mubr.bf16.mxu1 %v17795_v14  ;;  %v17800_v14 = vld [vmem:[#allocation56_spill] sm:$0xff] }
 0x2df   : > { %v12501_v8 = vpack.c.bf16 %v17801_v11, %v17800_v14  ;;  %3085 = vmatpush1.bf16.msra.mxu1 %v10271_v59  ;;  %v10274_v59 = vld [vmem:[%s16780_s6 + $0x178] sm:$0xff]  }
 0x2e0   : > { %3086 = vmatprep.subr.bf16.mxu1 %v17500_v39 }
 0x2e1   : > { %17802 = vst [vmem:[#allocation38_spill] sm:$0xff] %v12501_v8 }
 0x2e3   : > { %3087 = vmatpush1.bf16.msra.mxu1 %v10272_v35  ;;  %v17809_v35 = vld [vmem:[#allocation77_spill] sm:$0xff] }
 0x2e4   : > { %3088 = vmatprep.subr.bf16.mxu1 %v17500_v39 }
 0x2e5   : > { %2908 = vmatmul.mubr.bf16.gmra.mrb[32].mxu1 %v12485_v3 }
 0x2e6   : > { %2915 = vmatprep.mubr.bf16.mxu1 %v17799_v6  ;;  %v17804_v6 = vld [vmem:[#allocation62_spill] sm:$0xff] }
 0x2e7   : > { %v12517_v3 = vpack.c.bf16 %v17805_v47, %v17804_v6  ;;  %3089 = vmatpush1.bf16.msra.mxu1 %v10273_v4  ;;  %v17813_v4 = vld [vmem:[#allocation85_spill] sm:$0xff] }
 0x2e8   : > { %3090 = vmatprep.subr.bf16.mxu1 %v17500_v39 }
 0x2e9   : > { %17806 = vst [vmem:[#allocation43_spill] sm:$0xff] %v12517_v3 }
 0x2eb   : > { %3091 = vmatpush1.bf16.msra.mxu1 %v10274_v59  ;;  %v17817_v59 = vld [vmem:[#allocation93_spill] sm:$0xff] }
 0x2ec   : > { %3309 = vmatprep.subr.bf16.mxu1 %v17500_v39  ;;  %v12550_v0 = vpack.c.bf16 %v17817_v59, %v17816_v29 }
 0x2ed   : > { %2916 = vmatmul.mubr.bf16.gmra.mrb[36].mxu1 %v12501_v8 }
 0x2ee   : > { %2923 = vmatprep.mubr.bf16.mxu1 %v17803_v57  ;;  %v17808_v57 = vld [vmem:[#allocation70_spill] sm:$0xff]  ;;  %17818 = vst [vmem:[#allocation50_spill] sm:$0xff] %v12550_v0 }
 0x2ef   : > { %v12533_v8 = vpack.c.bf16 %v17809_v35, %v17808_v57 }
 0x2f1   : > { %17810 = vst [vmem:[#allocation44_spill] sm:$0xff] %v12533_v8 }
 0x2f5   : > { %2924 = vmatmul.mubr.bf16.gmra.mrb[40].mxu1 %v12517_v3  ;;  %v17815_v3 = vpack.c.bf16 %v17705_v54, %v17700_v23  ;;  %v17823_v23 = vpack.c.bf16 %v17717_v40, %v17712_v41  ;;  %v17824_v54 = vld [vmem:[#allocation102_spill] sm:$0xff]  ;;  %v17831_v41 = vpack.c.bf16 %v17729_v38, %v17724_v52 }
 0x2f6   : > { %2931 = vmatprep.mubr.bf16.mxu1 %v17807_v20  ;;  %v12542_v20 = vpack.c.bf16 %v17813_v4, %v17812_v22  ;;  %v17832_v40 = vld [vmem:[#allocation118_spill] sm:$0xff] }
 0x2f7   : > { %v17844_v38 = vld [vmem:[#allocation134_spill] sm:$0xff] }
 0x2f8   : > { %17814 = vst [vmem:[#allocation49_spill] sm:$0xff] %v12542_v20 }
 0x2fd   : > { %2932 = vmatmul.mubr.bf16.gmra.mrb[44].mxu1 %v12533_v8 }
 0x2fe   : > { %2939 = vmatprep.mubr.bf16.mxu1 %v17811_v61  ;;  %v17821_v61 = vld [vmem:[#allocation101_spill] sm:$0xff] }
 0x2ff   : > { %v12558_v8 = vpack.c.bf16 %v17821_v61, %v17820_v44 }
 0x301   : > { %17822 = vst [vmem:[#allocation55_spill] sm:$0xff] %v12558_v8 }
 0x305   : > { %2940 = vmatmul.mubr.bf16.gmra.mrb[48].mxu1 %v12542_v20 }
 0x306   : > { %2947 = vmatprep.mubr.bf16.mxu1 %v17815_v3  ;;  %v17825_v3 = vld [vmem:[#allocation109_spill] sm:$0xff] }
 0x307   : > { %v12566_v20 = vpack.c.bf16 %v17825_v3, %v17824_v54 }
 0x309   : > { %17826 = vst [vmem:[#allocation56_spill] sm:$0xff] %v12566_v20 }
 0x30d   : > { %2948 = vmatmul.mubr.bf16.gmra.mrb[52].mxu1 %v12550_v0 }
 0x30e   : > { %2955 = vmatprep.mubr.bf16.mxu1 %v17819_v62  ;;  %v17829_v62 = vld [vmem:[#allocation117_spill] sm:$0xff] }
 0x30f   : > { %v12574_v0 = vpack.c.bf16 %v17829_v62, %v17828_v63 }
 0x311   : > { %17830 = vst [vmem:[#allocation61_spill] sm:$0xff] %v12574_v0 }
 0x315   : > { %2956 = vmatmul.mubr.bf16.gmra.mrb[56].mxu1 %v12558_v8 }
 0x316   : > { %2963 = vmatprep.mubr.bf16.mxu1 %v17823_v23  ;;  %v17833_v23 = vld [vmem:[#allocation125_spill] sm:$0xff] }
 0x317   : > { %v12582_v8 = vpack.c.bf16 %v17833_v23, %v17832_v40 }
 0x319   : > { %17834 = vst [vmem:[#allocation62_spill] sm:$0xff] %v12582_v8 }
 0x31d   : > { %2964 = vmatmul.mubr.bf16.gmra.mrb[60].mxu1 %v12566_v20  ;;  %v17835_v20 = vld [vmem:[#allocation136_spill] sm:$0xff] }
 0x31e   : > { %2971 = vmatprep.mubr.bf16.mxu1 %v17827_v21  ;;  %v17837_v9 = vpack.c.bf16 %v17835_v20, %v17836_v19  ;;  %v17839_v21 = vld [vmem:[#allocation133_spill] sm:$0xff]  ;;  %v17849_v20 = vld [vmem:[#allocation142_spill] sm:$0xff] }
 0x31f   : > { %v12590_v30 = vpack.c.bf16 %v17839_v21, %v17838_v15 }
 0x321   : > { %17840 = vst [vmem:[#allocation69_spill] sm:$0xff] %v12590_v30 }
 0x325   : > { %2972 = vmatmul.mubr.bf16.gmra.mrb[64].mxu1 %v12574_v0  ;;  %v17841_v0 = vld [vmem:[#allocation144_spill] sm:$0xff] }
 0x326   : > { %2979 = vmatprep.mubr.bf16.mxu1 %v17831_v41  ;;  %v17843_v52 = vpack.c.bf16 %v17841_v0, %v17842_v58  ;;  %v17845_v41 = vld [vmem:[#allocation141_spill] sm:$0xff]  ;;  %v17852_v58 = vpack.c.bf16 %v17753_v33, %v17748_v28  ;;  %v17853_v0 = vld [vmem:[#allocation150_spill] sm:$0xff]  ;;  %v17860_v33 = vpack.c.bf16 %v17762_v5, %v11895_v56  ;;  %v17870_v56 = vld [vmem:[#allocation180_spill] sm:$0xff] }
 0x327   : > { %v12598_v34 = vpack.c.bf16 %v17845_v41, %v17844_v38  ;;  %v17861_v28 = vld [vmem:[#allocation166_spill] sm:$0xff] }
 0x329   : > { %17846 = vst [vmem:[#allocation70_spill] sm:$0xff] %v12598_v34 }
 0x32d   : > { %2980 = vmatmul.mubr.bf16.gmra.mrb[68].mxu1 %v12582_v8  ;;  %v17847_v8 = vld [vmem:[#allocation151_spill] sm:$0xff] }
 0x32e   : > { %2987 = vmatprep.mubr.bf16.mxu1 %v17837_v9  ;;  %v17848_v19 = vpack.c.bf16 %v17747_v7, %v17847_v8  ;;  %v17850_v9 = vld [vmem:[#allocation149_spill] sm:$0xff]  ;;  %v17856_v7 = vpack.c.bf16 %v17759_v16, %v17754_v37  ;;  %v17857_v8 = vld [vmem:[#allocation158_spill] sm:$0xff]  ;;  %v17864_v16 = vpack.c.bf16 %v17765_v55, %v11929_v18 }
 0x32f   : > { %v12606_v43 = vpack.c.bf16 %v17850_v9, %v17849_v20  ;;  %v17865_v37 = vld [vmem:[#allocation174_spill] sm:$0xff]  ;;  %v17875_v55 = vld [vmem:[#allocation185_spill] sm:$0xff] }
 0x331   : > { %17851 = vst [vmem:[#allocation77_spill] sm:$0xff] %v12606_v43 }
 0x335   : > { %2988 = vmatmul.mubr.bf16.gmra.mrb[72].mxu1 %v12590_v30 }
 0x336   : > { %2995 = vmatprep.mubr.bf16.mxu1 %v17843_v52  ;;  %v17854_v52 = vld [vmem:[#allocation157_spill] sm:$0xff] }
 0x337   : > { %v12614_v30 = vpack.c.bf16 %v17854_v52, %v17853_v0 }
 0x339   : > { %17855 = vst [vmem:[#allocation78_spill] sm:$0xff] %v12614_v30 }
 0x33d   : > { %2996 = vmatmul.mubr.bf16.gmra.mrb[76].mxu1 %v12598_v34 }
 0x33e   : > { %3003 = vmatprep.mubr.bf16.mxu1 %v17848_v19  ;;  %v17858_v19 = vld [vmem:[#allocation165_spill] sm:$0xff] }
 0x33f   : > { %v12622_v34 = vpack.c.bf16 %v17858_v19, %v17857_v8 }
 0x341   : > { %17859 = vst [vmem:[#allocation85_spill] sm:$0xff] %v12622_v34 }
 0x345   : > { %3004 = vmatmul.mubr.bf16.gmra.mrb[80].mxu1 %v12606_v43 }
 0x346   : > { %3011 = vmatprep.mubr.bf16.mxu1 %v17852_v58  ;;  %v17862_v58 = vld [vmem:[#allocation173_spill] sm:$0xff] }
 0x347   : > { %v12630_v43 = vpack.c.bf16 %v17862_v58, %v17861_v28 }
 0x349   : > { %17863 = vst [vmem:[#allocation86_spill] sm:$0xff] %v12630_v43 }
 0x34d   : > { %3012 = vmatmul.mubr.bf16.gmra.mrb[84].mxu1 %v12614_v30 }
 0x34e   : > { %3019 = vmatprep.mubr.bf16.mxu1 %v17856_v7  ;;  %v17866_v7 = vld [vmem:[#allocation179_spill] sm:$0xff] }
 0x34f   : > { %v12638_v30 = vpack.c.bf16 %v17866_v7, %v17865_v37 }
 0x351   : > { %17867 = vst [vmem:[#allocation93_spill] sm:$0xff] %v12638_v30 }
 0x355   : > { %3020 = vmatmul.mubr.bf16.gmra.mrb[88].mxu1 %v12622_v34  ;;  %v17868_v34 = vld [vmem:[#allocation186_spill] sm:$0xff] }
 0x356   : > { %3027 = vmatprep.mubr.bf16.mxu1 %v17860_v33  ;;  %v17869_v5 = vpack.c.bf16 %v17868_v34, %v11967_v42  ;;  %v17871_v33 = vld [vmem:[#allocation184_spill] sm:$0xff]  ;;  %v1925_v34 = vpack.c.bf16 %v11010_v48, %v11974_v60  ;;  %v17877_v42 = vpack.c.bf16 %v17776_v31, %v17773_v32  ;;  %v17882_v32 = vpack.c.bf16 %v17784_v45, %v17781_v26  ;;  %v10276_v31 = vld [vmem:[%s16780_s6 + $0x188] sm:$0xff]   ;;  %v17887_v45 = vld [vmem:[#allocation29_spill] sm:$0xff] }
 0x357   : > { %v12646_v46 = vpack.c.bf16 %v17871_v33, %v17870_v56  ;;  %v17886_v26 = vld [vmem:[#allocation28_spill] sm:$0xff] }
 0x35d   : > { %3028 = vmatmul.mubr.bf16.gmra.mrb[92].mxu1 %v12630_v43  ;;  %v17872_v43 = vld [vmem:[#allocation195_spill] sm:$0xff] }
 0x35e   : > { %3035 = vmatprep.mubr.bf16.mxu1 %v17864_v16  ;;  %v17874_v18 = vpack.c.bf16 %v17872_v43, %v17873_v24  ;;  %v17876_v16 = vld [vmem:[#allocation198_spill] sm:$0xff]  ;;  %v17878_v24 = vld [vmem:[#allocation13_spill] sm:$0xff] }
 0x35f   : > { %v12654_v7 = vpack.c.bf16 %v17876_v16, %v17875_v55  ;;  %v10275_v43 = vld [vmem:[%s16780_s6 + $0x180] sm:$0xff]  }
 0x365   : > { %3036 = vmatmul.mubr.bf16.gmra.mrb[96].mxu1 %v12638_v30  ;;  %v1952_v30 = vpack.c.bf16 %v12398_v50, %v12384_v27  ;;  %v1926_v27 = vpack.c.bf16 %v17878_v24, %v11013_v49  ;;  %v17880_v50 = vld [vmem:[#allocation16_spill] sm:$0xff] }
 0x366   : > { %3043 = vmatprep.mubr.bf16.mxu1 %v17869_v5  ;;  %v17881_v5 = vld [vmem:[#allocation17_spill] sm:$0xff] }
 0x36d   : > { %3044 = vmatmul.mubr.bf16.gmra.mrb[100].mxu1 %v12646_v46 }
 0x36e   : > { %3051 = vmatprep.mubr.bf16.mxu1 %v17874_v18  ;;  %v1927_v18 = vpack.c.bf16 %v17881_v5, %v17880_v50 }
 0x375   : > { %3052 = vmatmul.mubr.bf16.gmra.mrb[104].mxu1 %v12654_v7 }
 0x376   : > { %3092 = vmatprep.mubr.bf16.mxu1 %v1952_v30  ;;  %v17879_v30 = vpack.c.bf16 %v17780_v10, %v17777_v36  ;;  %v17885_v36 = vpack.c.bf16 %v17788_v25, %v17785_v2  ;;  %v10277_v10 = vld [vmem:[%s16780_s6 + $0x190] sm:$0xff]   ;;  %v10278_v2 = vld [vmem:[%s16780_s6 + $0x198] sm:$0xff]   ;;  %v17889_v25 = vld [vmem:[#allocation34_spill] sm:$0xff] }
 0x37d   : > { %3093 = vmatmul.mubr.bf16.vlgmr.msra.gmra.mrb[0].mxu1 %v1925_v34  ;;  %v17883_v34 = vld [vmem:[#allocation22_spill] sm:$0xff] }
 0x37e   : > { %3100 = vmatprep.mubr.bf16.mxu1 %v17877_v42  ;;  %3310 = vmatpush1.bf16.msra.mxu1 %v10275_v43  ;;  %v17884_v42 = vld [vmem:[#allocation23_spill] sm:$0xff] }
 0x37f   : > { %3311 = vmatprep.subr.bf16.mxu1 %v17500_v39  ;;  %v1928_v43 = vpack.c.bf16 %v17884_v42, %v17883_v34  ;;  %v10304_v42 = vld [vmem:[%s16782_s8 + $0x28] sm:$0xff]  }
 0x382   : > { %3312 = vmatpush1.bf16.msra.mxu1 %v10276_v31  ;;  %v17891_v31 = vpack.c.bf16 %v17796_v1, %v17793_v13  ;;  %v17894_v13 = vpack.c.bf16 %v17800_v14, %v17797_v53  ;;  %v10281_v1 = vld [vmem:[%s16780_s6 + $0x1b0] sm:$0xff]   ;;  %v17897_v53 = vpack.c.bf16 %v17804_v6, %v17801_v11  ;;  %v10283_v14 = vld [vmem:[%s16780_s6 + $0x1c0] sm:$0xff]   ;;  %v17900_v11 = vpack.c.bf16 %v17808_v57, %v17805_v47 }
 0x383   : > { %3313 = vmatprep.subr.bf16.mxu1 %v17500_v39  ;;  %v10285_v6 = vld [vmem:[%s16780_s6 + $0x1d0] sm:$0xff]   ;;  %v17903_v47 = vpack.c.bf16 %v17812_v22, %v17809_v35  ;;  %v10287_v57 = vld [vmem:[%s16780_s6 + $0x1e0] sm:$0xff]   ;;  %v17906_v22 = vpack.c.bf16 %v17816_v29, %v17813_v4  ;;  %v17912_v4 = vld [vmem:[#allocation83_spill] sm:$0xff] }
 0x384   : > { %v10289_v35 = vld [vmem:[%s16780_s6 + $0x1f0] sm:$0xff]   ;;  %v17911_v29 = vld [vmem:[#allocation82_spill] sm:$0xff] }
 0x385   : > { %3101 = vmatmul.mubr.bf16.gmra.mrb[4].mxu1 %v1926_v27  ;;  %v1929_v27 = vpack.c.bf16 %v17887_v45, %v17886_v26 }
 0x386   : > { %3108 = vmatprep.mubr.bf16.mxu1 %v17879_v30  ;;  %3314 = vmatpush1.bf16.msra.mxu1 %v10277_v10  ;;  %v17888_v30 = vpack.c.bf16 %v17792_v51, %v17789_v17  ;;  %v10279_v17 = vld [vmem:[%s16780_s6 + $0x1a0] sm:$0xff]   ;;  %v10280_v51 = vld [vmem:[%s16780_s6 + $0x1a8] sm:$0xff]  }
 0x387   : > { %3315 = vmatprep.subr.bf16.mxu1 %v17500_v39 }
 0x38a   : > { %3316 = vmatpush1.bf16.msra.mxu1 %v10278_v2  ;;  %v17896_v2 = vld [vmem:[#allocation47_spill] sm:$0xff] }
 0x38b   : > { %3317 = vmatprep.subr.bf16.mxu1 %v17500_v39 }
 0x38d   : > { %3109 = vmatmul.mubr.bf16.gmra.mrb[8].mxu1 %v1927_v18  ;;  %v17890_v18 = vld [vmem:[#allocation35_spill] sm:$0xff] }
 0x38e   : > { %3116 = vmatprep.mubr.bf16.mxu1 %v17882_v32  ;;  %v1930_v32 = vpack.c.bf16 %v17890_v18, %v17889_v25  ;;  %3318 = vmatpush1.bf16.msra.mxu1 %v10279_v17  ;;  %v17898_v17 = vld [vmem:[#allocation52_spill] sm:$0xff] }
 0x38f   : > { %3319 = vmatprep.subr.bf16.mxu1 %v17500_v39 }
 0x392   : > { %3320 = vmatpush1.bf16.msra.mxu1 %v10280_v51  ;;  %v17899_v51 = vld [vmem:[#allocation53_spill] sm:$0xff] }
 0x393   : > { %3321 = vmatprep.subr.bf16.mxu1 %v17500_v39 }
 0x395   : > { %3117 = vmatmul.mubr.bf16.gmra.mrb[12].mxu1 %v1928_v43  ;;  %v17892_v43 = vld [vmem:[#allocation40_spill] sm:$0xff] }
 0x396   : > { %3124 = vmatprep.mubr.bf16.mxu1 %v17885_v36  ;;  %v17893_v36 = vld [vmem:[#allocation41_spill] sm:$0xff]  ;;  %3322 = vmatpush1.bf16.msra.mxu1 %v10281_v1  ;;  %v17901_v1 = vld [vmem:[#allocation58_spill] sm:$0xff] }
 0x397   : > { %v1931_v10 = vpack.c.bf16 %v17893_v36, %v17892_v43  ;;  %3323 = vmatprep.subr.bf16.mxu1 %v17500_v39 }
 0x39d   : > { %3125 = vmatmul.mubr.bf16.gmra.mrb[16].mxu1 %v1929_v27  ;;  %v10282_v27 = vld [vmem:[%s16780_s6 + $0x1b8] sm:$0xff]  }
 0x39e   : > { %3132 = vmatprep.mubr.bf16.mxu1 %v17888_v30  ;;  %v17895_v30 = vld [vmem:[#allocation46_spill] sm:$0xff]  ;;  %3324 = vmatpush1.bf16.msra.mxu1 %v10282_v27  ;;  %v17902_v27 = vld [vmem:[#allocation59_spill] sm:$0xff] }
 0x39f   : > { %3325 = vmatprep.subr.bf16.mxu1 %v17500_v39 }
 0x3a2   : > { %3326 = vmatpush1.bf16.msra.mxu1 %v10283_v14  ;;  %v17904_v14 = vld [vmem:[#allocation66_spill] sm:$0xff] }
 0x3a3   : > { %3327 = vmatprep.subr.bf16.mxu1 %v17500_v39 }
 0x3a5   : > { %3133 = vmatmul.mubr.bf16.gmra.mrb[20].mxu1 %v1930_v32  ;;  %v1932_v32 = vpack.c.bf16 %v17896_v2, %v17895_v30 }
 0x3a6   : > { %3140 = vmatprep.mubr.bf16.mxu1 %v17891_v31  ;;  %v10284_v31 = vld [vmem:[%s16780_s6 + $0x1c8] sm:$0xff]  }
 0x3a7   : > { %3328 = vmatpush1.bf16.msra.mxu1 %v10284_v31  ;;  %v17905_v31 = vld [vmem:[#allocation67_spill] sm:$0xff] }
 0x3a8   : > { %3329 = vmatprep.subr.bf16.mxu1 %v17500_v39 }
 0x3ab   : > { %3330 = vmatpush1.bf16.msra.mxu1 %v10285_v6  ;;  %v17907_v6 = vld [vmem:[#allocation74_spill] sm:$0xff] }
 0x3ac   : > { %3331 = vmatprep.subr.bf16.mxu1 %v17500_v39 }
 0x3ad   : > { %3141 = vmatmul.mubr.bf16.gmra.mrb[24].mxu1 %v1931_v10  ;;  %v1933_v10 = vpack.c.bf16 %v17899_v51, %v17898_v17  ;;  %v10302_v17 = vld [vmem:[%s16782_s8 + $0x18] sm:$0xff]  }
 0x3ae   : > { %3148 = vmatprep.mubr.bf16.mxu1 %v17894_v13  ;;  %v10286_v13 = vld [vmem:[%s16780_s6 + $0x1d8] sm:$0xff]  }
 0x3af   : > { %3332 = vmatpush1.bf16.msra.mxu1 %v10286_v13  ;;  %v17908_v13 = vld [vmem:[#allocation75_spill] sm:$0xff] }
 0x3b0   : > { %3333 = vmatprep.subr.bf16.mxu1 %v17500_v39 }
 0x3b3   : > { %3334 = vmatpush1.bf16.msra.mxu1 %v10287_v57  ;;  %v17910_v57 = vpack.c.bf16 %v17820_v44, %v17817_v59  ;;  %v17919_v44 = vpack.c.bf16 %v17832_v40, %v17829_v62  ;;  %v17928_v40 = vpack.c.bf16 %v17849_v20, %v17845_v41  ;;  %v17937_v20 = vpack.c.bf16 %v17861_v28, %v17858_v19 }
 0x3b4   : > { %3335 = vmatprep.subr.bf16.mxu1 %v17500_v39  ;;  %v17946_v28 = vpack.c.bf16 %v17875_v55, %v17871_v33  ;;  %v17958_v55 = vld [vmem:[#allocation202_spill] sm:$0xff] }
 0x3b5   : > { %3149 = vmatmul.mubr.bf16.gmra.mrb[28].mxu1 %v1932_v32  ;;  %v1934_v32 = vpack.c.bf16 %v17902_v27, %v17901_v1 }
 0x3b6   : > { %3156 = vmatprep.mubr.bf16.mxu1 %v17897_v53  ;;  %v10288_v53 = vld [vmem:[%s16780_s6 + $0x1e8] sm:$0xff]  }
 0x3b7   : > { %3336 = vmatpush1.bf16.msra.mxu1 %v10288_v53  ;;  %v1937_v53 = vpack.c.bf16 %v17912_v4, %v17911_v29 }
 0x3b8   : > { %3337 = vmatprep.subr.bf16.mxu1 %v17500_v39 }
 0x3bb   : > { %3338 = vmatpush1.bf16.msra.mxu1 %v10289_v35  ;;  %v17914_v35 = vld [vmem:[#allocation90_spill] sm:$0xff] }
 0x3bc   : > { %3339 = vmatprep.subr.bf16.mxu1 %v17500_v39 }
 0x3bd   : > { %3157 = vmatmul.mubr.bf16.gmra.mrb[32].mxu1 %v1933_v10  ;;  %v1935_v10 = vpack.c.bf16 %v17905_v31, %v17904_v14 }
 0x3be   : > { %3164 = vmatprep.mubr.bf16.mxu1 %v17900_v11  ;;  %v10290_v11 = vld [vmem:[%s16780_s6 + $0x1f8] sm:$0xff]  }
 0x3bf   : > { %3340 = vmatpush1.bf16.msra.mxu1 %v10290_v11  ;;  %v17916_v11 = vpack.c.bf16 %v17828_v63, %v17825_v3  ;;  %v17925_v63 = vpack.c.bf16 %v17844_v38, %v17839_v21  ;;  %v17934_v38 = vpack.c.bf16 %v17857_v8, %v17854_v52  ;;  %v17942_v8 = vld [vmem:[#allocation179_spill] sm:$0xff] }
 0x3c5   : > { %3165 = vmatmul.mubr.bf16.gmra.mrb[36].mxu1 %v1934_v32  ;;  %v1936_v32 = vpack.c.bf16 %v17908_v13, %v17907_v6  ;;  %v17918_v13 = vld [vmem:[#allocation99_spill] sm:$0xff] }
 0x3c6   : > { %3172 = vmatprep.mubr.bf16.mxu1 %v17903_v47  ;;  %v17909_v47 = vmov 0.0  }
 0x3c7   : > { %9436 = vmatprep.subr.bf16.mxu1 %v17909_v47 }
 0x3cd   : > { %3173 = vmatmul.mubr.bf16.gmra.mrb[40].mxu1 %v1935_v10  ;;  %v17913_v10 = vpack.c.bf16 %v17824_v54, %v17821_v61  ;;  %v17922_v54 = vpack.c.bf16 %v17838_v15, %v17833_v23  ;;  %v17931_v15 = vpack.c.bf16 %v17853_v0, %v17850_v9  ;;  %v17939_v0 = vpack.c.bf16 %v17865_v37, %v17862_v58  ;;  %v17949_v37 = vld [vmem:[#allocation193_spill] sm:$0xff] }
 0x3ce   : > { %3180 = vmatprep.mubr.bf16.mxu1 %v17906_v22  ;;  %v17915_v22 = vld [vmem:[#allocation91_spill] sm:$0xff] }
 0x3cf   : > { %v1938_v31 = vpack.c.bf16 %v17915_v22, %v17914_v35 }
 0x3d5   : > { %3181 = vmatmul.mubr.bf16.gmra.mrb[44].mxu1 %v1936_v32  ;;  %v17917_v32 = vld [vmem:[#allocation98_spill] sm:$0xff] }
 0x3d6   : > { %3188 = vmatprep.mubr.bf16.mxu1 %v17910_v57  ;;  %v1939_v59 = vpack.c.bf16 %v17918_v13, %v17917_v32  ;;  %v17920_v57 = vld [vmem:[#allocation106_spill] sm:$0xff] }
 0x3dd   : > { %3189 = vmatmul.mubr.bf16.gmra.mrb[48].mxu1 %v1937_v53  ;;  %v17921_v53 = vld [vmem:[#allocation107_spill] sm:$0xff] }
 0x3de   : > { %3196 = vmatprep.mubr.bf16.mxu1 %v17913_v10  ;;  %v1940_v61 = vpack.c.bf16 %v17921_v53, %v17920_v57  ;;  %v17924_v10 = vld [vmem:[#allocation115_spill] sm:$0xff] }
 0x3e5   : > { %3197 = vmatmul.mubr.bf16.gmra.mrb[52].mxu1 %v1938_v31  ;;  %v17923_v31 = vld [vmem:[#allocation114_spill] sm:$0xff] }
 0x3e6   : > { %3204 = vmatprep.mubr.bf16.mxu1 %v17916_v11  ;;  %v1941_v3 = vpack.c.bf16 %v17924_v10, %v17923_v31  ;;  %v17926_v11 = vld [vmem:[#allocation122_spill] sm:$0xff]  ;;  %v10300_v10 = vld [vmem:[%s16782_s8 + $0x8] sm:$0xff]  }
 0x3ed   : > { %3205 = vmatmul.mubr.bf16.gmra.mrb[56].mxu1 %v1939_v59  ;;  %v17927_v59 = vld [vmem:[#allocation123_spill] sm:$0xff] }
 0x3ee   : > { %3212 = vmatprep.mubr.bf16.mxu1 %v17919_v44  ;;  %v1942_v62 = vpack.c.bf16 %v17927_v59, %v17926_v11  ;;  %v17929_v44 = vld [vmem:[#allocation130_spill] sm:$0xff]  ;;  %v18062_v11 = vld [vmem:[#allocation21_spill] sm:$0xff] }
 0x3f5   : > { %3213 = vmatmul.mubr.bf16.gmra.mrb[60].mxu1 %v1940_v61  ;;  %v17930_v61 = vld [vmem:[#allocation131_spill] sm:$0xff] }
 0x3f6   : > { %3220 = vmatprep.mubr.bf16.mxu1 %v17922_v54  ;;  %v1943_v23 = vpack.c.bf16 %v17930_v61, %v17929_v44  ;;  %v17932_v54 = vld [vmem:[#allocation138_spill] sm:$0xff] }
 0x3fd   : > { %3221 = vmatmul.mubr.bf16.gmra.mrb[64].mxu1 %v1941_v3  ;;  %v17933_v3 = vld [vmem:[#allocation139_spill] sm:$0xff] }
 0x3fe   : > { %3228 = vmatprep.mubr.bf16.mxu1 %v17925_v63  ;;  %v1944_v21 = vpack.c.bf16 %v17933_v3, %v17932_v54  ;;  %v17935_v63 = vld [vmem:[#allocation146_spill] sm:$0xff] }
 0x405   : > { %3229 = vmatmul.mubr.bf16.gmra.mrb[68].mxu1 %v1942_v62  ;;  %v17936_v62 = vld [vmem:[#allocation147_spill] sm:$0xff] }
 0x406   : > { %3236 = vmatprep.mubr.bf16.mxu1 %v17928_v40  ;;  %v1945_v41 = vpack.c.bf16 %v17936_v62, %v17935_v63  ;;  %v17938_v40 = vld [vmem:[#allocation154_spill] sm:$0xff] }
 0x407   : > { %v1946_v9 = vpack.c.bf16 %v17750_v12, %v17938_v40 }
 0x40d   : > { %3237 = vmatmul.mubr.bf16.gmra.mrb[72].mxu1 %v1943_v23  ;;  %v17940_v23 = vld [vmem:[#allocation162_spill] sm:$0xff] }
 0x40e   : > { %3244 = vmatprep.mubr.bf16.mxu1 %v17931_v15  ;;  %v17941_v15 = vld [vmem:[#allocation163_spill] sm:$0xff] }
 0x40f   : > { %v1947_v52 = vpack.c.bf16 %v17941_v15, %v17940_v23  ;;  %v17952_v15 = vld [vmem:[#allocation183_spill] sm:$0xff] }
 0x415   : > { %3245 = vmatmul.mubr.bf16.gmra.mrb[76].mxu1 %v1944_v21  ;;  %v17943_v21 = vpack.c.bf16 %v17870_v56, %v17942_v8  ;;  %v17953_v8 = vld [vmem:[#allocation197_spill] sm:$0xff] }
 0x416   : > { %3252 = vmatprep.mubr.bf16.mxu1 %v17934_v38  ;;  %v17944_v38 = vld [vmem:[#allocation170_spill] sm:$0xff] }
 0x41d   : > { %3253 = vmatmul.mubr.bf16.gmra.mrb[80].mxu1 %v1945_v41  ;;  %v17945_v41 = vld [vmem:[#allocation171_spill] sm:$0xff] }
 0x41e   : > { %3260 = vmatprep.mubr.bf16.mxu1 %v17937_v20  ;;  %v1948_v19 = vpack.c.bf16 %v17945_v41, %v17944_v38  ;;  %v17947_v20 = vld [vmem:[#allocation177_spill] sm:$0xff] }
 0x41f   : > { %v17957_v38 = vld [vmem:[#allocation189_spill] sm:$0xff] }
 0x425   : > { %3261 = vmatmul.mubr.bf16.gmra.mrb[84].mxu1 %v1946_v9  ;;  %v17948_v9 = vld [vmem:[#allocation178_spill] sm:$0xff] }
 0x426   : > { %3268 = vmatprep.mubr.bf16.mxu1 %v17939_v0  ;;  %v1949_v58 = vpack.c.bf16 %v17948_v9, %v17947_v20  ;;  %v17950_v0 = vpack.c.bf16 %v17949_v37, %v17876_v16  ;;  %v10291_v16 = vld [vmem:[%s16780_s6 + $0x200] sm:$0xff]   ;;  %v17961_v37 = vld [vmem:[#allocation205_spill] sm:$0xff] }
 0x42d   : > { %3269 = vmatmul.mubr.bf16.gmra.mrb[88].mxu1 %v1947_v52  ;;  %v17951_v52 = vld [vmem:[#allocation182_spill] sm:$0xff] }
 0x42e   : > { %3276 = vmatprep.mubr.bf16.mxu1 %v17943_v21  ;;  %v1950_v56 = vpack.c.bf16 %v17952_v15, %v17951_v52  ;;  %v17954_v21 = vld [vmem:[#allocation196_spill] sm:$0xff] }
 0x42f   : > { %v17955_v41 = vpack.c.bf16 %v17953_v8, %v17954_v21  ;;  %v17965_v8 = vld [vmem:[#allocation209_spill] sm:$0xff]  ;;  %v17966_v21 = vld [vmem:[#allocation210_spill] sm:$0xff]  ;;  %v18038_v15 = vld [vmem:[#allocation8_spill] sm:$0xff] }
 0x435   : > { %3277 = vmatmul.mubr.bf16.gmra.mrb[92].mxu1 %v1948_v19  ;;  %v17956_v19 = vld [vmem:[#allocation188_spill] sm:$0xff] }
 0x436   : > { %3284 = vmatprep.mubr.bf16.mxu1 %v17946_v28  ;;  %v1951_v33 = vpack.c.bf16 %v17957_v38, %v17956_v19  ;;  %v17959_v28 = vld [vmem:[#allocation203_spill] sm:$0xff] }
 0x43d   : > { %3285 = vmatmul.mubr.bf16.gmra.mrb[96].mxu1 %v1949_v58  ;;  %v17960_v58 = vld [vmem:[#allocation204_spill] sm:$0xff] }
 0x43e   : > { %3292 = vmatprep.mubr.bf16.mxu1 %v17950_v0  ;;  %v17963_v0 = vld [vmem:[#allocation207_spill] sm:$0xff] }
 0x445   : > { %3293 = vmatmul.mubr.bf16.gmra.mrb[100].mxu1 %v1950_v56  ;;  %v17964_v56 = vld [vmem:[#allocation208_spill] sm:$0xff] }
 0x446   : > { %3300 = vmatprep.mubr.bf16.mxu1 %v17955_v41  ;;  %v17962_v41 = vld [vmem:[#allocation206_spill] sm:$0xff] }
 0x44d   : > { %3301 = vmatmul.mubr.bf16.gmra.mrb[104].mxu1 %v1951_v33  ;;  %v10292_v33 = vld [vmem:[%s16780_s6 + $0x208] sm:$0xff]  }
 0x44e   : > { %3341 = vmatprep.mubr.bf16.mxu1 %v17958_v55  ;;  %v17967_v55 = vld [vmem:[#allocation211_spill] sm:$0xff] }
 0x455   : > { %3342 = vmatmul.mubr.bf16.vlgmr.msra.gmra.mrb[0].mxu1 %v17959_v28  ;;  %v17968_v28 = vld [vmem:[#allocation212_spill] sm:$0xff] }
 0x456   : > { %3349 = vmatprep.mubr.bf16.mxu1 %v17960_v58  ;;  %9437 = vmatpush3.bf16.msra.mxu1 %v10291_v16  ;;  %v17969_v58 = vld [vmem:[#allocation213_spill] sm:$0xff]  ;;  %v17970_v16 = vld [vmem:[#allocation214_spill] sm:$0xff] }
 0x457   : > { %9438 = vmatprep.subr.bf16.mxu1 %v17909_v47 }
 0x45a   : > { %9439 = vmatpush3.bf16.msra.mxu1 %v10292_v33  ;;  %v17976_v33 = vld [vmem:[#allocation71_spill] sm:$0xff] }
 0x45b   : > { %9440 = vmatprep.subr.bf16.mxu1 %v17909_v47 }
 0x45d   : > { %3350 = vmatmul.mubr.bf16.gmra.mrb[4].mxu1 %v17961_v37  ;;  %v17971_v37 = vld [vmem:[#allocation215_spill] sm:$0xff] }
 0x45e   : > { %3357 = vmatprep.mubr.bf16.mxu1 %v17962_v41  ;;  %v17972_v41 = vld [vmem:[#allocation216_spill] sm:$0xff] }
 0x465   : > { %3358 = vmatmul.mubr.bf16.gmra.mrb[8].mxu1 %v17963_v0  ;;  %v17973_v0 = vld [vmem:[#allocation63_spill] sm:$0xff] }
 0x466   : > { %3365 = vmatprep.mubr.bf16.mxu1 %v17964_v56  ;;  %v17974_v56 = vld [vmem:[#allocation217_spill] sm:$0xff] }
 0x46d   : > { %3366 = vmatmul.mubr.bf16.gmra.mrb[12].mxu1 %v17965_v8  ;;  %v10293_v8 = vld [vmem:[%s16780_s6 + $0x210] sm:$0xff]  }
 0x46e   : > { %3373 = vmatprep.mubr.bf16.mxu1 %v17966_v21  ;;  %9441 = vmatpush3.bf16.msra.mxu1 %v10293_v8  ;;  %v17975_v21 = vld [vmem:[#allocation64_spill] sm:$0xff]  ;;  %v10298_v8 = vld [vmem:[%s16780_s6 + $0x238] sm:$0xff]  }
 0x46f   : > { %9442 = vmatprep.subr.bf16.mxu1 %v17909_v47 }
 0x475   : > { %3374 = vmatmul.mubr.bf16.gmra.mrb[16].mxu1 %v17967_v55  ;;  %v10294_v55 = vld [vmem:[%s16780_s6 + $0x218] sm:$0xff]  }
 0x476   : > { %3381 = vmatprep.mubr.bf16.mxu1 %v17968_v28  ;;  %9443 = vmatpush3.bf16.msra.mxu1 %v10294_v55  ;;  %v17977_v28 = vld [vmem:[#allocation72_spill] sm:$0xff] }
 0x477   : > { %9444 = vmatprep.subr.bf16.mxu1 %v17909_v47  ;;  %v17983_v55 = vld [vmem:[#allocation96_spill] sm:$0xff] }
 0x47d   : > { %3382 = vmatmul.mubr.bf16.gmra.mrb[20].mxu1 %v17969_v58  ;;  %v17978_v58 = vld [vmem:[#allocation79_spill] sm:$0xff] }
 0x47e   : > { %3389 = vmatprep.mubr.bf16.mxu1 %v17970_v16  ;;  %v10295_v16 = vld [vmem:[%s16780_s6 + $0x220] sm:$0xff]  }
 0x47f   : > { %9445 = vmatpush3.bf16.msra.mxu1 %v10295_v16  ;;  %v17986_v16 = vld [vmem:[#allocation111_spill] sm:$0xff] }
 0x480   : > { %9446 = vmatprep.subr.bf16.mxu1 %v17909_v47 }
 0x485   : > { %3390 = vmatmul.mubr.bf16.gmra.mrb[24].mxu1 %v17971_v37  ;;  %v10296_v37 = vld [vmem:[%s16780_s6 + $0x228] sm:$0xff]  }
 0x486   : > { %3397 = vmatprep.mubr.bf16.mxu1 %v17972_v41  ;;  %9447 = vmatpush3.bf16.msra.mxu1 %v10296_v37  ;;  %v17979_v41 = vld [vmem:[#allocation80_spill] sm:$0xff] }
 0x487   : > { %9448 = vmatprep.subr.bf16.mxu1 %v17909_v47  ;;  %v17987_v37 = vld [vmem:[#allocation112_spill] sm:$0xff] }
 0x48d   : > { %3398 = vmatmul.mubr.bf16.gmra.mrb[28].mxu1 %v17973_v0  ;;  %v10297_v0 = vld [vmem:[%s16780_s6 + $0x230] sm:$0xff]  }
 0x48e   : > { %3405 = vmatprep.mubr.bf16.mxu1 %v17974_v56  ;;  %v17980_v56 = vld [vmem:[#allocation87_spill] sm:$0xff]  ;;  %9449 = vmatpush3.bf16.msra.mxu1 %v10297_v0  ;;  %v17989_v0 = vld [vmem:[#allocation120_spill] sm:$0xff] }
 0x48f   : > { %9450 = vmatprep.subr.bf16.mxu1 %v17909_v47 }
 0x492   : > { %9451 = vmatpush3.bf16.msra.mxu1 %v10298_v8  ;;  %v17991_v8 = vld [vmem:[#allocation128_spill] sm:$0xff] }
 0x495   : > { %3406 = vmatmul.mubr.bf16.gmra.mrb[32].mxu1 %v17975_v21  ;;  %v17981_v21 = vld [vmem:[#allocation88_spill] sm:$0xff] }
 0x496   : > { %3413 = vmatprep.mubr.bf16.mxu1 %v17976_v33  ;;  %v17982_v33 = vld [vmem:[#allocation95_spill] sm:$0xff] }
 0x49d   : > { %3414 = vmatmul.mubr.bf16.gmra.mrb[36].mxu1 %v17977_v28  ;;  %v17984_v28 = vld [vmem:[#allocation103_spill] sm:$0xff] }
 0x49e   : > { %3421 = vmatprep.mubr.bf16.mxu1 %v17978_v58  ;;  %v17985_v58 = vld [vmem:[#allocation104_spill] sm:$0xff] }
 0x4a5   : > { %3422 = vmatmul.mubr.bf16.gmra.mrb[40].mxu1 %v17979_v41  ;;  %v17988_v41 = vld [vmem:[#allocation119_spill] sm:$0xff] }
 0x4a6   : > { %3429 = vmatprep.mubr.bf16.mxu1 %v17980_v56  ;;  %v17990_v56 = vld [vmem:[#allocation127_spill] sm:$0xff] }
 0x4ad   : > { %3430 = vmatmul.mubr.bf16.gmra.mrb[44].mxu1 %v17981_v21  ;;  %v17992_v21 = vld [vmem:[#allocation218_spill] sm:$0xff] }
 0x4ae   : > { %3437 = vmatprep.mubr.bf16.mxu1 %v17982_v33  ;;  %v17993_v33 = vld [vmem:[#allocation219_spill] sm:$0xff] }
 0x4b5   : > { %3438 = vmatmul.mubr.bf16.gmra.mrb[48].mxu1 %v17983_v55  ;;  %v17994_v55 = vld [vmem:[#allocation220_spill] sm:$0xff] }
 0x4b6   : > { %3445 = vmatprep.mubr.bf16.mxu1 %v17984_v28  ;;  %v17995_v28 = vld [vmem:[#allocation221_spill] sm:$0xff] }
 0x4bd   : > { %3446 = vmatmul.mubr.bf16.gmra.mrb[52].mxu1 %v17985_v58  ;;  %v17996_v58 = vld [vmem:[#allocation222_spill] sm:$0xff] }
 0x4be   : > { %3453 = vmatprep.mubr.bf16.mxu1 %v17986_v16  ;;  %v17997_v16 = vld [vmem:[#allocation152_spill] sm:$0xff] }
 0x4c5   : > { %3454 = vmatmul.mubr.bf16.gmra.mrb[56].mxu1 %v17987_v37  ;;  %v17998_v37 = vld [vmem:[#allocation159_spill] sm:$0xff] }
 0x4c6   : > { %3461 = vmatprep.mubr.bf16.mxu1 %v17988_v41  ;;  %v17999_v41 = vld [vmem:[#allocation160_spill] sm:$0xff] }
 0x4cd   : > { %3462 = vmatmul.mubr.bf16.gmra.mrb[60].mxu1 %v17989_v0  ;;  %v18000_v0 = vld [vmem:[#allocation167_spill] sm:$0xff] }
 0x4ce   : > { %3469 = vmatprep.mubr.bf16.mxu1 %v17990_v56  ;;  %v18001_v56 = vld [vmem:[#allocation168_spill] sm:$0xff] }
 0x4d5   : > { %3470 = vmatmul.mubr.bf16.gmra.mrb[64].mxu1 %v17991_v8  ;;  %v18002_v8 = vld [vmem:[#allocation223_spill] sm:$0xff] }
 0x4d6   : > { %3477 = vmatprep.mubr.bf16.mxu1 %v17992_v21  ;;  %v18003_v21 = vld [vmem:[#allocation175_spill] sm:$0xff] }
 0x4dd   : > { %3478 = vmatmul.mubr.bf16.gmra.mrb[68].mxu1 %v17993_v33  ;;  %v18004_v33 = vld [vmem:[#allocation224_spill] sm:$0xff] }
 0x4de   : > { %3485 = vmatprep.mubr.bf16.mxu1 %v17994_v55  ;;  %v18005_v55 = vld [vmem:[#allocation181_spill] sm:$0xff] }
 0x4e5   : > { %3486 = vmatmul.mubr.bf16.gmra.mrb[72].mxu1 %v17995_v28  ;;  %v18006_v28 = vld [vmem:[#allocation190_spill] sm:$0xff] }
 0x4e6   : > { %3493 = vmatprep.mubr.bf16.mxu1 %v17996_v58  ;;  %v18007_v58 = vld [vmem:[#allocation192_spill] sm:$0xff] }
 0x4ed   : > { %3494 = vmatmul.mubr.bf16.gmra.mrb[76].mxu1 %v17997_v16  ;;  %v18008_v16 = vld [vmem:[#allocation194_spill] sm:$0xff] }
 0x4ee   : > { %3501 = vmatprep.mubr.bf16.mxu1 %v17998_v37  ;;  %v18009_v37 = vld [vmem:[#allocation199_spill] sm:$0xff] }
 0x4f5   : > { %3502 = vmatmul.mubr.bf16.gmra.mrb[80].mxu1 %v17999_v41  ;;  %v18010_v41 = vld [vmem:[#allocation200_spill] sm:$0xff] }
 0x4f6   : > { %3509 = vmatprep.mubr.bf16.mxu1 %v18000_v0  ;;  %v18011_v0 = vld [vmem:[#allocation201_spill] sm:$0xff] }
 0x4fd   : > { %3510 = vmatmul.mubr.bf16.gmra.mrb[84].mxu1 %v18001_v56  ;;  %v18012_v56 = vld [vmem:[#allocation20_spill] sm:$0xff] }
 0x4fe   : > { %3517 = vmatprep.mubr.bf16.mxu1 %v18002_v8  ;;  %v18013_v8 = vld [vmem:[#allocation25_spill] sm:$0xff] }
 0x505   : > { %3518 = vmatmul.mubr.bf16.gmra.mrb[88].mxu1 %v18003_v21  ;;  %v18014_v21 = vld [vmem:[#allocation26_spill] sm:$0xff] }
 0x506   : > { %3525 = vmatprep.mubr.bf16.mxu1 %v18004_v33  ;;  %v18015_v33 = vld [vmem:[#allocation31_spill] sm:$0xff] }
 0x50d   : > { %3526 = vmatmul.mubr.bf16.gmra.mrb[92].mxu1 %v18005_v55  ;;  %v18016_v55 = vld [vmem:[#allocation32_spill] sm:$0xff] }
 0x50e   : > { %3533 = vmatprep.mubr.bf16.mxu1 %v18006_v28  ;;  %v18017_v28 = vld [vmem:[#allocation37_spill] sm:$0xff] }
 0x515   : > { %3534 = vmatmul.mubr.bf16.gmra.mrb[96].mxu1 %v18007_v58  ;;  %v18018_v58 = vld [vmem:[#allocation38_spill] sm:$0xff] }
 0x516   : > { %3541 = vmatprep.mubr.bf16.mxu1 %v18008_v16  ;;  %v18019_v16 = vld [vmem:[#allocation43_spill] sm:$0xff] }
 0x51d   : > { %3542 = vmatmul.mubr.bf16.gmra.mrb[100].mxu1 %v18009_v37  ;;  %v18020_v37 = vld [vmem:[#allocation44_spill] sm:$0xff] }
 0x51e   : > { %3549 = vmatprep.mubr.bf16.mxu1 %v18010_v41  ;;  %v18021_v41 = vld [vmem:[#allocation49_spill] sm:$0xff] }
 0x525   : > { %3550 = vmatmul.mubr.bf16.gmra.mrb[104].mxu1 %v18011_v0  ;;  %v18022_v0 = vld [vmem:[#allocation50_spill] sm:$0xff] }
 0x526   : > { %9452 = vmatprep.mubr.msk.bf16.mxu1 %vm10578_vm0, %v17909_v47 }
 0x52d   : > { %9453 = vmatmul.mubr.bf16.vlgmr.msra.gmra.mrb[0].mxu1 %v18012_v56  ;;  %v18023_v56 = vld [vmem:[#allocation55_spill] sm:$0xff] }
 0x52e   : > { %9456 = vmatprep.mubr.msk.bf16.mxu1 %vm10578_vm0, %v17909_v47 }
 0x535   : > { %9457 = vmatmul.mubr.bf16.gmra.mrb[4].mxu1 %v18013_v8  ;;  %v18024_v8 = vld [vmem:[#allocation56_spill] sm:$0xff] }
 0x536   : > { %9460 = vmatprep.mubr.msk.bf16.mxu1 %vm10578_vm0, %v17909_v47 }
 0x53d   : > { %9461 = vmatmul.mubr.bf16.gmra.mrb[8].mxu1 %v18014_v21  ;;  %v18025_v21 = vld [vmem:[#allocation61_spill] sm:$0xff] }
 0x53e   : > { %9464 = vmatprep.mubr.msk.bf16.mxu1 %vm10578_vm0, %v17909_v47 }
 0x545   : > { %9465 = vmatmul.mubr.bf16.gmra.mrb[12].mxu1 %v18015_v33  ;;  %v18026_v33 = vld [vmem:[#allocation62_spill] sm:$0xff] }
 0x546   : > { %9468 = vmatprep.mubr.msk.bf16.mxu1 %vm10578_vm0, %v17909_v47 }
 0x54d   : > { %9469 = vmatmul.mubr.bf16.gmra.mrb[16].mxu1 %v18016_v55  ;;  %v18027_v55 = vld [vmem:[#allocation69_spill] sm:$0xff] }
 0x54e   : > { %9472 = vmatprep.mubr.msk.bf16.mxu1 %vm10578_vm0, %v17909_v47 }
 0x555   : > { %9473 = vmatmul.mubr.bf16.gmra.mrb[20].mxu1 %v18017_v28  ;;  %v18028_v28 = vld [vmem:[#allocation70_spill] sm:$0xff] }
 0x556   : > { %9476 = vmatprep.mubr.msk.bf16.mxu1 %vm10578_vm0, %v17909_v47 }
 0x55d   : > { %9477 = vmatmul.mubr.bf16.gmra.mrb[24].mxu1 %v18018_v58  ;;  %v18029_v58 = vld [vmem:[#allocation77_spill] sm:$0xff] }
 0x55e   : > { %9480 = vmatprep.mubr.msk.bf16.mxu1 %vm10578_vm0, %v17909_v47 }
 0x565   : > { %9481 = vmatmul.mubr.bf16.gmra.mrb[28].mxu1 %v18019_v16  ;;  %v18030_v16 = vld [vmem:[#allocation78_spill] sm:$0xff] }
 0x566   : > { %9484 = vmatprep.mubr.msk.bf16.mxu1 %vm10578_vm0, %v17909_v47 }
 0x56d   : > { %9485 = vmatmul.mubr.bf16.gmra.mrb[32].mxu1 %v18020_v37  ;;  %v18031_v37 = vld [vmem:[#allocation85_spill] sm:$0xff] }
 0x56e   : > { %9488 = vmatprep.mubr.msk.bf16.mxu1 %vm10578_vm0, %v17909_v47 }
 0x575   : > { %9489 = vmatmul.mubr.bf16.gmra.mrb[36].mxu1 %v18021_v41  ;;  %v18032_v41 = vld [vmem:[#allocation86_spill] sm:$0xff] }
 0x576   : > { %9492 = vmatprep.mubr.msk.bf16.mxu1 %vm10578_vm0, %v17909_v47 }
 0x57d   : > { %9493 = vmatmul.mubr.bf16.gmra.mrb[40].mxu1 %v18022_v0  ;;  %v18033_v0 = vld [vmem:[#allocation93_spill] sm:$0xff] }
 0x57e   : > { %9496 = vmatprep.mubr.msk.bf16.mxu1 %vm10578_vm0, %v17909_v47 }
 0x585   : > { %9497 = vmatmul.mubr.bf16.gmra.mrb[44].mxu1 %v18023_v56  ;;  %v18034_v56 = vld [vmem:[#allocation225_spill] sm:$0xff] }
 0x586   : > { %9500 = vmatprep.mubr.msk.bf16.mxu1 %vm10578_vm0, %v17909_v47 }
 0x58d   : > { %9501 = vmatmul.mubr.bf16.gmra.mrb[48].mxu1 %v18024_v8  ;;  %v18035_v8 = vld [vmem:[#allocation226_spill] sm:$0xff] }
 0x58e   : > { %9504 = vmatprep.mubr.msk.bf16.mxu1 %vm10578_vm0, %v17909_v47 }
 0x595   : > { %9505 = vmatmul.mubr.bf16.gmra.mrb[52].mxu1 %v18025_v21  ;;  %v18036_v21 = vld [vmem:[#allocation19_spill] sm:$0xff] }
 0x596   : > { %9508 = vmatprep.mubr.msk.bf16.mxu1 %vm10578_vm0, %v17909_v47 }
 0x59d   : > { %9509 = vmatmul.mubr.bf16.gmra.mrb[56].mxu1 %v18026_v33  ;;  %v13027_v33 = vld [vmem:[%s16781_s7] ss:$0 sm:$0xff] }
 0x59e   : > { %9512 = vmatprep.mubr.msk.bf16.mxu1 %vm10578_vm0, %v17909_v47 }
 0x5a5   : > { %9513 = vmatmul.mubr.bf16.gmra.mrb[60].mxu1 %v18027_v55 }
 0x5a6   : > { %9516 = vmatprep.mubr.msk.bf16.mxu1 %vm10578_vm0, %v17909_v47 }
 0x5ad   : > { %9517 = vmatmul.mubr.bf16.gmra.mrb[64].mxu1 %v18028_v28 }
 0x5ae   : > { %9520 = vmatprep.mubr.msk.bf16.mxu1 %vm10578_vm0, %v17909_v47 }
 0x5b5   : > { %9521 = vmatmul.mubr.bf16.gmra.mrb[68].mxu1 %v18029_v58 }
 0x5b6   : > { %9524 = vmatprep.mubr.msk.bf16.mxu1 %vm10578_vm0, %v17909_v47 }
 0x5bd   : > { %9525 = vmatmul.mubr.bf16.gmra.mrb[72].mxu1 %v18030_v16 }
 0x5be   : > { %9528 = vmatprep.mubr.msk.bf16.mxu1 %vm10578_vm0, %v17909_v47 }
 0x5c5   : > { %9529 = vmatmul.mubr.bf16.gmra.mrb[76].mxu1 %v18031_v37 }
 0x5c6   : > { %9532 = vmatprep.mubr.msk.bf16.mxu1 %vm10578_vm0, %v17909_v47 }
 0x5cd   : > { %9533 = vmatmul.mubr.bf16.gmra.mrb[80].mxu1 %v18032_v41 }
 0x5ce   : > { %9536 = vmatprep.mubr.msk.bf16.mxu1 %vm10578_vm0, %v17909_v47 }
 0x5d5   : > { %9537 = vmatmul.mubr.bf16.gmra.mrb[84].mxu1 %v18033_v0 }
 0x5d6   : > { %9540 = vmatprep.mubr.msk.bf16.mxu1 %vm10578_vm0, %v17909_v47 }
 0x5dd   : > { %9541 = vmatmul.mubr.bf16.gmra.mrb[88].mxu1 %v12646_v46 }
 0x5de   : > { %9544 = vmatprep.mubr.msk.bf16.mxu1 %vm10578_vm0, %v17909_v47 }
 0x5e5   : > { %9545 = vmatmul.mubr.bf16.gmra.mrb[92].mxu1 %v12654_v7 }
 0x5e6   : > { %9548 = vmatprep.mubr.msk.bf16.mxu1 %vm10578_vm0, %v17909_v47 }
 0x5ed   : > { %9549 = vmatmul.mubr.bf16.gmra.mrb[96].mxu1 %v18034_v56  ;;  %v18037_v56 = vld [vmem:[#allocation7_spill] sm:$0xff] }
 0x5ee   : > { %9552 = vmatprep.mubr.msk.bf16.mxu1 %vm10578_vm0, %v17909_v47 }
 0x5f5   : > { %9553 = vmatmul.mubr.bf16.gmra.mrb[100].mxu1 %v18035_v8 }
 0x5f6   : > { %9556 = vmatprep.mubr.msk.bf16.mxu1 %vm10578_vm0, %v17909_v47 }
 0x5fd   : > { %9557 = vmatmul.mubr.bf16.gmra.mrb[104].mxu1 %v18036_v21 }
 0x5fe   : > { %6502 = vmatprep.mubr.bf16.mxu1 %v17500_v39 }
 0x600   : > { %v13022_v46 = vpop.f32.mrb[0].mxu1 }
 0x601   : > { %v9454_v7 = vpop.f32.mrb[1].mxu1 }
 0x602   : > { %v3595_v55 = vpop.f32.mrb[2].mxu1 }
 0x603   : > { %v9685_v28 = vadd.f32 %v13027_v33, %v3595_v55  ;;  %v9455_v58 = vpop.f32.mrb[3].mxu1 }
 0x604   : > { %v18040_v58 = vld [vmem:[#allocation9_spill] sm:$0xff] }
 0x605   : > { %v3808_v16 = vmax.f32 %v9685_v28, 0.0 }
 0x607   : > { %v13032_v8 = vmul.f32 %v3808_v16, %v18037_v56 }
 0x608   : > { %v3600_v37 = vpop.f32.mrb[4].mxu1 }
 0x609   : > { %v9686_v41 = vadd.f32 %v13027_v33, %v3600_v37  ;;  %v9458_v0 = vpop.f32.mrb[5].mxu1  ;;  %v17204_v55 = vrot.slane %v13032_v8, 7 }
 0x60a   : > { %v3603_v21 = vpop.f32.mrb[6].mxu1 }
 0x60b   : > { %v3809_v38 = vmax.f32 %v9686_v41, 0.0  ;;  %v9687_v7 = vadd.f32 %v13027_v33, %v3603_v21  ;;  %v9459_v19 = vpop.f32.mrb[7].mxu1 }
 0x60d   : > { %v13036_v52 = vmul.f32 %v3809_v38, %v18038_v15  ;;  %v3810_v9 = vmax.f32 %v9687_v7, 0.0  ;;  %v18044_v15 = vrot.slane %v13032_v8, 1 }
 0x60f   : > { %18039 = vst [vmem:[#allocation94_spill] sm:$0xff] %v13036_v52  ;;  %v13040_v28 = vmul.f32 %v3810_v9, %v18040_v58  ;;  %v13044_v37 = vpack.c.bf16 %v13036_v52, %v13032_v8  ;;  %v3917_v16 = vrot.slane %v13036_v52, 7  ;;  %v4079_v41 = vrot.slane %v13036_v52, 1  ;;  %v10299_v9 = vld [vmem:[%s16782_s8] sm:$0xff]  }
 0x610   : > { %v3608_v0 = vpop.f32.mrb[8].mxu1  ;;  %4877 = vmatpush1.bf16.msra.mxu0 %v10299_v9 }
 0x611   : > { %18041 = vst [vmem:[#allocation101_spill] sm:$0xff] %v13040_v28  ;;  %18042 = vst [vmem:[#allocation102_spill] sm:$0xff] %v13044_v37  ;;  %v9688_v38 = vadd.f32 %v13027_v33, %v3608_v0  ;;  %v9462_v56 = vpop.f32.mrb[9].mxu1  ;;  %v13059_v7 = vsel %vm1653_vm3, %v17204_v55, %v3917_v16  ;;  %v3918_v58 = vrot.slane %v13040_v28, 7  ;;  %v4080_v19 = vrot.slane %v13040_v28, 1  ;;  %4878 = vmatprep.subr.bf16.mxu0 %v17500_v39 }
 0x612   : > { %v3611_v20 = vpop.f32.mrb[10].mxu1  ;;  %v13067_v0 = vsel %vm1816_vm4, %v18044_v15, %v4079_v41  ;;  %v18048_v15 = vld [vmem:[#allocation14_spill] sm:$0xff] }
 0x613   : > { %18045 = vst [vmem:[#allocation109_spill] sm:$0xff] %v13067_v0  ;;  %v3811_v56 = vmax.f32 %v9688_v38, 0.0  ;;  %v9689_v23 = vadd.f32 %v13027_v33, %v3611_v20  ;;  %v9463_v12 = vpop.f32.mrb[11].mxu1  ;;  %v13072_v55 = vsel %vm1653_vm3, %v3917_v16, %v3918_v58  ;;  %v13079_v62 = vsel %vm1816_vm4, %v4079_v41, %v4080_v19  ;;  %v18051_v20 = vld [vmem:[#allocation15_spill] sm:$0xff] }
 0x614   : > { %18046 = vst [vmem:[#allocation110_spill] sm:$0xff] %v13072_v55  ;;  %18047 = vst [vmem:[#allocation117_spill] sm:$0xff] %v13079_v62  ;;  %v13086_v12 = vpack.c.bf16 %v13079_v62, %v13067_v0  ;;  %4879 = vmatpush1.bf16.msra.mxu0 %v10300_v10 }
 0x615   : > { %v13082_v63 = vmul.f32 %v3811_v56, %v18048_v15  ;;  %v3812_v38 = vmax.f32 %v9689_v23, 0.0  ;;  %4880 = vmatprep.subr.bf16.mxu0 %v17500_v39 }
 0x616   : > { %18050 = vst [vmem:[#allocation125_spill] sm:$0xff] %v13086_v12 }
 0x617   : > { %18049 = vst [vmem:[#allocation118_spill] sm:$0xff] %v13082_v63  ;;  %v13089_v16 = vmul.f32 %v3812_v38, %v18051_v20  ;;  %v13093_v9 = vpack.c.bf16 %v13082_v63, %v13040_v28  ;;  %v3919_v40 = vrot.slane %v13082_v63, 7  ;;  %v4081_v41 = vrot.slane %v13082_v63, 1  ;;  %v10310_v63 = vld [vmem:[%s16782_s8 + $0x58] sm:$0xff]  }
 0x618   : > { %v3616_v3 = vpop.f32.mrb[12].mxu1 }
 0x619   : > { %18052 = vst [vmem:[#allocation136_spill] sm:$0xff] %v13089_v16  ;;  %18053 = vst [vmem:[#allocation135_spill] sm:$0xff] %v13093_v9  ;;  %v9690_v23 = vadd.f32 %v13027_v33, %v3616_v3  ;;  %v9466_v15 = vpop.f32.mrb[13].mxu1  ;;  %v13102_v54 = vsel %vm1653_vm3, %v3918_v58, %v3919_v40  ;;  %v3920_v38 = vrot.slane %v13089_v16, 7  ;;  %v4082_v44 = vrot.slane %v13089_v16, 1 }
 0x61a   : > { %18054 = vst [vmem:[#allocation126_spill] sm:$0xff] %v13102_v54  ;;  %v3619_v20 = vpop.f32.mrb[14].mxu1  ;;  %v13107_v61 = vpack.c.bf16 %v13102_v54, %v13072_v55  ;;  %v13112_v59 = vsel %vm1816_vm4, %v4080_v19, %v4081_v41  ;;  %v18269_v55 = vld [vmem:[#allocation156_spill] sm:$0xff] }
 0x61b   : > { %18056 = vst [vmem:[#allocation144_spill] sm:$0xff] %v13112_v59  ;;  %v3813_v56 = vmax.f32 %v9690_v23, 0.0  ;;  %v9691_v3 = vadd.f32 %v13027_v33, %v3619_v20  ;;  %v9467_v15 = vpop.f32.mrb[15].mxu1  ;;  %v13117_v58 = vsel %vm1653_vm3, %v3919_v40, %v3920_v38  ;;  %v13128_v19 = vsel %vm1816_vm4, %v4081_v41, %v4082_v44  ;;  %v18059_v23 = vld [vmem:[#allocation18_spill] sm:$0xff] }
 0x61c   : > { %18055 = vst [vmem:[#allocation133_spill] sm:$0xff] %v13107_v61  ;;  %18057 = vst [vmem:[#allocation143_spill] sm:$0xff] %v13117_v58  ;;  %v13135_v40 = vpack.c.bf16 %v13128_v19, %v13112_v59 }
 0x61d   : > { %18058 = vst [vmem:[#allocation134_spill] sm:$0xff] %v13128_v19  ;;  %v13131_v20 = vmul.f32 %v3813_v56, %v18059_v23  ;;  %v3814_v15 = vmax.f32 %v9691_v3, 0.0  ;;  %v18128_v19 = vld [vmem:[#allocation57_spill] sm:$0xff] }
 0x61e   : > { %18061 = vst [vmem:[#allocation151_spill] sm:$0xff] %v13135_v40  ;;  %v18236_v40 = vld [vmem:[#allocation132_spill] sm:$0xff] }
 0x61f   : > { %18060 = vst [vmem:[#allocation141_spill] sm:$0xff] %v13131_v20  ;;  %v13138_v53 = vmul.f32 %v3814_v15, %v18062_v11  ;;  %v13143_v31 = vpack.c.bf16 %v13131_v20, %v13089_v16  ;;  %v3921_v41 = vrot.slane %v13131_v20, 7  ;;  %v4083_v56 = vrot.slane %v13131_v20, 1 }
 0x620   : > { %v3624_v23 = vpop.f32.mrb[16].mxu1 }
 0x621   : > { %18063 = vst [vmem:[#allocation142_spill] sm:$0xff] %v13138_v53  ;;  %18064 = vst [vmem:[#allocation149_spill] sm:$0xff] %v13143_v31  ;;  %v9692_v57 = vadd.f32 %v13027_v33, %v3624_v23  ;;  %v9470_v10 = vpop.f32.mrb[17].mxu1  ;;  %v13152_v11 = vsel %vm1653_vm3, %v3920_v38, %v3921_v41  ;;  %v3922_v15 = vrot.slane %v13138_v53, 7  ;;  %v4084_v22 = vrot.slane %v13138_v53, 1 }
 0x622   : > { %18065 = vst [vmem:[#allocation150_spill] sm:$0xff] %v13152_v11  ;;  %v3627_v13 = vpop.f32.mrb[18].mxu1  ;;  %v13157_v32 = vpack.c.bf16 %v13152_v11, %v13117_v58  ;;  %v13162_v35 = vsel %vm1816_vm4, %v4082_v44, %v4083_v56  ;;  %v18070_v44 = vld [vmem:[#allocation24_spill] sm:$0xff] }
 0x623   : > { %18067 = vst [vmem:[#allocation158_spill] sm:$0xff] %v13162_v35  ;;  %v3815_v3 = vmax.f32 %v9692_v57, 0.0  ;;  %v9693_v23 = vadd.f32 %v13027_v33, %v3627_v13  ;;  %v9471_v10 = vpop.f32.mrb[19].mxu1  ;;  %v13167_v38 = vsel %vm1653_vm3, %v3921_v41, %v3922_v15  ;;  %v13175_v6 = vsel %vm1816_vm4, %v4083_v56, %v4084_v22  ;;  %v10301_v41 = vld [vmem:[%s16782_s8 + $0x10] sm:$0xff]  }
 0x624   : > { %18066 = vst [vmem:[#allocation157_spill] sm:$0xff] %v13157_v32  ;;  %18068 = vst [vmem:[#allocation165_spill] sm:$0xff] %v13167_v38  ;;  %v13182_v13 = vpack.c.bf16 %v13175_v6, %v13162_v35  ;;  %v18073_v10 = vld [vmem:[#allocation27_spill] sm:$0xff]  ;;  %4881 = vmatpush1.bf16.msra.mxu0 %v10301_v41 }
 0x625   : > { %18069 = vst [vmem:[#allocation166_spill] sm:$0xff] %v13175_v6  ;;  %v13178_v14 = vmul.f32 %v3815_v3, %v18070_v44  ;;  %v3816_v57 = vmax.f32 %v9693_v23, 0.0  ;;  %4882 = vmatprep.subr.bf16.mxu0 %v17500_v39 }
 0x626   : > { %18072 = vst [vmem:[#allocation174_spill] sm:$0xff] %v13182_v13 }
 0x627   : > { %18071 = vst [vmem:[#allocation173_spill] sm:$0xff] %v13178_v14  ;;  %v13188_v4 = vmul.f32 %v3816_v57, %v18073_v10  ;;  %v13192_v29 = vpack.c.bf16 %v13178_v14, %v13138_v53  ;;  %v3923_v56 = vrot.slane %v13178_v14, 7  ;;  %v4085_v3 = vrot.slane %v13178_v14, 1 }
 0x628   : > { %v3632_v23 = vpop.f32.mrb[20].mxu1  ;;  %4883 = vmatpush1.bf16.msra.mxu0 %v10302_v17  ;;  %v10303_v17 = vld [vmem:[%s16782_s8 + $0x20] sm:$0xff]  }
 0x629   : > { %18074 = vst [vmem:[#allocation186_spill] sm:$0xff] %v13188_v4  ;;  %18075 = vst [vmem:[#allocation180_spill] sm:$0xff] %v13192_v29  ;;  %v9694_v27 = vadd.f32 %v13027_v33, %v3632_v23  ;;  %v9474_v1 = vpop.f32.mrb[21].mxu1  ;;  %v13202_v57 = vsel %vm1653_vm3, %v3922_v15, %v3923_v56  ;;  %v3924_v10 = vrot.slane %v13188_v4, 7  ;;  %v4086_v23 = vrot.slane %v13188_v4, 1  ;;  %4884 = vmatprep.subr.bf16.mxu0 %v17500_v39 }
 0x62a   : > { %18076 = vst [vmem:[#allocation184_spill] sm:$0xff] %v13202_v57  ;;  %v3635_v51 = vpop.f32.mrb[22].mxu1  ;;  %v13210_v41 = vpack.c.bf16 %v13202_v57, %v13167_v38  ;;  %v13215_v1 = vsel %vm1816_vm4, %v4084_v22, %v4085_v3  ;;  %v18081_v22 = vld [vmem:[#allocation30_spill] sm:$0xff]  ;;  %v18225_v57 = vld [vmem:[#allocation124_spill] sm:$0xff] }
 0x62b   : > { %18078 = vst [vmem:[#allocation191_spill] sm:$0xff] %v13215_v1  ;;  %v3817_v44 = vmax.f32 %v9694_v27, 0.0  ;;  %v9695_v15 = vadd.f32 %v13027_v33, %v3635_v51  ;;  %v9475_v2 = vpop.f32.mrb[23].mxu1  ;;  %v13220_v30 = vsel %vm1653_vm3, %v3923_v56, %v3924_v10  ;;  %v13228_v18 = vsel %vm1816_vm4, %v4085_v3, %v4086_v23  ;;  %v18084_v56 = vld [vmem:[#allocation33_spill] sm:$0xff]  ;;  %v18247_v38 = vld [vmem:[#allocation140_spill] sm:$0xff] }
 0x62c   : > { %18077 = vst [vmem:[#allocation195_spill] sm:$0xff] %v13210_v41  ;;  %18079 = vst [vmem:[#allocation185_spill] sm:$0xff] %v13220_v30  ;;  %v13236_v2 = vpack.c.bf16 %v13228_v18, %v13215_v1  ;;  %4885 = vmatpush1.bf16.msra.mxu0 %v10303_v17 }
 0x62d   : > { %18080 = vst [vmem:[#allocation198_spill] sm:$0xff] %v13228_v18  ;;  %v13231_v27 = vmul.f32 %v3817_v44, %v18081_v22  ;;  %v3818_v51 = vmax.f32 %v9695_v15, 0.0  ;;  %4886 = vmatprep.subr.bf16.mxu0 %v17500_v39 }
 0x62e   : > { %18083 = vst [vmem:[#allocation193_spill] sm:$0xff] %v13236_v2  ;;  %v18203_v2 = vld [vmem:[#allocation108_spill] sm:$0xff] }
 0x62f   : > { %18082 = vst [vmem:[#allocation179_spill] sm:$0xff] %v13231_v27  ;;  %v13242_v36 = vmul.f32 %v3818_v51, %v18084_v56  ;;  %v13246_v3 = vpack.c.bf16 %v13231_v27, %v13188_v4  ;;  %v3925_v44 = vrot.slane %v13231_v27, 7  ;;  %v4087_v15 = vrot.slane %v13231_v27, 1  ;;  %v10306_v27 = vld [vmem:[%s16782_s8 + $0x38] sm:$0xff]  }
 0x630   : > { %v3640_v22 = vpop.f32.mrb[24].mxu1  ;;  %4887 = vmatpush1.bf16.msra.mxu0 %v10304_v42  ;;  %v10305_v42 = vld [vmem:[%s16782_s8 + $0x30] sm:$0xff]  }
 0x631   : > { %18085 = vst [vmem:[#allocation197_spill] sm:$0xff] %v13242_v36  ;;  %18086 = vst [vmem:[#allocation196_spill] sm:$0xff] %v13246_v3  ;;  %v9696_v25 = vadd.f32 %v13027_v33, %v3640_v22  ;;  %v9478_v45 = vpop.f32.mrb[25].mxu1  ;;  %v13256_v51 = vsel %vm1653_vm3, %v3924_v10, %v3925_v44  ;;  %v3926_v56 = vrot.slane %v13242_v36, 7  ;;  %v4088_v22 = vrot.slane %v13242_v36, 1  ;;  %4888 = vmatprep.subr.bf16.mxu0 %v17500_v39 }
 0x632   : > { %18087 = vst [vmem:[#allocation202_spill] sm:$0xff] %v13256_v51  ;;  %v3643_v26 = vpop.f32.mrb[26].mxu1  ;;  %v13264_v17 = vpack.c.bf16 %v13256_v51, %v13220_v30  ;;  %v13269_v45 = vsel %vm1816_vm4, %v4086_v23, %v4087_v15  ;;  %v18092_v23 = vld [vmem:[#allocation36_spill] sm:$0xff] }
 0x633   : > { %18089 = vst [vmem:[#allocation204_spill] sm:$0xff] %v13269_v45  ;;  %v3819_v43 = vmax.f32 %v9696_v25, 0.0  ;;  %v9697_v10 = vadd.f32 %v13027_v33, %v3643_v26  ;;  %v9479_v34 = vpop.f32.mrb[27].mxu1  ;;  %v13274_v5 = vsel %vm1653_vm3, %v3925_v44, %v3926_v56  ;;  %v13282_v49 = vsel %vm1816_vm4, %v4087_v15, %v4088_v22  ;;  %v18095_v44 = vld [vmem:[#allocation39_spill] sm:$0xff] }
 0x634   : > { %18088 = vst [vmem:[#allocation203_spill] sm:$0xff] %v13264_v17  ;;  %18090 = vst [vmem:[#allocation205_spill] sm:$0xff] %v13274_v5  ;;  %v13290_v34 = vpack.c.bf16 %v13282_v49, %v13269_v45  ;;  %4889 = vmatpush1.bf16.msra.mxu0 %v10305_v42  ;;  %v10308_v45 = vld [vmem:[%s16782_s8 + $0x48] sm:$0xff]  }
 0x635   : > { %18091 = vst [vmem:[#allocation206_spill] sm:$0xff] %v13282_v49  ;;  %v13285_v25 = vmul.f32 %v3819_v43, %v18092_v23  ;;  %v3820_v26 = vmax.f32 %v9697_v10, 0.0  ;;  %4890 = vmatprep.subr.bf16.mxu0 %v17500_v39 }
 0x636   : > { %18094 = vst [vmem:[#allocation208_spill] sm:$0xff] %v13290_v34 }
 0x637   : > { %18093 = vst [vmem:[#allocation207_spill] sm:$0xff] %v13285_v25  ;;  %v13296_v50 = vmul.f32 %v3820_v26, %v18095_v44  ;;  %v13300_v15 = vpack.c.bf16 %v13285_v25, %v13242_v36  ;;  %v3927_v43 = vrot.slane %v13285_v25, 7  ;;  %v4089_v10 = vrot.slane %v13285_v25, 1 }
 0x638   : > { %v3648_v23 = vpop.f32.mrb[28].mxu1  ;;  %4891 = vmatpush1.bf16.msra.mxu0 %v10306_v27  ;;  %v10307_v27 = vld [vmem:[%s16782_s8 + $0x40] sm:$0xff]  }
 0x639   : > { %18096 = vst [vmem:[#allocation209_spill] sm:$0xff] %v13296_v50  ;;  %18097 = vst [vmem:[#allocation210_spill] sm:$0xff] %v13300_v15  ;;  %v9698_v48 = vadd.f32 %v13027_v33, %v3648_v23  ;;  %v9482_v60 = vpop.f32.mrb[29].mxu1  ;;  %v13310_v26 = vsel %vm1653_vm3, %v3926_v56, %v3927_v43  ;;  %v3928_v44 = vrot.slane %v13296_v50, 7  ;;  %v4090_v23 = vrot.slane %v13296_v50, 1  ;;  %4892 = vmatprep.subr.bf16.mxu0 %v17500_v39 }
 0x63a   : > { %18098 = vst [vmem:[#allocation211_spill] sm:$0xff] %v13310_v26  ;;  %v3651_v47 = vpop.f32.mrb[30].mxu1  ;;  %v13318_v42 = vpack.c.bf16 %v13310_v26, %v13274_v5  ;;  %v13323_v60 = vsel %vm1816_vm4, %v4088_v22, %v4089_v10  ;;  %v18103_v22 = vld [vmem:[#allocation42_spill] sm:$0xff]  ;;  %v18192_v26 = vld [vmem:[#allocation100_spill] sm:$0xff] }
 0x63b   : > { %18100 = vst [vmem:[#allocation213_spill] sm:$0xff] %v13323_v60  ;;  %v3821_v24 = vmax.f32 %v9698_v48, 0.0  ;;  %v9699_v56 = vadd.f32 %v13027_v33, %v3651_v47  ;;  %v9483_v25 = vpop.f32.mrb[31].mxu1  ;;  %v13328_v36 = vsel %vm1653_vm3, %v3927_v43, %v3928_v44  ;;  %v13336_v18 = vsel %vm1816_vm4, %v4089_v10, %v4090_v23  ;;  %v18106_v43 = vld [vmem:[#allocation45_spill] sm:$0xff]  ;;  %v18214_v5 = vld [vmem:[#allocation116_spill] sm:$0xff] }
 0x63c   : > { %18099 = vst [vmem:[#allocation212_spill] sm:$0xff] %v13318_v42  ;;  %18101 = vst [vmem:[#allocation214_spill] sm:$0xff] %v13328_v36  ;;  %v13344_v25 = vpack.c.bf16 %v13336_v18, %v13323_v60  ;;  %4893 = vmatpush1.bf16.msra.mxu0 %v10307_v27 }
 0x63d   : > { %18102 = vst [vmem:[#allocation215_spill] sm:$0xff] %v13336_v18  ;;  %v13339_v48 = vmul.f32 %v3821_v24, %v18103_v22  ;;  %v3822_v47 = vmax.f32 %v9699_v56, 0.0  ;;  %4894 = vmatprep.subr.bf16.mxu0 %v17500_v39 }
 0x63e   : > { %18105 = vst [vmem:[#allocation63_spill] sm:$0xff] %v13344_v25  ;;  %v18170_v25 = vld [vmem:[#allocation84_spill] sm:$0xff] }
 0x63f   : > { %18104 = vst [vmem:[#allocation216_spill] sm:$0xff] %v13339_v48  ;;  %v13350_v14 = vmul.f32 %v3822_v47, %v18106_v43  ;;  %v13354_v10 = vpack.c.bf16 %v13339_v48, %v13296_v50  ;;  %v3929_v24 = vrot.slane %v13339_v48, 7  ;;  %v4091_v56 = vrot.slane %v13339_v48, 1 }
 0x640   : > { %v3656_v22 = vpop.f32.mrb[32].mxu1  ;;  %4895 = vmatpush1.bf16.msra.mxu0 %v10308_v45  ;;  %v10309_v45 = vld [vmem:[%s16782_s8 + $0x50] sm:$0xff]  }
 0x641   : > { %18107 = vst [vmem:[#allocation217_spill] sm:$0xff] %v13350_v14  ;;  %18108 = vst [vmem:[#allocation64_spill] sm:$0xff] %v13354_v10  ;;  %v9700_v49 = vadd.f32 %v13027_v33, %v3656_v22  ;;  %v9486_v60 = vpop.f32.mrb[33].mxu1  ;;  %v13364_v47 = vsel %vm1653_vm3, %v3928_v44, %v3929_v24  ;;  %v3930_v43 = vrot.slane %v13350_v14, 7  ;;  %v4092_v22 = vrot.slane %v13350_v14, 1  ;;  %4896 = vmatprep.subr.bf16.mxu0 %v17500_v39 }
 0x642   : > { %18109 = vst [vmem:[#allocation71_spill] sm:$0xff] %v13364_v47  ;;  %v3659_v50 = vpop.f32.mrb[34].mxu1  ;;  %v13372_v27 = vpack.c.bf16 %v13364_v47, %v13328_v36  ;;  %v13377_v60 = vsel %vm1816_vm4, %v4090_v23, %v4091_v56  ;;  %v18114_v23 = vld [vmem:[#allocation48_spill] sm:$0xff] }
 0x643   : > { %18111 = vst [vmem:[#allocation79_spill] sm:$0xff] %v13377_v60  ;;  %v3823_v4 = vmax.f32 %v9700_v49, 0.0  ;;  %v9701_v44 = vadd.f32 %v13027_v33, %v3659_v50  ;;  %v9487_v48 = vpop.f32.mrb[35].mxu1  ;;  %v13382_v20 = vsel %vm1653_vm3, %v3929_v24, %v3930_v43  ;;  %v13390_v1 = vsel %vm1816_vm4, %v4091_v56, %v4092_v22  ;;  %v18117_v24 = vld [vmem:[#allocation51_spill] sm:$0xff] }
 0x644   : > { %18110 = vst [vmem:[#allocation72_spill] sm:$0xff] %v13372_v27  ;;  %18112 = vst [vmem:[#allocation80_spill] sm:$0xff] %v13382_v20  ;;  %v13398_v48 = vpack.c.bf16 %v13390_v1, %v13377_v60  ;;  %4897 = vmatpush1.bf16.msra.mxu0 %v10309_v45 }
 0x645   : > { %18113 = vst [vmem:[#allocation87_spill] sm:$0xff] %v13390_v1  ;;  %v13393_v49 = vmul.f32 %v3823_v4, %v18114_v23  ;;  %v3824_v50 = vmax.f32 %v9701_v44, 0.0  ;;  %4898 = vmatprep.subr.bf16.mxu0 %v17500_v39 }
 0x646   : > { %18116 = vst [vmem:[#allocation95_spill] sm:$0xff] %v13398_v48 }
 0x647   : > { %18115 = vst [vmem:[#allocation88_spill] sm:$0xff] %v13393_v49  ;;  %v13404_v53 = vmul.f32 %v3824_v50, %v18117_v24  ;;  %v13408_v56 = vpack.c.bf16 %v13393_v49, %v13350_v14  ;;  %v3931_v4 = vrot.slane %v13393_v49, 7  ;;  %v4093_v44 = vrot.slane %v13393_v49, 1 }
 0x648   : > { %v3664_v23 = vpop.f32.mrb[36].mxu1  ;;  %4899 = vmatpush1.bf16.msra.mxu0 %v10310_v63  ;;  %v10311_v63 = vld [vmem:[%s16782_s8 + $0x60] sm:$0xff]  }
 0x649   : > { %18118 = vst [vmem:[#allocation96_spill] sm:$0xff] %v13404_v53  ;;  %18119 = vst [vmem:[#allocation103_spill] sm:$0xff] %v13408_v56  ;;  %v9702_v18 = vadd.f32 %v13027_v33, %v3664_v23  ;;  %v9490_v60 = vpop.f32.mrb[37].mxu1  ;;  %v13418_v50 = vsel %vm1653_vm3, %v3930_v43, %v3931_v4  ;;  %v3932_v24 = vrot.slane %v13404_v53, 7  ;;  %v4094_v23 = vrot.slane %v13404_v53, 1  ;;  %4900 = vmatprep.subr.bf16.mxu0 %v17500_v39 }
 0x64a   : > { %18120 = vst [vmem:[#allocation104_spill] sm:$0xff] %v13418_v50  ;;  %v3667_v14 = vpop.f32.mrb[38].mxu1  ;;  %v13426_v45 = vpack.c.bf16 %v13418_v50, %v13382_v20  ;;  %v13431_v60 = vsel %vm1816_vm4, %v4092_v22, %v4093_v44  ;;  %v18125_v22 = vld [vmem:[#allocation54_spill] sm:$0xff]  ;;  %v18181_v20 = vld [vmem:[#allocation92_spill] sm:$0xff] }
 0x64b   : > { %18122 = vst [vmem:[#allocation112_spill] sm:$0xff] %v13431_v60  ;;  %v3825_v6 = vmax.f32 %v9702_v18, 0.0  ;;  %v9703_v43 = vadd.f32 %v13027_v33, %v3667_v14  ;;  %v9491_v49 = vpop.f32.mrb[39].mxu1  ;;  %v13436_v16 = vsel %vm1653_vm3, %v3931_v4, %v3932_v24  ;;  %v13444_v52 = vsel %vm1816_vm4, %v4093_v44, %v4094_v23 }
 0x64c   : > { %18121 = vst [vmem:[#allocation111_spill] sm:$0xff] %v13426_v45  ;;  %18123 = vst [vmem:[#allocation119_spill] sm:$0xff] %v13436_v16  ;;  %v13452_v49 = vpack.c.bf16 %v13444_v52, %v13431_v60  ;;  %4901 = vmatpush1.bf16.msra.mxu0 %v10311_v63 }
 0x64d   : > { %18124 = vst [vmem:[#allocation120_spill] sm:$0xff] %v13444_v52  ;;  %v13447_v18 = vmul.f32 %v3825_v6, %v18125_v22  ;;  %v3826_v14 = vmax.f32 %v9703_v43, 0.0  ;;  %4902 = vmatprep.subr.bf16.mxu0 %v17500_v39 }
 0x64e   : > { %18127 = vst [vmem:[#allocation128_spill] sm:$0xff] %v13452_v49  ;;  %v18137_v49 = vld [vmem:[#allocation60_spill] sm:$0xff] }
 0x64f   : > { %18126 = vst [vmem:[#allocation127_spill] sm:$0xff] %v13447_v18  ;;  %v4095_v4 = vrot.slane %v13447_v18, 1  ;;  %v13459_v35 = vmul.f32 %v3826_v14, %v18128_v19  ;;  %v13463_v6 = vpack.c.bf16 %v13447_v18, %v13404_v53  ;;  %v3933_v44 = vrot.slane %v13447_v18, 7  ;;  %v10312_v53 = vld [vmem:[%s16782_s8 + $0x68] sm:$0xff]  }
 0x650   : > { %v3672_v43 = vpop.f32.mrb[40].mxu1  ;;  %4903 = vmatpush1.bf16.msra.mxu0 %v10312_v53  ;;  %v10313_v53 = vld [vmem:[%s16782_s8 + $0x70] sm:$0xff]  }
 0x651   : > { %18129 = vst [vmem:[#allocation218_spill] sm:$0xff] %v13459_v35  ;;  %18130 = vst [vmem:[#allocation219_spill] sm:$0xff] %v13463_v6  ;;  %v4096_v22 = vrot.slane %v13459_v35, 1  ;;  %v9704_v60 = vadd.f32 %v13027_v33, %v3672_v43  ;;  %v9494_v28 = vpop.f32.mrb[41].mxu1  ;;  %v13473_v19 = vsel %vm1653_vm3, %v3932_v24, %v3933_v44  ;;  %v3934_v1 = vrot.slane %v13459_v35, 7  ;;  %4904 = vmatprep.subr.bf16.mxu0 %v17500_v39 }
 0x652   : > { %18131 = vst [vmem:[#allocation220_spill] sm:$0xff] %v13473_v19  ;;  %v3675_v14 = vpop.f32.mrb[42].mxu1  ;;  %v13480_v63 = vpack.c.bf16 %v13473_v19, %v13436_v16  ;;  %v13485_v28 = vsel %vm1816_vm4, %v4094_v23, %v4095_v4 }
 0x653   : > { %18133 = vst [vmem:[#allocation222_spill] sm:$0xff] %v13485_v28  ;;  %v13489_v43 = vsel %vm1816_vm4, %v4095_v4, %v4096_v22  ;;  %v3827_v24 = vmax.f32 %v9704_v60, 0.0  ;;  %v9705_v18 = vadd.f32 %v13027_v33, %v3675_v14  ;;  %v9495_v62 = vpop.f32.mrb[43].mxu1  ;;  %v13496_v0 = vsel %vm1653_vm3, %v3933_v44, %v3934_v1  ;;  %v18139_v44 = vld [vmem:[#allocation65_spill] sm:$0xff] }
 0x654   : > { %18132 = vst [vmem:[#allocation221_spill] sm:$0xff] %v13480_v63  ;;  %18134 = vst [vmem:[#allocation152_spill] sm:$0xff] %v13489_v43  ;;  %v13500_v23 = vpack.c.bf16 %v13489_v43, %v13485_v28  ;;  %4905 = vmatpush1.bf16.msra.mxu0 %v10313_v53  ;;  %v18148_v43 = vld [vmem:[#allocation68_spill] sm:$0xff] }
 0x655   : > { %18135 = vst [vmem:[#allocation159_spill] sm:$0xff] %v13496_v0  ;;  %v13503_v48 = vmul.f32 %v3827_v24, %v18137_v49  ;;  %v3828_v4 = vmax.f32 %v9705_v18, 0.0  ;;  %4906 = vmatprep.subr.bf16.mxu0 %v17500_v39 }
 0x656   : > { %18136 = vst [vmem:[#allocation160_spill] sm:$0xff] %v13500_v23 }
 0x657   : > { %18138 = vst [vmem:[#allocation167_spill] sm:$0xff] %v13503_v48  ;;  %v4097_v60 = vrot.slane %v13503_v48, 1  ;;  %v13513_v14 = vmul.f32 %v3828_v4, %v18139_v44  ;;  %v13517_v59 = vpack.c.bf16 %v13503_v48, %v13459_v35  ;;  %v3935_v18 = vrot.slane %v13503_v48, 7  ;;  %v10314_v35 = vld [vmem:[%s16782_s8 + $0x78] sm:$0xff]  }
 0x658   : > { %v3680_v49 = vpop.f32.mrb[44].mxu1  ;;  %4907 = vmatpush1.bf16.msra.mxu0 %v10314_v35 }
 0x659   : > { %18140 = vst [vmem:[#allocation168_spill] sm:$0xff] %v13513_v14  ;;  %18141 = vst [vmem:[#allocation223_spill] sm:$0xff] %v13517_v59  ;;  %v13522_v24 = vsel %vm1816_vm4, %v4096_v22, %v4097_v60  ;;  %v4098_v62 = vrot.slane %v13513_v14, 1  ;;  %v9706_v4 = vadd.f32 %v13027_v33, %v3680_v49  ;;  %v9498_v44 = vpop.f32.mrb[45].mxu1  ;;  %v13534_v53 = vsel %vm1653_vm3, %v3934_v1, %v3935_v18 }
 0x65a   : > { %18142 = vst [vmem:[#allocation175_spill] sm:$0xff] %v13522_v24  ;;  %v3683_v28 = vpop.f32.mrb[46].mxu1  ;;  %18143 = vst [vmem:[#allocation224_spill] sm:$0xff] %v13534_v53  ;;  %v3936_v22 = vrot.slane %v13513_v14, 7  ;;  %v13546_v19 = vpack.c.bf16 %v13534_v53, %v13496_v0  ;;  %5125 = vmatprep.subr.bf16.mxu0 %v17500_v39  ;;  %v18150_v0 = vld [vmem:[#allocation73_spill] sm:$0xff]  ;;  %v18159_v53 = vld [vmem:[#allocation76_spill] sm:$0xff] }
 0x65b   : > { %v13541_v49 = vsel %vm1816_vm4, %v4097_v60, %v4098_v62  ;;  %v3829_v44 = vmax.f32 %v9706_v4, 0.0  ;;  %v9707_v52 = vadd.f32 %v13027_v33, %v3683_v28  ;;  %v9499_v48 = vpop.f32.mrb[47].mxu1 }
 0x65c   : > { %18144 = vst [vmem:[#allocation181_spill] sm:$0xff] %v13541_v49  ;;  %18145 = vst [vmem:[#allocation190_spill] sm:$0xff] %v13546_v19  ;;  %v13550_v1 = vpack.c.bf16 %v13541_v49, %v13522_v24  ;;  %v13554_v23 = vsel %vm1653_vm3, %v3935_v18, %v3936_v22 }
 0x65d   : > { %18147 = vst [vmem:[#allocation194_spill] sm:$0xff] %v13554_v23  ;;  %v13557_v60 = vmul.f32 %v3829_v44, %v18148_v43  ;;  %v3830_v4 = vmax.f32 %v9707_v52, 0.0 }
 0x65e   : > { %18146 = vst [vmem:[#allocation192_spill] sm:$0xff] %v13550_v1 }
 0x65f   : > { %18149 = vst [vmem:[#allocation199_spill] sm:$0xff] %v13557_v60  ;;  %v4099_v28 = vrot.slane %v13557_v60, 1  ;;  %v13564_v50 = vmul.f32 %v3830_v4, %v18150_v0  ;;  %v13568_v35 = vpack.c.bf16 %v13557_v60, %v13513_v14  ;;  %v3937_v18 = vrot.slane %v13557_v60, 7 }
 0x660   : > { %v3688_v24 = vpop.f32.mrb[48].mxu1 }
 0x661   : > { %18151 = vst [vmem:[#allocation200_spill] sm:$0xff] %v13564_v50  ;;  %18152 = vst [vmem:[#allocation201_spill] sm:$0xff] %v13568_v35  ;;  %v13573_v52 = vsel %vm1816_vm4, %v4098_v62, %v4099_v28  ;;  %v4100_v43 = vrot.slane %v13564_v50, 1  ;;  %v9708_v48 = vadd.f32 %v13027_v33, %v3688_v24  ;;  %v9502_v0 = vpop.f32.mrb[49].mxu1  ;;  %v13581_v14 = vsel %vm1653_vm3, %v3936_v22, %v3937_v18 }
 0x662   : > { %18153 = vst [vmem:[#allocation20_spill] sm:$0xff] %v13573_v52  ;;  %v3691_v4 = vpop.f32.mrb[50].mxu1  ;;  %18154 = vst [vmem:[#allocation25_spill] sm:$0xff] %v13581_v14  ;;  %v3938_v1 = vrot.slane %v13564_v50, 7  ;;  %v13593_v24 = vpack.c.bf16 %v13581_v14, %v13554_v23 }
 0x663   : > { %v13588_v62 = vsel %vm1816_vm4, %v4099_v28, %v4100_v43  ;;  %v3831_v16 = vmax.f32 %v9708_v48, 0.0  ;;  %v9709_v44 = vadd.f32 %v13027_v33, %v3691_v4  ;;  %v9503_v60 = vpop.f32.mrb[51].mxu1  ;;  %v18161_v4 = vld [vmem:[#allocation81_spill] sm:$0xff] }
 0x664   : > { %18155 = vst [vmem:[#allocation26_spill] sm:$0xff] %v13588_v62  ;;  %18156 = vst [vmem:[#allocation31_spill] sm:$0xff] %v13593_v24  ;;  %v13597_v22 = vpack.c.bf16 %v13588_v62, %v13573_v52  ;;  %v13601_v0 = vsel %vm1653_vm3, %v3937_v18, %v3938_v1 }
 0x665   : > { %18158 = vst [vmem:[#allocation37_spill] sm:$0xff] %v13601_v0  ;;  %v13604_v49 = vmul.f32 %v3831_v16, %v18159_v53  ;;  %v3832_v28 = vmax.f32 %v9709_v44, 0.0 }
 0x666   : > { %18157 = vst [vmem:[#allocation32_spill] sm:$0xff] %v13597_v22 }
 0x667   : > { %18160 = vst [vmem:[#allocation38_spill] sm:$0xff] %v13604_v49  ;;  %v4101_v60 = vrot.slane %v13604_v49, 1  ;;  %v13610_v23 = vmul.f32 %v3832_v28, %v18161_v4  ;;  %v13614_v52 = vpack.c.bf16 %v13604_v49, %v13564_v50  ;;  %v3939_v22 = vrot.slane %v13604_v49, 7 }
 0x668   : > { %v3696_v18 = vpop.f32.mrb[52].mxu1 }
 0x669   : > { %18162 = vst [vmem:[#allocation43_spill] sm:$0xff] %v13610_v23  ;;  %18163 = vst [vmem:[#allocation44_spill] sm:$0xff] %v13614_v52  ;;  %v13619_v16 = vsel %vm1816_vm4, %v4100_v43, %v4101_v60  ;;  %v4102_v53 = vrot.slane %v13610_v23, 1  ;;  %v9710_v48 = vadd.f32 %v13027_v33, %v3696_v18  ;;  %v9506_v28 = vpop.f32.mrb[53].mxu1  ;;  %v13627_v50 = vsel %vm1653_vm3, %v3938_v1, %v3939_v22 }
 0x66a   : > { %18164 = vst [vmem:[#allocation49_spill] sm:$0xff] %v13619_v16  ;;  %v3699_v4 = vpop.f32.mrb[54].mxu1  ;;  %18165 = vst [vmem:[#allocation50_spill] sm:$0xff] %v13627_v50  ;;  %v3940_v14 = vrot.slane %v13610_v23, 7  ;;  %v13639_v18 = vpack.c.bf16 %v13627_v50, %v13601_v0 }
 0x66b   : > { %v13634_v43 = vsel %vm1816_vm4, %v4101_v60, %v4102_v53  ;;  %v3833_v47 = vmax.f32 %v9710_v48, 0.0  ;;  %v9711_v44 = vadd.f32 %v13027_v33, %v3699_v4  ;;  %v9507_v49 = vpop.f32.mrb[55].mxu1  ;;  %v18172_v4 = vld [vmem:[#allocation89_spill] sm:$0xff] }
 0x66c   : > { %18166 = vst [vmem:[#allocation55_spill] sm:$0xff] %v13634_v43  ;;  %18167 = vst [vmem:[#allocation56_spill] sm:$0xff] %v13639_v18  ;;  %v13643_v1 = vpack.c.bf16 %v13634_v43, %v13619_v16  ;;  %v13647_v28 = vsel %vm1653_vm3, %v3939_v22, %v3940_v14 }
 0x66d   : > { %18169 = vst [vmem:[#allocation62_spill] sm:$0xff] %v13647_v28  ;;  %v13650_v62 = vmul.f32 %v3833_v47, %v18170_v25  ;;  %v3834_v60 = vmax.f32 %v9711_v44, 0.0 }
 0x66e   : > { %18168 = vst [vmem:[#allocation61_spill] sm:$0xff] %v13643_v1 }
 0x66f   : > { %18171 = vst [vmem:[#allocation69_spill] sm:$0xff] %v13650_v62  ;;  %v4103_v49 = vrot.slane %v13650_v62, 1  ;;  %v13656_v0 = vmul.f32 %v3834_v60, %v18172_v4  ;;  %v13660_v16 = vpack.c.bf16 %v13650_v62, %v13610_v23  ;;  %v3941_v1 = vrot.slane %v13650_v62, 7 }
 0x670   : > { %v3704_v22 = vpop.f32.mrb[56].mxu1 }
 0x671   : > { %18173 = vst [vmem:[#allocation70_spill] sm:$0xff] %v13656_v0  ;;  %18174 = vst [vmem:[#allocation77_spill] sm:$0xff] %v13660_v16  ;;  %v13665_v25 = vsel %vm1816_vm4, %v4102_v53, %v4103_v49  ;;  %v4104_v47 = vrot.slane %v13656_v0, 1  ;;  %v9712_v48 = vadd.f32 %v13027_v33, %v3704_v22  ;;  %v9510_v60 = vpop.f32.mrb[57].mxu1  ;;  %v13673_v23 = vsel %vm1653_vm3, %v3940_v14, %v3941_v1 }
 0x672   : > { %18175 = vst [vmem:[#allocation78_spill] sm:$0xff] %v13665_v25  ;;  %v3707_v4 = vpop.f32.mrb[58].mxu1  ;;  %18176 = vst [vmem:[#allocation85_spill] sm:$0xff] %v13673_v23  ;;  %v3942_v50 = vrot.slane %v13656_v0, 7  ;;  %v13685_v22 = vpack.c.bf16 %v13673_v23, %v13647_v28 }
 0x673   : > { %v13680_v53 = vsel %vm1816_vm4, %v4103_v49, %v4104_v47  ;;  %v3835_v34 = vmax.f32 %v9712_v48, 0.0  ;;  %v9713_v44 = vadd.f32 %v13027_v33, %v3707_v4  ;;  %v9511_v62 = vpop.f32.mrb[59].mxu1  ;;  %v18183_v4 = vld [vmem:[#allocation97_spill] sm:$0xff] }
 0x674   : > { %18177 = vst [vmem:[#allocation86_spill] sm:$0xff] %v13680_v53  ;;  %18178 = vst [vmem:[#allocation93_spill] sm:$0xff] %v13685_v22  ;;  %v13689_v14 = vpack.c.bf16 %v13680_v53, %v13665_v25  ;;  %v13693_v60 = vsel %vm1653_vm3, %v3941_v1, %v3942_v50 }
 0x675   : > { %18180 = vst [vmem:[#allocation226_spill] sm:$0xff] %v13693_v60  ;;  %v13696_v43 = vmul.f32 %v3835_v34, %v18181_v20  ;;  %v3836_v49 = vmax.f32 %v9713_v44, 0.0 }
 0x676   : > { %18179 = vst [vmem:[#allocation225_spill] sm:$0xff] %v13689_v14 }
 0x677   : > { %18182 = vst [vmem:[#allocation19_spill] sm:$0xff] %v13696_v43  ;;  %v4105_v62 = vrot.slane %v13696_v43, 1  ;;  %v13702_v28 = vmul.f32 %v3836_v49, %v18183_v4  ;;  %v13706_v25 = vpack.c.bf16 %v13696_v43, %v13656_v0  ;;  %v3943_v14 = vrot.slane %v13696_v43, 7 }
 0x678   : > { %v3712_v1 = vpop.f32.mrb[60].mxu1 }
 0x679   : > { %18184 = vst [vmem:[#allocation7_spill] sm:$0xff] %v13702_v28  ;;  %18185 = vst [vmem:[#allocation8_spill] sm:$0xff] %v13706_v25  ;;  %v13711_v20 = vsel %vm1816_vm4, %v4104_v47, %v4105_v62  ;;  %v4106_v34 = vrot.slane %v13702_v28, 1  ;;  %v9714_v48 = vadd.f32 %v13027_v33, %v3712_v1  ;;  %v9514_v49 = vpop.f32.mrb[61].mxu1  ;;  %v13719_v0 = vsel %vm1653_vm3, %v3942_v50, %v3943_v14 }
 0x67a   : > { %18186 = vst [vmem:[#allocation9_spill] sm:$0xff] %v13711_v20  ;;  %v3715_v4 = vpop.f32.mrb[62].mxu1  ;;  %18187 = vst [vmem:[#allocation14_spill] sm:$0xff] %v13719_v0  ;;  %v3944_v23 = vrot.slane %v13702_v28, 7  ;;  %v13731_v1 = vpack.c.bf16 %v13719_v0, %v13693_v60 }
 0x67b   : > { %v13726_v47 = vsel %vm1816_vm4, %v4105_v62, %v4106_v34  ;;  %v3837_v36 = vmax.f32 %v9714_v48, 0.0  ;;  %v9715_v44 = vadd.f32 %v13027_v33, %v3715_v4  ;;  %v9515_v43 = vpop.f32.mrb[63].mxu1  ;;  %v18194_v4 = vld [vmem:[#allocation105_spill] sm:$0xff] }
 0x67c   : > { %18188 = vst [vmem:[#allocation15_spill] sm:$0xff] %v13726_v47  ;;  %18189 = vst [vmem:[#allocation18_spill] sm:$0xff] %v13731_v1  ;;  %v13735_v50 = vpack.c.bf16 %v13726_v47, %v13711_v20  ;;  %v13739_v49 = vsel %vm1653_vm3, %v3943_v14, %v3944_v23 }
 0x67d   : > { %18191 = vst [vmem:[#allocation24_spill] sm:$0xff] %v13739_v49  ;;  %v13742_v53 = vmul.f32 %v3837_v36, %v18192_v26  ;;  %v3838_v62 = vmax.f32 %v9715_v44, 0.0 }
 0x67e   : > { %18190 = vst [vmem:[#allocation21_spill] sm:$0xff] %v13735_v50 }
 0x67f   : > { %18193 = vst [vmem:[#allocation27_spill] sm:$0xff] %v13742_v53  ;;  %v4107_v43 = vrot.slane %v13742_v53, 1  ;;  %v13748_v60 = vmul.f32 %v3838_v62, %v18194_v4  ;;  %v13752_v20 = vpack.c.bf16 %v13742_v53, %v13702_v28  ;;  %v3945_v50 = vrot.slane %v13742_v53, 7 }
 0x680   : > { %v3720_v14 = vpop.f32.mrb[64].mxu1 }
 0x681   : > { %18195 = vst [vmem:[#allocation30_spill] sm:$0xff] %v13748_v60  ;;  %18196 = vst [vmem:[#allocation33_spill] sm:$0xff] %v13752_v20  ;;  %v13757_v36 = vsel %vm1816_vm4, %v4106_v34, %v4107_v43  ;;  %v4108_v26 = vrot.slane %v13748_v60, 1  ;;  %v9716_v48 = vadd.f32 %v13027_v33, %v3720_v14  ;;  %v9518_v62 = vpop.f32.mrb[65].mxu1  ;;  %v13765_v28 = vsel %vm1653_vm3, %v3944_v23, %v3945_v50 }
 0x682   : > { %18197 = vst [vmem:[#allocation36_spill] sm:$0xff] %v13757_v36  ;;  %v3723_v4 = vpop.f32.mrb[66].mxu1  ;;  %18198 = vst [vmem:[#allocation39_spill] sm:$0xff] %v13765_v28  ;;  %v3946_v0 = vrot.slane %v13748_v60, 7  ;;  %v13777_v14 = vpack.c.bf16 %v13765_v28, %v13739_v49 }
 0x683   : > { %v13772_v34 = vsel %vm1816_vm4, %v4107_v43, %v4108_v26  ;;  %v3839_v51 = vmax.f32 %v9716_v48, 0.0  ;;  %v9717_v44 = vadd.f32 %v13027_v33, %v3723_v4  ;;  %v9519_v53 = vpop.f32.mrb[67].mxu1  ;;  %v18205_v4 = vld [vmem:[#allocation113_spill] sm:$0xff] }
 0x684   : > { %18199 = vst [vmem:[#allocation42_spill] sm:$0xff] %v13772_v34  ;;  %18200 = vst [vmem:[#allocation45_spill] sm:$0xff] %v13777_v14  ;;  %v13781_v23 = vpack.c.bf16 %v13772_v34, %v13757_v36  ;;  %v13785_v62 = vsel %vm1653_vm3, %v3945_v50, %v3946_v0 }
 0x685   : > { %18202 = vst [vmem:[#allocation51_spill] sm:$0xff] %v13785_v62  ;;  %v13788_v47 = vmul.f32 %v3839_v51, %v18203_v2  ;;  %v3840_v43 = vmax.f32 %v9717_v44, 0.0 }
 0x686   : > { %18201 = vst [vmem:[#allocation48_spill] sm:$0xff] %v13781_v23 }
 0x687   : > { %18204 = vst [vmem:[#allocation54_spill] sm:$0xff] %v13788_v47  ;;  %v4109_v53 = vrot.slane %v13788_v47, 1  ;;  %v13794_v49 = vmul.f32 %v3840_v43, %v18205_v4  ;;  %v13798_v36 = vpack.c.bf16 %v13788_v47, %v13748_v60  ;;  %v3947_v23 = vrot.slane %v13788_v47, 7 }
 0x688   : > { %v3728_v50 = vpop.f32.mrb[68].mxu1 }
 0x689   : > { %18206 = vst [vmem:[#allocation57_spill] sm:$0xff] %v13794_v49  ;;  %18207 = vst [vmem:[#allocation60_spill] sm:$0xff] %v13798_v36  ;;  %v13803_v2 = vsel %vm1816_vm4, %v4108_v26, %v4109_v53  ;;  %v4110_v51 = vrot.slane %v13794_v49, 1  ;;  %v9718_v48 = vadd.f32 %v13027_v33, %v3728_v50  ;;  %v9522_v43 = vpop.f32.mrb[69].mxu1  ;;  %v13811_v60 = vsel %vm1653_vm3, %v3946_v0, %v3947_v23 }
 0x68a   : > { %18208 = vst [vmem:[#allocation65_spill] sm:$0xff] %v13803_v2  ;;  %v3731_v4 = vpop.f32.mrb[70].mxu1  ;;  %18209 = vst [vmem:[#allocation68_spill] sm:$0xff] %v13811_v60  ;;  %v3948_v28 = vrot.slane %v13794_v49, 7  ;;  %v13823_v50 = vpack.c.bf16 %v13811_v60, %v13785_v62 }
 0x68b   : > { %v13818_v26 = vsel %vm1816_vm4, %v4109_v53, %v4110_v51  ;;  %v3841_v13 = vmax.f32 %v9718_v48, 0.0  ;;  %v9719_v44 = vadd.f32 %v13027_v33, %v3731_v4  ;;  %v9523_v47 = vpop.f32.mrb[71].mxu1  ;;  %v18216_v4 = vld [vmem:[#allocation121_spill] sm:$0xff] }
 0x68c   : > { %18210 = vst [vmem:[#allocation73_spill] sm:$0xff] %v13818_v26  ;;  %18211 = vst [vmem:[#allocation76_spill] sm:$0xff] %v13823_v50  ;;  %v13827_v0 = vpack.c.bf16 %v13818_v26, %v13803_v2  ;;  %v13831_v43 = vsel %vm1653_vm3, %v3947_v23, %v3948_v28 }
 0x68d   : > { %18213 = vst [vmem:[#allocation84_spill] sm:$0xff] %v13831_v43  ;;  %v13834_v34 = vmul.f32 %v3841_v13, %v18214_v5  ;;  %v3842_v53 = vmax.f32 %v9719_v44, 0.0 }
 0x68e   : > { %18212 = vst [vmem:[#allocation81_spill] sm:$0xff] %v13827_v0 }
 0x68f   : > { %18215 = vst [vmem:[#allocation89_spill] sm:$0xff] %v13834_v34  ;;  %v4111_v47 = vrot.slane %v13834_v34, 1  ;;  %v13840_v62 = vmul.f32 %v3842_v53, %v18216_v4  ;;  %v13844_v2 = vpack.c.bf16 %v13834_v34, %v13794_v49  ;;  %v3949_v0 = vrot.slane %v13834_v34, 7 }
 0x690   : > { %v3736_v23 = vpop.f32.mrb[72].mxu1 }
 0x691   : > { %18217 = vst [vmem:[#allocation92_spill] sm:$0xff] %v13840_v62  ;;  %18218 = vst [vmem:[#allocation97_spill] sm:$0xff] %v13844_v2  ;;  %v13849_v5 = vsel %vm1816_vm4, %v4110_v51, %v4111_v47  ;;  %v4112_v13 = vrot.slane %v13840_v62, 1  ;;  %v9720_v48 = vadd.f32 %v13027_v33, %v3736_v23  ;;  %v9526_v53 = vpop.f32.mrb[73].mxu1  ;;  %v13857_v49 = vsel %vm1653_vm3, %v3948_v28, %v3949_v0 }
 0x692   : > { %18219 = vst [vmem:[#allocation100_spill] sm:$0xff] %v13849_v5  ;;  %v3739_v4 = vpop.f32.mrb[74].mxu1  ;;  %18220 = vst [vmem:[#allocation105_spill] sm:$0xff] %v13857_v49  ;;  %v3950_v60 = vrot.slane %v13840_v62, 7  ;;  %v13869_v23 = vpack.c.bf16 %v13857_v49, %v13831_v43 }
 0x693   : > { %v13864_v51 = vsel %vm1816_vm4, %v4111_v47, %v4112_v13  ;;  %v3843_v30 = vmax.f32 %v9720_v48, 0.0  ;;  %v9721_v44 = vadd.f32 %v13027_v33, %v3739_v4  ;;  %v9527_v34 = vpop.f32.mrb[75].mxu1  ;;  %v18227_v4 = vld [vmem:[#allocation129_spill] sm:$0xff] }
 0x694   : > { %18221 = vst [vmem:[#allocation108_spill] sm:$0xff] %v13864_v51  ;;  %18222 = vst [vmem:[#allocation113_spill] sm:$0xff] %v13869_v23  ;;  %v13873_v28 = vpack.c.bf16 %v13864_v51, %v13849_v5  ;;  %v13877_v53 = vsel %vm1653_vm3, %v3949_v0, %v3950_v60 }
 0x695   : > { %18224 = vst [vmem:[#allocation121_spill] sm:$0xff] %v13877_v53  ;;  %v13880_v26 = vmul.f32 %v3843_v30, %v18225_v57  ;;  %v3844_v47 = vmax.f32 %v9721_v44, 0.0 }
 0x696   : > { %18223 = vst [vmem:[#allocation116_spill] sm:$0xff] %v13873_v28 }
 0x697   : > { %18226 = vst [vmem:[#allocation124_spill] sm:$0xff] %v13880_v26  ;;  %v4113_v34 = vrot.slane %v13880_v26, 1  ;;  %v13886_v43 = vmul.f32 %v3844_v47, %v18227_v4  ;;  %v13890_v5 = vpack.c.bf16 %v13880_v26, %v13840_v62  ;;  %v3951_v28 = vrot.slane %v13880_v26, 7 }
 0x698   : > { %v3744_v0 = vpop.f32.mrb[76].mxu1 }
 0x699   : > { %18228 = vst [vmem:[#allocation129_spill] sm:$0xff] %v13886_v43  ;;  %18229 = vst [vmem:[#allocation227_spill] sm:$0xff] %v13890_v5  ;;  %v13895_v30 = vsel %vm1816_vm4, %v4112_v13, %v4113_v34  ;;  %v4114_v57 = vrot.slane %v13886_v43, 1  ;;  %v9722_v48 = vadd.f32 %v13027_v33, %v3744_v0  ;;  %v9530_v47 = vpop.f32.mrb[77].mxu1  ;;  %v13903_v62 = vsel %vm1653_vm3, %v3950_v60, %v3951_v28 }
 0x69a   : > { %18230 = vst [vmem:[#allocation228_spill] sm:$0xff] %v13895_v30  ;;  %v3747_v4 = vpop.f32.mrb[78].mxu1  ;;  %18231 = vst [vmem:[#allocation229_spill] sm:$0xff] %v13903_v62  ;;  %v3952_v49 = vrot.slane %v13886_v43, 7  ;;  %v13915_v0 = vpack.c.bf16 %v13903_v62, %v13877_v53 }
 0x69b   : > { %v13910_v13 = vsel %vm1816_vm4, %v4113_v34, %v4114_v57  ;;  %v3845_v11 = vmax.f32 %v9722_v48, 0.0  ;;  %v9723_v44 = vadd.f32 %v13027_v33, %v3747_v4  ;;  %v9531_v26 = vpop.f32.mrb[79].mxu1  ;;  %v18238_v4 = vld [vmem:[#allocation137_spill] sm:$0xff] }
 0x69c   : > { %18232 = vst [vmem:[#allocation230_spill] sm:$0xff] %v13910_v13  ;;  %18233 = vst [vmem:[#allocation231_spill] sm:$0xff] %v13915_v0  ;;  %v13919_v60 = vpack.c.bf16 %v13910_v13, %v13895_v30  ;;  %v13923_v47 = vsel %vm1653_vm3, %v3951_v28, %v3952_v49 }
 0x69d   : > { %18235 = vst [vmem:[#allocation233_spill] sm:$0xff] %v13923_v47  ;;  %v13926_v51 = vmul.f32 %v3845_v11, %v18236_v40  ;;  %v3846_v34 = vmax.f32 %v9723_v44, 0.0 }
 0x69e   : > { %18234 = vst [vmem:[#allocation232_spill] sm:$0xff] %v13919_v60 }
 0x69f   : > { %18237 = vst [vmem:[#allocation132_spill] sm:$0xff] %v13926_v51  ;;  %v4115_v26 = vrot.slane %v13926_v51, 1  ;;  %v13932_v53 = vmul.f32 %v3846_v34, %v18238_v4  ;;  %v13936_v30 = vpack.c.bf16 %v13926_v51, %v13886_v43  ;;  %v3953_v60 = vrot.slane %v13926_v51, 7 }
 0x6a0   : > { %v3752_v28 = vpop.f32.mrb[80].mxu1 }
 0x6a1   : > { %18239 = vst [vmem:[#allocation137_spill] sm:$0xff] %v13932_v53  ;;  %18240 = vst [vmem:[#allocation234_spill] sm:$0xff] %v13936_v30  ;;  %v13941_v40 = vsel %vm1816_vm4, %v4114_v57, %v4115_v26  ;;  %v4116_v11 = vrot.slane %v13932_v53, 1  ;;  %v9724_v48 = vadd.f32 %v13027_v33, %v3752_v28  ;;  %v9534_v34 = vpop.f32.mrb[81].mxu1  ;;  %v13949_v43 = vsel %vm1653_vm3, %v3952_v49, %v3953_v60 }
 0x6a2   : > { %18241 = vst [vmem:[#allocation235_spill] sm:$0xff] %v13941_v40  ;;  %v3755_v4 = vpop.f32.mrb[82].mxu1  ;;  %18242 = vst [vmem:[#allocation236_spill] sm:$0xff] %v13949_v43  ;;  %v3954_v62 = vrot.slane %v13932_v53, 7  ;;  %v13961_v28 = vpack.c.bf16 %v13949_v43, %v13923_v47  ;;  %v18258_v47 = vld [vmem:[#allocation148_spill] sm:$0xff] }
 0x6a3   : > { %v13956_v57 = vsel %vm1816_vm4, %v4115_v26, %v4116_v11  ;;  %v3847_v12 = vmax.f32 %v9724_v48, 0.0  ;;  %v9725_v44 = vadd.f32 %v13027_v33, %v3755_v4  ;;  %v9535_v51 = vpop.f32.mrb[83].mxu1  ;;  %v18249_v48 = vld [vmem:[#allocation145_spill] sm:$0xff] }
 0x6a4   : > { %18243 = vst [vmem:[#allocation237_spill] sm:$0xff] %v13956_v57  ;;  %18244 = vst [vmem:[#allocation238_spill] sm:$0xff] %v13961_v28  ;;  %v13965_v49 = vpack.c.bf16 %v13956_v57, %v13941_v40  ;;  %v13969_v34 = vsel %vm1653_vm3, %v3953_v60, %v3954_v62 }
 0x6a5   : > { %18246 = vst [vmem:[#allocation240_spill] sm:$0xff] %v13969_v34  ;;  %v13972_v13 = vmul.f32 %v3847_v12, %v18247_v38  ;;  %v3848_v26 = vmax.f32 %v9725_v44, 0.0 }
 0x6a6   : > { %18245 = vst [vmem:[#allocation239_spill] sm:$0xff] %v13965_v49 }
 0x6a7   : > { %18248 = vst [vmem:[#allocation140_spill] sm:$0xff] %v13972_v13  ;;  %v4117_v51 = vrot.slane %v13972_v13, 1  ;;  %v13978_v4 = vmul.f32 %v3848_v26, %v18249_v48  ;;  %v13982_v40 = vpack.c.bf16 %v13972_v13, %v13932_v53  ;;  %v3955_v49 = vrot.slane %v13972_v13, 7  ;;  %v13995_v26 = vld [vmem:[%s16781_s7] ss:$0 sm:$0xff] }
 0x6a8   : > { %v3760_v60 = vpop.f32.mrb[84].mxu1 }
 0x6a9   : > { %18250 = vst [vmem:[#allocation145_spill] sm:$0xff] %v13978_v4  ;;  %18251 = vst [vmem:[#allocation241_spill] sm:$0xff] %v13982_v40  ;;  %v13987_v12 = vsel %vm1816_vm4, %v4116_v11, %v4117_v51  ;;  %v4118_v38 = vrot.slane %v13978_v4, 1  ;;  %v9726_v48 = vadd.f32 %v13995_v26, %v3760_v60  ;;  %v9538_v33 = vpop.f32.mrb[85].mxu1  ;;  %v14000_v43 = vsel %vm1653_vm3, %v3954_v62, %v3955_v49 }
 0x6aa   : > { %18252 = vst [vmem:[#allocation242_spill] sm:$0xff] %v13987_v12  ;;  %v3763_v53 = vpop.f32.mrb[86].mxu1  ;;  %18253 = vst [vmem:[#allocation243_spill] sm:$0xff] %v14000_v43  ;;  %v3956_v11 = vrot.slane %v13978_v4, 7  ;;  %v14012_v33 = vpack.c.bf16 %v14000_v43, %v13969_v34 }
 0x6ab   : > { %v14007_v44 = vsel %vm1816_vm4, %v4117_v51, %v4118_v38  ;;  %v3849_v13 = vmax.f32 %v9726_v48, 0.0  ;;  %v9727_v54 = vadd.f32 %v13995_v26, %v3763_v53  ;;  %v9539_v58 = vpop.f32.mrb[87].mxu1  ;;  %v18260_v48 = vld [vmem:[#allocation153_spill] sm:$0xff] }
 0x6ac   : > { %18254 = vst [vmem:[#allocation244_spill] sm:$0xff] %v14007_v44  ;;  %18255 = vst [vmem:[#allocation245_spill] sm:$0xff] %v14012_v33  ;;  %v14016_v62 = vpack.c.bf16 %v14007_v44, %v13987_v12  ;;  %v14020_v60 = vsel %vm1653_vm3, %v3955_v49, %v3956_v11 }
 0x6ad   : > { %18257 = vst [vmem:[#allocation247_spill] sm:$0xff] %v14020_v60  ;;  %v14023_v57 = vmul.f32 %v3849_v13, %v18258_v47  ;;  %v3850_v51 = vmax.f32 %v9727_v54, 0.0 }
 0x6ae   : > { %18256 = vst [vmem:[#allocation246_spill] sm:$0xff] %v14016_v62 }
 0x6af   : > { %18259 = vst [vmem:[#allocation148_spill] sm:$0xff] %v14023_v57  ;;  %v4119_v58 = vrot.slane %v14023_v57, 1  ;;  %v14029_v34 = vmul.f32 %v3850_v51, %v18260_v48  ;;  %v14033_v12 = vpack.c.bf16 %v14023_v57, %v13978_v4  ;;  %v3957_v62 = vrot.slane %v14023_v57, 7 }
 0x6b0   : > { %v3768_v49 = vpop.f32.mrb[88].mxu1 }
 0x6b1   : > { %18261 = vst [vmem:[#allocation153_spill] sm:$0xff] %v14029_v34  ;;  %18262 = vst [vmem:[#allocation248_spill] sm:$0xff] %v14033_v12  ;;  %v14038_v13 = vsel %vm1816_vm4, %v4118_v38, %v4119_v58  ;;  %v4120_v54 = vrot.slane %v14029_v34, 1  ;;  %v9728_v53 = vadd.f32 %v13995_v26, %v3768_v49  ;;  %v9542_v51 = vpop.f32.mrb[89].mxu1  ;;  %v14046_v4 = vsel %vm1653_vm3, %v3956_v11, %v3957_v62 }
 0x6b2   : > { %18263 = vst [vmem:[#allocation249_spill] sm:$0xff] %v14038_v13  ;;  %v3771_v48 = vpop.f32.mrb[90].mxu1  ;;  %18264 = vst [vmem:[#allocation250_spill] sm:$0xff] %v14046_v4  ;;  %v3958_v43 = vrot.slane %v14029_v34, 7  ;;  %v14058_v49 = vpack.c.bf16 %v14046_v4, %v14020_v60 }
 0x6b3   : > { %v14053_v38 = vsel %vm1816_vm4, %v4119_v58, %v4120_v54  ;;  %v3851_v12 = vmax.f32 %v9728_v53, 0.0  ;;  %v9729_v47 = vadd.f32 %v13995_v26, %v3771_v48  ;;  %v9543_v57 = vpop.f32.mrb[91].mxu1  ;;  %v18271_v48 = vld [vmem:[#allocation161_spill] sm:$0xff] }
 0x6b4   : > { %18265 = vst [vmem:[#allocation251_spill] sm:$0xff] %v14053_v38  ;;  %18266 = vst [vmem:[#allocation252_spill] sm:$0xff] %v14058_v49  ;;  %v14062_v11 = vpack.c.bf16 %v14053_v38, %v14038_v13  ;;  %v14066_v51 = vsel %vm1653_vm3, %v3957_v62, %v3958_v43 }
 0x6b5   : > { %18268 = vst [vmem:[#allocation254_spill] sm:$0xff] %v14066_v51  ;;  %v14069_v44 = vmul.f32 %v3851_v12, %v18269_v55  ;;  %v3852_v58 = vmax.f32 %v9729_v47, 0.0 }
 0x6b6   : > { %18267 = vst [vmem:[#allocation253_spill] sm:$0xff] %v14062_v11 }
 0x6b7   : > { %18270 = vst [vmem:[#allocation156_spill] sm:$0xff] %v14069_v44  ;;  %v4121_v57 = vrot.slane %v14069_v44, 1  ;;  %v14075_v60 = vmul.f32 %v3852_v58, %v18271_v48  ;;  %v14079_v13 = vpack.c.bf16 %v14069_v44, %v14029_v34  ;;  %v3959_v11 = vrot.slane %v14069_v44, 7 }
 0x6b8   : > { %v3776_v62 = vpop.f32.mrb[92].mxu1 }
 0x6b9   : > { %18272 = vst [vmem:[#allocation161_spill] sm:$0xff] %v14075_v60  ;;  %18273 = vst [vmem:[#allocation255_spill] sm:$0xff] %v14079_v13  ;;  %v14084_v55 = vsel %vm1816_vm4, %v4120_v54, %v4121_v57  ;;  %v4122_v12 = vrot.slane %v14075_v60, 1  ;;  %v9730_v53 = vadd.f32 %v13995_v26, %v3776_v62  ;;  %v9546_v58 = vpop.f32.mrb[93].mxu1  ;;  %v14092_v34 = vsel %vm1653_vm3, %v3958_v43, %v3959_v11  ;;  %v18280_v13 = vld [vmem:[#allocation164_spill] sm:$0xff] }
 0x6ba   : > { %18274 = vst [vmem:[#allocation256_spill] sm:$0xff] %v14084_v55  ;;  %v3779_v48 = vpop.f32.mrb[94].mxu1  ;;  %18275 = vst [vmem:[#allocation257_spill] sm:$0xff] %v14092_v34  ;;  %v3960_v4 = vrot.slane %v14075_v60, 7  ;;  %v14104_v62 = vpack.c.bf16 %v14092_v34, %v14066_v51 }
 0x6bb   : > { %v14099_v54 = vsel %vm1816_vm4, %v4121_v57, %v4122_v12  ;;  %v3853_v49 = vmax.f32 %v9730_v53, 0.0  ;;  %v9731_v47 = vadd.f32 %v13995_v26, %v3779_v48  ;;  %v9547_v44 = vpop.f32.mrb[95].mxu1  ;;  %v18282_v48 = vld [vmem:[#allocation169_spill] sm:$0xff] }
 0x6bc   : > { %18276 = vst [vmem:[#allocation258_spill] sm:$0xff] %v14099_v54  ;;  %18277 = vst [vmem:[#allocation259_spill] sm:$0xff] %v14104_v62  ;;  %v14108_v43 = vpack.c.bf16 %v14099_v54, %v14084_v55  ;;  %v14112_v58 = vsel %vm1653_vm3, %v3959_v11, %v3960_v4 }
 0x6bd   : > { %18279 = vst [vmem:[#allocation261_spill] sm:$0xff] %v14112_v58  ;;  %v14115_v38 = vmul.f32 %v3853_v49, %v18280_v13  ;;  %v3854_v57 = vmax.f32 %v9731_v47, 0.0 }
 0x6be   : > { %18278 = vst [vmem:[#allocation260_spill] sm:$0xff] %v14108_v43 }
 0x6bf   : > { %18281 = vst [vmem:[#allocation164_spill] sm:$0xff] %v14115_v38  ;;  %v4123_v44 = vrot.slane %v14115_v38, 1  ;;  %v14121_v51 = vmul.f32 %v3854_v57, %v18282_v48  ;;  %v14125_v55 = vpack.c.bf16 %v14115_v38, %v14075_v60  ;;  %v3961_v43 = vrot.slane %v14115_v38, 7 }
 0x6c0   : > { %v3784_v11 = vpop.f32.mrb[96].mxu1 }
 0x6c1   : > { %18283 = vst [vmem:[#allocation169_spill] sm:$0xff] %v14121_v51  ;;  %18284 = vst [vmem:[#allocation262_spill] sm:$0xff] %v14125_v55  ;;  %v14130_v13 = vsel %vm1816_vm4, %v4122_v12, %v4123_v44  ;;  %v4124_v49 = vrot.slane %v14121_v51, 1  ;;  %v9732_v53 = vadd.f32 %v13995_v26, %v3784_v11  ;;  %v9550_v57 = vpop.f32.mrb[97].mxu1  ;;  %v14138_v60 = vsel %vm1653_vm3, %v3960_v4, %v3961_v43  ;;  %v18291_v55 = vld [vmem:[#allocation172_spill] sm:$0xff] }
 0x6c2   : > { %18285 = vst [vmem:[#allocation263_spill] sm:$0xff] %v14130_v13  ;;  %v3787_v48 = vpop.f32.mrb[98].mxu1  ;;  %18286 = vst [vmem:[#allocation264_spill] sm:$0xff] %v14138_v60  ;;  %v3962_v34 = vrot.slane %v14121_v51, 7  ;;  %v14150_v11 = vpack.c.bf16 %v14138_v60, %v14112_v58 }
 0x6c3   : > { %v14145_v12 = vsel %vm1816_vm4, %v4123_v44, %v4124_v49  ;;  %v3855_v62 = vmax.f32 %v9732_v53, 0.0  ;;  %v9733_v47 = vadd.f32 %v13995_v26, %v3787_v48  ;;  %v9551_v38 = vpop.f32.mrb[99].mxu1  ;;  %v18293_v48 = vld [vmem:[#allocation176_spill] sm:$0xff] }
 0x6c4   : > { %18287 = vst [vmem:[#allocation265_spill] sm:$0xff] %v14145_v12  ;;  %18288 = vst [vmem:[#allocation266_spill] sm:$0xff] %v14150_v11  ;;  %v14154_v4 = vpack.c.bf16 %v14145_v12, %v14130_v13  ;;  %v14158_v57 = vsel %vm1653_vm3, %v3961_v43, %v3962_v34 }
 0x6c5   : > { %18290 = vst [vmem:[#allocation268_spill] sm:$0xff] %v14158_v57  ;;  %v14161_v54 = vmul.f32 %v3855_v62, %v18291_v55  ;;  %v3856_v44 = vmax.f32 %v9733_v47, 0.0 }
 0x6c6   : > { %18289 = vst [vmem:[#allocation267_spill] sm:$0xff] %v14154_v4 }
 0x6c7   : > { %18292 = vst [vmem:[#allocation172_spill] sm:$0xff] %v14161_v54  ;;  %v4125_v38 = vrot.slane %v14161_v54, 1  ;;  %v14167_v58 = vmul.f32 %v3856_v44, %v18293_v48  ;;  %v14171_v13 = vpack.c.bf16 %v14161_v54, %v14121_v51  ;;  %v3963_v4 = vrot.slane %v14161_v54, 7 }
 0x6c8   : > { %v3792_v43 = vpop.f32.mrb[100].mxu1 }
 0x6c9   : > { %18294 = vst [vmem:[#allocation176_spill] sm:$0xff] %v14167_v58  ;;  %18295 = vst [vmem:[#allocation269_spill] sm:$0xff] %v14171_v13  ;;  %v14176_v55 = vsel %vm1816_vm4, %v4124_v49, %v4125_v38  ;;  %v4126_v62 = vrot.slane %v14167_v58, 1  ;;  %v9734_v53 = vadd.f32 %v13995_v26, %v3792_v43  ;;  %v9554_v44 = vpop.f32.mrb[101].mxu1  ;;  %v14184_v51 = vsel %vm1653_vm3, %v3962_v34, %v3963_v4 }
 0x6ca   : > { %18296 = vst [vmem:[#allocation270_spill] sm:$0xff] %v14176_v55  ;;  %v3795_v48 = vpop.f32.mrb[102].mxu1  ;;  %18297 = vst [vmem:[#allocation271_spill] sm:$0xff] %v14184_v51  ;;  %v3964_v60 = vrot.slane %v14167_v58, 7  ;;  %v14196_v43 = vpack.c.bf16 %v14184_v51, %v14158_v57  ;;  %v9684_v34 = vadd.f32 %v13995_v26, %v13022_v46  ;;  %v18304_v46 = vld [vmem:[#allocation4_spill] sm:$0xff] }
 0x6cb   : > { %v14191_v49 = vsel %vm1816_vm4, %v4125_v38, %v4126_v62  ;;  %v3857_v11 = vmax.f32 %v9734_v53, 0.0  ;;  %v9735_v47 = vadd.f32 %v13995_v26, %v3795_v48  ;;  %v9555_v54 = vpop.f32.mrb[103].mxu1  ;;  %v18302_v38 = vld [vmem:[#allocation2_spill] sm:$0xff] }
 0x6cc   : > { %18298 = vst [vmem:[#allocation272_spill] sm:$0xff] %v14191_v49  ;;  %18299 = vst [vmem:[#allocation273_spill] sm:$0xff] %v14196_v43  ;;  %v14202_v44 = vpack.c.bf16 %v14191_v49, %v14176_v55  ;;  %v14206_v13 = vsel %vm1653_vm3, %v3963_v4, %v3964_v60  ;;  %v3807_v4 = vmax.f32 %v9684_v34, 0.0  ;;  %v18311_v34 = vld [vmem:[#allocation5_spill] sm:$0xff] }
 0x6cd   : > { %18301 = vst [vmem:[#allocation275_spill] sm:$0xff] %v14206_v13  ;;  %v14209_v53 = vmul.f32 %v3857_v11, %v18302_v38  ;;  %v3858_v48 = vmax.f32 %v9735_v47, 0.0 }
 0x6ce   : > { %18300 = vst [vmem:[#allocation274_spill] sm:$0xff] %v14202_v44 }
 0x6cf   : > { %18303 = vst [vmem:[#allocation2_spill] sm:$0xff] %v14209_v53  ;;  %v3965_v12 = vrot.slane %v14209_v53, 7  ;;  %v4127_v57 = vrot.slane %v14209_v53, 1  ;;  %v14216_v43 = vmul.f32 %v3858_v48, %v18304_v46  ;;  %v14220_v55 = vpack.c.bf16 %v14209_v53, %v14167_v58 }
 0x6d0   : > { %v3800_v44 = vpop.f32.mrb[104].mxu1  ;;  %v14257_v53 = vmul.f32 %v3807_v4, %v18311_v34 }
 0x6d1   : > { %18305 = vst [vmem:[#allocation4_spill] sm:$0xff] %v14216_v43  ;;  %18306 = vst [vmem:[#allocation276_spill] sm:$0xff] %v14220_v55  ;;  %v14224_v11 = vsel %vm1816_vm4, %v4126_v62, %v4127_v57  ;;  %v3966_v47 = vrot.slane %v14216_v43, 7  ;;  %v4128_v38 = vrot.slane %v14216_v43, 1  ;;  %v9558_v51 = vpop.f32.mrb[105].mxu1  ;;  %v9736_v48 = vadd.f32 %v13995_v26, %v3800_v44 }
 0x6d2   : > { %18307 = vst [vmem:[#allocation277_spill] sm:$0xff] %v14224_v11  ;;  %v3803_v46 = vpop.f32.mrb[106].mxu1  ;;  %v14233_v58 = vsel %vm1653_vm3, %v3964_v60, %v3965_v12 }
 0x6d3   : > { %v14239_v62 = vsel %vm1816_vm4, %v4127_v57, %v4128_v38  ;;  %v9737_v55 = vadd.f32 %v13995_v26, %v3803_v46  ;;  %v9559_v33 = vpop.f32.mrb[107].mxu1  ;;  %v14244_v51 = vsel %vm1653_vm3, %v3965_v12, %v3966_v47  ;;  %v14248_v44 = vpack.c.bf16 %v14233_v58, %v14206_v13  ;;  %v18314_v12 = vld [vmem:[#allocation6_spill] sm:$0xff] }
 0x6d4   : > { %18308 = vst [vmem:[#allocation278_spill] sm:$0xff] %v14239_v62  ;;  %v14252_v60 = vpack.c.bf16 %v14239_v62, %v14224_v11  ;;  %v3859_v54 = vmax.f32 %v9736_v48, 0.0  ;;  %v18312_v33 = vld [vmem:[#allocation3_spill] sm:$0xff]  ;;  %v10315_v11 = vld [vmem:[%s16782_s8 + $0x80] sm:$0xff]  }
 0x6d5   : > { %18309 = vst [vmem:[#allocation279_spill] sm:$0xff] %v14248_v44  ;;  %v3860_v26 = vmax.f32 %v9737_v55, 0.0  ;;  %v3915_v55 = vrot.slane %v14257_v53, 7 }
 0x6d6   : > { %18310 = vst [vmem:[#allocation280_spill] sm:$0xff] %v14252_v60  ;;  %v14260_v46 = vmul.f32 %v3859_v54, %v18312_v33 }
 0x6d7   : > { %v14263_v49 = vmul.f32 %v3860_v26, %v18314_v12 }
 0x6d8   : > { %18313 = vst [vmem:[#allocation5_spill] sm:$0xff] %v14260_v46  ;;  %v3967_v13 = vrot.slane %v14260_v46, 7  ;;  %v4129_v44 = vrot.slane %v14260_v46, 1  ;;  %v14269_v48 = vpack.c.bf16 %v14260_v46, %v14216_v43  ;;  %v18323_v46 = vrot.slane %v14257_v53, 1 }
 0x6d9   : > { %18315 = vst [vmem:[#allocation3_spill] sm:$0xff] %v14263_v49  ;;  %v4130_v57 = vrot.slane %v14263_v49, 1  ;;  %v3968_v54 = vrot.slane %v14263_v49, 7 }
 0x6da   : > { %18316 = vst [vmem:[#allocation6_spill] sm:$0xff] %v14269_v48  ;;  %4908 = vmatprep.mubr.bf16.mxu0 %v14269_v48  ;;  %v14279_v34 = vsel %vm1653_vm3, %v3966_v47, %v3967_v13  ;;  %v14283_v26 = vsel %vm1816_vm4, %v4128_v38, %v4129_v44  ;;  %v14304_v38 = vpack.c.bf16 %v14257_v53, %v14263_v49  ;;  %v18330_v49 = vld [vmem:[#allocation255_spill] sm:$0xff] }
 0x6db   : > { %18317 = vst [vmem:[#allocation281_spill] sm:$0xff] %v14283_v26  ;;  %v14288_v12 = vpack.c.bf16 %v14279_v34, %v14244_v51  ;;  %v14292_v4 = vsel %vm1653_vm3, %v3967_v13, %v3968_v54  ;;  %v14296_v48 = vsel %vm1653_vm3, %v3968_v54, %v3915_v55  ;;  %v14300_v47 = vsel %vm1816_vm4, %v4129_v44, %v4130_v57  ;;  %v18331_v44 = vld [vmem:[#allocation259_spill] sm:$0xff] }
 0x6dc   : > { %18319 = vst [vmem:[#allocation283_spill] sm:$0xff] %v14300_v47  ;;  %18320 = vst [vmem:[#allocation284_spill] sm:$0xff] %v14304_v38  ;;  %v14308_v33 = vpack.c.bf16 %v14296_v48, %v14292_v4  ;;  %v14312_v13 = vpack.c.bf16 %v14300_v47, %v14283_v26  ;;  %v14318_v54 = vsel %vm1816_vm4, %v4130_v57, %v18323_v46  ;;  %v18325_v57 = vrot.slane %v13032_v8, 7 }
 0x6dd   : > { %18318 = vst [vmem:[#allocation282_spill] sm:$0xff] %v14288_v12  ;;  %18324 = vst [vmem:[#allocation287_spill] sm:$0xff] %v14318_v54  ;;  %4909 = vmatmul.mubr.bf16.vlgmr.msra.gmra.mrb[108].mxu0 %v14288_v12  ;;  %v18336_v12 = vld [vmem:[#allocation276_spill] sm:$0xff] }
 0x6de   : > { %18321 = vst [vmem:[#allocation285_spill] sm:$0xff] %v14308_v33  ;;  %18322 = vst [vmem:[#allocation286_spill] sm:$0xff] %v14312_v13  ;;  %4916 = vmatprep.mubr.bf16.mxu0 %v14304_v38  ;;  %5126 = vmatpush1.bf16.msra.mxu0 %v10315_v11  ;;  %v14338_v46 = vsel %vm1653_vm3, %v3915_v55, %v18325_v57  ;;  %v10316_v11 = vld [vmem:[%s16782_s8 + $0x88] sm:$0xff]   ;;  %v10317_v55 = vld [vmem:[%s16782_s8 + $0x90] sm:$0xff]  }
 0x6df   : > { %5127 = vmatprep.subr.bf16.mxu0 %v17500_v39  ;;  %v14342_v43 = vpack.c.bf16 %v13059_v7, %v14338_v46  ;;  %v10318_v57 = vld [vmem:[%s16782_s8 + $0x98] sm:$0xff]  }
 0x6e0   : > { %v18335_v38 = vld [vmem:[#allocation273_spill] sm:$0xff] }
 0x6e1   : > { %18326 = vst [vmem:[#allocation288_spill] sm:$0xff] %v14342_v43 }
 0x6e2   : > { %5128 = vmatpush1.bf16.msra.mxu0 %v10316_v11  ;;  %v10319_v11 = vld [vmem:[%s16782_s8 + $0xa0] sm:$0xff]  }
 0x6e3   : > { %5129 = vmatprep.subr.bf16.mxu0 %v17500_v39 }
 0x6e5   : > { %4917 = vmatmul.mubr.bf16.gmra.mrb[112].mxu0 %v14308_v33  ;;  %v18334_v33 = vld [vmem:[#allocation269_spill] sm:$0xff] }
 0x6e6   : > { %4924 = vmatprep.mubr.bf16.mxu0 %v13044_v37  ;;  %5130 = vmatpush1.bf16.msra.mxu0 %v10317_v55  ;;  %v10320_v55 = vld [vmem:[%s16782_s8 + $0xa8] sm:$0xff]   ;;  %v18333_v37 = vld [vmem:[#allocation266_spill] sm:$0xff] }
 0x6e7   : > { %5131 = vmatprep.subr.bf16.mxu0 %v17500_v39 }
 0x6ea   : > { %5132 = vmatpush1.bf16.msra.mxu0 %v10318_v57  ;;  %v10321_v57 = vld [vmem:[%s16782_s8 + $0xb0] sm:$0xff]  }
 0x6eb   : > { %5133 = vmatprep.subr.bf16.mxu0 %v17500_v39 }
 0x6ed   : > { %4925 = vmatmul.mubr.bf16.gmra.mrb[116].mxu0 %v14342_v43  ;;  %v18332_v43 = vld [vmem:[#allocation262_spill] sm:$0xff] }
 0x6ee   : > { %4932 = vmatprep.mubr.bf16.mxu0 %v13093_v9  ;;  %5134 = vmatpush1.bf16.msra.mxu0 %v10319_v11  ;;  %v10322_v11 = vld [vmem:[%s16782_s8 + $0xb8] sm:$0xff]  }
 0x6ef   : > { %5135 = vmatprep.subr.bf16.mxu0 %v17500_v39 }
 0x6f2   : > { %5136 = vmatpush1.bf16.msra.mxu0 %v10320_v55  ;;  %v10323_v55 = vld [vmem:[%s16782_s8 + $0xc0] sm:$0xff]  }
 0x6f3   : > { %5137 = vmatprep.subr.bf16.mxu0 %v17500_v39 }
 0x6f5   : > { %4933 = vmatmul.mubr.bf16.gmra.mrb[120].mxu0 %v13107_v61 }
 0x6f6   : > { %4940 = vmatprep.mubr.bf16.mxu0 %v13143_v31  ;;  %5138 = vmatpush1.bf16.msra.mxu0 %v10321_v57  ;;  %v10324_v57 = vld [vmem:[%s16782_s8 + $0xc8] sm:$0xff]  }
 0x6f7   : > { %5139 = vmatprep.subr.bf16.mxu0 %v17500_v39 }
 0x6fa   : > { %5140 = vmatpush1.bf16.msra.mxu0 %v10322_v11  ;;  %v10325_v11 = vld [vmem:[%s16782_s8 + $0xd0] sm:$0xff]  }
 0x6fb   : > { %5141 = vmatprep.subr.bf16.mxu0 %v17500_v39 }
 0x6fd   : > { %4941 = vmatmul.mubr.bf16.gmra.mrb[124].mxu0 %v13157_v32 }
 0x6fe   : > { %4948 = vmatprep.mubr.bf16.mxu0 %v13192_v29  ;;  %5142 = vmatpush1.bf16.msra.mxu0 %v10323_v55  ;;  %v10326_v55 = vld [vmem:[%s16782_s8 + $0xd8] sm:$0xff]  }
 0x6ff   : > { %5143 = vmatprep.subr.bf16.mxu0 %v17500_v39 }
 0x702   : > { %5144 = vmatpush1.bf16.msra.mxu0 %v10324_v57  ;;  %v10327_v57 = vld [vmem:[%s16782_s8 + $0xe0] sm:$0xff]  }
 0x703   : > { %5145 = vmatprep.subr.bf16.mxu0 %v17500_v39 }
 0x705   : > { %4949 = vmatmul.mubr.bf16.gmra.mrb[128].mxu0 %v13210_v41 }
 0x706   : > { %4956 = vmatprep.mubr.bf16.mxu0 %v13246_v3  ;;  %5146 = vmatpush1.bf16.msra.mxu0 %v10325_v11  ;;  %v10328_v11 = vld [vmem:[%s16782_s8 + $0xe8] sm:$0xff]  }
 0x707   : > { %5147 = vmatprep.subr.bf16.mxu0 %v17500_v39 }
 0x70a   : > { %5148 = vmatpush1.bf16.msra.mxu0 %v10326_v55  ;;  %v10329_v55 = vld [vmem:[%s16782_s8 + $0xf0] sm:$0xff]  }
 0x70b   : > { %5149 = vmatprep.subr.bf16.mxu0 %v17500_v39 }
 0x70d   : > { %4957 = vmatmul.mubr.bf16.gmra.mrb[132].mxu0 %v13264_v17 }
 0x70e   : > { %4964 = vmatprep.mubr.bf16.mxu0 %v13300_v15  ;;  %5150 = vmatpush1.bf16.msra.mxu0 %v10327_v57  ;;  %v10330_v57 = vld [vmem:[%s16782_s8 + $0xf8] sm:$0xff]  }
 0x70f   : > { %5151 = vmatprep.subr.bf16.mxu0 %v17500_v39 }
 0x712   : > { %5152 = vmatpush1.bf16.msra.mxu0 %v10328_v11  ;;  %v18327_v11 = vld [vmem:[#allocation245_spill] sm:$0xff] }
 0x713   : > { %5153 = vmatprep.subr.bf16.mxu0 %v17500_v39 }
 0x715   : > { %4965 = vmatmul.mubr.bf16.gmra.mrb[136].mxu0 %v13318_v42 }
 0x716   : > { %4972 = vmatprep.mubr.bf16.mxu0 %v13354_v10  ;;  %5154 = vmatpush1.bf16.msra.mxu0 %v10329_v55  ;;  %v18328_v55 = vld [vmem:[#allocation248_spill] sm:$0xff] }
 0x717   : > { %5155 = vmatprep.subr.bf16.mxu0 %v17500_v39 }
 0x71a   : > { %5156 = vmatpush1.bf16.msra.mxu0 %v10330_v57  ;;  %v18329_v57 = vld [vmem:[#allocation252_spill] sm:$0xff] }
 0x71b   : > { %5374 = vmatprep.subr.bf16.mxu0 %v17500_v39 }
 0x71d   : > { %4973 = vmatmul.mubr.bf16.gmra.mrb[140].mxu0 %v13372_v27 }
 0x71e   : > { %4980 = vmatprep.mubr.bf16.mxu0 %v13408_v56 }
 0x725   : > { %4981 = vmatmul.mubr.bf16.gmra.mrb[144].mxu0 %v13426_v45 }
 0x726   : > { %4988 = vmatprep.mubr.bf16.mxu0 %v13463_v6  ;;  %v18388_v6 = vld [vmem:[#allocation85_spill] sm:$0xff] }
 0x72d   : > { %4989 = vmatmul.mubr.bf16.gmra.mrb[148].mxu0 %v13480_v63  ;;  %v18387_v63 = vld [vmem:[#allocation226_spill] sm:$0xff] }
 0x72e   : > { %4996 = vmatprep.mubr.bf16.mxu0 %v13517_v59  ;;  %v18386_v59 = vld [vmem:[#allocation32_spill] sm:$0xff] }
 0x735   : > { %4997 = vmatmul.mubr.bf16.gmra.mrb[152].mxu0 %v13546_v19 }
 0x736   : > { %5004 = vmatprep.mubr.bf16.mxu0 %v13568_v35 }
 0x73d   : > { %5005 = vmatmul.mubr.bf16.gmra.mrb[156].mxu0 %v13593_v24  ;;  %v18382_v24 = vld [vmem:[#allocation192_spill] sm:$0xff] }
 0x73e   : > { %5012 = vmatprep.mubr.bf16.mxu0 %v13614_v52 }
 0x745   : > { %5013 = vmatmul.mubr.bf16.gmra.mrb[160].mxu0 %v13639_v18 }
 0x746   : > { %5020 = vmatprep.mubr.bf16.mxu0 %v13660_v16 }
 0x74d   : > { %5021 = vmatmul.mubr.bf16.gmra.mrb[164].mxu0 %v13685_v22 }
 0x74e   : > { %5028 = vmatprep.mubr.bf16.mxu0 %v13706_v25 }
 0x755   : > { %5029 = vmatmul.mubr.bf16.gmra.mrb[168].mxu0 %v13731_v1 }
 0x756   : > { %5036 = vmatprep.mubr.bf16.mxu0 %v13752_v20 }
 0x75d   : > { %5037 = vmatmul.mubr.bf16.gmra.mrb[172].mxu0 %v13777_v14 }
 0x75e   : > { %5044 = vmatprep.mubr.bf16.mxu0 %v13798_v36 }
 0x765   : > { %5045 = vmatmul.mubr.bf16.gmra.mrb[176].mxu0 %v13823_v50 }
 0x766   : > { %5052 = vmatprep.mubr.bf16.mxu0 %v13844_v2 }
 0x76d   : > { %5053 = vmatmul.mubr.bf16.gmra.mrb[180].mxu0 %v13869_v23  ;;  %v18355_v23 = vld [vmem:[#allocation205_spill] sm:$0xff] }
 0x76e   : > { %5060 = vmatprep.mubr.bf16.mxu0 %v13890_v5 }
 0x775   : > { %5061 = vmatmul.mubr.bf16.gmra.mrb[184].mxu0 %v13915_v0 }
 0x776   : > { %5068 = vmatprep.mubr.bf16.mxu0 %v13936_v30 }
 0x77d   : > { %5069 = vmatmul.mubr.bf16.gmra.mrb[188].mxu0 %v13961_v28  ;;  %v18348_v28 = vld [vmem:[#allocation150_spill] sm:$0xff] }
 0x77e   : > { %5076 = vmatprep.mubr.bf16.mxu0 %v13982_v40 }
 0x785   : > { %5077 = vmatmul.mubr.bf16.gmra.mrb[192].mxu0 %v18327_v11  ;;  %v4212_v11 = vpack.c.bf16 %v14338_v46, %v14296_v48  ;;  %v10331_v48 = vld [vmem:[%s16782_s8 + $0x100] sm:$0xff]  }
 0x786   : > { %5084 = vmatprep.mubr.bf16.mxu0 %v18328_v55  ;;  %v18337_v55 = vld [vmem:[#allocation279_spill] sm:$0xff] }
 0x78d   : > { %5085 = vmatmul.mubr.bf16.gmra.mrb[196].mxu0 %v18329_v57 }
 0x78e   : > { %5092 = vmatprep.mubr.bf16.mxu0 %v18330_v49 }
 0x795   : > { %5093 = vmatmul.mubr.bf16.gmra.mrb[200].mxu0 %v18331_v44 }
 0x796   : > { %5100 = vmatprep.mubr.bf16.mxu0 %v18332_v43 }
 0x79d   : > { %5101 = vmatmul.mubr.bf16.gmra.mrb[204].mxu0 %v18333_v37  ;;  %v18338_v37 = vld [vmem:[#allocation110_spill] sm:$0xff] }
 0x79e   : > { %5108 = vmatprep.mubr.bf16.mxu0 %v18334_v33  ;;  %v18339_v33 = vpack.c.bf16 %v18338_v37, %v13059_v7  ;;  %v18343_v7 = vld [vmem:[#allocation143_spill] sm:$0xff] }
 0x7a5   : > { %5109 = vmatmul.mubr.bf16.gmra.mrb[208].mxu0 %v18335_v38 }
 0x7a6   : > { %5116 = vmatprep.mubr.bf16.mxu0 %v18336_v12 }
 0x7ad   : > { %5117 = vmatmul.mubr.bf16.gmra.mrb[212].mxu0 %v18337_v55 }
 0x7ae   : > { %5157 = vmatprep.mubr.bf16.mxu0 %v4212_v11  ;;  %v18341_v11 = vrot.slane %v14257_v53, 1 }
 0x7b0   : > { %v14455_v57 = vpop.f32.mrb[108].mxu0 }
 0x7b1   : > { %v4912_v49 = vpop.f32.mrb[109].mxu0 }
 0x7b2   : > { %v14457_v44 = vpop.f32.mrb[110].mxu0  ;;  %v18340_v49 = vrot.slane %v13032_v8, 1 }
 0x7b3   : > { %v4915_v43 = vpop.f32.mrb[111].mxu0 }
 0x7b4   : > { %v14476_v43 = vsel %vm1816_vm4, %v18341_v11, %v18340_v49  ;;  %v18347_v11 = vld [vmem:[#allocation165_spill] sm:$0xff] }
 0x7b5   : > { %5158 = vmatmul.mubr.bf16.vlgmr.msra.gmra.mrb[216].mxu0 %v14312_v13  ;;  %v14480_v37 = vpack.c.bf16 %v14476_v43, %v14318_v54  ;;  %v18349_v30 = vpack.c.bf16 %v18347_v11, %v18348_v28 }
 0x7b6   : > { %5165 = vmatprep.mubr.bf16.mxu0 %v18339_v33  ;;  %5375 = vmatpush1.bf16.msra.mxu0 %v10331_v48  ;;  %v18344_v33 = vld [vmem:[#allocation126_spill] sm:$0xff]  ;;  %v10332_v48 = vld [vmem:[%s16782_s8 + $0x108] sm:$0xff]  }
 0x7b7   : > { %18342 = vst [vmem:[#allocation110_spill] sm:$0xff] %v14480_v37  ;;  %5376 = vmatprep.subr.bf16.mxu0 %v17500_v39 }
 0x7b8   : > { %v14463_v38 = vpop.f32.mrb[112].mxu0 }
 0x7b9   : > { %v4920_v12 = vpop.f32.mrb[113].mxu0 }
 0x7ba   : > { %v14468_v46 = vpop.f32.mrb[114].mxu0  ;;  %v18345_v12 = vpack.c.bf16 %v18343_v7, %v18344_v33  ;;  %5377 = vmatpush1.bf16.msra.mxu0 %v10332_v48  ;;  %v10333_v48 = vld [vmem:[%s16782_s8 + $0x110] sm:$0xff]  }
 0x7bb   : > { %v4923_v13 = vpop.f32.mrb[115].mxu0  ;;  %5378 = vmatprep.subr.bf16.mxu0 %v17500_v39 }
 0x7bc   : > { %v18346_v13 = vld [vmem:[#allocation125_spill] sm:$0xff] }
 0x7bd   : > { %5166 = vmatmul.mubr.bf16.gmra.mrb[220].mxu0 %v14480_v37 }
 0x7be   : > { %5173 = vmatprep.mubr.bf16.mxu0 %v18345_v12  ;;  %v18350_v12 = vld [vmem:[#allocation151_spill] sm:$0xff]  ;;  %5379 = vmatpush1.bf16.msra.mxu0 %v10333_v48 }
 0x7bf   : > { %5380 = vmatprep.subr.bf16.mxu0 %v17500_v39 }
 0x7c0   : > { %v14487_v55 = vpop.f32.mrb[116].mxu0 }
 0x7c1   : > { %v4928_v40 = vpop.f32.mrb[117].mxu0 }
 0x7c2   : > { %v14489_v21 = vpop.f32.mrb[118].mxu0 }
 0x7c3   : > { %v4931_v49 = vpop.f32.mrb[119].mxu0 }
 0x7c4   : > { %v18351_v49 = vld [vmem:[#allocation185_spill] sm:$0xff] }
 0x7c5   : > { %5174 = vmatmul.mubr.bf16.gmra.mrb[224].mxu0 %v18346_v13  ;;  %v18352_v13 = vld [vmem:[#allocation184_spill] sm:$0xff] }
 0x7c6   : > { %5181 = vmatprep.mubr.bf16.mxu0 %v18349_v30  ;;  %v18353_v0 = vpack.c.bf16 %v18351_v49, %v18352_v13 }
 0x7c8   : > { %v14498_v37 = vpop.f32.mrb[120].mxu0 }
 0x7c9   : > { %v4936_v7 = vpop.f32.mrb[121].mxu0 }
 0x7ca   : > { %v14501_v40 = vpop.f32.mrb[122].mxu0  ;;  %v18354_v7 = vld [vmem:[#allocation174_spill] sm:$0xff] }
 0x7cb   : > { %v4939_v33 = vpop.f32.mrb[123].mxu0 }
 0x7cc   : > { %v18356_v33 = vld [vmem:[#allocation202_spill] sm:$0xff] }
 0x7cd   : > { %5182 = vmatmul.mubr.bf16.gmra.mrb[228].mxu0 %v18350_v12  ;;  %v18357_v2 = vpack.c.bf16 %v18355_v23, %v18356_v33  ;;  %v18358_v12 = vld [vmem:[#allocation193_spill] sm:$0xff]  ;;  %v18359_v23 = vld [vmem:[#allocation214_spill] sm:$0xff] }
 0x7ce   : > { %5189 = vmatprep.mubr.bf16.mxu0 %v18353_v0  ;;  %v10335_v33 = vld [vmem:[%s16782_s8 + $0x120] sm:$0xff]  }
 0x7d0   : > { %v14507_v30 = vpop.f32.mrb[124].mxu0 }
 0x7d1   : > { %v4944_v28 = vpop.f32.mrb[125].mxu0 }
 0x7d2   : > { %v14509_v11 = vpop.f32.mrb[126].mxu0 }
 0x7d3   : > { %v4947_v5 = vpop.f32.mrb[127].mxu0 }
 0x7d4   : > { %v10334_v5 = vld [vmem:[%s16782_s8 + $0x118] sm:$0xff]  }
 0x7d5   : > { %5190 = vmatmul.mubr.bf16.gmra.mrb[232].mxu0 %v18354_v7 }
 0x7d6   : > { %5197 = vmatprep.mubr.bf16.mxu0 %v18357_v2  ;;  %5381 = vmatpush1.bf16.msra.mxu0 %v10334_v5  ;;  %v18360_v2 = vld [vmem:[#allocation211_spill] sm:$0xff] }
 0x7d7   : > { %5382 = vmatprep.subr.bf16.mxu0 %v17500_v39  ;;  %v18361_v48 = vpack.c.bf16 %v18359_v23, %v18360_v2  ;;  %v10336_v5 = vld [vmem:[%s16782_s8 + $0x128] sm:$0xff]   ;;  %v18362_v23 = vld [vmem:[#allocation208_spill] sm:$0xff] }
 0x7d8   : > { %v14519_v0 = vpop.f32.mrb[128].mxu0  ;;  %v18363_v2 = vld [vmem:[#allocation80_spill] sm:$0xff] }
 0x7d9   : > { %v4952_v13 = vpop.f32.mrb[129].mxu0 }
 0x7da   : > { %v14521_v49 = vpop.f32.mrb[130].mxu0  ;;  %5383 = vmatpush1.bf16.msra.mxu0 %v10335_v33 }
 0x7db   : > { %v4955_v28 = vpop.f32.mrb[131].mxu0  ;;  %5384 = vmatprep.subr.bf16.mxu0 %v17500_v39 }
 0x7dd   : > { %5198 = vmatmul.mubr.bf16.gmra.mrb[236].mxu0 %v18358_v12 }
 0x7de   : > { %5205 = vmatprep.mubr.bf16.mxu0 %v18361_v48  ;;  %5385 = vmatpush1.bf16.msra.mxu0 %v10336_v5  ;;  %v18364_v48 = vld [vmem:[#allocation71_spill] sm:$0xff]  ;;  %v10338_v5 = vld [vmem:[%s16782_s8 + $0x138] sm:$0xff]  }
 0x7df   : > { %5386 = vmatprep.subr.bf16.mxu0 %v17500_v39  ;;  %v18365_v50 = vpack.c.bf16 %v18363_v2, %v18364_v48  ;;  %v18366_v2 = vld [vmem:[#allocation63_spill] sm:$0xff]  ;;  %v18368_v48 = vld [vmem:[#allocation104_spill] sm:$0xff] }
 0x7e0   : > { %v14534_v13 = vpop.f32.mrb[132].mxu0 }
 0x7e1   : > { %v4960_v7 = vpop.f32.mrb[133].mxu0 }
 0x7e2   : > { %v14537_v28 = vpop.f32.mrb[134].mxu0  ;;  %v10337_v7 = vld [vmem:[%s16782_s8 + $0x130] sm:$0xff]  }
 0x7e3   : > { %v4963_v12 = vpop.f32.mrb[135].mxu0  ;;  %5387 = vmatpush1.bf16.msra.mxu0 %v10337_v7 }
 0x7e4   : > { %5388 = vmatprep.subr.bf16.mxu0 %v17500_v39 }
 0x7e5   : > { %5206 = vmatmul.mubr.bf16.gmra.mrb[240].mxu0 %v18362_v23 }
 0x7e6   : > { %5213 = vmatprep.mubr.bf16.mxu0 %v18365_v50  ;;  %v18367_v50 = vld [vmem:[#allocation119_spill] sm:$0xff] }
 0x7e7   : > { %5389 = vmatpush1.bf16.msra.mxu0 %v10338_v5  ;;  %v18369_v14 = vpack.c.bf16 %v18367_v50, %v18368_v48  ;;  %v10340_v5 = vld [vmem:[%s16782_s8 + $0x148] sm:$0xff]   ;;  %v18372_v48 = vld [vmem:[#allocation220_spill] sm:$0xff] }
 0x7e8   : > { %v14550_v33 = vpop.f32.mrb[136].mxu0  ;;  %5390 = vmatprep.subr.bf16.mxu0 %v17500_v39  ;;  %v18370_v50 = vld [vmem:[#allocation95_spill] sm:$0xff] }
 0x7e9   : > { %v4968_v36 = vpop.f32.mrb[137].mxu0 }
 0x7ea   : > { %v14553_v12 = vpop.f32.mrb[138].mxu0  ;;  %v10339_v36 = vld [vmem:[%s16782_s8 + $0x140] sm:$0xff]  }
 0x7eb   : > { %v4971_v23 = vpop.f32.mrb[139].mxu0  ;;  %5391 = vmatpush1.bf16.msra.mxu0 %v10339_v36 }
 0x7ec   : > { %5392 = vmatprep.subr.bf16.mxu0 %v17500_v39 }
 0x7ed   : > { %5214 = vmatmul.mubr.bf16.gmra.mrb[244].mxu0 %v18366_v2 }
 0x7ee   : > { %5221 = vmatprep.mubr.bf16.mxu0 %v18369_v14  ;;  %v18371_v14 = vld [vmem:[#allocation159_spill] sm:$0xff] }
 0x7ef   : > { %5393 = vmatpush1.bf16.msra.mxu0 %v10340_v5  ;;  %v18373_v1 = vpack.c.bf16 %v18371_v14, %v18372_v48  ;;  %v10342_v5 = vld [vmem:[%s16782_s8 + $0x158] sm:$0xff]   ;;  %v18374_v14 = vld [vmem:[#allocation128_spill] sm:$0xff] }
 0x7f0   : > { %v14566_v7 = vpop.f32.mrb[140].mxu0  ;;  %5394 = vmatprep.subr.bf16.mxu0 %v17500_v39  ;;  %v18376_v48 = vld [vmem:[#allocation224_spill] sm:$0xff] }
 0x7f1   : > { %v4976_v20 = vpop.f32.mrb[141].mxu0 }
 0x7f2   : > { %v14569_v23 = vpop.f32.mrb[142].mxu0  ;;  %v10341_v20 = vld [vmem:[%s16782_s8 + $0x150] sm:$0xff]  }
 0x7f3   : > { %v4979_v2 = vpop.f32.mrb[143].mxu0  ;;  %5395 = vmatpush1.bf16.msra.mxu0 %v10341_v20 }
 0x7f4   : > { %5396 = vmatprep.subr.bf16.mxu0 %v17500_v39 }
 0x7f5   : > { %5222 = vmatmul.mubr.bf16.gmra.mrb[248].mxu0 %v18370_v50 }
 0x7f6   : > { %5229 = vmatprep.mubr.bf16.mxu0 %v18373_v1  ;;  %v18375_v1 = vld [vmem:[#allocation194_spill] sm:$0xff] }
 0x7f7   : > { %5397 = vmatpush1.bf16.msra.mxu0 %v10342_v5  ;;  %v18377_v22 = vpack.c.bf16 %v18375_v1, %v18376_v48  ;;  %v10344_v5 = vld [vmem:[%s16782_s8 + $0x168] sm:$0xff]   ;;  %v18378_v1 = vld [vmem:[#allocation160_spill] sm:$0xff]  ;;  %v18379_v48 = vld [vmem:[#allocation37_spill] sm:$0xff] }
 0x7f8   : > { %v14582_v36 = vpop.f32.mrb[144].mxu0  ;;  %5398 = vmatprep.subr.bf16.mxu0 %v17500_v39 }
 0x7f9   : > { %v4984_v25 = vpop.f32.mrb[145].mxu0 }
 0x7fa   : > { %v14585_v2 = vpop.f32.mrb[146].mxu0  ;;  %v10343_v25 = vld [vmem:[%s16782_s8 + $0x160] sm:$0xff]  }
 0x7fb   : > { %v4987_v50 = vpop.f32.mrb[147].mxu0  ;;  %5399 = vmatpush1.bf16.msra.mxu0 %v10343_v25 }
 0x7fc   : > { %5400 = vmatprep.subr.bf16.mxu0 %v17500_v39 }
 0x7fd   : > { %5230 = vmatmul.mubr.bf16.gmra.mrb[252].mxu0 %v18374_v14 }
 0x7fe   : > { %5237 = vmatprep.mubr.bf16.mxu0 %v18377_v22  ;;  %v10345_v22 = vld [vmem:[%s16782_s8 + $0x170] sm:$0xff]  }
 0x7ff   : > { %5401 = vmatpush1.bf16.msra.mxu0 %v10344_v5  ;;  %v10346_v5 = vld [vmem:[%s16782_s8 + $0x178] sm:$0xff]  }
 0x800   : > { %v14598_v20 = vpop.f32.mrb[148].mxu0  ;;  %5402 = vmatprep.subr.bf16.mxu0 %v17500_v39 }
 0x801   : > { %v4992_v16 = vpop.f32.mrb[149].mxu0 }
 0x802   : > { %v14601_v50 = vpop.f32.mrb[150].mxu0  ;;  %v18380_v16 = vld [vmem:[#allocation25_spill] sm:$0xff] }
 0x803   : > { %v4995_v14 = vpop.f32.mrb[151].mxu0  ;;  %v18381_v25 = vpack.c.bf16 %v18379_v48, %v18380_v16  ;;  %5403 = vmatpush1.bf16.msra.mxu0 %v10345_v22  ;;  %v18383_v48 = vld [vmem:[#allocation62_spill] sm:$0xff] }
 0x804   : > { %5404 = vmatprep.subr.bf16.mxu0 %v17500_v39  ;;  %v18384_v16 = vld [vmem:[#allocation50_spill] sm:$0xff] }
 0x805   : > { %5238 = vmatmul.mubr.bf16.gmra.mrb[0].mxu0 %v18378_v1 }
 0x806   : > { %5245 = vmatprep.mubr.bf16.mxu0 %v18381_v25  ;;  %v18385_v25 = vpack.c.bf16 %v18383_v48, %v18384_v16  ;;  %v18390_v48 = vld [vmem:[#allocation61_spill] sm:$0xff]  ;;  %v18391_v16 = vld [vmem:[#allocation24_spill] sm:$0xff] }
 0x807   : > { %5405 = vmatpush1.bf16.msra.mxu0 %v10346_v5 }
 0x808   : > { %v14614_v18 = vpop.f32.mrb[152].mxu0  ;;  %5623 = vmatprep.subr.bf16.mxu0 %v17500_v39 }
 0x809   : > { %v5000_v52 = vpop.f32.mrb[153].mxu0 }
 0x80a   : > { %v14617_v14 = vpop.f32.mrb[154].mxu0 }
 0x80b   : > { %v5003_v1 = vpop.f32.mrb[155].mxu0 }
 0x80c   : > { %v18389_v1 = vpack.c.bf16 %v18387_v63, %v18388_v6  ;;  %v18394_v6 = vld [vmem:[#allocation225_spill] sm:$0xff]  ;;  %v18395_v63 = vld [vmem:[#allocation51_spill] sm:$0xff] }
 0x80d   : > { %5246 = vmatmul.mubr.bf16.gmra.mrb[4].mxu0 %v18382_v24 }
 0x80e   : > { %5253 = vmatprep.mubr.bf16.mxu0 %v18385_v25  ;;  %v18392_v25 = vld [vmem:[#allocation14_spill] sm:$0xff] }
 0x810   : > { %v14627_v22 = vpop.f32.mrb[156].mxu0 }
 0x811   : > { %v5008_v52 = vpop.f32.mrb[157].mxu0 }
 0x812   : > { %v14629_v35 = vpop.f32.mrb[158].mxu0  ;;  %v18393_v52 = vpack.c.bf16 %v18391_v16, %v18392_v25  ;;  %v18398_v16 = vld [vmem:[#allocation21_spill] sm:$0xff]  ;;  %v18399_v25 = vld [vmem:[#allocation84_spill] sm:$0xff] }
 0x813   : > { %v5011_v19 = vpop.f32.mrb[159].mxu0 }
 0x815   : > { %5254 = vmatmul.mubr.bf16.gmra.mrb[8].mxu0 %v18386_v59 }
 0x816   : > { %5261 = vmatprep.mubr.bf16.mxu0 %v18389_v1  ;;  %v18396_v1 = vld [vmem:[#allocation39_spill] sm:$0xff] }
 0x818   : > { %v14635_v5 = vpop.f32.mrb[160].mxu0 }
 0x819   : > { %v5016_v24 = vpop.f32.mrb[161].mxu0 }
 0x81a   : > { %v14637_v45 = vpop.f32.mrb[162].mxu0  ;;  %v18397_v24 = vpack.c.bf16 %v18395_v63, %v18396_v1  ;;  %v18402_v63 = vld [vmem:[#allocation48_spill] sm:$0xff]  ;;  %v18403_v1 = vld [vmem:[#allocation121_spill] sm:$0xff] }
 0x81b   : > { %v5019_v56 = vpop.f32.mrb[163].mxu0 }
 0x81d   : > { %5262 = vmatmul.mubr.bf16.gmra.mrb[12].mxu0 %v18390_v48 }
 0x81e   : > { %5269 = vmatprep.mubr.bf16.mxu0 %v18393_v52  ;;  %v18400_v52 = vld [vmem:[#allocation68_spill] sm:$0xff] }
 0x820   : > { %v14643_v27 = vpop.f32.mrb[164].mxu0 }
 0x821   : > { %v5024_v19 = vpop.f32.mrb[165].mxu0 }
 0x822   : > { %v14645_v59 = vpop.f32.mrb[166].mxu0  ;;  %v18401_v19 = vpack.c.bf16 %v18399_v25, %v18400_v52  ;;  %v18406_v25 = vld [vmem:[#allocation81_spill] sm:$0xff] }
 0x823   : > { %v5027_v10 = vpop.f32.mrb[167].mxu0  ;;  %v18407_v52 = vld [vmem:[#allocation233_spill] sm:$0xff] }
 0x825   : > { %5270 = vmatmul.mubr.bf16.gmra.mrb[16].mxu0 %v18394_v6 }
 0x826   : > { %5277 = vmatprep.mubr.bf16.mxu0 %v18397_v24  ;;  %v18404_v24 = vld [vmem:[#allocation105_spill] sm:$0xff] }
 0x828   : > { %v14651_v42 = vpop.f32.mrb[168].mxu0 }
 0x829   : > { %v5032_v56 = vpop.f32.mrb[169].mxu0 }
 0x82a   : > { %v14653_v48 = vpop.f32.mrb[170].mxu0  ;;  %v18405_v56 = vpack.c.bf16 %v18403_v1, %v18404_v24  ;;  %v18410_v1 = vld [vmem:[#allocation116_spill] sm:$0xff] }
 0x82b   : > { %v5035_v15 = vpop.f32.mrb[171].mxu0  ;;  %v18411_v24 = vld [vmem:[#allocation240_spill] sm:$0xff] }
 0x82d   : > { %5278 = vmatmul.mubr.bf16.gmra.mrb[20].mxu0 %v18398_v16 }
 0x82e   : > { %5285 = vmatprep.mubr.bf16.mxu0 %v18401_v19  ;;  %v18408_v19 = vld [vmem:[#allocation229_spill] sm:$0xff] }
 0x830   : > { %v14659_v17 = vpop.f32.mrb[172].mxu0 }
 0x831   : > { %v5040_v10 = vpop.f32.mrb[173].mxu0 }
 0x832   : > { %v14661_v6 = vpop.f32.mrb[174].mxu0  ;;  %v18409_v10 = vpack.c.bf16 %v18407_v52, %v18408_v19  ;;  %v18414_v52 = vld [vmem:[#allocation232_spill] sm:$0xff]  ;;  %v18415_v19 = vld [vmem:[#allocation247_spill] sm:$0xff] }
 0x833   : > { %v5043_v3 = vpop.f32.mrb[175].mxu0 }
 0x835   : > { %5286 = vmatmul.mubr.bf16.gmra.mrb[24].mxu0 %v18402_v63 }
 0x836   : > { %5293 = vmatprep.mubr.bf16.mxu0 %v18405_v56  ;;  %v18412_v56 = vld [vmem:[#allocation236_spill] sm:$0xff] }
 0x838   : > { %v14667_v41 = vpop.f32.mrb[176].mxu0 }
 0x839   : > { %v5048_v15 = vpop.f32.mrb[177].mxu0 }
 0x83a   : > { %v14669_v16 = vpop.f32.mrb[178].mxu0  ;;  %v18413_v15 = vpack.c.bf16 %v18411_v24, %v18412_v56  ;;  %v18420_v24 = vld [vmem:[#allocation239_spill] sm:$0xff]  ;;  %v18421_v56 = vld [vmem:[#allocation254_spill] sm:$0xff] }
 0x83b   : > { %v5051_v29 = vpop.f32.mrb[179].mxu0 }
 0x83d   : > { %5294 = vmatmul.mubr.bf16.gmra.mrb[28].mxu0 %v18406_v25 }
 0x83e   : > { %5301 = vmatprep.mubr.bf16.mxu0 %v18409_v10  ;;  %v18416_v10 = vld [vmem:[#allocation243_spill] sm:$0xff] }
 0x840   : > { %v14675_v32 = vpop.f32.mrb[180].mxu0 }
 0x841   : > { %v5056_v3 = vpop.f32.mrb[181].mxu0 }
 0x842   : > { %v14677_v63 = vpop.f32.mrb[182].mxu0  ;;  %v18417_v3 = vpack.c.bf16 %v18415_v19, %v18416_v10  ;;  %v18426_v19 = vld [vmem:[#allocation246_spill] sm:$0xff]  ;;  %v18427_v10 = vld [vmem:[#allocation261_spill] sm:$0xff] }
 0x843   : > { %v5059_v31 = vpop.f32.mrb[183].mxu0 }
 0x845   : > { %5302 = vmatmul.mubr.bf16.gmra.mrb[32].mxu0 %v18410_v1 }
 0x846   : > { %5309 = vmatprep.mubr.bf16.mxu0 %v18413_v15  ;;  %v18422_v15 = vld [vmem:[#allocation250_spill] sm:$0xff] }
 0x848   : > { %v14683_v61 = vpop.f32.mrb[184].mxu0 }
 0x849   : > { %v5064_v29 = vpop.f32.mrb[185].mxu0 }
 0x84a   : > { %v14685_v25 = vpop.f32.mrb[186].mxu0  ;;  %v18423_v29 = vpack.c.bf16 %v18421_v56, %v18422_v15  ;;  %v18432_v56 = vld [vmem:[#allocation253_spill] sm:$0xff]  ;;  %v18433_v15 = vld [vmem:[#allocation268_spill] sm:$0xff] }
 0x84b   : > { %v5067_v9 = vpop.f32.mrb[187].mxu0 }
 0x84d   : > { %5310 = vmatmul.mubr.bf16.gmra.mrb[36].mxu0 %v18414_v52 }
 0x84e   : > { %5317 = vmatprep.mubr.bf16.mxu0 %v18417_v3  ;;  %v18428_v3 = vld [vmem:[#allocation257_spill] sm:$0xff] }
 0x850   : > { %v14691_v47 = vpop.f32.mrb[188].mxu0 }
 0x851   : > { %18418 = vst [vmem:[#allocation143_spill] sm:$0xff] %v14691_v47  ;;  %v5072_v31 = vpop.f32.mrb[189].mxu0 }
 0x852   : > { %v14693_v1 = vpop.f32.mrb[190].mxu0  ;;  %v18429_v31 = vpack.c.bf16 %v18427_v10, %v18428_v3  ;;  %v18436_v10 = vld [vmem:[#allocation260_spill] sm:$0xff]  ;;  %v18437_v3 = vld [vmem:[#allocation275_spill] sm:$0xff] }
 0x853   : > { %18419 = vst [vmem:[#allocation126_spill] sm:$0xff] %v14693_v1  ;;  %v5075_v54 = vpop.f32.mrb[191].mxu0 }
 0x855   : > { %5318 = vmatmul.mubr.bf16.gmra.mrb[40].mxu0 %v18420_v24 }
 0x856   : > { %5325 = vmatprep.mubr.bf16.mxu0 %v18423_v29  ;;  %v18434_v29 = vld [vmem:[#allocation264_spill] sm:$0xff] }
 0x858   : > { %v14699_v62 = vpop.f32.mrb[192].mxu0 }
 0x859   : > { %18424 = vst [vmem:[#allocation165_spill] sm:$0xff] %v14699_v62  ;;  %v5080_v9 = vpop.f32.mrb[193].mxu0 }
 0x85a   : > { %v14701_v52 = vpop.f32.mrb[194].mxu0  ;;  %v18435_v9 = vpack.c.bf16 %v18433_v15, %v18434_v29  ;;  %v18440_v15 = vld [vmem:[#allocation267_spill] sm:$0xff]  ;;  %v18441_v29 = vpack.c.bf16 %v14244_v51, %v14233_v58  ;;  %v14746_v58 = vld [vmem:[%s16783_s9] ss:$0 sm:$0xff]  ;;  %v18445_v51 = vld [vmem:[#allocation109_spill] sm:$0xff] }
 0x85b   : > { %18425 = vst [vmem:[#allocation150_spill] sm:$0xff] %v14701_v52  ;;  %v5083_v26 = vpop.f32.mrb[195].mxu0 }
 0x85d   : > { %5326 = vmatmul.mubr.bf16.gmra.mrb[44].mxu0 %v18426_v19 }
 0x85e   : > { %5333 = vmatprep.mubr.bf16.mxu0 %v18429_v31  ;;  %v18438_v31 = vld [vmem:[#allocation271_spill] sm:$0xff] }
 0x860   : > { %v14707_v1 = vpop.f32.mrb[196].mxu0 }
 0x861   : > { %18430 = vst [vmem:[#allocation185_spill] sm:$0xff] %v14707_v1  ;;  %v5088_v54 = vpop.f32.mrb[197].mxu0 }
 0x862   : > { %v14709_v24 = vpop.f32.mrb[198].mxu0  ;;  %v18439_v54 = vpack.c.bf16 %v18437_v3, %v18438_v31  ;;  %v18442_v3 = vld [vmem:[#allocation274_spill] sm:$0xff]  ;;  %v18443_v31 = vpack.c.bf16 %v14292_v4, %v14279_v34  ;;  %v4911_v4 = vadd.f32 %v14746_v58, %v14455_v57  ;;  %v4919_v57 = vadd.f32 %v14746_v58, %v14463_v38 }
 0x863   : > { %18431 = vst [vmem:[#allocation184_spill] sm:$0xff] %v14709_v24  ;;  %v5091_v47 = vpop.f32.mrb[199].mxu0  ;;  %v18450_v38 = vld [vmem:[#allocation94_spill] sm:$0xff] }
 0x865   : > { %5334 = vmatmul.mubr.bf16.gmra.mrb[48].mxu0 %v18432_v56 }
 0x866   : > { %5341 = vmatprep.mubr.bf16.mxu0 %v18435_v9 }
 0x868   : > { %v14715_v52 = vpop.f32.mrb[200].mxu0 }
 0x869   : > { %v5096_v26 = vpop.f32.mrb[201].mxu0 }
 0x86a   : > { %v14717_v19 = vpop.f32.mrb[202].mxu0 }
 0x86b   : > { %v5099_v62 = vpop.f32.mrb[203].mxu0 }
 0x86d   : > { %5342 = vmatmul.mubr.bf16.gmra.mrb[52].mxu0 %v18436_v10 }
 0x86e   : > { %5349 = vmatprep.mubr.bf16.mxu0 %v18439_v54 }
 0x870   : > { %v14723_v24 = vpop.f32.mrb[204].mxu0 }
 0x871   : > { %v5104_v47 = vpop.f32.mrb[205].mxu0 }
 0x872   : > { %v14725_v56 = vpop.f32.mrb[206].mxu0 }
 0x873   : > { %v5107_v1 = vpop.f32.mrb[207].mxu0 }
 0x875   : > { %5350 = vmatmul.mubr.bf16.gmra.mrb[56].mxu0 %v18440_v15 }
 0x876   : > { %5357 = vmatprep.mubr.bf16.mxu0 %v18441_v29  ;;  %v4914_v29 = vadd.f32 %v14746_v58, %v14457_v44  ;;  %v4922_v44 = vadd.f32 %v14746_v58, %v14468_v46  ;;  %v18453_v46 = vld [vmem:[#allocation134_spill] sm:$0xff] }
 0x878   : > { %v14731_v9 = vpop.f32.mrb[208].mxu0 }
 0x879   : > { %v5112_v62 = vpop.f32.mrb[209].mxu0 }
 0x87a   : > { %v14733_v26 = vpop.f32.mrb[210].mxu0 }
 0x87b   : > { %v5115_v10 = vpop.f32.mrb[211].mxu0 }
 0x87c   : > { %v4266_v10 = vpack.c.bf16 %v18445_v51, %v14476_v43  ;;  %v18446_v51 = vld [vmem:[#allocation144_spill] sm:$0xff] }
 0x87d   : > { %5358 = vmatmul.mubr.bf16.gmra.mrb[60].mxu0 %v18442_v3 }
 0x87e   : > { %5365 = vmatprep.mubr.bf16.mxu0 %v18443_v31 }
 0x880   : > { %v14739_v54 = vpop.f32.mrb[212].mxu0 }
 0x881   : > { %v5120_v1 = vpop.f32.mrb[213].mxu0 }
 0x882   : > { %v14741_v47 = vpop.f32.mrb[214].mxu0  ;;  %v4239_v1 = vpack.c.bf16 %v13032_v8, %v14257_v53  ;;  %v10347_v8 = vld [vmem:[%s16782_s8 + $0x180] sm:$0xff]  }
 0x883   : > { %18444 = vst [vmem:[#allocation205_spill] sm:$0xff] %v14741_v47  ;;  %v5123_v15 = vpop.f32.mrb[215].mxu0 }
 0x885   : > { %5366 = vmatmul.mubr.bf16.gmra.mrb[64].mxu0 %v14252_v60 }
 0x886   : > { %5406 = vmatprep.mubr.bf16.mxu0 %v4266_v10  ;;  %v18447_v10 = vld [vmem:[#allocation117_spill] sm:$0xff] }
 0x887   : > { %v18448_v60 = vpack.c.bf16 %v18446_v51, %v18447_v10  ;;  %v4930_v10 = vadd.f32 %v14746_v58, %v14489_v21  ;;  %v4935_v21 = vadd.f32 %v14746_v58, %v14498_v37  ;;  %v18465_v37 = vld [vmem:[#allocation198_spill] sm:$0xff] }
 0x888   : > { %v5159_v34 = vpop.f32.mrb[216].mxu0 }
 0x889   : > { %v14755_v62 = vadd.f32 %v5159_v34, %v4911_v4  ;;  %v5161_v15 = vpop.f32.mrb[217].mxu0 }
 0x88a   : > { %v5162_v31 = vpop.f32.mrb[218].mxu0 }
 0x88b   : > { %v14759_v3 = vadd.f32 %v5162_v31, %v4914_v29  ;;  %v5164_v43 = vpop.f32.mrb[219].mxu0 }
 0x88c   : > { %v4927_v43 = vadd.f32 %v14746_v58, %v14487_v55  ;;  %v10348_v55 = vld [vmem:[%s16782_s8 + $0x188] sm:$0xff]  }
 0x88d   : > { %5407 = vmatmul.mubr.bf16.vlgmr.msra.gmra.mrb[68].mxu0 %v4239_v1  ;;  %v18452_v1 = vld [vmem:[#allocation158_spill] sm:$0xff] }
 0x88e   : > { %5414 = vmatprep.mubr.bf16.mxu0 %v18448_v60  ;;  %5624 = vmatpush1.bf16.msra.mxu0 %v10347_v8  ;;  %v18449_v60 = vld [vmem:[#allocation101_spill] sm:$0xff] }
 0x88f   : > { %5625 = vmatprep.subr.bf16.mxu0 %v17500_v39  ;;  %v18451_v31 = vpack.c.bf16 %v18449_v60, %v18450_v38  ;;  %v18456_v60 = vld [vmem:[#allocation118_spill] sm:$0xff] }
 0x890   : > { %v5167_v47 = vpop.f32.mrb[220].mxu0 }
 0x891   : > { %v14768_v4 = vadd.f32 %v5167_v47, %v4919_v57  ;;  %v5169_v34 = vpop.f32.mrb[221].mxu0  ;;  %v18454_v47 = vpack.c.bf16 %v18452_v1, %v18453_v46  ;;  %v18459_v1 = vld [vmem:[#allocation166_spill] sm:$0xff] }
 0x892   : > { %v5170_v53 = vpop.f32.mrb[222].mxu0  ;;  %5626 = vmatpush1.bf16.msra.mxu0 %v10348_v55  ;;  %v4946_v55 = vadd.f32 %v14746_v58, %v14509_v11  ;;  %v4951_v11 = vadd.f32 %v14746_v58, %v14519_v0  ;;  %v18474_v0 = vld [vmem:[#allocation179_spill] sm:$0xff] }
 0x893   : > { %v14773_v29 = vadd.f32 %v5170_v53, %v4922_v44  ;;  %v5172_v15 = vpop.f32.mrb[223].mxu0  ;;  %5627 = vmatprep.subr.bf16.mxu0 %v17500_v39 }
 0x894   : > { %v18455_v15 = vld [vmem:[#allocation136_spill] sm:$0xff] }
 0x895   : > { %5415 = vmatmul.mubr.bf16.gmra.mrb[72].mxu0 %v18451_v31  ;;  %v18457_v38 = vpack.c.bf16 %v18455_v15, %v18456_v60  ;;  %v18458_v31 = vld [vmem:[#allocation191_spill] sm:$0xff]  ;;  %v18461_v15 = vld [vmem:[#allocation142_spill] sm:$0xff]  ;;  %v18462_v60 = vld [vmem:[#allocation141_spill] sm:$0xff] }
 0x896   : > { %5422 = vmatprep.mubr.bf16.mxu0 %v18454_v47  ;;  %v18460_v46 = vpack.c.bf16 %v18458_v31, %v18459_v1  ;;  %v18464_v31 = vld [vmem:[#allocation204_spill] sm:$0xff] }
 0x897   : > { %v18466_v1 = vpack.c.bf16 %v18464_v31, %v18465_v37  ;;  %v18471_v31 = vld [vmem:[#allocation206_spill] sm:$0xff] }
 0x898   : > { %v5175_v51 = vpop.f32.mrb[224].mxu0 }
 0x899   : > { %v14786_v57 = vadd.f32 %v5175_v51, %v4927_v43  ;;  %v5177_v44 = vpop.f32.mrb[225].mxu0  ;;  %v4938_v43 = vadd.f32 %v14746_v58, %v14501_v40  ;;  %v4943_v40 = vadd.f32 %v14746_v58, %v14507_v30  ;;  %v18470_v30 = vld [vmem:[#allocation213_spill] sm:$0xff] }
 0x89a   : > { %v5178_v34 = vpop.f32.mrb[226].mxu0  ;;  %v18472_v37 = vpack.c.bf16 %v18470_v30, %v18471_v31  ;;  %v10351_v31 = vld [vmem:[%s16782_s8 + $0x1a0] sm:$0xff]  }
 0x89b   : > { %v14788_v8 = vadd.f32 %v5178_v34, %v4930_v10  ;;  %v5180_v53 = vpop.f32.mrb[227].mxu0 }
 0x89d   : > { %5423 = vmatmul.mubr.bf16.gmra.mrb[76].mxu0 %v18457_v38  ;;  %v18463_v38 = vpack.c.bf16 %v18461_v15, %v18462_v60  ;;  %v18467_v15 = vld [vmem:[#allocation186_spill] sm:$0xff]  ;;  %v18468_v60 = vld [vmem:[#allocation173_spill] sm:$0xff] }
 0x89e   : > { %5430 = vmatprep.mubr.bf16.mxu0 %v18460_v46 }
 0x8a0   : > { %v5183_v47 = vpop.f32.mrb[228].mxu0 }
 0x8a1   : > { %v14803_v51 = vadd.f32 %v5183_v47, %v4935_v21  ;;  %v5185_v10 = vpop.f32.mrb[229].mxu0 }
 0x8a2   : > { %v5186_v44 = vpop.f32.mrb[230].mxu0 }
 0x8a3   : > { %v14806_v34 = vadd.f32 %v5186_v44, %v4938_v43  ;;  %v5188_v53 = vpop.f32.mrb[231].mxu0 }
 0x8a4   : > { %v10349_v53 = vld [vmem:[%s16782_s8 + $0x190] sm:$0xff]  }
 0x8a5   : > { %5431 = vmatmul.mubr.bf16.gmra.mrb[80].mxu0 %v18463_v38  ;;  %v18469_v38 = vpack.c.bf16 %v18467_v15, %v18468_v60  ;;  %v18473_v15 = vld [vmem:[#allocation197_spill] sm:$0xff] }
 0x8a6   : > { %5438 = vmatprep.mubr.bf16.mxu0 %v18466_v1  ;;  %5628 = vmatpush1.bf16.msra.mxu0 %v10349_v53  ;;  %v18475_v60 = vpack.c.bf16 %v18473_v15, %v18474_v0  ;;  %v18480_v0 = vld [vmem:[#allocation207_spill] sm:$0xff] }
 0x8a7   : > { %5629 = vmatprep.subr.bf16.mxu0 %v17500_v39 }
 0x8a8   : > { %v5191_v46 = vpop.f32.mrb[232].mxu0 }
 0x8a9   : > { %v14818_v21 = vadd.f32 %v5191_v46, %v4943_v40  ;;  %v5193_v47 = vpop.f32.mrb[233].mxu0  ;;  %v4954_v40 = vadd.f32 %v14746_v58, %v14521_v49  ;;  %v18477_v49 = vld [vmem:[#allocation215_spill] sm:$0xff] }
 0x8aa   : > { %v5194_v43 = vpop.f32.mrb[234].mxu0 }
 0x8ab   : > { %v14820_v10 = vadd.f32 %v5194_v43, %v4946_v55  ;;  %v5196_v44 = vpop.f32.mrb[235].mxu0  ;;  %v10350_v43 = vld [vmem:[%s16782_s8 + $0x198] sm:$0xff]  }
 0x8ac   : > { %5630 = vmatpush1.bf16.msra.mxu0 %v10350_v43  ;;  %v10352_v43 = vld [vmem:[%s16782_s8 + $0x1a8] sm:$0xff]  }
 0x8ad   : > { %5439 = vmatmul.mubr.bf16.gmra.mrb[84].mxu0 %v18469_v38  ;;  %5631 = vmatprep.subr.bf16.mxu0 %v17500_v39  ;;  %v18476_v38 = vld [vmem:[#allocation79_spill] sm:$0xff] }
 0x8ae   : > { %5446 = vmatprep.mubr.bf16.mxu0 %v18472_v37  ;;  %v18478_v30 = vpack.c.bf16 %v18476_v38, %v18477_v49  ;;  %v4959_v37 = vadd.f32 %v14746_v58, %v14534_v13  ;;  %v18479_v13 = vld [vmem:[#allocation209_spill] sm:$0xff]  ;;  %v18483_v38 = vld [vmem:[#allocation87_spill] sm:$0xff] }
 0x8b0   : > { %v5199_v1 = vpop.f32.mrb[236].mxu0  ;;  %5632 = vmatpush1.bf16.msra.mxu0 %v10351_v31  ;;  %v4967_v31 = vadd.f32 %v14746_v58, %v14550_v33  ;;  %v18485_v33 = vld [vmem:[#allocation217_spill] sm:$0xff] }
 0x8b1   : > { %v14836_v46 = vadd.f32 %v5199_v1, %v4951_v11  ;;  %v5201_v55 = vpop.f32.mrb[237].mxu0  ;;  %v4962_v1 = vadd.f32 %v14746_v58, %v14537_v28  ;;  %5633 = vmatprep.subr.bf16.mxu0 %v17500_v39  ;;  %v18482_v28 = vld [vmem:[#allocation112_spill] sm:$0xff] }
 0x8b2   : > { %v5202_v47 = vpop.f32.mrb[238].mxu0  ;;  %v18484_v49 = vpack.c.bf16 %v18482_v28, %v18483_v38  ;;  %v18489_v28 = vld [vmem:[#allocation120_spill] sm:$0xff] }
 0x8b3   : > { %v14841_v44 = vadd.f32 %v5202_v47, %v4954_v40  ;;  %v5204_v53 = vpop.f32.mrb[239].mxu0 }
 0x8b4   : > { %5634 = vmatpush1.bf16.msra.mxu0 %v10352_v43  ;;  %v10354_v43 = vld [vmem:[%s16782_s8 + $0x1b8] sm:$0xff]  }
 0x8b5   : > { %5447 = vmatmul.mubr.bf16.gmra.mrb[88].mxu0 %v18475_v60  ;;  %v18481_v60 = vpack.c.bf16 %v18479_v13, %v18480_v0  ;;  %5635 = vmatprep.subr.bf16.mxu0 %v17500_v39  ;;  %v18486_v0 = vld [vmem:[#allocation216_spill] sm:$0xff] }
 0x8b6   : > { %5454 = vmatprep.mubr.bf16.mxu0 %v18478_v30  ;;  %v10353_v30 = vld [vmem:[%s16782_s8 + $0x1b0] sm:$0xff]  }
 0x8b8   : > { %v5207_v11 = vpop.f32.mrb[240].mxu0  ;;  %5636 = vmatpush1.bf16.msra.mxu0 %v10353_v30  ;;  %v4975_v30 = vadd.f32 %v14746_v58, %v14566_v7  ;;  %v18491_v7 = vld [vmem:[#allocation96_spill] sm:$0xff] }
 0x8b9   : > { %v14857_v40 = vadd.f32 %v5207_v11, %v4959_v37  ;;  %v5209_v55 = vpop.f32.mrb[241].mxu0  ;;  %v4970_v11 = vadd.f32 %v14746_v58, %v14553_v12  ;;  %5637 = vmatprep.subr.bf16.mxu0 %v17500_v39  ;;  %v18488_v12 = vld [vmem:[#allocation222_spill] sm:$0xff] }
 0x8ba   : > { %v5210_v47 = vpop.f32.mrb[242].mxu0  ;;  %v18490_v38 = vpack.c.bf16 %v18488_v12, %v18489_v28  ;;  %v18495_v12 = vld [vmem:[#allocation152_spill] sm:$0xff] }
 0x8bb   : > { %v14863_v53 = vadd.f32 %v5210_v47, %v4962_v1  ;;  %v5212_v15 = vpop.f32.mrb[243].mxu0 }
 0x8bc   : > { %5638 = vmatpush1.bf16.msra.mxu0 %v10354_v43  ;;  %v10356_v43 = vld [vmem:[%s16782_s8 + $0x1c8] sm:$0xff]  }
 0x8bd   : > { %5455 = vmatmul.mubr.bf16.gmra.mrb[92].mxu0 %v18481_v60  ;;  %v18487_v60 = vpack.c.bf16 %v18485_v33, %v18486_v0  ;;  %5639 = vmatprep.subr.bf16.mxu0 %v17500_v39  ;;  %v18492_v0 = vld [vmem:[#allocation88_spill] sm:$0xff] }
 0x8be   : > { %5462 = vmatprep.mubr.bf16.mxu0 %v18484_v49  ;;  %v10355_v49 = vld [vmem:[%s16782_s8 + $0x1c0] sm:$0xff]  }
 0x8c0   : > { %v5215_v37 = vpop.f32.mrb[244].mxu0  ;;  %5640 = vmatpush1.bf16.msra.mxu0 %v10355_v49  ;;  %v4983_v49 = vadd.f32 %v14746_v58, %v14582_v36  ;;  %v18497_v36 = vld [vmem:[#allocation218_spill] sm:$0xff] }
 0x8c1   : > { %v14879_v1 = vadd.f32 %v5215_v37, %v4967_v31  ;;  %v5217_v55 = vpop.f32.mrb[245].mxu0  ;;  %v4978_v37 = vadd.f32 %v14746_v58, %v14569_v23  ;;  %5641 = vmatprep.subr.bf16.mxu0 %v17500_v39  ;;  %v18494_v23 = vld [vmem:[#allocation175_spill] sm:$0xff] }
 0x8c2   : > { %v5218_v47 = vpop.f32.mrb[246].mxu0  ;;  %v18496_v28 = vpack.c.bf16 %v18494_v23, %v18495_v12  ;;  %v18501_v23 = vld [vmem:[#allocation181_spill] sm:$0xff] }
 0x8c3   : > { %v14885_v15 = vadd.f32 %v5218_v47, %v4970_v11  ;;  %v5220_v13 = vpop.f32.mrb[247].mxu0 }
 0x8c4   : > { %5642 = vmatpush1.bf16.msra.mxu0 %v10356_v43  ;;  %v10358_v43 = vld [vmem:[%s16782_s8 + $0x1d8] sm:$0xff]  }
 0x8c5   : > { %5463 = vmatmul.mubr.bf16.gmra.mrb[96].mxu0 %v18487_v60  ;;  %v18493_v60 = vpack.c.bf16 %v18491_v7, %v18492_v0  ;;  %5643 = vmatprep.subr.bf16.mxu0 %v17500_v39  ;;  %v18498_v0 = vld [vmem:[#allocation127_spill] sm:$0xff] }
 0x8c6   : > { %5470 = vmatprep.mubr.bf16.mxu0 %v18490_v38  ;;  %v10357_v38 = vld [vmem:[%s16782_s8 + $0x1d0] sm:$0xff]  }
 0x8c8   : > { %v5223_v31 = vpop.f32.mrb[248].mxu0  ;;  %5644 = vmatpush1.bf16.msra.mxu0 %v10357_v38  ;;  %v4991_v38 = vadd.f32 %v14746_v58, %v14598_v20  ;;  %v18503_v20 = vld [vmem:[#allocation168_spill] sm:$0xff] }
 0x8c9   : > { %v14901_v11 = vadd.f32 %v5223_v31, %v4975_v30  ;;  %v5225_v55 = vpop.f32.mrb[249].mxu0  ;;  %v4986_v31 = vadd.f32 %v14746_v58, %v14585_v2  ;;  %5645 = vmatprep.subr.bf16.mxu0 %v17500_v39  ;;  %v18500_v2 = vld [vmem:[#allocation20_spill] sm:$0xff] }
 0x8ca   : > { %v5226_v47 = vpop.f32.mrb[250].mxu0  ;;  %v18502_v12 = vpack.c.bf16 %v18500_v2, %v18501_v23  ;;  %v18506_v2 = vld [vmem:[#allocation49_spill] sm:$0xff]  ;;  %v18507_v23 = vld [vmem:[#allocation26_spill] sm:$0xff] }
 0x8cb   : > { %v14907_v13 = vadd.f32 %v5226_v47, %v4978_v37  ;;  %v5228_v33 = vpop.f32.mrb[251].mxu0 }
 0x8cc   : > { %5646 = vmatpush1.bf16.msra.mxu0 %v10358_v43  ;;  %v10360_v43 = vld [vmem:[%s16782_s8 + $0x1e8] sm:$0xff]  }
 0x8cd   : > { %5471 = vmatmul.mubr.bf16.gmra.mrb[100].mxu0 %v18493_v60  ;;  %v18499_v60 = vpack.c.bf16 %v18497_v36, %v18498_v0  ;;  %5647 = vmatprep.subr.bf16.mxu0 %v17500_v39  ;;  %v18504_v0 = vld [vmem:[#allocation167_spill] sm:$0xff] }
 0x8ce   : > { %5478 = vmatprep.mubr.bf16.mxu0 %v18496_v28  ;;  %v10359_v28 = vld [vmem:[%s16782_s8 + $0x1e0] sm:$0xff]  }
 0x8d0   : > { %v5231_v30 = vpop.f32.mrb[252].mxu0  ;;  %5648 = vmatpush1.bf16.msra.mxu0 %v10359_v28  ;;  %v4999_v28 = vadd.f32 %v14746_v58, %v14614_v18  ;;  %v18509_v18 = vld [vmem:[#allocation200_spill] sm:$0xff] }
 0x8d1   : > { %v14923_v37 = vadd.f32 %v5231_v30, %v4983_v49  ;;  %v5233_v55 = vpop.f32.mrb[253].mxu0  ;;  %v4994_v30 = vadd.f32 %v14746_v58, %v14601_v50  ;;  %5649 = vmatprep.subr.bf16.mxu0 %v17500_v39  ;;  %v10361_v50 = vld [vmem:[%s16782_s8 + $0x1f0] sm:$0xff]  }
 0x8d2   : > { %v5234_v47 = vpop.f32.mrb[254].mxu0 }
 0x8d3   : > { %v14929_v33 = vadd.f32 %v5234_v47, %v4986_v31  ;;  %v5236_v7 = vpop.f32.mrb[255].mxu0 }
 0x8d4   : > { %5650 = vmatpush1.bf16.msra.mxu0 %v10360_v43  ;;  %v10362_v43 = vld [vmem:[%s16782_s8 + $0x1f8] sm:$0xff]  }
 0x8d5   : > { %5479 = vmatmul.mubr.bf16.gmra.mrb[104].mxu0 %v18499_v60  ;;  %v18505_v60 = vpack.c.bf16 %v18503_v20, %v18504_v0  ;;  %5651 = vmatprep.subr.bf16.mxu0 %v17500_v39  ;;  %v18510_v0 = vld [vmem:[#allocation199_spill] sm:$0xff] }
 0x8d6   : > { %5486 = vmatprep.mubr.bf16.mxu0 %v18502_v12  ;;  %v18508_v12 = vpack.c.bf16 %v18506_v2, %v18507_v23  ;;  %v18514_v2 = vld [vmem:[#allocation55_spill] sm:$0xff] }
 0x8d8   : > { %v5239_v49 = vpop.f32.mrb[0].mxu0  ;;  %5652 = vmatpush1.bf16.msra.mxu0 %v10361_v50  ;;  %v18512_v50 = vmov 0.0  }
 0x8d9   : > { %v14945_v31 = vadd.f32 %v5239_v49, %v4991_v38  ;;  %v5241_v55 = vpop.f32.mrb[1].mxu0  ;;  %v5002_v49 = vadd.f32 %v14746_v58, %v14617_v14  ;;  %5653 = vmatprep.subr.bf16.mxu0 %v17500_v39  ;;  %v18513_v14 = vld [vmem:[#allocation78_spill] sm:$0xff] }
 0x8da   : > { %v5242_v47 = vpop.f32.mrb[2].mxu0  ;;  %v18515_v23 = vpack.c.bf16 %v18513_v14, %v18514_v2  ;;  %v18519_v14 = vld [vmem:[#allocation9_spill] sm:$0xff]  ;;  %v18520_v2 = vld [vmem:[#allocation86_spill] sm:$0xff] }
 0x8db   : > { %v14951_v7 = vadd.f32 %v5242_v47, %v4994_v30  ;;  %v5244_v36 = vpop.f32.mrb[3].mxu0 }
 0x8dc   : > { %5654 = vmatpush1.bf16.msra.mxu0 %v10362_v43 }
 0x8dd   : > { %5487 = vmatmul.mubr.bf16.gmra.mrb[108].mxu0 %v18505_v60  ;;  %v18511_v60 = vpack.c.bf16 %v18509_v18, %v18510_v0  ;;  %9560 = vmatprep.subr.bf16.mxu0 %v18512_v50  ;;  %v18516_v18 = vld [vmem:[#allocation43_spill] sm:$0xff]  ;;  %v18517_v0 = vld [vmem:[#allocation38_spill] sm:$0xff] }
 0x8de   : > { %5494 = vmatprep.mubr.bf16.mxu0 %v18508_v12  ;;  %v5007_v12 = vadd.f32 %v14746_v58, %v14627_v22  ;;  %v5015_v22 = vadd.f32 %v14746_v58, %v14635_v5  ;;  %v5023_v5 = vadd.f32 %v14746_v58, %v14643_v27  ;;  %v5031_v27 = vadd.f32 %v14746_v58, %v14651_v42 }
 0x8df   : > { %v5039_v42 = vadd.f32 %v14746_v58, %v14659_v17  ;;  %v5047_v17 = vadd.f32 %v14746_v58, %v14667_v41  ;;  %v5055_v41 = vadd.f32 %v14746_v58, %v14675_v32  ;;  %v5063_v32 = vadd.f32 %v14746_v58, %v14683_v61  ;;  %v18567_v61 = vld [vmem:[#allocation143_spill] sm:$0xff] }
 0x8e0   : > { %v5247_v38 = vpop.f32.mrb[4].mxu0 }
 0x8e1   : > { %v14967_v30 = vadd.f32 %v5247_v38, %v4999_v28  ;;  %v5249_v55 = vpop.f32.mrb[5].mxu0  ;;  %v5010_v38 = vadd.f32 %v14746_v58, %v14629_v35  ;;  %v5018_v35 = vadd.f32 %v14746_v58, %v14637_v45 }
 0x8e2   : > { %v5250_v47 = vpop.f32.mrb[6].mxu0 }
 0x8e3   : > { %v14973_v36 = vadd.f32 %v5250_v47, %v5002_v49  ;;  %v5252_v20 = vpop.f32.mrb[7].mxu0 }
 0x8e5   : > { %5495 = vmatmul.mubr.bf16.gmra.mrb[112].mxu0 %v18511_v60  ;;  %v18518_v60 = vpack.c.bf16 %v18516_v18, %v18517_v0  ;;  %v18523_v18 = vld [vmem:[#allocation69_spill] sm:$0xff] }
 0x8e6   : > { %5502 = vmatprep.mubr.bf16.mxu0 %v18515_v23  ;;  %v18521_v23 = vpack.c.bf16 %v18519_v14, %v18520_v2  ;;  %v18526_v14 = vld [vmem:[#allocation15_spill] sm:$0xff] }
 0x8e8   : > { %v5255_v28 = vpop.f32.mrb[8].mxu0 }
 0x8e9   : > { %v14986_v49 = vadd.f32 %v5255_v28, %v5007_v12  ;;  %v5257_v55 = vpop.f32.mrb[9].mxu0 }
 0x8ea   : > { %v5258_v47 = vpop.f32.mrb[10].mxu0 }
 0x8eb   : > { %v14988_v43 = vadd.f32 %v5258_v47, %v5010_v38  ;;  %v5260_v20 = vpop.f32.mrb[11].mxu0 }
 0x8ec   : > { %v18522_v20 = vld [vmem:[#allocation70_spill] sm:$0xff] }
 0x8ed   : > { %5503 = vmatmul.mubr.bf16.gmra.mrb[116].mxu0 %v18518_v60  ;;  %v18524_v0 = vpack.c.bf16 %v18522_v20, %v18523_v18  ;;  %v18525_v60 = vld [vmem:[#allocation36_spill] sm:$0xff]  ;;  %v18529_v20 = vld [vmem:[#allocation19_spill] sm:$0xff] }
 0x8ee   : > { %5510 = vmatprep.mubr.bf16.mxu0 %v18521_v23  ;;  %v18527_v2 = vpack.c.bf16 %v18525_v60, %v18526_v14  ;;  %v18532_v60 = vld [vmem:[#allocation42_spill] sm:$0xff] }
 0x8f0   : > { %v5263_v39 = vpop.f32.mrb[12].mxu0 }
 0x8f1   : > { %v15000_v12 = vadd.f32 %v5263_v39, %v5015_v22  ;;  %v5265_v28 = vpop.f32.mrb[13].mxu0  ;;  %v5026_v39 = vadd.f32 %v14746_v58, %v14645_v59  ;;  %v5034_v59 = vadd.f32 %v14746_v58, %v14653_v48  ;;  %v5042_v48 = vadd.f32 %v14746_v58, %v14661_v6 }
 0x8f2   : > { %v5266_v38 = vpop.f32.mrb[14].mxu0  ;;  %v5050_v6 = vadd.f32 %v14746_v58, %v14669_v16  ;;  %v5058_v16 = vadd.f32 %v14746_v58, %v14677_v63  ;;  %v5066_v63 = vadd.f32 %v14746_v58, %v14685_v25  ;;  %v18568_v25 = vld [vmem:[#allocation126_spill] sm:$0xff] }
 0x8f3   : > { %v15002_v55 = vadd.f32 %v5266_v38, %v5018_v35  ;;  %v5268_v47 = vpop.f32.mrb[15].mxu0 }
 0x8f4   : > { %v18528_v47 = vld [vmem:[#allocation7_spill] sm:$0xff] }
 0x8f5   : > { %5511 = vmatmul.mubr.bf16.gmra.mrb[120].mxu0 %v18524_v0  ;;  %v18530_v18 = vpack.c.bf16 %v18528_v47, %v18529_v20  ;;  %v18531_v0 = vld [vmem:[#allocation65_spill] sm:$0xff]  ;;  %v18535_v47 = vld [vmem:[#allocation27_spill] sm:$0xff] }
 0x8f6   : > { %5518 = vmatprep.mubr.bf16.mxu0 %v18527_v2  ;;  %v18533_v14 = vpack.c.bf16 %v18531_v0, %v18532_v60  ;;  %v18538_v0 = vld [vmem:[#allocation73_spill] sm:$0xff] }
 0x8f8   : > { %v5271_v23 = vpop.f32.mrb[16].mxu0 }
 0x8f9   : > { %v15014_v45 = vadd.f32 %v5271_v23, %v5023_v5  ;;  %v5273_v22 = vpop.f32.mrb[17].mxu0 }
 0x8fa   : > { %v5274_v35 = vpop.f32.mrb[18].mxu0 }
 0x8fb   : > { %v15016_v28 = vadd.f32 %v5274_v35, %v5026_v39  ;;  %v5276_v38 = vpop.f32.mrb[19].mxu0 }
 0x8fc   : > { %v18534_v38 = vld [vmem:[#allocation30_spill] sm:$0xff] }
 0x8fd   : > { %5519 = vmatmul.mubr.bf16.gmra.mrb[124].mxu0 %v18530_v18  ;;  %v18536_v20 = vpack.c.bf16 %v18534_v38, %v18535_v47  ;;  %v18537_v18 = vld [vmem:[#allocation100_spill] sm:$0xff]  ;;  %v18541_v38 = vld [vmem:[#allocation54_spill] sm:$0xff] }
 0x8fe   : > { %5526 = vmatprep.mubr.bf16.mxu0 %v18533_v14  ;;  %v18539_v60 = vpack.c.bf16 %v18537_v18, %v18538_v0  ;;  %v18544_v18 = vld [vmem:[#allocation108_spill] sm:$0xff] }
 0x900   : > { %v5279_v2 = vpop.f32.mrb[20].mxu0 }
 0x901   : > { %v15028_v5 = vadd.f32 %v5279_v2, %v5031_v27  ;;  %v5281_v23 = vpop.f32.mrb[21].mxu0 }
 0x902   : > { %v5282_v39 = vpop.f32.mrb[22].mxu0 }
 0x903   : > { %v15030_v22 = vadd.f32 %v5282_v39, %v5034_v59  ;;  %v5284_v35 = vpop.f32.mrb[23].mxu0 }
 0x904   : > { %v18540_v35 = vld [vmem:[#allocation57_spill] sm:$0xff] }
 0x905   : > { %5527 = vmatmul.mubr.bf16.gmra.mrb[128].mxu0 %v18536_v20  ;;  %v18542_v47 = vpack.c.bf16 %v18540_v35, %v18541_v38  ;;  %v18543_v20 = vld [vmem:[#allocation228_spill] sm:$0xff]  ;;  %v18547_v35 = vld [vmem:[#allocation89_spill] sm:$0xff] }
 0x906   : > { %5534 = vmatprep.mubr.bf16.mxu0 %v18539_v60  ;;  %v18545_v0 = vpack.c.bf16 %v18543_v20, %v18544_v18  ;;  %v18550_v20 = vld [vmem:[#allocation230_spill] sm:$0xff] }
 0x908   : > { %v5287_v14 = vpop.f32.mrb[24].mxu0 }
 0x909   : > { %v15042_v27 = vadd.f32 %v5287_v14, %v5039_v42  ;;  %v5289_v2 = vpop.f32.mrb[25].mxu0 }
 0x90a   : > { %v5290_v59 = vpop.f32.mrb[26].mxu0 }
 0x90b   : > { %v15044_v23 = vadd.f32 %v5290_v59, %v5042_v48  ;;  %v5292_v39 = vpop.f32.mrb[27].mxu0 }
 0x90c   : > { %v18546_v39 = vld [vmem:[#allocation92_spill] sm:$0xff] }
 0x90d   : > { %5535 = vmatmul.mubr.bf16.gmra.mrb[132].mxu0 %v18542_v47  ;;  %v18548_v38 = vpack.c.bf16 %v18546_v39, %v18547_v35  ;;  %v18549_v47 = vld [vmem:[#allocation235_spill] sm:$0xff]  ;;  %v18554_v39 = vld [vmem:[#allocation124_spill] sm:$0xff] }
 0x90e   : > { %5542 = vmatprep.mubr.bf16.mxu0 %v18545_v0  ;;  %v18551_v18 = vpack.c.bf16 %v18549_v47, %v18550_v20  ;;  %v18557_v47 = vld [vmem:[#allocation237_spill] sm:$0xff] }
 0x910   : > { %v5295_v60 = vpop.f32.mrb[28].mxu0 }
 0x911   : > { %v15056_v42 = vadd.f32 %v5295_v60, %v5047_v17  ;;  %v5297_v14 = vpop.f32.mrb[29].mxu0 }
 0x912   : > { %v5298_v48 = vpop.f32.mrb[30].mxu0 }
 0x913   : > { %v15058_v2 = vadd.f32 %v5298_v48, %v5050_v6  ;;  %v5300_v59 = vpop.f32.mrb[31].mxu0 }
 0x914   : > { %v18553_v59 = vld [vmem:[#allocation129_spill] sm:$0xff] }
 0x915   : > { %5543 = vmatmul.mubr.bf16.gmra.mrb[136].mxu0 %v18548_v38  ;;  %v18555_v35 = vpack.c.bf16 %v18553_v59, %v18554_v39  ;;  %v18556_v38 = vld [vmem:[#allocation242_spill] sm:$0xff]  ;;  %v18562_v59 = vld [vmem:[#allocation132_spill] sm:$0xff] }
 0x916   : > { %5550 = vmatprep.mubr.bf16.mxu0 %v18551_v18  ;;  %v18558_v20 = vpack.c.bf16 %v18556_v38, %v18557_v47  ;;  %v18565_v38 = vld [vmem:[#allocation244_spill] sm:$0xff] }
 0x918   : > { %v5303_v0 = vpop.f32.mrb[32].mxu0 }
 0x919   : > { %v15070_v17 = vadd.f32 %v5303_v0, %v5055_v41  ;;  %v5305_v60 = vpop.f32.mrb[33].mxu0 }
 0x91a   : > { %v5306_v6 = vpop.f32.mrb[34].mxu0 }
 0x91b   : > { %v15072_v14 = vadd.f32 %v5306_v6, %v5058_v16  ;;  %v5308_v48 = vpop.f32.mrb[35].mxu0 }
 0x91c   : > { %v18561_v48 = vld [vmem:[#allocation137_spill] sm:$0xff] }
 0x91d   : > { %18552 = vst [vmem:[#allocation202_spill] sm:$0xff] %v15072_v14  ;;  %5551 = vmatmul.mubr.bf16.gmra.mrb[140].mxu0 %v18555_v35  ;;  %v18563_v39 = vpack.c.bf16 %v18561_v48, %v18562_v59  ;;  %v18564_v35 = vld [vmem:[#allocation249_spill] sm:$0xff]  ;;  %v18572_v59 = vld [vmem:[#allocation140_spill] sm:$0xff] }
 0x91e   : > { %5558 = vmatprep.mubr.bf16.mxu0 %v18558_v20  ;;  %v18566_v47 = vpack.c.bf16 %v18564_v35, %v18565_v38  ;;  %v5071_v20 = vadd.f32 %v14746_v58, %v18567_v61  ;;  %v18571_v48 = vld [vmem:[#allocation145_spill] sm:$0xff]  ;;  %v18574_v35 = vld [vmem:[#allocation256_spill] sm:$0xff]  ;;  %v18575_v38 = vld [vmem:[#allocation251_spill] sm:$0xff] }
 0x91f   : > { %v18577_v61 = vld [vmem:[#allocation165_spill] sm:$0xff] }
 0x920   : > { %v5311_v18 = vpop.f32.mrb[36].mxu0 }
 0x921   : > { %v15084_v41 = vadd.f32 %v5311_v18, %v5063_v32  ;;  %v5313_v0 = vpop.f32.mrb[37].mxu0  ;;  %v5074_v32 = vadd.f32 %v14746_v58, %v18568_v25  ;;  %v18578_v25 = vld [vmem:[#allocation150_spill] sm:$0xff] }
 0x922   : > { %v5314_v16 = vpop.f32.mrb[38].mxu0 }
 0x923   : > { %18559 = vst [vmem:[#allocation214_spill] sm:$0xff] %v15084_v41  ;;  %v15086_v60 = vadd.f32 %v5314_v16, %v5066_v63  ;;  %v5316_v6 = vpop.f32.mrb[39].mxu0 }
 0x925   : > { %18560 = vst [vmem:[#allocation211_spill] sm:$0xff] %v15086_v60  ;;  %5559 = vmatmul.mubr.bf16.gmra.mrb[144].mxu0 %v18563_v39  ;;  %v18573_v39 = vpack.c.bf16 %v18571_v48, %v18572_v59  ;;  %v5079_v60 = vadd.f32 %v14746_v58, %v18577_v61  ;;  %v18580_v48 = vld [vmem:[#allocation153_spill] sm:$0xff]  ;;  %v18581_v59 = vld [vmem:[#allocation148_spill] sm:$0xff] }
 0x926   : > { %5566 = vmatprep.mubr.bf16.mxu0 %v18566_v47  ;;  %v18576_v47 = vpack.c.bf16 %v18574_v35, %v18575_v38  ;;  %v18583_v35 = vld [vmem:[#allocation263_spill] sm:$0xff]  ;;  %v18584_v38 = vld [vmem:[#allocation258_spill] sm:$0xff]  ;;  %v18586_v61 = vld [vmem:[#allocation185_spill] sm:$0xff] }
 0x928   : > { %v5319_v14 = vpop.f32.mrb[40].mxu0 }
 0x929   : > { %v15098_v18 = vadd.f32 %v5319_v14, %v5071_v20  ;;  %v5321_v63 = vpop.f32.mrb[41].mxu0  ;;  %v5082_v14 = vadd.f32 %v14746_v58, %v18578_v25  ;;  %v18587_v25 = vld [vmem:[#allocation184_spill] sm:$0xff] }
 0x92a   : > { %v5322_v0 = vpop.f32.mrb[42].mxu0 }
 0x92b   : > { %18569 = vst [vmem:[#allocation80_spill] sm:$0xff] %v15098_v18  ;;  %v15100_v16 = vadd.f32 %v5322_v0, %v5074_v32  ;;  %v5324_v6 = vpop.f32.mrb[43].mxu0 }
 0x92d   : > { %18570 = vst [vmem:[#allocation71_spill] sm:$0xff] %v15100_v16  ;;  %5567 = vmatmul.mubr.bf16.gmra.mrb[148].mxu0 %v18573_v39  ;;  %v18582_v39 = vpack.c.bf16 %v18580_v48, %v18581_v59  ;;  %v5087_v16 = vadd.f32 %v14746_v58, %v18586_v61  ;;  %v18588_v48 = vld [vmem:[#allocation161_spill] sm:$0xff]  ;;  %v18589_v59 = vld [vmem:[#allocation156_spill] sm:$0xff]  ;;  %v5095_v61 = vadd.f32 %v14746_v58, %v14715_v52 }
 0x92e   : > { %5574 = vmatprep.mubr.bf16.mxu0 %v18576_v47  ;;  %v18585_v47 = vpack.c.bf16 %v18583_v35, %v18584_v38  ;;  %v18591_v35 = vld [vmem:[#allocation270_spill] sm:$0xff]  ;;  %v18592_v38 = vld [vmem:[#allocation265_spill] sm:$0xff]  ;;  %v5103_v52 = vadd.f32 %v14746_v58, %v14723_v24  ;;  %v5111_v24 = vadd.f32 %v14746_v58, %v14731_v9  ;;  %v5119_v9 = vadd.f32 %v14746_v58, %v14739_v54 }
 0x930   : > { %v5327_v41 = vpop.f32.mrb[44].mxu0 }
 0x931   : > { %v15112_v20 = vadd.f32 %v5327_v41, %v5079_v60  ;;  %v5329_v32 = vpop.f32.mrb[45].mxu0  ;;  %v5090_v41 = vadd.f32 %v14746_v58, %v18587_v25 }
 0x932   : > { %v5330_v63 = vpop.f32.mrb[46].mxu0 }
 0x933   : > { %v15114_v0 = vadd.f32 %v5330_v63, %v5082_v14  ;;  %v5332_v6 = vpop.f32.mrb[47].mxu0 }
 0x935   : > { %18579 = vst [vmem:[#allocation119_spill] sm:$0xff] %v15114_v0  ;;  %5575 = vmatmul.mubr.bf16.gmra.mrb[152].mxu0 %v18582_v39  ;;  %v18590_v39 = vpack.c.bf16 %v18588_v48, %v18589_v59  ;;  %v18595_v48 = vld [vmem:[#allocation164_spill] sm:$0xff] }
 0x936   : > { %5582 = vmatprep.mubr.bf16.mxu0 %v18585_v47  ;;  %v18593_v47 = vpack.c.bf16 %v18591_v35, %v18592_v38  ;;  %v18598_v35 = vld [vmem:[#allocation272_spill] sm:$0xff] }
 0x938   : > { %v5335_v18 = vpop.f32.mrb[48].mxu0 }
 0x939   : > { %v15126_v60 = vadd.f32 %v5335_v18, %v5087_v16  ;;  %v5337_v14 = vpop.f32.mrb[49].mxu0  ;;  %v5098_v18 = vadd.f32 %v14746_v58, %v14717_v19  ;;  %v5106_v19 = vadd.f32 %v14746_v58, %v14725_v56  ;;  %v5114_v56 = vadd.f32 %v14746_v58, %v14733_v26  ;;  %v18613_v26 = vld [vmem:[#allocation205_spill] sm:$0xff] }
 0x93a   : > { %v5338_v32 = vpop.f32.mrb[50].mxu0 }
 0x93b   : > { %v15128_v63 = vadd.f32 %v5338_v32, %v5090_v41  ;;  %v5340_v6 = vpop.f32.mrb[51].mxu0 }
 0x93c   : > { %v18594_v6 = vld [vmem:[#allocation169_spill] sm:$0xff] }
 0x93d   : > { %5583 = vmatmul.mubr.bf16.gmra.mrb[156].mxu0 %v18590_v39  ;;  %v18596_v59 = vpack.c.bf16 %v18594_v6, %v18595_v48  ;;  %v18597_v39 = vld [vmem:[#allocation277_spill] sm:$0xff]  ;;  %v18601_v6 = vld [vmem:[#allocation172_spill] sm:$0xff] }
 0x93e   : > { %5590 = vmatprep.mubr.bf16.mxu0 %v18593_v47  ;;  %v18599_v38 = vpack.c.bf16 %v18597_v39, %v18598_v35  ;;  %v18604_v39 = vld [vmem:[#allocation278_spill] sm:$0xff] }
 0x940   : > { %v5343_v0 = vpop.f32.mrb[52].mxu0 }
 0x941   : > { %v15140_v16 = vadd.f32 %v5343_v0, %v5095_v61  ;;  %v5345_v25 = vpop.f32.mrb[53].mxu0 }
 0x942   : > { %v5346_v41 = vpop.f32.mrb[54].mxu0 }
 0x943   : > { %v15142_v14 = vadd.f32 %v5346_v41, %v5098_v18  ;;  %v5348_v32 = vpop.f32.mrb[55].mxu0 }
 0x944   : > { %v18600_v32 = vld [vmem:[#allocation176_spill] sm:$0xff] }
 0x945   : > { %5591 = vmatmul.mubr.bf16.gmra.mrb[160].mxu0 %v18596_v59  ;;  %v18602_v48 = vpack.c.bf16 %v18600_v32, %v18601_v6  ;;  %v18603_v59 = vld [vmem:[#allocation281_spill] sm:$0xff]  ;;  %v18608_v32 = vld [vmem:[#allocation2_spill] sm:$0xff] }
 0x946   : > { %5598 = vmatprep.mubr.bf16.mxu0 %v18599_v38  ;;  %v18605_v35 = vpack.c.bf16 %v18603_v59, %v18604_v39  ;;  %v18611_v59 = vld [vmem:[#allocation283_spill] sm:$0xff] }
 0x948   : > { %v5351_v47 = vpop.f32.mrb[56].mxu0 }
 0x949   : > { %v15154_v0 = vadd.f32 %v5351_v47, %v5103_v52  ;;  %v5353_v61 = vpop.f32.mrb[57].mxu0 }
 0x94a   : > { %v5354_v18 = vpop.f32.mrb[58].mxu0 }
 0x94b   : > { %v15156_v25 = vadd.f32 %v5354_v18, %v5106_v19  ;;  %v5356_v41 = vpop.f32.mrb[59].mxu0 }
 0x94c   : > { %v18607_v41 = vld [vmem:[#allocation4_spill] sm:$0xff] }
 0x94d   : > { %5599 = vmatmul.mubr.bf16.gmra.mrb[164].mxu0 %v18602_v48  ;;  %v18609_v6 = vpack.c.bf16 %v18607_v41, %v18608_v32  ;;  %v18610_v48 = vld [vmem:[#allocation287_spill] sm:$0xff]  ;;  %v18615_v32 = vld [vmem:[#allocation5_spill] sm:$0xff] }
 0x94e   : > { %5606 = vmatprep.mubr.bf16.mxu0 %v18605_v35  ;;  %v18612_v39 = vpack.c.bf16 %v18610_v48, %v18611_v59  ;;  %v18614_v41 = vld [vmem:[#allocation3_spill] sm:$0xff] }
 0x94f   : > { %v18617_v48 = vld [vmem:[#allocation135_spill] sm:$0xff] }
 0x950   : > { %v5359_v38 = vpop.f32.mrb[60].mxu0 }
 0x951   : > { %v15168_v52 = vadd.f32 %v5359_v38, %v5111_v24  ;;  %v5361_v47 = vpop.f32.mrb[61].mxu0  ;;  %v5122_v24 = vadd.f32 %v14746_v58, %v18613_v26  ;;  %v18619_v26 = vld [vmem:[#allocation149_spill] sm:$0xff] }
 0x952   : > { %v5362_v19 = vpop.f32.mrb[62].mxu0 }
 0x953   : > { %v15170_v61 = vadd.f32 %v5362_v19, %v5114_v56  ;;  %v5364_v18 = vpop.f32.mrb[63].mxu0 }
 0x955   : > { %18606 = vst [vmem:[#allocation104_spill] sm:$0xff] %v15170_v61  ;;  %5607 = vmatmul.mubr.bf16.gmra.mrb[168].mxu0 %v18609_v6  ;;  %v18616_v6 = vpack.c.bf16 %v18614_v41, %v18615_v32  ;;  %v18621_v32 = vld [vmem:[#allocation180_spill] sm:$0xff] }
 0x956   : > { %5614 = vmatprep.mubr.bf16.mxu0 %v18612_v39 }
 0x958   : > { %v5367_v35 = vpop.f32.mrb[64].mxu0 }
 0x959   : > { %v15182_v38 = vadd.f32 %v5367_v35, %v5119_v9  ;;  %v5369_v56 = vpop.f32.mrb[65].mxu0  ;;  %v18618_v35 = vld [vmem:[#allocation133_spill] sm:$0xff] }
 0x95a   : > { %v5370_v47 = vpop.f32.mrb[66].mxu0 }
 0x95b   : > { %v15184_v19 = vadd.f32 %v5370_v47, %v5122_v24  ;;  %v5372_v18 = vpop.f32.mrb[67].mxu0 }
 0x95d   : > { %5615 = vmatmul.mubr.bf16.gmra.mrb[172].mxu0 %v18616_v6 }
 0x95e   : > { %5655 = vmatprep.mubr.bf16.mxu0 %v18617_v48 }
 0x960   : > { %v5408_v59 = vpop.f32.mrb[68].mxu0 }
 0x961   : > { %v15191_v54 = vadd.f32 %v5408_v59, %v14755_v62  ;;  %v5410_v39 = vpop.f32.mrb[69].mxu0  ;;  %v10363_v62 = vld [vmem:[%s16782_s8 + $0x200] sm:$0xff]  }
 0x962   : > { %v5411_v61 = vpop.f32.mrb[70].mxu0 }
 0x963   : > { %v15194_v58 = vadd.f32 %v5411_v61, %v14759_v3  ;;  %v5413_v9 = vpop.f32.mrb[71].mxu0  ;;  %v18620_v61 = vld [vmem:[#allocation157_spill] sm:$0xff] }
 0x965   : > { %5656 = vmatmul.mubr.bf16.vlgmr.msra.gmra.mrb[176].mxu0 %v18618_v35  ;;  %v18623_v35 = vld [vmem:[#allocation196_spill] sm:$0xff] }
 0x966   : > { %5663 = vmatprep.mubr.bf16.mxu0 %v18619_v26  ;;  %9561 = vmatpush3.bf16.msra.mxu0 %v10363_v62 }
 0x967   : > { %9562 = vmatprep.subr.bf16.mxu0 %v18512_v50 }
 0x968   : > { %v5416_v24 = vpop.f32.mrb[72].mxu0 }
 0x969   : > { %v15199_v56 = vadd.f32 %v5416_v24, %v14768_v4  ;;  %v5418_v47 = vpop.f32.mrb[73].mxu0 }
 0x96a   : > { %v5419_v18 = vpop.f32.mrb[74].mxu0 }
 0x96b   : > { %v15205_v41 = vadd.f32 %v5419_v18, %v14773_v29  ;;  %v5421_v3 = vpop.f32.mrb[75].mxu0  ;;  %v18622_v29 = vld [vmem:[#allocation195_spill] sm:$0xff] }
 0x96c   : > { %v18624_v3 = vld [vmem:[#allocation203_spill] sm:$0xff] }
 0x96d   : > { %5664 = vmatmul.mubr.bf16.gmra.mrb[180].mxu0 %v18620_v61  ;;  %v18625_v61 = vld [vmem:[#allocation210_spill] sm:$0xff] }
 0x96e   : > { %5671 = vmatprep.mubr.bf16.mxu0 %v18621_v32 }
 0x970   : > { %v5424_v6 = vpop.f32.mrb[76].mxu0 }
 0x971   : > { %v15211_v4 = vadd.f32 %v5424_v6, %v14786_v57  ;;  %v5426_v48 = vpop.f32.mrb[77].mxu0 }
 0x972   : > { %v5427_v59 = vpop.f32.mrb[78].mxu0 }
 0x973   : > { %v15214_v39 = vadd.f32 %v5427_v59, %v14788_v8  ;;  %v5429_v9 = vpop.f32.mrb[79].mxu0 }
 0x974   : > { %v18626_v9 = vld [vmem:[#allocation212_spill] sm:$0xff] }
 0x975   : > { %5672 = vmatmul.mubr.bf16.gmra.mrb[184].mxu0 %v18622_v29  ;;  %v18627_v29 = vld [vmem:[#allocation64_spill] sm:$0xff] }
 0x976   : > { %5679 = vmatprep.mubr.bf16.mxu0 %v18623_v35 }
 0x978   : > { %v5432_v26 = vpop.f32.mrb[80].mxu0 }
 0x979   : > { %v15219_v24 = vadd.f32 %v5432_v26, %v14803_v51  ;;  %v5434_v47 = vpop.f32.mrb[81].mxu0 }
 0x97a   : > { %v5435_v62 = vpop.f32.mrb[82].mxu0 }
 0x97b   : > { %v15222_v18 = vadd.f32 %v5435_v62, %v14806_v34  ;;  %v5437_v57 = vpop.f32.mrb[83].mxu0  ;;  %v10364_v34 = vld [vmem:[%s16782_s8 + $0x208] sm:$0xff]  }
 0x97c   : > { %9563 = vmatpush3.bf16.msra.mxu0 %v10364_v34  ;;  %v18628_v57 = vld [vmem:[#allocation72_spill] sm:$0xff]  ;;  %v18630_v34 = vld [vmem:[#allocation111_spill] sm:$0xff] }
 0x97d   : > { %5680 = vmatmul.mubr.bf16.gmra.mrb[188].mxu0 %v18624_v3  ;;  %9564 = vmatprep.subr.bf16.mxu0 %v18512_v50  ;;  %v18629_v3 = vld [vmem:[#allocation103_spill] sm:$0xff] }
 0x97e   : > { %5687 = vmatprep.mubr.bf16.mxu0 %v18625_v61 }
 0x980   : > { %v5440_v8 = vpop.f32.mrb[84].mxu0 }
 0x981   : > { %v15227_v32 = vadd.f32 %v5440_v8, %v14818_v21  ;;  %v5442_v6 = vpop.f32.mrb[85].mxu0 }
 0x982   : > { %v5443_v48 = vpop.f32.mrb[86].mxu0 }
 0x983   : > { %v15230_v59 = vadd.f32 %v5443_v48, %v14820_v10  ;;  %v5445_v51 = vpop.f32.mrb[87].mxu0 }
 0x985   : > { %5688 = vmatmul.mubr.bf16.gmra.mrb[192].mxu0 %v18626_v9  ;;  %v18631_v9 = vld [vmem:[#allocation219_spill] sm:$0xff] }
 0x986   : > { %5695 = vmatprep.mubr.bf16.mxu0 %v18627_v29 }
 0x988   : > { %v5448_v35 = vpop.f32.mrb[88].mxu0 }
 0x989   : > { %v15239_v21 = vadd.f32 %v5448_v35, %v14836_v46  ;;  %v5450_v26 = vpop.f32.mrb[89].mxu0 }
 0x98a   : > { %v5451_v47 = vpop.f32.mrb[90].mxu0 }
 0x98b   : > { %v15242_v10 = vadd.f32 %v5451_v47, %v14841_v44  ;;  %v5453_v62 = vpop.f32.mrb[91].mxu0 }
 0x98c   : > { %v18632_v62 = vld [vmem:[#allocation221_spill] sm:$0xff] }
 0x98d   : > { %5696 = vmatmul.mubr.bf16.gmra.mrb[196].mxu0 %v18628_v57  ;;  %v18633_v57 = vld [vmem:[#allocation223_spill] sm:$0xff] }
 0x98e   : > { %5703 = vmatprep.mubr.bf16.mxu0 %v18629_v3 }
 0x990   : > { %v5456_v61 = vpop.f32.mrb[92].mxu0 }
 0x991   : > { %v15247_v8 = vadd.f32 %v5456_v61, %v14857_v40  ;;  %v5458_v6 = vpop.f32.mrb[93].mxu0 }
 0x992   : > { %v5459_v48 = vpop.f32.mrb[94].mxu0 }
 0x993   : > { %v15250_v51 = vadd.f32 %v5459_v48, %v14863_v53  ;;  %v5461_v46 = vpop.f32.mrb[95].mxu0  ;;  %v10365_v53 = vld [vmem:[%s16782_s8 + $0x210] sm:$0xff]  }
 0x994   : > { %9565 = vmatpush3.bf16.msra.mxu0 %v10365_v53  ;;  %v18634_v46 = vld [vmem:[#allocation190_spill] sm:$0xff] }
 0x995   : > { %5704 = vmatmul.mubr.bf16.gmra.mrb[200].mxu0 %v18630_v34  ;;  %9566 = vmatprep.subr.bf16.mxu0 %v18512_v50  ;;  %v18635_v34 = vld [vmem:[#allocation201_spill] sm:$0xff] }
 0x996   : > { %5711 = vmatprep.mubr.bf16.mxu0 %v18631_v9 }
 0x998   : > { %v5464_v44 = vpop.f32.mrb[96].mxu0 }
 0x999   : > { %v15255_v29 = vadd.f32 %v5464_v44, %v14879_v1  ;;  %v5466_v35 = vpop.f32.mrb[97].mxu0 }
 0x99a   : > { %v5467_v26 = vpop.f32.mrb[98].mxu0 }
 0x99b   : > { %v15258_v47 = vadd.f32 %v5467_v26, %v14885_v15  ;;  %v5469_v40 = vpop.f32.mrb[99].mxu0 }
 0x99d   : > { %5712 = vmatmul.mubr.bf16.gmra.mrb[204].mxu0 %v18632_v62  ;;  %v18636_v62 = vld [vmem:[#allocation31_spill] sm:$0xff] }
 0x99e   : > { %5719 = vmatprep.mubr.bf16.mxu0 %v18633_v57  ;;  %v18637_v57 = vld [vmem:[#allocation44_spill] sm:$0xff] }
 0x9a0   : > { %v5472_v3 = vpop.f32.mrb[100].mxu0 }
 0x9a1   : > { %v15266_v61 = vadd.f32 %v5472_v3, %v14901_v11  ;;  %v5474_v1 = vpop.f32.mrb[101].mxu0  ;;  %v10366_v11 = vld [vmem:[%s16782_s8 + $0x218] sm:$0xff]  }
 0x9a2   : > { %v5475_v6 = vpop.f32.mrb[102].mxu0  ;;  %9567 = vmatpush3.bf16.msra.mxu0 %v10366_v11 }
 0x9a3   : > { %v15270_v15 = vadd.f32 %v5475_v6, %v14907_v13  ;;  %v5477_v48 = vpop.f32.mrb[103].mxu0  ;;  %9568 = vmatprep.subr.bf16.mxu0 %v18512_v50  ;;  %v10368_v6 = vld [vmem:[%s16782_s8 + $0x228] sm:$0xff]  }
 0x9a5   : > { %5720 = vmatmul.mubr.bf16.gmra.mrb[208].mxu0 %v18634_v46 }
 0x9a6   : > { %5727 = vmatprep.mubr.bf16.mxu0 %v18635_v34  ;;  %v18638_v34 = vld [vmem:[#allocation56_spill] sm:$0xff] }
 0x9a8   : > { %v5480_v9 = vpop.f32.mrb[104].mxu0 }
 0x9a9   : > { %v15275_v44 = vadd.f32 %v5480_v9, %v14923_v37  ;;  %v5482_v35 = vpop.f32.mrb[105].mxu0  ;;  %v10367_v37 = vld [vmem:[%s16782_s8 + $0x220] sm:$0xff]   ;;  %v18639_v9 = vld [vmem:[#allocation77_spill] sm:$0xff] }
 0x9aa   : > { %v5483_v26 = vpop.f32.mrb[106].mxu0  ;;  %9569 = vmatpush3.bf16.msra.mxu0 %v10367_v37  ;;  %v18640_v37 = vld [vmem:[#allocation93_spill] sm:$0xff] }
 0x9ab   : > { %v15281_v40 = vadd.f32 %v5483_v26, %v14929_v33  ;;  %v5485_v13 = vpop.f32.mrb[107].mxu0  ;;  %9570 = vmatprep.subr.bf16.mxu0 %v18512_v50 }
 0x9ac   : > { %v10370_v13 = vld [vmem:[%s16782_s8 + $0x238] sm:$0xff]  }
 0x9ad   : > { %5728 = vmatmul.mubr.bf16.gmra.mrb[212].mxu0 %v18636_v62 }
 0x9ae   : > { %5735 = vmatprep.mubr.bf16.mxu0 %v18637_v57  ;;  %9571 = vmatpush3.bf16.msra.mxu0 %v10368_v6 }
 0x9af   : > { %9572 = vmatprep.subr.bf16.mxu0 %v18512_v50 }
 0x9b0   : > { %v5488_v53 = vpop.f32.mrb[108].mxu0 }
 0x9b1   : > { %v15290_v3 = vadd.f32 %v5488_v53, %v14945_v31  ;;  %v5490_v1 = vpop.f32.mrb[109].mxu0  ;;  %v10369_v31 = vld [vmem:[%s16782_s8 + $0x230] sm:$0xff]  }
 0x9b2   : > { %v5491_v33 = vpop.f32.mrb[110].mxu0  ;;  %9573 = vmatpush3.bf16.msra.mxu0 %v10369_v31  ;;  %v18641_v53 = vld [vmem:[#allocation8_spill] sm:$0xff]  ;;  %v18642_v31 = vld [vmem:[#allocation18_spill] sm:$0xff] }
 0x9b3   : > { %v15297_v48 = vadd.f32 %v5491_v33, %v14951_v7  ;;  %v5493_v46 = vpop.f32.mrb[111].mxu0  ;;  %9574 = vmatprep.subr.bf16.mxu0 %v18512_v50 }
 0x9b5   : > { %5736 = vmatmul.mubr.bf16.gmra.mrb[216].mxu0 %v18638_v34 }
 0x9b6   : > { %5743 = vmatprep.mubr.bf16.mxu0 %v18639_v9  ;;  %9575 = vmatpush3.bf16.msra.mxu0 %v10370_v13 }
 0x9b8   : > { %v5496_v35 = vpop.f32.mrb[112].mxu0 }
 0x9b9   : > { %v15306_v26 = vadd.f32 %v5496_v35, %v14967_v30  ;;  %v5498_v11 = vpop.f32.mrb[113].mxu0 }
 0x9ba   : > { %v5499_v7 = vpop.f32.mrb[114].mxu0 }
 0x9bb   : > { %v15313_v62 = vadd.f32 %v5499_v7, %v14973_v36  ;;  %v5501_v57 = vpop.f32.mrb[115].mxu0  ;;  %v18643_v36 = vld [vmem:[#allocation33_spill] sm:$0xff] }
 0x9bc   : > { %v18644_v57 = vld [vmem:[#allocation45_spill] sm:$0xff] }
 0x9bd   : > { %5744 = vmatmul.mubr.bf16.gmra.mrb[220].mxu0 %v18640_v37  ;;  %v18645_v37 = vld [vmem:[#allocation60_spill] sm:$0xff] }
 0x9be   : > { %5751 = vmatprep.mubr.bf16.mxu0 %v18641_v53 }
 0x9c0   : > { %v5504_v1 = vpop.f32.mrb[116].mxu0 }
 0x9c1   : > { %v15318_v30 = vadd.f32 %v5504_v1, %v14986_v49  ;;  %v5506_v33 = vpop.f32.mrb[117].mxu0 }
 0x9c2   : > { %v5507_v6 = vpop.f32.mrb[118].mxu0 }
 0x9c3   : > { %v15321_v46 = vadd.f32 %v5507_v6, %v14988_v43  ;;  %v5509_v34 = vpop.f32.mrb[119].mxu0 }
 0x9c4   : > { %v18646_v34 = vld [vmem:[#allocation76_spill] sm:$0xff] }
 0x9c5   : > { %5752 = vmatmul.mubr.bf16.gmra.mrb[224].mxu0 %v18642_v31  ;;  %v18647_v31 = vld [vmem:[#allocation97_spill] sm:$0xff] }
 0x9c6   : > { %5759 = vmatprep.mubr.bf16.mxu0 %v18643_v36 }
 0x9c8   : > { %v5512_v9 = vpop.f32.mrb[120].mxu0 }
 0x9c9   : > { %v15326_v35 = vadd.f32 %v5512_v9, %v15000_v12  ;;  %v5514_v11 = vpop.f32.mrb[121].mxu0 }
 0x9ca   : > { %v5515_v7 = vpop.f32.mrb[122].mxu0 }
 0x9cb   : > { %v15329_v13 = vadd.f32 %v5515_v7, %v15002_v55  ;;  %v5517_v49 = vpop.f32.mrb[123].mxu0 }
 0x9cc   : > { %v18648_v49 = vld [vmem:[#allocation113_spill] sm:$0xff] }
 0x9cd   : > { %5760 = vmatmul.mubr.bf16.gmra.mrb[228].mxu0 %v18644_v57  ;;  %v18649_v57 = vld [vmem:[#allocation227_spill] sm:$0xff] }
 0x9ce   : > { %5767 = vmatprep.mubr.bf16.mxu0 %v18645_v37 }
 0x9d0   : > { %v5520_v43 = vpop.f32.mrb[124].mxu0 }
 0x9d1   : > { %v15334_v53 = vadd.f32 %v5520_v43, %v15014_v45  ;;  %v5522_v1 = vpop.f32.mrb[125].mxu0 }
 0x9d2   : > { %v5523_v33 = vpop.f32.mrb[126].mxu0 }
 0x9d3   : > { %v15337_v6 = vadd.f32 %v5523_v33, %v15016_v28  ;;  %v5525_v12 = vpop.f32.mrb[127].mxu0 }
 0x9d4   : > { %v18650_v12 = vld [vmem:[#allocation231_spill] sm:$0xff] }
 0x9d5   : > { %5768 = vmatmul.mubr.bf16.gmra.mrb[232].mxu0 %v18646_v34  ;;  %v18651_v34 = vld [vmem:[#allocation234_spill] sm:$0xff] }
 0x9d6   : > { %5775 = vmatprep.mubr.bf16.mxu0 %v18647_v31 }
 0x9d8   : > { %v5528_v55 = vpop.f32.mrb[128].mxu0 }
 0x9d9   : > { %v15342_v36 = vadd.f32 %v5528_v55, %v15028_v5  ;;  %v5530_v9 = vpop.f32.mrb[129].mxu0 }
 0x9da   : > { %v5531_v11 = vpop.f32.mrb[130].mxu0 }
 0x9db   : > { %v15345_v7 = vadd.f32 %v5531_v11, %v15030_v22  ;;  %v5533_v45 = vpop.f32.mrb[131].mxu0 }
 0x9dc   : > { %v18652_v45 = vld [vmem:[#allocation238_spill] sm:$0xff] }
 0x9dd   : > { %5776 = vmatmul.mubr.bf16.gmra.mrb[236].mxu0 %v18648_v49  ;;  %v18653_v49 = vld [vmem:[#allocation241_spill] sm:$0xff] }
 0x9de   : > { %5783 = vmatprep.mubr.bf16.mxu0 %v18649_v57 }
 0x9e0   : > { %v5536_v28 = vpop.f32.mrb[132].mxu0 }
 0x9e1   : > { %v15350_v37 = vadd.f32 %v5536_v28, %v15042_v27  ;;  %v5538_v43 = vpop.f32.mrb[133].mxu0 }
 0x9e2   : > { %v5539_v1 = vpop.f32.mrb[134].mxu0 }
 0x9e3   : > { %v15353_v33 = vadd.f32 %v5539_v1, %v15044_v23  ;;  %v5541_v5 = vpop.f32.mrb[135].mxu0  ;;  %v18655_v1 = vld [vmem:[#allocation202_spill] sm:$0xff] }
 0x9e5   : > { %5784 = vmatmul.mubr.bf16.gmra.mrb[240].mxu0 %v18650_v12  ;;  %v18657_v12 = vld [vmem:[#allocation245_spill] sm:$0xff] }
 0x9e6   : > { %5791 = vmatprep.mubr.bf16.mxu0 %v18651_v34  ;;  %v18658_v34 = vld [vmem:[#allocation248_spill] sm:$0xff] }
 0x9e8   : > { %v5544_v22 = vpop.f32.mrb[136].mxu0 }
 0x9e9   : > { %v15358_v31 = vadd.f32 %v5544_v22, %v15056_v42  ;;  %v5546_v55 = vpop.f32.mrb[137].mxu0  ;;  %v18659_v22 = vld [vmem:[#allocation214_spill] sm:$0xff] }
 0x9ea   : > { %v5547_v9 = vpop.f32.mrb[138].mxu0 }
 0x9eb   : > { %v15361_v11 = vadd.f32 %v5547_v9, %v15058_v2  ;;  %v5549_v27 = vpop.f32.mrb[139].mxu0 }
 0x9ed   : > { %5792 = vmatmul.mubr.bf16.gmra.mrb[244].mxu0 %v18652_v45  ;;  %v18660_v45 = vld [vmem:[#allocation211_spill] sm:$0xff] }
 0x9ee   : > { %5799 = vmatprep.mubr.bf16.mxu0 %v18653_v49 }
 0x9f0   : > { %v5552_v23 = vpop.f32.mrb[140].mxu0 }
 0x9f1   : > { %v15366_v57 = vadd.f32 %v5552_v23, %v15070_v17  ;;  %v5554_v28 = vpop.f32.mrb[141].mxu0  ;;  %v18662_v23 = vld [vmem:[#allocation252_spill] sm:$0xff] }
 0x9f2   : > { %v5555_v43 = vpop.f32.mrb[142].mxu0  ;;  %v18663_v28 = vld [vmem:[#allocation255_spill] sm:$0xff] }
 0x9f3   : > { %18654 = vst [vmem:[#allocation159_spill] sm:$0xff] %v15366_v57  ;;  %v15369_v5 = vadd.f32 %v5555_v43, %v18655_v1  ;;  %v5557_v42 = vpop.f32.mrb[143].mxu0  ;;  %v18664_v1 = vld [vmem:[#allocation80_spill] sm:$0xff] }
 0x9f5   : > { %18656 = vst [vmem:[#allocation220_spill] sm:$0xff] %v15369_v5  ;;  %5800 = vmatmul.mubr.bf16.gmra.mrb[248].mxu0 %v18657_v12  ;;  %v18665_v5 = vld [vmem:[#allocation71_spill] sm:$0xff] }
 0x9f6   : > { %5807 = vmatprep.mubr.bf16.mxu0 %v18658_v34 }
 0x9f8   : > { %v5560_v2 = vpop.f32.mrb[144].mxu0 }
 0x9f9   : > { %v15374_v55 = vadd.f32 %v5560_v2, %v18659_v22  ;;  %v5562_v9 = vpop.f32.mrb[145].mxu0  ;;  %v18666_v22 = vld [vmem:[#allocation259_spill] sm:$0xff] }
 0x9fa   : > { %v5563_v27 = vpop.f32.mrb[146].mxu0  ;;  %v18667_v9 = vld [vmem:[#allocation262_spill] sm:$0xff] }
 0x9fb   : > { %v15377_v49 = vadd.f32 %v5563_v27, %v18660_v45  ;;  %v5565_v17 = vpop.f32.mrb[147].mxu0 }
 0x9fd   : > { %18661 = vst [vmem:[#allocation194_spill] sm:$0xff] %v15377_v49  ;;  %5808 = vmatmul.mubr.bf16.gmra.mrb[252].mxu0 %v18662_v23  ;;  %v18668_v49 = vld [vmem:[#allocation119_spill] sm:$0xff] }
 0x9fe   : > { %5815 = vmatprep.mubr.bf16.mxu0 %v18663_v28 }
 0xa00   : > { %v5568_v43 = vpop.f32.mrb[148].mxu0 }
 0xa01   : > { %v15382_v42 = vadd.f32 %v5568_v43, %v18664_v1  ;;  %v5570_v12 = vpop.f32.mrb[149].mxu0  ;;  %v18669_v1 = vld [vmem:[#allocation266_spill] sm:$0xff] }
 0xa02   : > { %v5571_v34 = vpop.f32.mrb[150].mxu0  ;;  %v18670_v12 = vld [vmem:[#allocation269_spill] sm:$0xff] }
 0xa03   : > { %v15385_v57 = vadd.f32 %v5571_v34, %v18665_v5  ;;  %v5573_v2 = vpop.f32.mrb[151].mxu0 }
 0xa05   : > { %5816 = vmatmul.mubr.bf16.gmra.mrb[0].mxu0 %v18666_v22 }
 0xa06   : > { %5823 = vmatprep.mubr.bf16.mxu0 %v18667_v9 }
 0xa08   : > { %v5576_v27 = vpop.f32.mrb[152].mxu0 }
 0xa09   : > { %v5578_v45 = vpop.f32.mrb[153].mxu0  ;;  %v15390_v17 = vadd.f32 %v5576_v27, %v15112_v20  ;;  %v18671_v20 = vld [vmem:[#allocation273_spill] sm:$0xff]  ;;  %v18672_v27 = vld [vmem:[#allocation276_spill] sm:$0xff] }
 0xa0a   : > { %v5579_v23 = vpop.f32.mrb[154].mxu0 }
 0xa0b   : > { %v5581_v28 = vpop.f32.mrb[155].mxu0  ;;  %v15393_v43 = vadd.f32 %v5579_v23, %v18668_v49 }
 0xa0d   : > { %5824 = vmatmul.mubr.bf16.gmra.mrb[4].mxu0 %v18669_v1 }
 0xa0e   : > { %5831 = vmatprep.mubr.bf16.mxu0 %v18670_v12 }
 0xa10   : > { %v5584_v5 = vpop.f32.mrb[156].mxu0 }
 0xa11   : > { %v5586_v34 = vpop.f32.mrb[157].mxu0  ;;  %v15398_v2 = vadd.f32 %v5584_v5, %v15126_v60  ;;  %v18674_v60 = vld [vmem:[#allocation279_spill] sm:$0xff]  ;;  %v18675_v5 = vld [vmem:[#allocation6_spill] sm:$0xff] }
 0xa12   : > { %v5587_v22 = vpop.f32.mrb[158].mxu0 }
 0xa13   : > { %v5589_v9 = vpop.f32.mrb[159].mxu0  ;;  %v15401_v45 = vadd.f32 %v5587_v22, %v15128_v63 }
 0xa15   : > { %5832 = vmatmul.mubr.bf16.gmra.mrb[8].mxu0 %v18671_v20 }
 0xa16   : > { %5839 = vmatprep.mubr.bf16.mxu0 %v18672_v27 }
 0xa18   : > { %v5592_v49 = vpop.f32.mrb[160].mxu0 }
 0xa19   : > { %v5594_v23 = vpop.f32.mrb[161].mxu0  ;;  %v15406_v28 = vadd.f32 %v5592_v49, %v15140_v16  ;;  %v18676_v16 = vld [vmem:[#allocation282_spill] sm:$0xff]  ;;  %v18677_v49 = vld [vmem:[#allocation284_spill] sm:$0xff] }
 0xa1a   : > { %v5595_v1 = vpop.f32.mrb[162].mxu0 }
 0xa1b   : > { %v5597_v12 = vpop.f32.mrb[163].mxu0  ;;  %v15409_v34 = vadd.f32 %v5595_v1, %v15142_v14 }
 0xa1d   : > { %18673 = vst [vmem:[#allocation224_spill] sm:$0xff] %v15409_v34  ;;  %5840 = vmatmul.mubr.bf16.gmra.mrb[12].mxu0 %v18674_v60 }
 0xa1e   : > { %5847 = vmatprep.mubr.bf16.mxu0 %v18675_v5 }
 0xa20   : > { %v5600_v63 = vpop.f32.mrb[164].mxu0 }
 0xa21   : > { %v5602_v22 = vpop.f32.mrb[165].mxu0  ;;  %v15414_v9 = vadd.f32 %v5600_v63, %v15154_v0  ;;  %v18679_v0 = vld [vmem:[#allocation285_spill] sm:$0xff]  ;;  %v18680_v63 = vld [vmem:[#allocation102_spill] sm:$0xff] }
 0xa22   : > { %v5603_v20 = vpop.f32.mrb[166].mxu0  ;;  %v18678_v22 = vld [vmem:[#allocation104_spill] sm:$0xff] }
 0xa23   : > { %v5605_v27 = vpop.f32.mrb[167].mxu0  ;;  %v15417_v23 = vadd.f32 %v5603_v20, %v15156_v25 }
 0xa25   : > { %5848 = vmatmul.mubr.bf16.gmra.mrb[16].mxu0 %v18676_v16 }
 0xa26   : > { %5855 = vmatprep.mubr.bf16.mxu0 %v18677_v49 }
 0xa28   : > { %v5608_v14 = vpop.f32.mrb[168].mxu0 }
 0xa29   : > { %v5610_v1 = vpop.f32.mrb[169].mxu0  ;;  %v15422_v12 = vadd.f32 %v5608_v14, %v15168_v52  ;;  %v18681_v52 = vld [vmem:[#allocation288_spill] sm:$0xff] }
 0xa2a   : > { %v5611_v60 = vpop.f32.mrb[170].mxu0 }
 0xa2b   : > { %v5613_v5 = vpop.f32.mrb[171].mxu0  ;;  %v15425_v34 = vadd.f32 %v5611_v60, %v18678_v22 }
 0xa2d   : > { %5856 = vmatmul.mubr.bf16.gmra.mrb[20].mxu0 %v18679_v0 }
 0xa2e   : > { %5863 = vmatprep.mubr.bf16.mxu0 %v18680_v63  ;;  %v18682_v63 = vld [vmem:[#allocation151_spill] sm:$0xff] }
 0xa30   : > { %v5616_v25 = vpop.f32.mrb[172].mxu0 }
 0xa31   : > { %v5618_v20 = vpop.f32.mrb[173].mxu0  ;;  %v15430_v27 = vadd.f32 %v5616_v25, %v15182_v38 }
 0xa32   : > { %v5619_v16 = vpop.f32.mrb[174].mxu0 }
 0xa33   : > { %v5621_v49 = vpop.f32.mrb[175].mxu0  ;;  %v15433_v1 = vadd.f32 %v5619_v16, %v15184_v19 }
 0xa35   : > { %5864 = vmatmul.mubr.bf16.gmra.mrb[24].mxu0 %v18681_v52  ;;  %v18683_v52 = vld [vmem:[#allocation174_spill] sm:$0xff] }
 0xa36   : > { %9576 = vmatprep.mubr.msk.bf16.mxu0 %vm10578_vm0, %v18512_v50 }
 0xa38   : > { %v5657_v14 = vpop.f32.mrb[176].mxu0 }
 0xa39   : > { %v5659_v60 = vpop.f32.mrb[177].mxu0  ;;  %v15439_v5 = vadd.f32 %v5657_v14, %v15191_v54  ;;  %v10373_v14 = vld [vmem:[%s16784_s10 + $0x4] ss:$16 sps:$4 sm:$0xff]  }
 0xa3a   : > { %v5660_v22 = vpop.f32.mrb[178].mxu0  ;;  %6470 = vmatprep.subr.bf16.mxu1 %v10373_v14  ;;  %v18685_v14 = vld [vmem:[#allocation208_spill] sm:$0xff] }
 0xa3b   : > { %v5662_v0 = vpop.f32.mrb[179].mxu0  ;;  %v15442_v38 = vadd.f32 %v5660_v22, %v15194_v58  ;;  %v10371_v58 = vld [vmem:[%s16784_s10] ss:$16 sps:$4 sm:$0xff]  }
 0xa3c   : > { %6471 = vmatpush1.bf16.msra.mxu1 %v10371_v58 }
 0xa3d   : > { %9577 = vmatmul.mubr.bf16.vlgmr.msra.gmra.mrb[28].mxu0 %v18682_v63 }
 0xa3e   : > { %9580 = vmatprep.mubr.msk.bf16.mxu0 %vm10578_vm0, %v18512_v50 }
 0xa40   : > { %v5665_v19 = vpop.f32.mrb[180].mxu0 }
 0xa41   : > { %v5667_v25 = vpop.f32.mrb[181].mxu0  ;;  %v15448_v20 = vadd.f32 %v5665_v19, %v15199_v56  ;;  %v18684_v19 = vld [vmem:[#allocation193_spill] sm:$0xff] }
 0xa42   : > { %v5668_v16 = vpop.f32.mrb[182].mxu0 }
 0xa43   : > { %v5670_v49 = vpop.f32.mrb[183].mxu0  ;;  %v15451_v54 = vadd.f32 %v5668_v16, %v15205_v41 }
 0xa45   : > { %9581 = vmatmul.mubr.bf16.gmra.mrb[32].mxu0 %v18683_v52 }
 0xa46   : > { %9584 = vmatprep.mubr.msk.bf16.mxu0 %vm10578_vm0, %v18512_v50 }
 0xa48   : > { %v5673_v56 = vpop.f32.mrb[184].mxu0 }
 0xa49   : > { %v5675_v60 = vpop.f32.mrb[185].mxu0  ;;  %v15463_v41 = vadd.f32 %v5673_v56, %v15211_v4 }
 0xa4a   : > { %v5676_v22 = vpop.f32.mrb[186].mxu0 }
 0xa4b   : > { %v5678_v0 = vpop.f32.mrb[187].mxu0  ;;  %v15466_v63 = vadd.f32 %v5676_v22, %v15214_v39 }
 0xa4d   : > { %9585 = vmatmul.mubr.bf16.gmra.mrb[36].mxu0 %v18684_v19  ;;  %v18686_v19 = vld [vmem:[#allocation63_spill] sm:$0xff] }
 0xa4e   : > { %9588 = vmatprep.mubr.msk.bf16.mxu0 %vm10578_vm0, %v18512_v50 }
 0xa50   : > { %v5681_v25 = vpop.f32.mrb[188].mxu0 }
 0xa51   : > { %v5683_v16 = vpop.f32.mrb[189].mxu0  ;;  %v15472_v49 = vadd.f32 %v5681_v25, %v15219_v24 }
 0xa52   : > { %v5684_v52 = vpop.f32.mrb[190].mxu0  ;;  %v10374_v16 = vld [vmem:[%s16784_s10 + $0x20] ss:$16 sps:$4 sm:$0xff]  }
 0xa53   : > { %v5686_v58 = vpop.f32.mrb[191].mxu0  ;;  %v15475_v4 = vadd.f32 %v5684_v52, %v15222_v18 }
 0xa55   : > { %9589 = vmatmul.mubr.bf16.gmra.mrb[40].mxu0 %v18685_v14 }
 0xa56   : > { %9592 = vmatprep.mubr.msk.bf16.mxu0 %vm10578_vm0, %v18512_v50 }
 0xa58   : > { %v5689_v39 = vpop.f32.mrb[192].mxu0 }
 0xa59   : > { %v5691_v56 = vpop.f32.mrb[193].mxu0  ;;  %v15481_v60 = vadd.f32 %v5689_v39, %v15227_v32  ;;  %v10376_v32 = vld [vmem:[%s16784_s10 + $0x24] ss:$16 sps:$4 sm:$0xff]   ;;  %v18687_v39 = vld [vmem:[#allocation95_spill] sm:$0xff] }
 0xa5a   : > { %v5692_v22 = vpop.f32.mrb[194].mxu0  ;;  %6472 = vmatprep.subr.bf16.mxu1 %v10376_v32 }
 0xa5b   : > { %v5694_v0 = vpop.f32.mrb[195].mxu0  ;;  %v15484_v24 = vadd.f32 %v5692_v22, %v15230_v59  ;;  %6473 = vmatpush1.bf16.msra.mxu1 %v10374_v16 }
 0xa5d   : > { %9593 = vmatmul.mubr.bf16.gmra.mrb[44].mxu0 %v18686_v19 }
 0xa5e   : > { %9596 = vmatprep.mubr.msk.bf16.mxu0 %vm10578_vm0, %v18512_v50 }
 0xa60   : > { %v5697_v18 = vpop.f32.mrb[196].mxu0 }
 0xa61   : > { %v5699_v25 = vpop.f32.mrb[197].mxu0  ;;  %v15496_v52 = vadd.f32 %v5697_v18, %v15239_v21 }
 0xa62   : > { %v5700_v59 = vpop.f32.mrb[198].mxu0  ;;  %v18688_v25 = vld [vmem:[#allocation128_spill] sm:$0xff] }
 0xa63   : > { %v5702_v58 = vpop.f32.mrb[199].mxu0  ;;  %v15499_v14 = vadd.f32 %v5700_v59, %v15242_v10 }
 0xa65   : > { %9597 = vmatmul.mubr.bf16.gmra.mrb[48].mxu0 %v18687_v39  ;;  %v18689_v39 = vld [vmem:[#allocation160_spill] sm:$0xff] }
 0xa66   : > { %9600 = vmatprep.mubr.msk.bf16.mxu0 %vm10578_vm0, %v18512_v50 }
 0xa68   : > { %v5705_v56 = vpop.f32.mrb[200].mxu0 }
 0xa69   : > { %v5707_v22 = vpop.f32.mrb[201].mxu0  ;;  %v15505_v0 = vadd.f32 %v5705_v56, %v15247_v8 }
 0xa6a   : > { %v5708_v19 = vpop.f32.mrb[202].mxu0 }
 0xa6b   : > { %v5710_v21 = vpop.f32.mrb[203].mxu0  ;;  %v15508_v18 = vadd.f32 %v5708_v19, %v15250_v51 }
 0xa6d   : > { %9601 = vmatmul.mubr.bf16.gmra.mrb[52].mxu0 %v18688_v25 }
 0xa6e   : > { %9604 = vmatprep.mubr.msk.bf16.mxu0 %vm10578_vm0, %v18512_v50 }
 0xa70   : > { %v5713_v10 = vpop.f32.mrb[204].mxu0 }
 0xa71   : > { %v5715_v16 = vpop.f32.mrb[205].mxu0  ;;  %v15514_v32 = vadd.f32 %v5713_v10, %v15255_v29  ;;  %v10377_v29 = vld [vmem:[%s16784_s10 + $0x8] ss:$16 sps:$4 sm:$0xff]   ;;  %v10380_v10 = vld [vmem:[%s16784_s10 + $0x40] ss:$16 sps:$4 sm:$0xff]  }
 0xa72   : > { %v5716_v59 = vpop.f32.mrb[206].mxu0  ;;  %v18690_v16 = vld [vmem:[#allocation192_spill] sm:$0xff] }
 0xa73   : > { %v5718_v58 = vpop.f32.mrb[207].mxu0  ;;  %v15517_v8 = vadd.f32 %v5716_v59, %v15258_v47  ;;  %v10379_v47 = vld [vmem:[%s16784_s10 + $0xc] ss:$16 sps:$4 sm:$0xff]  }
 0xa74   : > { %6773 = vmatprep.subr.bf16.mxu0 %v10379_v47  ;;  %v10385_v59 = vld [vmem:[%s16784_s10 + $0x2c] ss:$16 sps:$4 sm:$0xff]  }
 0xa75   : > { %9605 = vmatmul.mubr.bf16.gmra.mrb[56].mxu0 %v18689_v39 }
 0xa76   : > { %9608 = vmatprep.mubr.msk.bf16.mxu0 %vm10578_vm0, %v18512_v50  ;;  %6774 = vmatpush1.bf16.msra.mxu0 %v10377_v29  ;;  %v10388_v29 = vld [vmem:[%s16784_s10 + $0x4c] ss:$16 sps:$4 sm:$0xff]  }
 0xa77   : > { %6775 = vmatprep.subr.bf16.mxu0 %v10385_v59 }
 0xa78   : > { %v5721_v51 = vpop.f32.mrb[208].mxu0 }
 0xa79   : > { %v5723_v56 = vpop.f32.mrb[209].mxu0  ;;  %v15523_v22 = vadd.f32 %v5721_v51, %v15266_v61  ;;  %v10382_v61 = vld [vmem:[%s16784_s10 + $0x44] ss:$16 sps:$4 sm:$0xff]  }
 0xa7a   : > { %v5724_v19 = vpop.f32.mrb[210].mxu0  ;;  %6474 = vmatprep.subr.bf16.mxu1 %v10382_v61  ;;  %v10391_v61 = vld [vmem:[%s16784_s10 + $0x64] ss:$16 sps:$4 sm:$0xff]  }
 0xa7b   : > { %v5726_v21 = vpop.f32.mrb[211].mxu0  ;;  %v15532_v25 = vadd.f32 %v5724_v19, %v15270_v15  ;;  %6475 = vmatpush1.bf16.msra.mxu1 %v10380_v10  ;;  %v10383_v15 = vld [vmem:[%s16784_s10 + $0x28] ss:$16 sps:$4 sm:$0xff]   ;;  %v18691_v10 = vld [vmem:[#allocation32_spill] sm:$0xff] }
 0xa7c   : > { %6776 = vmatpush1.bf16.msra.mxu0 %v10383_v15  ;;  %v10386_v21 = vld [vmem:[%s16784_s10 + $0x48] ss:$16 sps:$4 sm:$0xff]   ;;  %6476 = vmatprep.subr.bf16.mxu1 %v10391_v61  ;;  %v10403_v61 = vld [vmem:[%s16784_s10 + $0xa4] ss:$16 sps:$4 sm:$0xff]  }
 0xa7d   : > { %9609 = vmatmul.mubr.bf16.gmra.mrb[60].mxu0 %v18690_v16  ;;  %6777 = vmatprep.subr.bf16.mxu0 %v10388_v29  ;;  %v10394_v16 = vld [vmem:[%s16784_s10 + $0x6c] ss:$16 sps:$4 sm:$0xff]  }
 0xa7e   : > { %9612 = vmatprep.mubr.msk.bf16.mxu0 %vm10578_vm0, %v18512_v50 }
 0xa80   : > { %v5729_v58 = vpop.f32.mrb[212].mxu0  ;;  %6778 = vmatpush1.bf16.msra.mxu0 %v10386_v21  ;;  %v10397_v21 = vld [vmem:[%s16784_s10 + $0x84] ss:$16 sps:$4 sm:$0xff]  }
 0xa81   : > { %v5731_v39 = vpop.f32.mrb[213].mxu0  ;;  %v15550_v51 = vadd.f32 %v5729_v58, %v15275_v44  ;;  %v10389_v44 = vld [vmem:[%s16784_s10 + $0x60] ss:$16 sps:$4 sm:$0xff]   ;;  %6779 = vmatprep.subr.bf16.mxu0 %v10394_v16 }
 0xa82   : > { %v5732_v56 = vpop.f32.mrb[214].mxu0  ;;  %6477 = vmatpush1.bf16.msra.mxu1 %v10389_v44  ;;  %v18692_v44 = vld [vmem:[#allocation61_spill] sm:$0xff]  ;;  %v10401_v16 = vld [vmem:[%s16784_s10 + $0xa0] ss:$16 sps:$4 sm:$0xff]  }
 0xa83   : > { %v5734_v19 = vpop.f32.mrb[215].mxu0  ;;  %v15559_v47 = vadd.f32 %v5732_v56, %v15281_v40  ;;  %v10392_v40 = vld [vmem:[%s16784_s10 + $0x68] ss:$16 sps:$4 sm:$0xff]   ;;  %6478 = vmatprep.subr.bf16.mxu1 %v10397_v21 }
 0xa84   : > { %6780 = vmatpush1.bf16.msra.mxu0 %v10392_v40  ;;  %v10395_v19 = vld [vmem:[%s16784_s10 + $0x80] ss:$16 sps:$4 sm:$0xff]   ;;  %v10404_v40 = vld [vmem:[%s16784_s10 + $0xa8] ss:$16 sps:$4 sm:$0xff]  }
 0xa85   : > { %9613 = vmatmul.mubr.bf16.gmra.mrb[64].mxu0 %v18691_v10  ;;  %v10398_v10 = vld [vmem:[%s16784_s10 + $0x88] ss:$16 sps:$4 sm:$0xff]  }
 0xa86   : > { %9616 = vmatprep.mubr.msk.bf16.mxu0 %vm10578_vm0, %v18512_v50  ;;  %6479 = vmatpush1.bf16.msra.mxu1 %v10395_v19  ;;  %v10409_v19 = vld [vmem:[%s16784_s10 + $0xc4] ss:$16 sps:$4 sm:$0xff]  }
 0xa87   : > { %6480 = vmatprep.subr.bf16.mxu1 %v10403_v61  ;;  %v18693_v61 = vld [vmem:[#allocation225_spill] sm:$0xff] }
 0xa88   : > { %v5737_v59 = vpop.f32.mrb[216].mxu0 }
 0xa89   : > { %v5739_v15 = vpop.f32.mrb[217].mxu0  ;;  %v15577_v58 = vadd.f32 %v5737_v59, %v15290_v3  ;;  %v10400_v3 = vld [vmem:[%s16784_s10 + $0x8c] ss:$16 sps:$4 sm:$0xff]  }
 0xa8a   : > { %v5740_v39 = vpop.f32.mrb[218].mxu0  ;;  %6781 = vmatprep.subr.bf16.mxu0 %v10400_v3  ;;  %6481 = vmatpush1.bf16.msra.mxu1 %v10401_v16 }
 0xa8b   : > { %v5742_v56 = vpop.f32.mrb[219].mxu0  ;;  %v15586_v29 = vadd.f32 %v5740_v39, %v15297_v48  ;;  %v10406_v48 = vld [vmem:[%s16784_s10 + $0xac] ss:$16 sps:$4 sm:$0xff]   ;;  %6782 = vmatpush1.bf16.msra.mxu0 %v10398_v10  ;;  %6482 = vmatprep.subr.bf16.mxu1 %v10409_v19 }
 0xa8c   : > { %6783 = vmatprep.subr.bf16.mxu0 %v10406_v48  ;;  %v10412_v10 = vld [vmem:[%s16784_s10 + $0xcc] ss:$16 sps:$4 sm:$0xff]  }
 0xa8d   : > { %9617 = vmatmul.mubr.bf16.gmra.mrb[68].mxu0 %v18692_v44  ;;  %v10410_v44 = vld [vmem:[%s16784_s10 + $0xc8] ss:$16 sps:$4 sm:$0xff]   ;;  %v10418_v48 = vld [vmem:[%s16784_s10 + $0xec] ss:$16 sps:$4 sm:$0xff]  }
 0xa8e   : > { %9620 = vmatprep.mubr.msk.bf16.mxu0 %vm10578_vm0, %v18512_v50 }
 0xa8f   : > { %6784 = vmatpush1.bf16.msra.mxu0 %v10404_v40  ;;  %v10413_v40 = vld [vmem:[%s16784_s10 + $0xe0] ss:$16 sps:$4 sm:$0xff]  }
 0xa90   : > { %v5745_v59 = vpop.f32.mrb[220].mxu0  ;;  %6785 = vmatprep.subr.bf16.mxu0 %v10412_v10 }
 0xa91   : > { %v5747_v15 = vpop.f32.mrb[221].mxu0  ;;  %v15610_v39 = vadd.f32 %v5745_v59, %v15306_v26  ;;  %v10407_v26 = vld [vmem:[%s16784_s10 + $0xc0] ss:$16 sps:$4 sm:$0xff]   ;;  %v10416_v59 = vld [vmem:[%s16784_s10 + $0xe8] ss:$16 sps:$4 sm:$0xff]  }
 0xa92   : > { %v5748_v56 = vpop.f32.mrb[222].mxu0  ;;  %6483 = vmatpush1.bf16.msra.mxu1 %v10407_v26  ;;  %v18694_v26 = vld [vmem:[#allocation21_spill] sm:$0xff] }
 0xa93   : > { %v5750_v21 = vpop.f32.mrb[223].mxu0  ;;  %v15619_v3 = vadd.f32 %v5748_v56, %v15313_v62  ;;  %6786 = vmatpush1.bf16.msra.mxu0 %v10410_v44  ;;  %v10415_v62 = vld [vmem:[%s16784_s10 + $0xe4] ss:$16 sps:$4 sm:$0xff]  }
 0xa94   : > { %6484 = vmatprep.subr.bf16.mxu1 %v10415_v62  ;;  %6787 = vmatprep.subr.bf16.mxu0 %v10418_v48 }
 0xa95   : > { %9621 = vmatmul.mubr.bf16.gmra.mrb[72].mxu0 %v18693_v61 }
 0xa96   : > { %9624 = vmatprep.mubr.msk.bf16.mxu0 %vm10578_vm0, %v18512_v50  ;;  %6485 = vmatpush1.bf16.msra.mxu1 %v10413_v40  ;;  %v18695_v40 = vld [vmem:[#allocation48_spill] sm:$0xff] }
 0xa97   : > { %6788 = vmatpush1.bf16.msra.mxu0 %v10416_v59 }
 0xa98   : > { %v5753_v16 = vpop.f32.mrb[224].mxu0 }
 0xa99   : > { %v5755_v15 = vpop.f32.mrb[225].mxu0  ;;  %v15643_v56 = vadd.f32 %v5753_v16, %v15318_v30 }
 0xa9a   : > { %v5756_v21 = vpop.f32.mrb[226].mxu0 }
 0xa9b   : > { %v5758_v19 = vpop.f32.mrb[227].mxu0  ;;  %v15646_v10 = vadd.f32 %v5756_v21, %v15321_v46 }
 0xa9d   : > { %9625 = vmatmul.mubr.bf16.gmra.mrb[76].mxu0 %v18694_v26  ;;  %v18696_v26 = vld [vmem:[#allocation81_spill] sm:$0xff] }
 0xa9e   : > { %9628 = vmatprep.mubr.msk.bf16.mxu0 %vm10578_vm0, %v18512_v50 }
 0xaa0   : > { %v5761_v44 = vpop.f32.mrb[228].mxu0 }
 0xaa1   : > { %v5763_v61 = vpop.f32.mrb[229].mxu0  ;;  %v15652_v62 = vadd.f32 %v5761_v44, %v15326_v35 }
 0xaa2   : > { %v5764_v48 = vpop.f32.mrb[230].mxu0 }
 0xaa3   : > { %v5766_v30 = vpop.f32.mrb[231].mxu0  ;;  %v15655_v16 = vadd.f32 %v5764_v48, %v15329_v13 }
 0xaa5   : > { %9629 = vmatmul.mubr.bf16.gmra.mrb[80].mxu0 %v18695_v40  ;;  %v18697_v40 = vld [vmem:[#allocation116_spill] sm:$0xff] }
 0xaa6   : > { %9632 = vmatprep.mubr.msk.bf16.mxu0 %vm10578_vm0, %v18512_v50 }
 0xaa8   : > { %v5769_v46 = vpop.f32.mrb[232].mxu0 }
 0xaa9   : > { %v5771_v59 = vpop.f32.mrb[233].mxu0  ;;  %v15661_v15 = vadd.f32 %v5769_v46, %v15334_v53 }
 0xaaa   : > { %v5772_v21 = vpop.f32.mrb[234].mxu0 }
 0xaab   : > { %v5774_v19 = vpop.f32.mrb[235].mxu0  ;;  %v15664_v35 = vadd.f32 %v5772_v21, %v15337_v6 }
 0xaad   : > { %9633 = vmatmul.mubr.bf16.gmra.mrb[84].mxu0 %v18696_v26  ;;  %v18698_v26 = vld [vmem:[#allocation232_spill] sm:$0xff] }
 0xaae   : > { %9636 = vmatprep.mubr.msk.bf16.mxu0 %vm10578_vm0, %v18512_v50 }
 0xab0   : > { %v5777_v13 = vpop.f32.mrb[236].mxu0 }
 0xab1   : > { %v5779_v44 = vpop.f32.mrb[237].mxu0  ;;  %v15670_v61 = vadd.f32 %v5777_v13, %v15342_v36 }
 0xab2   : > { %v5780_v48 = vpop.f32.mrb[238].mxu0 }
 0xab3   : > { %v5782_v30 = vpop.f32.mrb[239].mxu0  ;;  %v15673_v53 = vadd.f32 %v5780_v48, %v15345_v7 }
 0xab5   : > { %9637 = vmatmul.mubr.bf16.gmra.mrb[88].mxu0 %v18697_v40  ;;  %v18700_v40 = vld [vmem:[#allocation239_spill] sm:$0xff] }
 0xab6   : > { %9640 = vmatprep.mubr.msk.bf16.mxu0 %vm10578_vm0, %v18512_v50 }
 0xab8   : > { %v5785_v6 = vpop.f32.mrb[240].mxu0 }
 0xab9   : > { %v5787_v46 = vpop.f32.mrb[241].mxu0  ;;  %v15679_v59 = vadd.f32 %v5785_v6, %v15350_v37 }
 0xaba   : > { %v5788_v21 = vpop.f32.mrb[242].mxu0  ;;  %v18701_v46 = vld [vmem:[#allocation159_spill] sm:$0xff] }
 0xabb   : > { %v5790_v19 = vpop.f32.mrb[243].mxu0  ;;  %v15682_v36 = vadd.f32 %v5788_v21, %v15353_v33 }
 0xabd   : > { %9641 = vmatmul.mubr.bf16.gmra.mrb[92].mxu0 %v18698_v26 }
 0xabe   : > { %9644 = vmatprep.mubr.msk.bf16.mxu0 %vm10578_vm0, %v18512_v50 }
 0xac0   : > { %v5793_v7 = vpop.f32.mrb[244].mxu0 }
 0xac1   : > { %v5795_v13 = vpop.f32.mrb[245].mxu0  ;;  %v15688_v44 = vadd.f32 %v5793_v7, %v15358_v31  ;;  %v18703_v7 = vld [vmem:[#allocation246_spill] sm:$0xff] }
 0xac2   : > { %v5796_v48 = vpop.f32.mrb[246].mxu0  ;;  %v18702_v13 = vld [vmem:[#allocation220_spill] sm:$0xff] }
 0xac3   : > { %v5798_v30 = vpop.f32.mrb[247].mxu0  ;;  %v15691_v37 = vadd.f32 %v5796_v48, %v15361_v11 }
 0xac5   : > { %18699 = vst [vmem:[#allocation37_spill] sm:$0xff] %v15691_v37  ;;  %9645 = vmatmul.mubr.bf16.gmra.mrb[96].mxu0 %v18700_v40  ;;  %v18704_v37 = vld [vmem:[#allocation194_spill] sm:$0xff] }
 0xac6   : > { %9648 = vmatprep.mubr.msk.bf16.mxu0 %vm10578_vm0, %v18512_v50 }
 0xac8   : > { %v5801_v33 = vpop.f32.mrb[248].mxu0 }
 0xac9   : > { %v5803_v6 = vpop.f32.mrb[249].mxu0  ;;  %v15697_v21 = vadd.f32 %v5801_v33, %v18701_v46  ;;  %v18705_v46 = vld [vmem:[#allocation253_spill] sm:$0xff] }
 0xaca   : > { %v5804_v19 = vpop.f32.mrb[250].mxu0 }
 0xacb   : > { %v5806_v26 = vpop.f32.mrb[251].mxu0  ;;  %v15700_v31 = vadd.f32 %v5804_v19, %v18702_v13 }
 0xacd   : > { %9649 = vmatmul.mubr.bf16.gmra.mrb[100].mxu0 %v18703_v7 }
 0xace   : > { %9652 = vmatprep.mubr.msk.bf16.mxu0 %vm10578_vm0, %v18512_v50 }
 0xad0   : > { %v5809_v11 = vpop.f32.mrb[252].mxu0 }
 0xad1   : > { %v5811_v48 = vpop.f32.mrb[253].mxu0  ;;  %v15706_v30 = vadd.f32 %v5809_v11, %v15374_v55  ;;  %v18706_v11 = vld [vmem:[#allocation260_spill] sm:$0xff] }
 0xad2   : > { %v5812_v40 = vpop.f32.mrb[254].mxu0 }
 0xad3   : > { %v5814_v6 = vpop.f32.mrb[255].mxu0  ;;  %v15709_v33 = vadd.f32 %v5812_v40, %v18704_v37 }
 0xad5   : > { %9653 = vmatmul.mubr.bf16.gmra.mrb[104].mxu0 %v18705_v46 }
 0xad6   : > { %9656 = vmatprep.mubr.msk.bf16.mxu0 %vm10578_vm0, %v18512_v50 }
 0xad8   : > { %v5817_v19 = vpop.f32.mrb[0].mxu0 }
 0xad9   : > { %v5819_v26 = vpop.f32.mrb[1].mxu0  ;;  %v15715_v13 = vadd.f32 %v5817_v19, %v15382_v42  ;;  %v18708_v19 = vld [vmem:[#allocation267_spill] sm:$0xff] }
 0xada   : > { %v5820_v7 = vpop.f32.mrb[2].mxu0 }
 0xadb   : > { %v5822_v48 = vpop.f32.mrb[3].mxu0  ;;  %v15718_v55 = vadd.f32 %v5820_v7, %v15385_v57 }
 0xadd   : > { %9657 = vmatmul.mubr.bf16.gmra.mrb[108].mxu0 %v18706_v11 }
 0xade   : > { %9660 = vmatprep.mubr.msk.bf16.mxu0 %vm10578_vm0, %v18512_v50 }
 0xae0   : > { %v5825_v37 = vpop.f32.mrb[4].mxu0 }
 0xae1   : > { %v15724_v40 = vadd.f32 %v5825_v37, %v15390_v17  ;;  %v5827_v6 = vpop.f32.mrb[5].mxu0 }
 0xae2   : > { %v5828_v46 = vpop.f32.mrb[6].mxu0  ;;  %v18709_v6 = vld [vmem:[#allocation274_spill] sm:$0xff] }
 0xae3   : > { %v15727_v26 = vadd.f32 %v5828_v46, %v15393_v43  ;;  %v5830_v42 = vpop.f32.mrb[7].mxu0 }
 0xae5   : > { %18707 = vst [vmem:[#allocation25_spill] sm:$0xff] %v15727_v26  ;;  %9661 = vmatmul.mubr.bf16.gmra.mrb[112].mxu0 %v18708_v19  ;;  %v18711_v26 = vld [vmem:[#allocation224_spill] sm:$0xff] }
 0xae6   : > { %9664 = vmatprep.mubr.msk.bf16.mxu0 %vm10578_vm0, %v18512_v50 }
 0xae8   : > { %v5833_v57 = vpop.f32.mrb[8].mxu0 }
 0xae9   : > { %v15733_v7 = vadd.f32 %v5833_v57, %v15398_v2  ;;  %v5835_v48 = vpop.f32.mrb[9].mxu0 }
 0xaea   : > { %v5836_v11 = vpop.f32.mrb[10].mxu0  ;;  %v18713_v48 = vld [vmem:[#allocation280_spill] sm:$0xff] }
 0xaeb   : > { %v15736_v17 = vadd.f32 %v5836_v11, %v15401_v45  ;;  %v5838_v37 = vpop.f32.mrb[11].mxu0 }
 0xaed   : > { %9665 = vmatmul.mubr.bf16.gmra.mrb[116].mxu0 %v18709_v6 }
 0xaee   : > { %9668 = vmatprep.mubr.msk.bf16.mxu0 %vm10578_vm0, %v18512_v50 }
 0xaf0   : > { %v5841_v43 = vpop.f32.mrb[12].mxu0 }
 0xaf1   : > { %v15742_v46 = vadd.f32 %v5841_v43, %v15406_v28  ;;  %v5843_v42 = vpop.f32.mrb[13].mxu0 }
 0xaf2   : > { %v5844_v19 = vpop.f32.mrb[14].mxu0  ;;  %v18716_v42 = vld [vmem:[#allocation286_spill] sm:$0xff] }
 0xaf3   : > { %18710 = vst [vmem:[#allocation62_spill] sm:$0xff] %v15742_v46  ;;  %v15745_v2 = vadd.f32 %v5844_v19, %v18711_v26  ;;  %v5846_v57 = vpop.f32.mrb[15].mxu0 }
 0xaf5   : > { %18712 = vst [vmem:[#allocation50_spill] sm:$0xff] %v15745_v2  ;;  %9669 = vmatmul.mubr.bf16.gmra.mrb[120].mxu0 %v18713_v48  ;;  %v18726_v2 = vld [vmem:[#allocation11_spill] sm:$0xff] }
 0xaf6   : > { %9672 = vmatprep.mubr.msk.bf16.mxu0 %vm10578_vm0, %v18512_v50 }
 0xaf8   : > { %v5849_v45 = vpop.f32.mrb[16].mxu0 }
 0xaf9   : > { %v15751_v11 = vadd.f32 %v5849_v45, %v15414_v9  ;;  %v5851_v37 = vpop.f32.mrb[17].mxu0 }
 0xafa   : > { %v5852_v6 = vpop.f32.mrb[18].mxu0  ;;  %v18719_v37 = vld [vmem:[#allocation110_spill] sm:$0xff] }
 0xafb   : > { %18714 = vst [vmem:[#allocation226_spill] sm:$0xff] %v15751_v11  ;;  %v15754_v28 = vadd.f32 %v5852_v6, %v15417_v23  ;;  %v5854_v43 = vpop.f32.mrb[19].mxu0 }
 0xafd   : > { %18715 = vst [vmem:[#allocation85_spill] sm:$0xff] %v15754_v28  ;;  %9673 = vmatmul.mubr.bf16.gmra.mrb[124].mxu0 %v18716_v42 }
 0xafe   : > { %9676 = vmatprep.mubr.msk.bf16.mxu0 %vm10578_vm0, %v18512_v50 }
 0xb00   : > { %v5857_v26 = vpop.f32.mrb[20].mxu0 }
 0xb01   : > { %v15760_v19 = vadd.f32 %v5857_v26, %v15422_v12  ;;  %v5859_v57 = vpop.f32.mrb[21].mxu0 }
 0xb02   : > { %v5860_v48 = vpop.f32.mrb[22].mxu0  ;;  %v18722_v57 = vld [vmem:[#allocation125_spill] sm:$0xff] }
 0xb03   : > { %18717 = vst [vmem:[#allocation24_spill] sm:$0xff] %v15760_v19  ;;  %v15763_v9 = vadd.f32 %v5860_v48, %v15425_v34  ;;  %v5862_v45 = vpop.f32.mrb[23].mxu0  ;;  %v18723_v34 = vmov 0  }
 0xb05   : > { %18718 = vst [vmem:[#allocation14_spill] sm:$0xff] %v15763_v9  ;;  %9677 = vmatmul.mubr.bf16.gmra.mrb[128].mxu0 %v18719_v37 }
 0xb06   : > { %9680 = vmatprep.mubr.msk.bf16.mxu0 %vm10578_vm0, %v18512_v50  ;;  %v18724_v50 = vld [vmem:[#allocation187_spill] sm:$0xff] }
 0xb08   : > { %v5865_v23 = vpop.f32.mrb[24].mxu0 }
 0xb09   : > { %v15769_v6 = vadd.f32 %v5865_v23, %v15430_v27  ;;  %v5867_v43 = vpop.f32.mrb[25].mxu0 }
 0xb0a   : > { %v5868_v42 = vpop.f32.mrb[26].mxu0  ;;  %v18725_v43 = vld [vmem:[#allocation10_spill] sm:$0xff] }
 0xb0b   : > { %18720 = vst [vmem:[#allocation51_spill] sm:$0xff] %v15769_v6  ;;  %v15772_v12 = vadd.f32 %v5868_v42, %v15433_v1  ;;  %v5870_v26 = vpop.f32.mrb[27].mxu0 }
 0xb0d   : > { %18721 = vst [vmem:[#allocation39_spill] sm:$0xff] %v15772_v12  ;;  %9681 = vmatmul.mubr.bf16.gmra.mrb[132].mxu0 %v18722_v57 }
 0xb0e   : > { %6805 = vmatprep.mubr.bf16.mxu0 %v18723_v34 }
 0xb10   : > { %v5906_v48 = vpop.f32.mrb[28].mxu0 }
 0xb11   : > { %v5907_v45 = vadd.f32 %v5906_v48, %v15439_v5  ;;  %v9578_v37 = vpop.f32.mrb[29].mxu0 }
 0xb12   : > { %v5909_v9 = vpop.f32.mrb[30].mxu0 }
 0xb13   : > { %v6121_v19 = vadd.f32 %v5907_v45, %v18724_v50  ;;  %v5910_v27 = vadd.f32 %v5909_v9, %v15442_v38  ;;  %v9579_v23 = vpop.f32.mrb[31].mxu0  ;;  %v18727_v38 = vld [vmem:[#allocation13_spill] sm:$0xff] }
 0xb15   : > { %v6122_v6 = vadd.f32 %v5910_v27, %v18725_v43  ;;  %v6175_v28 = vmax.f32 %v6121_v19, 0.0  ;;  %v18729_v27 = vld [vmem:[#allocation17_spill] sm:$0xff] }
 0xb17   : > { %v6176_v1 = vmax.f32 %v6122_v6, 0.0 }
 0xb18   : > { %v5914_v42 = vpop.f32.mrb[32].mxu0 }
 0xb19   : > { %v6229_v26 = vpack.c.bf16 %v6176_v1, %v6175_v28  ;;  %v5915_v57 = vadd.f32 %v5914_v42, %v15448_v20  ;;  %v9582_v12 = vpop.f32.mrb[33].mxu0 }
 0xb1a   : > { %v5917_v11 = vpop.f32.mrb[34].mxu0 }
 0xb1b   : > { %v6123_v46 = vadd.f32 %v5915_v57, %v18726_v2  ;;  %v5918_v5 = vadd.f32 %v5917_v11, %v15451_v54  ;;  %v9583_v48 = vpop.f32.mrb[35].mxu0  ;;  %6503 = vmatmul.mubr.bf16.vlgmr.msra.gmra.mrb[108].mxu1 %v6229_v26  ;;  %6806 = vmatmul.mubr.bf16.vlgmr.msra.gmra.mrb[136].mxu0 %v6229_v26  ;;  %v18728_v2 = vld [vmem:[#allocation16_spill] sm:$0xff] }
 0xb1c   : > { %6512 = vmatprep.mubr.bf16.mxu1 %v18723_v34  ;;  %6815 = vmatprep.mubr.bf16.mxu0 %v18723_v34 }
 0xb1d   : > { %v6124_v19 = vadd.f32 %v5918_v5, %v18727_v38  ;;  %v6177_v9 = vmax.f32 %v6123_v46, 0.0  ;;  %v18730_v5 = vld [vmem:[#allocation22_spill] sm:$0xff] }
 0xb1f   : > { %v6178_v6 = vmax.f32 %v6124_v19, 0.0  ;;  %v18731_v19 = vld [vmem:[#allocation23_spill] sm:$0xff] }
 0xb20   : > { %v5922_v28 = vpop.f32.mrb[36].mxu0 }
 0xb21   : > { %v5923_v20 = vadd.f32 %v5922_v28, %v15463_v41  ;;  %v9586_v12 = vpop.f32.mrb[37].mxu0  ;;  %v6230_v45 = vpack.c.bf16 %v6178_v6, %v6177_v9 }
 0xb22   : > { %v5925_v37 = vpop.f32.mrb[38].mxu0 }
 0xb23   : > { %v6125_v50 = vadd.f32 %v5923_v20, %v18728_v2  ;;  %v5926_v54 = vadd.f32 %v5925_v37, %v15466_v63  ;;  %v9587_v11 = vpop.f32.mrb[39].mxu0  ;;  %6513 = vmatmul.mubr.bf16.gmra.mrb[112].mxu1 %v6230_v45  ;;  %6816 = vmatmul.mubr.bf16.gmra.mrb[140].mxu0 %v6230_v45  ;;  %v18732_v2 = vld [vmem:[#allocation28_spill] sm:$0xff] }
 0xb24   : > { %6522 = vmatprep.mubr.bf16.mxu1 %v18723_v34  ;;  %6825 = vmatprep.mubr.bf16.mxu0 %v18723_v34  ;;  %v18733_v11 = vld [vmem:[#allocation29_spill] sm:$0xff] }
 0xb25   : > { %v6126_v46 = vadd.f32 %v5926_v54, %v18729_v27  ;;  %v6179_v23 = vmax.f32 %v6125_v50, 0.0 }
 0xb27   : > { %v6180_v43 = vmax.f32 %v6126_v46, 0.0 }
 0xb28   : > { %v5930_v1 = vpop.f32.mrb[40].mxu0 }
 0xb29   : > { %v5931_v41 = vadd.f32 %v5930_v1, %v15472_v49  ;;  %v9590_v42 = vpop.f32.mrb[41].mxu0  ;;  %v6231_v26 = vpack.c.bf16 %v6180_v43, %v6179_v23 }
 0xb2a   : > { %v5933_v57 = vpop.f32.mrb[42].mxu0 }
 0xb2b   : > { %v6127_v48 = vadd.f32 %v5931_v41, %v18730_v5  ;;  %v5934_v63 = vadd.f32 %v5933_v57, %v15475_v4  ;;  %v9591_v38 = vpop.f32.mrb[43].mxu0  ;;  %6523 = vmatmul.mubr.bf16.gmra.mrb[116].mxu1 %v6231_v26  ;;  %6826 = vmatmul.mubr.bf16.gmra.mrb[144].mxu0 %v6231_v26  ;;  %v18734_v26 = vld [vmem:[#allocation34_spill] sm:$0xff] }
 0xb2c   : > { %6532 = vmatprep.mubr.bf16.mxu1 %v18723_v34  ;;  %6835 = vmatprep.mubr.bf16.mxu0 %v18723_v34 }
 0xb2d   : > { %v6128_v9 = vadd.f32 %v5934_v63, %v18731_v19  ;;  %v6181_v6 = vmax.f32 %v6127_v48, 0.0  ;;  %v18735_v48 = vld [vmem:[#allocation35_spill] sm:$0xff] }
 0xb2f   : > { %v6182_v28 = vmax.f32 %v6128_v9, 0.0 }
 0xb30   : > { %v5938_v20 = vpop.f32.mrb[44].mxu0 }
 0xb31   : > { %v5939_v49 = vadd.f32 %v5938_v20, %v15481_v60  ;;  %v9594_v12 = vpop.f32.mrb[45].mxu0  ;;  %v6232_v45 = vpack.c.bf16 %v6182_v28, %v6181_v6 }
 0xb32   : > { %v5941_v37 = vpop.f32.mrb[46].mxu0 }
 0xb33   : > { %v6129_v50 = vadd.f32 %v5939_v49, %v18732_v2  ;;  %v5942_v4 = vadd.f32 %v5941_v37, %v15484_v24  ;;  %v9595_v54 = vpop.f32.mrb[47].mxu0  ;;  %6533 = vmatmul.mubr.bf16.gmra.mrb[120].mxu1 %v6232_v45  ;;  %6836 = vmatmul.mubr.bf16.gmra.mrb[148].mxu0 %v6232_v45  ;;  %v18736_v49 = vld [vmem:[#allocation40_spill] sm:$0xff]  ;;  %v18737_v37 = vld [vmem:[#allocation41_spill] sm:$0xff] }
 0xb34   : > { %6542 = vmatprep.mubr.bf16.mxu1 %v18723_v34  ;;  %6845 = vmatprep.mubr.bf16.mxu0 %v18723_v34 }
 0xb35   : > { %v6130_v27 = vadd.f32 %v5942_v4, %v18733_v11  ;;  %v6183_v46 = vmax.f32 %v6129_v50, 0.0 }
 0xb37   : > { %v6184_v23 = vmax.f32 %v6130_v27, 0.0 }
 0xb38   : > { %v5946_v43 = vpop.f32.mrb[48].mxu0 }
 0xb39   : > { %v5947_v60 = vadd.f32 %v5946_v43, %v15496_v52  ;;  %v9598_v1 = vpop.f32.mrb[49].mxu0  ;;  %v6233_v41 = vpack.c.bf16 %v6184_v23, %v6183_v46  ;;  %v18738_v23 = vld [vmem:[#allocation46_spill] sm:$0xff] }
 0xb3a   : > { %v5949_v42 = vpop.f32.mrb[50].mxu0  ;;  %v18739_v1 = vld [vmem:[#allocation47_spill] sm:$0xff] }
 0xb3b   : > { %v6131_v57 = vadd.f32 %v5947_v60, %v18734_v26  ;;  %v5950_v24 = vadd.f32 %v5949_v42, %v15499_v14  ;;  %v9599_v5 = vpop.f32.mrb[51].mxu0  ;;  %6543 = vmatmul.mubr.bf16.gmra.mrb[124].mxu1 %v6233_v41  ;;  %6846 = vmatmul.mubr.bf16.gmra.mrb[152].mxu0 %v6233_v41 }
 0xb3c   : > { %6552 = vmatprep.mubr.bf16.mxu1 %v18723_v34  ;;  %6855 = vmatprep.mubr.bf16.mxu0 %v18723_v34 }
 0xb3d   : > { %v6132_v63 = vadd.f32 %v5950_v24, %v18735_v48  ;;  %v6185_v38 = vmax.f32 %v6131_v57, 0.0 }
 0xb3f   : > { %v6186_v19 = vmax.f32 %v6132_v63, 0.0  ;;  %v18740_v63 = vld [vmem:[#allocation52_spill] sm:$0xff] }
 0xb40   : > { %v5954_v9 = vpop.f32.mrb[52].mxu0 }
 0xb41   : > { %v5955_v52 = vadd.f32 %v5954_v9, %v15505_v0  ;;  %v9602_v6 = vpop.f32.mrb[53].mxu0  ;;  %v6234_v28 = vpack.c.bf16 %v6186_v19, %v6185_v38  ;;  %v18741_v9 = vld [vmem:[#allocation53_spill] sm:$0xff] }
 0xb42   : > { %v5957_v20 = vpop.f32.mrb[54].mxu0 }
 0xb43   : > { %v6133_v12 = vadd.f32 %v5955_v52, %v18736_v49  ;;  %v5958_v14 = vadd.f32 %v5957_v20, %v15508_v18  ;;  %v9603_v45 = vpop.f32.mrb[55].mxu0  ;;  %6553 = vmatmul.mubr.bf16.gmra.mrb[128].mxu1 %v6234_v28  ;;  %6856 = vmatmul.mubr.bf16.gmra.mrb[156].mxu0 %v6234_v28 }
 0xb44   : > { %6562 = vmatprep.mubr.bf16.mxu1 %v18723_v34  ;;  %6865 = vmatprep.mubr.bf16.mxu0 %v18723_v34  ;;  %v18742_v45 = vld [vmem:[#allocation58_spill] sm:$0xff] }
 0xb45   : > { %v6134_v2 = vadd.f32 %v5958_v14, %v18737_v37  ;;  %v6187_v50 = vmax.f32 %v6133_v12, 0.0 }
 0xb47   : > { %v6188_v4 = vmax.f32 %v6134_v2, 0.0 }
 0xb48   : > { %v5962_v54 = vpop.f32.mrb[56].mxu0 }
 0xb49   : > { %v5963_v0 = vadd.f32 %v5962_v54, %v15514_v32  ;;  %v9606_v11 = vpop.f32.mrb[57].mxu0  ;;  %v6235_v27 = vpack.c.bf16 %v6188_v4, %v6187_v50  ;;  %v18743_v50 = vld [vmem:[#allocation59_spill] sm:$0xff] }
 0xb4a   : > { %v5965_v46 = vpop.f32.mrb[58].mxu0 }
 0xb4b   : > { %v6135_v43 = vadd.f32 %v5963_v0, %v18738_v23  ;;  %v5966_v18 = vadd.f32 %v5965_v46, %v15517_v8  ;;  %v9607_v60 = vpop.f32.mrb[59].mxu0  ;;  %6563 = vmatmul.mubr.bf16.gmra.mrb[132].mxu1 %v6235_v27  ;;  %6866 = vmatmul.mubr.bf16.gmra.mrb[160].mxu0 %v6235_v27 }
 0xb4c   : > { %6572 = vmatprep.mubr.bf16.mxu1 %v18723_v34  ;;  %6875 = vmatprep.mubr.bf16.mxu0 %v18723_v34 }
 0xb4d   : > { %v6136_v41 = vadd.f32 %v5966_v18, %v18739_v1  ;;  %v6189_v42 = vmax.f32 %v6135_v43, 0.0  ;;  %v18744_v43 = vld [vmem:[#allocation66_spill] sm:$0xff]  ;;  %v18745_v1 = vld [vmem:[#allocation67_spill] sm:$0xff] }
 0xb4f   : > { %v6190_v26 = vmax.f32 %v6136_v41, 0.0 }
 0xb50   : > { %v5970_v57 = vpop.f32.mrb[60].mxu0 }
 0xb51   : > { %v5971_v32 = vadd.f32 %v5970_v57, %v15523_v22  ;;  %v9610_v24 = vpop.f32.mrb[61].mxu0  ;;  %v6236_v5 = vpack.c.bf16 %v6190_v26, %v6189_v42 }
 0xb52   : > { %v5973_v48 = vpop.f32.mrb[62].mxu0 }
 0xb53   : > { %v6137_v38 = vadd.f32 %v5971_v32, %v18740_v63  ;;  %v5974_v8 = vadd.f32 %v5973_v48, %v15532_v25  ;;  %v9611_v19 = vpop.f32.mrb[63].mxu0  ;;  %6573 = vmatmul.mubr.bf16.gmra.mrb[136].mxu1 %v6236_v5  ;;  %6876 = vmatmul.mubr.bf16.gmra.mrb[164].mxu0 %v6236_v5  ;;  %v18746_v48 = vld [vmem:[#allocation74_spill] sm:$0xff] }
 0xb54   : > { %6582 = vmatprep.mubr.bf16.mxu1 %v18723_v34  ;;  %6885 = vmatprep.mubr.bf16.mxu0 %v18723_v34 }
 0xb55   : > { %v6138_v52 = vadd.f32 %v5974_v8, %v18741_v9  ;;  %v6191_v6 = vmax.f32 %v6137_v38, 0.0  ;;  %v18747_v8 = vld [vmem:[#allocation75_spill] sm:$0xff] }
 0xb57   : > { %v6192_v28 = vmax.f32 %v6138_v52, 0.0 }
 0xb58   : > { %v5978_v20 = vpop.f32.mrb[64].mxu0 }
 0xb59   : > { %v5979_v22 = vadd.f32 %v5978_v20, %v15550_v51  ;;  %v9614_v49 = vpop.f32.mrb[65].mxu0  ;;  %v6237_v12 = vpack.c.bf16 %v6192_v28, %v6191_v6 }
 0xb5a   : > { %v5981_v14 = vpop.f32.mrb[66].mxu0  ;;  %v18748_v49 = vld [vmem:[#allocation82_spill] sm:$0xff] }
 0xb5b   : > { %v6139_v37 = vadd.f32 %v5979_v22, %v18742_v45  ;;  %v5982_v25 = vadd.f32 %v5981_v14, %v15559_v47  ;;  %v9615_v2 = vpop.f32.mrb[67].mxu0  ;;  %6583 = vmatmul.mubr.bf16.gmra.mrb[140].mxu1 %v6237_v12  ;;  %6886 = vmatmul.mubr.bf16.gmra.mrb[168].mxu0 %v6237_v12  ;;  %v18749_v45 = vld [vmem:[#allocation83_spill] sm:$0xff] }
 0xb5c   : > { %6592 = vmatprep.mubr.bf16.mxu1 %v18723_v34  ;;  %6895 = vmatprep.mubr.bf16.mxu0 %v18723_v34 }
 0xb5d   : > { %v6140_v4 = vadd.f32 %v5982_v25, %v18743_v50  ;;  %v6193_v54 = vmax.f32 %v6139_v37, 0.0 }
 0xb5f   : > { %v6194_v0 = vmax.f32 %v6140_v4, 0.0 }
 0xb60   : > { %v5986_v11 = vpop.f32.mrb[68].mxu0 }
 0xb61   : > { %v5987_v51 = vadd.f32 %v5986_v11, %v15577_v58  ;;  %v9618_v27 = vpop.f32.mrb[69].mxu0  ;;  %v6238_v46 = vpack.c.bf16 %v6194_v0, %v6193_v54  ;;  %v18750_v11 = vld [vmem:[#allocation90_spill] sm:$0xff] }
 0xb62   : > { %v5989_v23 = vpop.f32.mrb[70].mxu0 }
 0xb63   : > { %v6141_v18 = vadd.f32 %v5987_v51, %v18744_v43  ;;  %v5990_v47 = vadd.f32 %v5989_v23, %v15586_v29  ;;  %v9619_v60 = vpop.f32.mrb[71].mxu0  ;;  %6593 = vmatmul.mubr.bf16.gmra.mrb[144].mxu1 %v6238_v46  ;;  %6896 = vmatmul.mubr.bf16.gmra.mrb[172].mxu0 %v6238_v46  ;;  %v18751_v46 = vld [vmem:[#allocation91_spill] sm:$0xff] }
 0xb64   : > { %6602 = vmatprep.mubr.bf16.mxu1 %v18723_v34  ;;  %6905 = vmatprep.mubr.bf16.mxu0 %v18723_v34 }
 0xb65   : > { %v6142_v41 = vadd.f32 %v5990_v47, %v18745_v1  ;;  %v6195_v42 = vmax.f32 %v6141_v18, 0.0 }
 0xb67   : > { %v6196_v26 = vmax.f32 %v6142_v41, 0.0 }
 0xb68   : > { %v5994_v57 = vpop.f32.mrb[72].mxu0 }
 0xb69   : > { %v5995_v58 = vadd.f32 %v5994_v57, %v15610_v39  ;;  %v9622_v32 = vpop.f32.mrb[73].mxu0  ;;  %v6239_v24 = vpack.c.bf16 %v6196_v26, %v6195_v42  ;;  %v18752_v42 = vld [vmem:[#allocation98_spill] sm:$0xff] }
 0xb6a   : > { %v5997_v5 = vpop.f32.mrb[74].mxu0 }
 0xb6b   : > { %v6143_v63 = vadd.f32 %v5995_v58, %v18746_v48  ;;  %v5998_v29 = vadd.f32 %v5997_v5, %v15619_v3  ;;  %v9623_v38 = vpop.f32.mrb[75].mxu0  ;;  %6603 = vmatmul.mubr.bf16.gmra.mrb[148].mxu1 %v6239_v24  ;;  %6906 = vmatmul.mubr.bf16.gmra.mrb[176].mxu0 %v6239_v24  ;;  %v18753_v58 = vld [vmem:[#allocation99_spill] sm:$0xff] }
 0xb6c   : > { %6612 = vmatprep.mubr.bf16.mxu1 %v18723_v34  ;;  %6915 = vmatprep.mubr.bf16.mxu0 %v18723_v34 }
 0xb6d   : > { %v6144_v19 = vadd.f32 %v5998_v29, %v18747_v8  ;;  %v6197_v9 = vmax.f32 %v6143_v63, 0.0  ;;  %v18754_v8 = vld [vmem:[#allocation106_spill] sm:$0xff] }
 0xb6f   : > { %v6198_v52 = vmax.f32 %v6144_v19, 0.0 }
 0xb70   : > { %v6002_v6 = vpop.f32.mrb[76].mxu0 }
 0xb71   : > { %v6003_v39 = vadd.f32 %v6002_v6, %v15643_v56  ;;  %v9626_v28 = vpop.f32.mrb[77].mxu0  ;;  %v6240_v20 = vpack.c.bf16 %v6198_v52, %v6197_v9  ;;  %v18755_v52 = vld [vmem:[#allocation107_spill] sm:$0xff] }
 0xb72   : > { %v6005_v22 = vpop.f32.mrb[78].mxu0 }
 0xb73   : > { %v6145_v12 = vadd.f32 %v6003_v39, %v18748_v49  ;;  %v6006_v3 = vadd.f32 %v6005_v22, %v15646_v10  ;;  %v9627_v14 = vpop.f32.mrb[79].mxu0  ;;  %6613 = vmatmul.mubr.bf16.gmra.mrb[152].mxu1 %v6240_v20  ;;  %6916 = vmatmul.mubr.bf16.gmra.mrb[180].mxu0 %v6240_v20 }
 0xb74   : > { %6622 = vmatprep.mubr.bf16.mxu1 %v18723_v34  ;;  %6925 = vmatprep.mubr.bf16.mxu0 %v18723_v34 }
 0xb75   : > { %v6146_v37 = vadd.f32 %v6006_v3, %v18749_v45  ;;  %v6199_v25 = vmax.f32 %v6145_v12, 0.0  ;;  %v18756_v3 = vld [vmem:[#allocation114_spill] sm:$0xff] }
 0xb77   : > { %v6200_v2 = vmax.f32 %v6146_v37, 0.0  ;;  %v18757_v37 = vld [vmem:[#allocation115_spill] sm:$0xff] }
 0xb78   : > { %v6010_v50 = vpop.f32.mrb[80].mxu0 }
 0xb79   : > { %v6011_v56 = vadd.f32 %v6010_v50, %v15652_v62  ;;  %v9630_v4 = vpop.f32.mrb[81].mxu0  ;;  %v6241_v54 = vpack.c.bf16 %v6200_v2, %v6199_v25 }
 0xb7a   : > { %v6013_v0 = vpop.f32.mrb[82].mxu0 }
 0xb7b   : > { %v6147_v51 = vadd.f32 %v6011_v56, %v18750_v11  ;;  %v6014_v10 = vadd.f32 %v6013_v0, %v15655_v16  ;;  %v9631_v27 = vpop.f32.mrb[83].mxu0  ;;  %6623 = vmatmul.mubr.bf16.gmra.mrb[156].mxu1 %v6241_v54  ;;  %6926 = vmatmul.mubr.bf16.gmra.mrb[184].mxu0 %v6241_v54  ;;  %v18758_v11 = vld [vmem:[#allocation122_spill] sm:$0xff] }
 0xb7c   : > { %6632 = vmatprep.mubr.bf16.mxu1 %v18723_v34  ;;  %6935 = vmatprep.mubr.bf16.mxu0 %v18723_v34 }
 0xb7d   : > { %v6148_v23 = vadd.f32 %v6014_v10, %v18751_v46  ;;  %v6201_v43 = vmax.f32 %v6147_v51, 0.0  ;;  %v18760_v46 = vld [vmem:[#allocation123_spill] sm:$0xff] }
 0xb7f   : > { %v6202_v18 = vmax.f32 %v6148_v23, 0.0 }
 0xb80   : > { %v6018_v47 = vpop.f32.mrb[84].mxu0 }
 0xb81   : > { %v6019_v62 = vadd.f32 %v6018_v47, %v15661_v15  ;;  %v9634_v60 = vpop.f32.mrb[85].mxu0  ;;  %v6242_v1 = vpack.c.bf16 %v6202_v18, %v6201_v43 }
 0xb82   : > { %v6021_v41 = vpop.f32.mrb[86].mxu0 }
 0xb83   : > { %v6149_v26 = vadd.f32 %v6019_v62, %v18752_v42  ;;  %v6022_v16 = vadd.f32 %v6021_v41, %v15664_v35  ;;  %v9635_v57 = vpop.f32.mrb[87].mxu0  ;;  %6633 = vmatmul.mubr.bf16.gmra.mrb[160].mxu1 %v6242_v1  ;;  %6936 = vmatmul.mubr.bf16.gmra.mrb[188].mxu0 %v6242_v1  ;;  %v18761_v41 = vld [vmem:[#allocation130_spill] sm:$0xff] }
 0xb84   : > { %6642 = vmatprep.mubr.bf16.mxu1 %v18723_v34  ;;  %6945 = vmatprep.mubr.bf16.mxu0 %v18723_v34  ;;  %v18762_v57 = vld [vmem:[#allocation131_spill] sm:$0xff] }
 0xb85   : > { %v6150_v32 = vadd.f32 %v6022_v16, %v18753_v58  ;;  %v6203_v24 = vmax.f32 %v6149_v26, 0.0 }
 0xb87   : > { %v6204_v5 = vmax.f32 %v6150_v32, 0.0 }
 0xb88   : > { %v6026_v48 = vpop.f32.mrb[88].mxu0 }
 0xb89   : > { %v6027_v15 = vadd.f32 %v6026_v48, %v15670_v61  ;;  %v9638_v63 = vpop.f32.mrb[89].mxu0  ;;  %v6243_v29 = vpack.c.bf16 %v6204_v5, %v6203_v24 }
 0xb8a   : > { %v6029_v38 = vpop.f32.mrb[90].mxu0 }
 0xb8b   : > { %v6151_v19 = vadd.f32 %v6027_v15, %v18754_v8  ;;  %v6030_v35 = vadd.f32 %v6029_v38, %v15673_v53  ;;  %v9639_v9 = vpop.f32.mrb[91].mxu0  ;;  %6643 = vmatmul.mubr.bf16.gmra.mrb[164].mxu1 %v6243_v29  ;;  %6946 = vmatmul.mubr.bf16.gmra.mrb[192].mxu0 %v6243_v29  ;;  %v18763_v29 = vld [vmem:[#allocation138_spill] sm:$0xff] }
 0xb8c   : > { %6652 = vmatprep.mubr.bf16.mxu1 %v18723_v34  ;;  %6955 = vmatprep.mubr.bf16.mxu0 %v18723_v34 }
 0xb8d   : > { %v6152_v6 = vadd.f32 %v6030_v35, %v18755_v52  ;;  %v6205_v39 = vmax.f32 %v6151_v19, 0.0  ;;  %v18764_v19 = vld [vmem:[#allocation139_spill] sm:$0xff] }
 0xb8f   : > { %v6206_v28 = vmax.f32 %v6152_v6, 0.0 }
 0xb90   : > { %v6034_v20 = vpop.f32.mrb[92].mxu0 }
 0xb91   : > { %v6035_v61 = vadd.f32 %v6034_v20, %v15679_v59  ;;  %v9642_v22 = vpop.f32.mrb[93].mxu0  ;;  %v6244_v49 = vpack.c.bf16 %v6206_v28, %v6205_v39 }
 0xb92   : > { %v6037_v12 = vpop.f32.mrb[94].mxu0 }
 0xb93   : > { %v6153_v14 = vadd.f32 %v6035_v61, %v18756_v3  ;;  %v6038_v53 = vadd.f32 %v6037_v12, %v15682_v36  ;;  %v9643_v45 = vpop.f32.mrb[95].mxu0  ;;  %6653 = vmatmul.mubr.bf16.gmra.mrb[168].mxu1 %v6244_v49  ;;  %6956 = vmatmul.mubr.bf16.gmra.mrb[196].mxu0 %v6244_v49  ;;  %v18759_v36 = vld [vmem:[#allocation37_spill] sm:$0xff]  ;;  %v18765_v61 = vld [vmem:[#allocation146_spill] sm:$0xff]  ;;  %v18766_v12 = vld [vmem:[#allocation147_spill] sm:$0xff] }
 0xb94   : > { %6662 = vmatprep.mubr.bf16.mxu1 %v18723_v34  ;;  %6965 = vmatprep.mubr.bf16.mxu0 %v18723_v34 }
 0xb95   : > { %v6154_v25 = vadd.f32 %v6038_v53, %v18757_v37  ;;  %v6207_v2 = vmax.f32 %v6153_v14, 0.0 }
 0xb97   : > { %v6208_v50 = vmax.f32 %v6154_v25, 0.0 }
 0xb98   : > { %v6042_v56 = vpop.f32.mrb[96].mxu0 }
 0xb99   : > { %v6043_v59 = vadd.f32 %v6042_v56, %v15688_v44  ;;  %v9646_v4 = vpop.f32.mrb[97].mxu0  ;;  %v6245_v54 = vpack.c.bf16 %v6208_v50, %v6207_v2  ;;  %v18767_v50 = vld [vmem:[#allocation154_spill] sm:$0xff] }
 0xb9a   : > { %v6045_v0 = vpop.f32.mrb[98].mxu0 }
 0xb9b   : > { %v6155_v51 = vadd.f32 %v6043_v59, %v18758_v11  ;;  %v6046_v10 = vadd.f32 %v6045_v0, %v18759_v36  ;;  %v9647_v27 = vpop.f32.mrb[99].mxu0  ;;  %6663 = vmatmul.mubr.bf16.gmra.mrb[172].mxu1 %v6245_v54  ;;  %6966 = vmatmul.mubr.bf16.gmra.mrb[200].mxu0 %v6245_v54  ;;  %v18769_v54 = vld [vmem:[#allocation155_spill] sm:$0xff] }
 0xb9c   : > { %6672 = vmatprep.mubr.bf16.mxu1 %v18723_v34  ;;  %6975 = vmatprep.mubr.bf16.mxu0 %v18723_v34 }
 0xb9d   : > { %v6156_v23 = vadd.f32 %v6046_v10, %v18760_v46  ;;  %v6209_v43 = vmax.f32 %v6155_v51, 0.0 }
 0xb9f   : > { %v6210_v18 = vmax.f32 %v6156_v23, 0.0  ;;  %v18770_v23 = vld [vmem:[#allocation162_spill] sm:$0xff] }
 0xba0   : > { %v6050_v47 = vpop.f32.mrb[100].mxu0 }
 0xba1   : > { %v6051_v44 = vadd.f32 %v6050_v47, %v15697_v21  ;;  %v9650_v62 = vpop.f32.mrb[101].mxu0  ;;  %v6246_v60 = vpack.c.bf16 %v6210_v18, %v6209_v43 }
 0xba2   : > { %v6053_v1 = vpop.f32.mrb[102].mxu0 }
 0xba3   : > { %v6157_v42 = vadd.f32 %v6051_v44, %v18761_v41  ;;  %v6054_v26 = vadd.f32 %v6053_v1, %v15700_v31  ;;  %v9651_v16 = vpop.f32.mrb[103].mxu0  ;;  %6673 = vmatmul.mubr.bf16.gmra.mrb[176].mxu1 %v6246_v60  ;;  %6976 = vmatmul.mubr.bf16.gmra.mrb[204].mxu0 %v6246_v60  ;;  %v18771_v44 = vld [vmem:[#allocation163_spill] sm:$0xff] }
 0xba4   : > { %6682 = vmatprep.mubr.bf16.mxu1 %v18723_v34  ;;  %6985 = vmatprep.mubr.bf16.mxu0 %v18723_v34 }
 0xba5   : > { %v6158_v58 = vadd.f32 %v6054_v26, %v18762_v57  ;;  %v6211_v32 = vmax.f32 %v6157_v42, 0.0 }
 0xba7   : > { %v6212_v24 = vmax.f32 %v6158_v58, 0.0  ;;  %v18773_v58 = vld [vmem:[#allocation170_spill] sm:$0xff] }
 0xba8   : > { %v6058_v5 = vpop.f32.mrb[104].mxu0 }
 0xba9   : > { %v6059_v21 = vadd.f32 %v6058_v5, %v15706_v30  ;;  %v9654_v48 = vpop.f32.mrb[105].mxu0  ;;  %v6247_v15 = vpack.c.bf16 %v6212_v24, %v6211_v32 }
 0xbaa   : > { %v6061_v63 = vpop.f32.mrb[106].mxu0 }
 0xbab   : > { %v6159_v38 = vadd.f32 %v6059_v21, %v18763_v29  ;;  %v6062_v31 = vadd.f32 %v6061_v63, %v15709_v33  ;;  %v9655_v8 = vpop.f32.mrb[107].mxu0  ;;  %6683 = vmatmul.mubr.bf16.gmra.mrb[180].mxu1 %v6247_v15  ;;  %6986 = vmatmul.mubr.bf16.gmra.mrb[208].mxu0 %v6247_v15  ;;  %v18775_v21 = vld [vmem:[#allocation171_spill] sm:$0xff] }
 0xbac   : > { %6692 = vmatprep.mubr.bf16.mxu1 %v18723_v34  ;;  %6995 = vmatprep.mubr.bf16.mxu0 %v18723_v34 }
 0xbad   : > { %v6160_v35 = vadd.f32 %v6062_v31, %v18764_v19  ;;  %v6213_v9 = vmax.f32 %v6159_v38, 0.0  ;;  %v18776_v38 = vld [vmem:[#allocation226_spill] sm:$0xff] }
 0xbaf   : > { %v6214_v52 = vmax.f32 %v6160_v35, 0.0 }
 0xbb0   : > { %v6066_v6 = vpop.f32.mrb[108].mxu0 }
 0xbb1   : > { %v6067_v30 = vadd.f32 %v6066_v6, %v15715_v13  ;;  %v9658_v39 = vpop.f32.mrb[109].mxu0  ;;  %v6248_v28 = vpack.c.bf16 %v6214_v52, %v6213_v9  ;;  %v18777_v9 = vld [vmem:[#allocation177_spill] sm:$0xff] }
 0xbb2   : > { %v6069_v20 = vpop.f32.mrb[110].mxu0  ;;  %v18778_v6 = vld [vmem:[#allocation85_spill] sm:$0xff] }
 0xbb3   : > { %v6161_v22 = vadd.f32 %v6067_v30, %v18765_v61  ;;  %v6070_v33 = vadd.f32 %v6069_v20, %v15718_v55  ;;  %v9659_v49 = vpop.f32.mrb[111].mxu0  ;;  %6693 = vmatmul.mubr.bf16.gmra.mrb[184].mxu1 %v6248_v28  ;;  %6996 = vmatmul.mubr.bf16.gmra.mrb[212].mxu0 %v6248_v28  ;;  %v18768_v55 = vld [vmem:[#allocation25_spill] sm:$0xff]  ;;  %v18779_v28 = vld [vmem:[#allocation178_spill] sm:$0xff] }
 0xbb4   : > { %6702 = vmatprep.mubr.bf16.mxu1 %v18723_v34  ;;  %7005 = vmatprep.mubr.bf16.mxu0 %v18723_v34  ;;  %v18780_v49 = vld [vmem:[#allocation24_spill] sm:$0xff] }
 0xbb5   : > { %v6162_v3 = vadd.f32 %v6070_v33, %v18766_v12  ;;  %v6215_v14 = vmax.f32 %v6161_v22, 0.0 }
 0xbb7   : > { %v6216_v53 = vmax.f32 %v6162_v3, 0.0 }
 0xbb8   : > { %v6074_v45 = vpop.f32.mrb[112].mxu0 }
 0xbb9   : > { %v6075_v13 = vadd.f32 %v6074_v45, %v15724_v40  ;;  %v9662_v37 = vpop.f32.mrb[113].mxu0  ;;  %v6249_v25 = vpack.c.bf16 %v6216_v53, %v6215_v14  ;;  %v18781_v45 = vld [vmem:[#allocation182_spill] sm:$0xff] }
 0xbba   : > { %v6077_v2 = vpop.f32.mrb[114].mxu0  ;;  %v18782_v37 = vld [vmem:[#allocation14_spill] sm:$0xff] }
 0xbbb   : > { %v6163_v56 = vadd.f32 %v6075_v13, %v18767_v50  ;;  %v6078_v59 = vadd.f32 %v6077_v2, %v18768_v55  ;;  %v9663_v4 = vpop.f32.mrb[115].mxu0  ;;  %6703 = vmatmul.mubr.bf16.gmra.mrb[188].mxu1 %v6249_v25  ;;  %7006 = vmatmul.mubr.bf16.gmra.mrb[216].mxu0 %v6249_v25  ;;  %v18783_v50 = vld [vmem:[#allocation183_spill] sm:$0xff] }
 0xbbc   : > { %6712 = vmatprep.mubr.bf16.mxu1 %v18723_v34  ;;  %7015 = vmatprep.mubr.bf16.mxu0 %v18723_v34 }
 0xbbd   : > { %v6164_v0 = vadd.f32 %v6078_v59, %v18769_v54  ;;  %v6217_v11 = vmax.f32 %v6163_v56, 0.0  ;;  %v18784_v54 = vld [vmem:[#allocation51_spill] sm:$0xff] }
 0xbbf   : > { %v6218_v51 = vmax.f32 %v6164_v0, 0.0 }
 0xbc0   : > { %v6082_v36 = vpop.f32.mrb[116].mxu0 }
 0xbc1   : > { %v6083_v40 = vadd.f32 %v6082_v36, %v15733_v7  ;;  %v9666_v10 = vpop.f32.mrb[117].mxu0  ;;  %v6250_v27 = vpack.c.bf16 %v6218_v51, %v6217_v11  ;;  %v18772_v7 = vld [vmem:[#allocation62_spill] sm:$0xff] }
 0xbc2   : > { %v6085_v46 = vpop.f32.mrb[118].mxu0 }
 0xbc3   : > { %v6165_v43 = vadd.f32 %v6083_v40, %v18770_v23  ;;  %v6086_v18 = vadd.f32 %v6085_v46, %v15736_v17  ;;  %v9667_v47 = vpop.f32.mrb[119].mxu0  ;;  %6713 = vmatmul.mubr.bf16.gmra.mrb[192].mxu1 %v6250_v27  ;;  %7016 = vmatmul.mubr.bf16.gmra.mrb[220].mxu0 %v6250_v27  ;;  %v18774_v17 = vld [vmem:[#allocation50_spill] sm:$0xff]  ;;  %v18785_v40 = vld [vmem:[#allocation188_spill] sm:$0xff]  ;;  %v18786_v27 = vld [vmem:[#allocation39_spill] sm:$0xff] }
 0xbc4   : > { %6722 = vmatprep.mubr.bf16.mxu1 %v18723_v34  ;;  %7025 = vmatprep.mubr.bf16.mxu0 %v18723_v34 }
 0xbc5   : > { %v6166_v62 = vadd.f32 %v6086_v18, %v18771_v44  ;;  %v6219_v60 = vmax.f32 %v6165_v43, 0.0  ;;  %v18787_v43 = vld [vmem:[#allocation189_spill] sm:$0xff] }
 0xbc7   : > { %v6220_v1 = vmax.f32 %v6166_v62, 0.0  ;;  %v18788_v62 = vld [vmem:[#allocation12_spill] sm:$0xff] }
 0xbc8   : > { %v6090_v41 = vpop.f32.mrb[120].mxu0 }
 0xbc9   : > { %v6091_v42 = vadd.f32 %v6090_v41, %v18772_v7  ;;  %v9670_v26 = vpop.f32.mrb[121].mxu0  ;;  %v6251_v16 = vpack.c.bf16 %v6220_v1, %v6219_v60  ;;  %v15937_v60 = vsub.s32 0, %v18788_v62  ;;  %v17444_v1 = vsub.s32 2, %v18788_v62  ;;  %v6288_v41 = vld [vmem:[%s16785_s11] sm:$0xf] }
 0xbca   : > { %v6093_v57 = vpop.f32.mrb[122].mxu0  ;;  %v15944_v7 = vsub.s32 1, %v18788_v62 }
 0xbcb   : > { %v6167_v32 = vadd.f32 %v6091_v42, %v18773_v58  ;;  %v6094_v24 = vadd.f32 %v6093_v57, %v18774_v17  ;;  %v9671_v5 = vpop.f32.mrb[123].mxu0  ;;  %6723 = vmatmul.mubr.bf16.gmra.mrb[196].mxu1 %v6251_v16  ;;  %7026 = vmatmul.mubr.bf16.gmra.mrb[224].mxu0 %v6251_v16  ;;  %18789 = vst [vmem:[#allocation84_spill] sm:$0xff] %v15937_v60  ;;  %v17445_v42 = vsub.s32 3, %v18788_v62 }
 0xbcc   : > { %6732 = vmatprep.mubr.bf16.mxu1 %v18723_v34  ;;  %7035 = vmatprep.mubr.bf16.mxu0 %v18723_v34  ;;  %18790 = vst [vmem:[#allocation68_spill] sm:$0xff] %v15944_v7  ;;  %v15948_v16 = vrot.slane %v6288_v41, %v15937_v60  ;;  %v15952_v57 = vrot.slane %v6288_v41, %v17444_v1 }
 0xbcd   : > { %v6168_v48 = vadd.f32 %v6094_v24, %v18775_v21  ;;  %v6221_v15 = vmax.f32 %v6167_v32, 0.0  ;;  %v15955_v58 = vrot.slane %v6288_v41, %v15944_v7  ;;  %v15959_v32 = vrot.slane %v6288_v41, %v17445_v42 }
 0xbcf   : > { %v6222_v63 = vmax.f32 %v6168_v48, 0.0 }
 0xbd0   : > { %v6098_v29 = vpop.f32.mrb[124].mxu0 }
 0xbd1   : > { %v6099_v31 = vadd.f32 %v6098_v29, %v18776_v38  ;;  %v9674_v8 = vpop.f32.mrb[125].mxu0  ;;  %v6252_v19 = vpack.c.bf16 %v6222_v63, %v6221_v15 }
 0xbd2   : > { %v6101_v35 = vpop.f32.mrb[126].mxu0 }
 0xbd3   : > { %v6169_v52 = vadd.f32 %v6099_v31, %v18777_v9  ;;  %v6102_v30 = vadd.f32 %v6101_v35, %v18778_v6  ;;  %v9675_v39 = vpop.f32.mrb[127].mxu0  ;;  %6733 = vmatmul.mubr.bf16.gmra.mrb[200].mxu1 %v6252_v19  ;;  %7036 = vmatmul.mubr.bf16.gmra.mrb[228].mxu0 %v6252_v19 }
 0xbd4   : > { %6742 = vmatprep.mubr.bf16.mxu1 %v18723_v34  ;;  %7045 = vmatprep.mubr.bf16.mxu0 %v18723_v34 }
 0xbd5   : > { %v6170_v20 = vadd.f32 %v6102_v30, %v18779_v28  ;;  %v6223_v61 = vmax.f32 %v6169_v52, 0.0 }
 0xbd7   : > { %v6224_v22 = vmax.f32 %v6170_v20, 0.0 }
 0xbd8   : > { %v6106_v33 = vpop.f32.mrb[128].mxu0 }
 0xbd9   : > { %v6107_v12 = vadd.f32 %v6106_v33, %v18780_v49  ;;  %v9678_v3 = vpop.f32.mrb[129].mxu0  ;;  %v6253_v14 = vpack.c.bf16 %v6224_v22, %v6223_v61 }
 0xbda   : > { %v6109_v53 = vpop.f32.mrb[130].mxu0 }
 0xbdb   : > { %v6171_v13 = vadd.f32 %v6107_v12, %v18781_v45  ;;  %v6110_v25 = vadd.f32 %v6109_v53, %v18782_v37  ;;  %v9679_v2 = vpop.f32.mrb[131].mxu0  ;;  %6743 = vmatmul.mubr.bf16.gmra.mrb[204].mxu1 %v6253_v14  ;;  %7046 = vmatmul.mubr.bf16.gmra.mrb[232].mxu0 %v6253_v14 }
 0xbdc   : > { %6752 = vmatprep.mubr.bf16.mxu1 %v18723_v34  ;;  %7055 = vmatprep.mubr.bf16.mxu0 %v18723_v34 }
 0xbdd   : > { %v6172_v56 = vadd.f32 %v6110_v25, %v18783_v50  ;;  %v6225_v55 = vmax.f32 %v6171_v13, 0.0 }
 0xbdf   : > { %v6226_v59 = vmax.f32 %v6172_v56, 0.0 }
 0xbe0   : > { %v6114_v4 = vpop.f32.mrb[132].mxu0 }
 0xbe1   : > { %v6115_v0 = vadd.f32 %v6114_v4, %v18784_v54  ;;  %v9682_v11 = vpop.f32.mrb[133].mxu0  ;;  %v6254_v51 = vpack.c.bf16 %v6226_v59, %v6225_v55 }
 0xbe2   : > { %v6117_v36 = vpop.f32.mrb[134].mxu0 }
 0xbe3   : > { %v6173_v10 = vadd.f32 %v6115_v0, %v18785_v40  ;;  %v6118_v46 = vadd.f32 %v6117_v36, %v18786_v27  ;;  %v9683_v23 = vpop.f32.mrb[135].mxu0  ;;  %6753 = vmatmul.mubr.bf16.gmra.mrb[208].mxu1 %v6254_v51  ;;  %7056 = vmatmul.mubr.bf16.gmra.mrb[236].mxu0 %v6254_v51 }
 0xbe4   : > { %6762 = vmatprep.mubr.bf16.mxu1 %v18723_v34  ;;  %7065 = vmatprep.mubr.bf16.mxu0 %v18723_v34 }
 0xbe5   : > { %v6174_v18 = vadd.f32 %v6118_v46, %v18787_v43  ;;  %v6227_v47 = vmax.f32 %v6173_v10, 0.0 }
 0xbe7   : > { %v6228_v44 = vmax.f32 %v6174_v18, 0.0 }
 0xbe9   : > { %v6255_v26 = vpack.c.bf16 %v6228_v44, %v6227_v47 }
 0xbeb   : > { %6763 = vmatmul.mubr.bf16.gmra.mrb[212].mxu1 %v6255_v26  ;;  %7066 = vmatmul.mubr.bf16.gmra.mrb[240].mxu0 %v6255_v26 }
 0xbee   : > { %v6504_v17 = vpop.f32.mrb[108].mxu1  ;;  %v6807_v24 = vpop.f32.mrb[136].mxu0 }
 0xbef   : > { %v6505_v5 = vadd.f32 %v6504_v17, %v15948_v16  ;;  %v6808_v21 = vadd.f32 %v6807_v24, %v15952_v57  ;;  %v6506_v48 = vpop.f32.mrb[109].mxu1  ;;  %v6809_v15 = vpop.f32.mrb[137].mxu0 }
 0xbf0   : > { %v6507_v63 = vadd.f32 %v6506_v48, %v15955_v58  ;;  %v6810_v29 = vadd.f32 %v6809_v15, %v15959_v32  ;;  %v6508_v38 = vpop.f32.mrb[110].mxu1  ;;  %v6811_v31 = vpop.f32.mrb[138].mxu0 }
 0xbf1   : > { %v6509_v8 = vadd.f32 %v6508_v38, %v15948_v16  ;;  %v6812_v19 = vadd.f32 %v6811_v31, %v15952_v57  ;;  %v6510_v35 = vpop.f32.mrb[111].mxu1  ;;  %v6813_v9 = vpop.f32.mrb[139].mxu0  ;;  %v7076_v30 = vmax.f32 %v6505_v5, 0.0  ;;  %v7078_v39 = vmax.f32 %v6808_v21, 0.0 }
 0xbf2   : > { %v6511_v52 = vadd.f32 %v6510_v35, %v15955_v58  ;;  %v6814_v6 = vadd.f32 %v6813_v9, %v15959_v32  ;;  %v7077_v61 = vmax.f32 %v6507_v63, 0.0  ;;  %v7079_v22 = vmax.f32 %v6810_v29, 0.0 }
 0xbf3   : > { %v7080_v28 = vmax.f32 %v6509_v8, 0.0  ;;  %v7082_v20 = vmax.f32 %v6812_v19, 0.0 }
 0xbf4   : > { %v7081_v33 = vmax.f32 %v6511_v52, 0.0  ;;  %v7083_v49 = vmax.f32 %v6814_v6, 0.0 }
 0xbf5   : > { %v7293_v12 = vpack.c.bf16 %v7080_v28, %v7076_v30  ;;  %v15969_v3 = vpack.c.bf16 %v7082_v20, %v7078_v39 }
 0xbf6   : > { %v7294_v14 = vpack.c.bf16 %v7081_v33, %v7077_v61  ;;  %v15971_v53 = vpack.c.bf16 %v7083_v49, %v7079_v22  ;;  %v6514_v45 = vpop.f32.mrb[112].mxu1  ;;  %v6817_v13 = vpop.f32.mrb[140].mxu0 }
 0xbf7   : > { %v6515_v37 = vadd.f32 %v6514_v45, %v15948_v16  ;;  %v6818_v25 = vadd.f32 %v6817_v13, %v15952_v57  ;;  %v6516_v2 = vpop.f32.mrb[113].mxu1  ;;  %v6819_v50 = vpop.f32.mrb[141].mxu0 }
 0xbf8   : > { %v6517_v56 = vadd.f32 %v6516_v2, %v15955_v58  ;;  %v6820_v55 = vadd.f32 %v6819_v50, %v15959_v32  ;;  %v6518_v59 = vpop.f32.mrb[114].mxu1  ;;  %v6821_v4 = vpop.f32.mrb[142].mxu0  ;;  %7433 = vmatprep.subr.bf16.mxu0 %v7294_v14 }
 0xbf9   : > { %v6519_v54 = vadd.f32 %v6518_v59, %v15948_v16  ;;  %v6822_v0 = vadd.f32 %v6821_v4, %v15952_v57  ;;  %v6520_v11 = vpop.f32.mrb[115].mxu1  ;;  %v6823_v51 = vpop.f32.mrb[143].mxu0  ;;  %7434 = vmatpush1.bf16.msra.mxu0 %v7293_v12  ;;  %v7084_v10 = vmax.f32 %v6515_v37, 0.0  ;;  %v7086_v27 = vmax.f32 %v6818_v25, 0.0 }
 0xbfa   : > { %v6521_v36 = vadd.f32 %v6520_v11, %v15955_v58  ;;  %v6824_v40 = vadd.f32 %v6823_v51, %v15959_v32  ;;  %v7085_v43 = vmax.f32 %v6517_v56, 0.0  ;;  %v7087_v18 = vmax.f32 %v6820_v55, 0.0 }
 0xbfb   : > { %v7088_v46 = vmax.f32 %v6519_v54, 0.0  ;;  %v7090_v23 = vmax.f32 %v6822_v0, 0.0 }
 0xbfc   : > { %v7089_v47 = vmax.f32 %v6521_v36, 0.0  ;;  %v7091_v44 = vmax.f32 %v6824_v40, 0.0 }
 0xbfd   : > { %v7297_v41 = vpack.c.bf16 %v7088_v46, %v7084_v10  ;;  %v15981_v26 = vpack.c.bf16 %v7090_v23, %v7086_v27 }
 0xbfe   : > { %v7298_v17 = vpack.c.bf16 %v7089_v47, %v7085_v43  ;;  %v15983_v24 = vpack.c.bf16 %v7091_v44, %v7087_v18  ;;  %v6524_v5 = vpop.f32.mrb[116].mxu1  ;;  %v6827_v21 = vpop.f32.mrb[144].mxu0 }
 0xbff   : > { %v6525_v48 = vadd.f32 %v6524_v5, %v15948_v16  ;;  %v6828_v15 = vadd.f32 %v6827_v21, %v15952_v57  ;;  %v6526_v63 = vpop.f32.mrb[117].mxu1  ;;  %v6829_v29 = vpop.f32.mrb[145].mxu0 }
 0xc00   : > { %v6527_v38 = vadd.f32 %v6526_v63, %v15955_v58  ;;  %v6830_v31 = vadd.f32 %v6829_v29, %v15959_v32  ;;  %v6528_v8 = vpop.f32.mrb[118].mxu1  ;;  %v6831_v19 = vpop.f32.mrb[146].mxu0  ;;  %7435 = vmatprep.subr.bf16.mxu0 %v7298_v17 }
 0xc01   : > { %v6529_v35 = vadd.f32 %v6528_v8, %v15948_v16  ;;  %v6832_v9 = vadd.f32 %v6831_v19, %v15952_v57  ;;  %v6530_v52 = vpop.f32.mrb[119].mxu1  ;;  %v6833_v6 = vpop.f32.mrb[147].mxu0  ;;  %7436 = vmatpush1.bf16.msra.mxu0 %v7297_v41  ;;  %v7092_v28 = vmax.f32 %v6525_v48, 0.0  ;;  %v7094_v20 = vmax.f32 %v6828_v15, 0.0 }
 0xc02   : > { %v6531_v30 = vadd.f32 %v6530_v52, %v15955_v58  ;;  %v6834_v39 = vadd.f32 %v6833_v6, %v15959_v32  ;;  %v7093_v33 = vmax.f32 %v6527_v38, 0.0  ;;  %v7095_v49 = vmax.f32 %v6830_v31, 0.0 }
 0xc03   : > { %v7096_v61 = vmax.f32 %v6529_v35, 0.0  ;;  %v7098_v22 = vmax.f32 %v6832_v9, 0.0 }
 0xc04   : > { %v7097_v12 = vmax.f32 %v6531_v30, 0.0  ;;  %v7099_v14 = vmax.f32 %v6834_v39, 0.0 }
 0xc05   : > { %v7301_v45 = vpack.c.bf16 %v7096_v61, %v7092_v28  ;;  %v15993_v13 = vpack.c.bf16 %v7098_v22, %v7094_v20 }
 0xc06   : > { %v7302_v37 = vpack.c.bf16 %v7097_v12, %v7093_v33  ;;  %v15995_v25 = vpack.c.bf16 %v7099_v14, %v7095_v49  ;;  %v6534_v2 = vpop.f32.mrb[120].mxu1  ;;  %v6837_v50 = vpop.f32.mrb[148].mxu0 }
 0xc07   : > { %v6535_v56 = vadd.f32 %v6534_v2, %v15948_v16  ;;  %v6838_v55 = vadd.f32 %v6837_v50, %v15952_v57  ;;  %v6536_v59 = vpop.f32.mrb[121].mxu1  ;;  %v6839_v4 = vpop.f32.mrb[149].mxu0 }
 0xc08   : > { %v6537_v54 = vadd.f32 %v6536_v59, %v15955_v58  ;;  %v6840_v0 = vadd.f32 %v6839_v4, %v15959_v32  ;;  %v6538_v11 = vpop.f32.mrb[122].mxu1  ;;  %v6841_v51 = vpop.f32.mrb[150].mxu0  ;;  %7437 = vmatprep.subr.bf16.mxu0 %v7302_v37 }
 0xc09   : > { %v6539_v36 = vadd.f32 %v6538_v11, %v15948_v16  ;;  %v6842_v40 = vadd.f32 %v6841_v51, %v15952_v57  ;;  %v6540_v10 = vpop.f32.mrb[123].mxu1  ;;  %v6843_v27 = vpop.f32.mrb[151].mxu0  ;;  %7438 = vmatpush1.bf16.msra.mxu0 %v7301_v45  ;;  %v7100_v43 = vmax.f32 %v6535_v56, 0.0  ;;  %v7102_v18 = vmax.f32 %v6838_v55, 0.0 }
 0xc0a   : > { %v6541_v46 = vadd.f32 %v6540_v10, %v15955_v58  ;;  %v6844_v23 = vadd.f32 %v6843_v27, %v15959_v32  ;;  %v7101_v41 = vmax.f32 %v6537_v54, 0.0  ;;  %v7103_v17 = vmax.f32 %v6840_v0, 0.0 }
 0xc0b   : > { %v7104_v47 = vmax.f32 %v6539_v36, 0.0  ;;  %v7106_v44 = vmax.f32 %v6842_v40, 0.0 }
 0xc0c   : > { %v7105_v5 = vmax.f32 %v6541_v46, 0.0  ;;  %v7107_v21 = vmax.f32 %v6844_v23, 0.0 }
 0xc0d   : > { %v7305_v48 = vpack.c.bf16 %v7104_v47, %v7100_v43  ;;  %v16005_v15 = vpack.c.bf16 %v7106_v44, %v7102_v18 }
 0xc0e   : > { %v7306_v63 = vpack.c.bf16 %v7105_v5, %v7101_v41  ;;  %v16007_v29 = vpack.c.bf16 %v7107_v21, %v7103_v17  ;;  %v6544_v38 = vpop.f32.mrb[124].mxu1  ;;  %v6847_v31 = vpop.f32.mrb[152].mxu0 }
 0xc0f   : > { %v6545_v8 = vadd.f32 %v6544_v38, %v15948_v16  ;;  %v6848_v19 = vadd.f32 %v6847_v31, %v15952_v57  ;;  %v6546_v35 = vpop.f32.mrb[125].mxu1  ;;  %v6849_v9 = vpop.f32.mrb[153].mxu0 }
 0xc10   : > { %v6547_v52 = vadd.f32 %v6546_v35, %v15955_v58  ;;  %v6850_v6 = vadd.f32 %v6849_v9, %v15959_v32  ;;  %v6548_v30 = vpop.f32.mrb[126].mxu1  ;;  %v6851_v39 = vpop.f32.mrb[154].mxu0  ;;  %7439 = vmatprep.subr.bf16.mxu0 %v7306_v63 }
 0xc11   : > { %v6549_v28 = vadd.f32 %v6548_v30, %v15948_v16  ;;  %v6852_v20 = vadd.f32 %v6851_v39, %v15952_v57  ;;  %v6550_v61 = vpop.f32.mrb[127].mxu1  ;;  %v6853_v22 = vpop.f32.mrb[155].mxu0  ;;  %7440 = vmatpush1.bf16.msra.mxu0 %v7305_v48  ;;  %v7108_v12 = vmax.f32 %v6545_v8, 0.0  ;;  %v7110_v14 = vmax.f32 %v6848_v19, 0.0 }
 0xc12   : > { %v6551_v33 = vadd.f32 %v6550_v61, %v15955_v58  ;;  %v6854_v49 = vadd.f32 %v6853_v22, %v15959_v32  ;;  %v7109_v2 = vmax.f32 %v6547_v52, 0.0  ;;  %v7111_v50 = vmax.f32 %v6850_v6, 0.0 }
 0xc13   : > { %v7112_v45 = vmax.f32 %v6549_v28, 0.0  ;;  %v7114_v37 = vmax.f32 %v6852_v20, 0.0 }
 0xc14   : > { %v7113_v56 = vmax.f32 %v6551_v33, 0.0  ;;  %v7115_v55 = vmax.f32 %v6854_v49, 0.0 }
 0xc15   : > { %v7309_v59 = vpack.c.bf16 %v7112_v45, %v7108_v12  ;;  %v16017_v4 = vpack.c.bf16 %v7114_v37, %v7110_v14 }
 0xc16   : > { %v7310_v54 = vpack.c.bf16 %v7113_v56, %v7109_v2  ;;  %v16019_v0 = vpack.c.bf16 %v7115_v55, %v7111_v50  ;;  %v6554_v11 = vpop.f32.mrb[128].mxu1  ;;  %v6857_v51 = vpop.f32.mrb[156].mxu0 }
 0xc17   : > { %v6555_v36 = vadd.f32 %v6554_v11, %v15948_v16  ;;  %v6858_v40 = vadd.f32 %v6857_v51, %v15952_v57  ;;  %v6556_v10 = vpop.f32.mrb[129].mxu1  ;;  %v6859_v27 = vpop.f32.mrb[157].mxu0 }
 0xc18   : > { %v6557_v46 = vadd.f32 %v6556_v10, %v15955_v58  ;;  %v6860_v23 = vadd.f32 %v6859_v27, %v15959_v32  ;;  %v6558_v43 = vpop.f32.mrb[130].mxu1  ;;  %v6861_v18 = vpop.f32.mrb[158].mxu0  ;;  %7441 = vmatprep.subr.bf16.mxu0 %v7310_v54 }
 0xc19   : > { %v6559_v47 = vadd.f32 %v6558_v43, %v15948_v16  ;;  %v6862_v44 = vadd.f32 %v6861_v18, %v15952_v57  ;;  %v6560_v41 = vpop.f32.mrb[131].mxu1  ;;  %v6863_v17 = vpop.f32.mrb[159].mxu0  ;;  %7442 = vmatpush1.bf16.msra.mxu0 %v7309_v59  ;;  %v7116_v48 = vmax.f32 %v6555_v36, 0.0  ;;  %v7118_v63 = vmax.f32 %v6858_v40, 0.0 }
 0xc1a   : > { %v6561_v5 = vadd.f32 %v6560_v41, %v15955_v58  ;;  %v6864_v21 = vadd.f32 %v6863_v17, %v15959_v32  ;;  %v7117_v8 = vmax.f32 %v6557_v46, 0.0  ;;  %v7119_v19 = vmax.f32 %v6860_v23, 0.0 }
 0xc1b   : > { %v7120_v38 = vmax.f32 %v6559_v47, 0.0  ;;  %v7122_v31 = vmax.f32 %v6862_v44, 0.0 }
 0xc1c   : > { %v7121_v35 = vmax.f32 %v6561_v5, 0.0  ;;  %v7123_v9 = vmax.f32 %v6864_v21, 0.0 }
 0xc1d   : > { %v7313_v52 = vpack.c.bf16 %v7120_v38, %v7116_v48  ;;  %v16029_v6 = vpack.c.bf16 %v7122_v31, %v7118_v63 }
 0xc1e   : > { %v7314_v30 = vpack.c.bf16 %v7121_v35, %v7117_v8  ;;  %v16031_v39 = vpack.c.bf16 %v7123_v9, %v7119_v19  ;;  %v6564_v28 = vpop.f32.mrb[132].mxu1  ;;  %v6867_v20 = vpop.f32.mrb[160].mxu0 }
 0xc1f   : > { %v6565_v61 = vadd.f32 %v6564_v28, %v15948_v16  ;;  %v6868_v22 = vadd.f32 %v6867_v20, %v15952_v57  ;;  %v6566_v33 = vpop.f32.mrb[133].mxu1  ;;  %v6869_v49 = vpop.f32.mrb[161].mxu0 }
 0xc20   : > { %v6567_v12 = vadd.f32 %v6566_v33, %v15955_v58  ;;  %v6870_v14 = vadd.f32 %v6869_v49, %v15959_v32  ;;  %v6568_v45 = vpop.f32.mrb[134].mxu1  ;;  %v6871_v37 = vpop.f32.mrb[162].mxu0  ;;  %7443 = vmatprep.subr.bf16.mxu0 %v7314_v30 }
 0xc21   : > { %v6569_v2 = vadd.f32 %v6568_v45, %v15948_v16  ;;  %v6872_v50 = vadd.f32 %v6871_v37, %v15952_v57  ;;  %v6570_v56 = vpop.f32.mrb[135].mxu1  ;;  %v6873_v55 = vpop.f32.mrb[163].mxu0  ;;  %7444 = vmatpush1.bf16.msra.mxu0 %v7313_v52  ;;  %v7124_v11 = vmax.f32 %v6565_v61, 0.0  ;;  %v7126_v51 = vmax.f32 %v6868_v22, 0.0 }
 0xc22   : > { %v6571_v59 = vadd.f32 %v6570_v56, %v15955_v58  ;;  %v6874_v54 = vadd.f32 %v6873_v55, %v15959_v32  ;;  %v7125_v10 = vmax.f32 %v6567_v12, 0.0  ;;  %v7127_v27 = vmax.f32 %v6870_v14, 0.0 }
 0xc23   : > { %v7128_v36 = vmax.f32 %v6569_v2, 0.0  ;;  %v7130_v40 = vmax.f32 %v6872_v50, 0.0 }
 0xc24   : > { %v7129_v46 = vmax.f32 %v6571_v59, 0.0  ;;  %v7131_v23 = vmax.f32 %v6874_v54, 0.0 }
 0xc25   : > { %v7317_v43 = vpack.c.bf16 %v7128_v36, %v7124_v11  ;;  %v16041_v18 = vpack.c.bf16 %v7130_v40, %v7126_v51 }
 0xc26   : > { %v7318_v47 = vpack.c.bf16 %v7129_v46, %v7125_v10  ;;  %v16043_v44 = vpack.c.bf16 %v7131_v23, %v7127_v27  ;;  %v6574_v41 = vpop.f32.mrb[136].mxu1  ;;  %v6877_v17 = vpop.f32.mrb[164].mxu0 }
 0xc27   : > { %v6575_v5 = vadd.f32 %v6574_v41, %v15948_v16  ;;  %v6878_v21 = vadd.f32 %v6877_v17, %v15952_v57  ;;  %v6576_v48 = vpop.f32.mrb[137].mxu1  ;;  %v6879_v63 = vpop.f32.mrb[165].mxu0 }
 0xc28   : > { %v6577_v38 = vadd.f32 %v6576_v48, %v15955_v58  ;;  %v6880_v31 = vadd.f32 %v6879_v63, %v15959_v32  ;;  %v6578_v8 = vpop.f32.mrb[138].mxu1  ;;  %v6881_v19 = vpop.f32.mrb[166].mxu0  ;;  %7445 = vmatprep.subr.bf16.mxu0 %v7318_v47 }
 0xc29   : > { %v6579_v35 = vadd.f32 %v6578_v8, %v15948_v16  ;;  %v6882_v9 = vadd.f32 %v6881_v19, %v15952_v57  ;;  %v6580_v52 = vpop.f32.mrb[139].mxu1  ;;  %v6883_v30 = vpop.f32.mrb[167].mxu0  ;;  %7446 = vmatpush1.bf16.msra.mxu0 %v7317_v43  ;;  %v7132_v61 = vmax.f32 %v6575_v5, 0.0  ;;  %v7134_v22 = vmax.f32 %v6878_v21, 0.0 }
 0xc2a   : > { %v6581_v28 = vadd.f32 %v6580_v52, %v15955_v58  ;;  %v6884_v20 = vadd.f32 %v6883_v30, %v15959_v32  ;;  %v7133_v12 = vmax.f32 %v6577_v38, 0.0  ;;  %v7135_v14 = vmax.f32 %v6880_v31, 0.0 }
 0xc2b   : > { %v7136_v33 = vmax.f32 %v6579_v35, 0.0  ;;  %v7138_v49 = vmax.f32 %v6882_v9, 0.0 }
 0xc2c   : > { %v7137_v45 = vmax.f32 %v6581_v28, 0.0  ;;  %v7139_v37 = vmax.f32 %v6884_v20, 0.0 }
 0xc2d   : > { %v7321_v2 = vpack.c.bf16 %v7136_v33, %v7132_v61  ;;  %v16053_v50 = vpack.c.bf16 %v7138_v49, %v7134_v22 }
 0xc2e   : > { %v7322_v56 = vpack.c.bf16 %v7137_v45, %v7133_v12  ;;  %v16055_v55 = vpack.c.bf16 %v7139_v37, %v7135_v14  ;;  %v6584_v59 = vpop.f32.mrb[140].mxu1  ;;  %v6887_v54 = vpop.f32.mrb[168].mxu0 }
 0xc2f   : > { %v6585_v11 = vadd.f32 %v6584_v59, %v15948_v16  ;;  %v6888_v51 = vadd.f32 %v6887_v54, %v15952_v57  ;;  %v6586_v36 = vpop.f32.mrb[141].mxu1  ;;  %v6889_v40 = vpop.f32.mrb[169].mxu0 }
 0xc30   : > { %v6587_v10 = vadd.f32 %v6586_v36, %v15955_v58  ;;  %v6890_v27 = vadd.f32 %v6889_v40, %v15959_v32  ;;  %v6588_v46 = vpop.f32.mrb[142].mxu1  ;;  %v6891_v23 = vpop.f32.mrb[170].mxu0  ;;  %7447 = vmatprep.subr.bf16.mxu0 %v7322_v56 }
 0xc31   : > { %v6589_v43 = vadd.f32 %v6588_v46, %v15948_v16  ;;  %v6892_v47 = vadd.f32 %v6891_v23, %v15952_v57  ;;  %v6590_v41 = vpop.f32.mrb[143].mxu1  ;;  %v6893_v17 = vpop.f32.mrb[171].mxu0  ;;  %7448 = vmatpush1.bf16.msra.mxu0 %v7321_v2  ;;  %v7140_v48 = vmax.f32 %v6585_v11, 0.0  ;;  %v7142_v63 = vmax.f32 %v6888_v51, 0.0 }
 0xc32   : > { %v6591_v5 = vadd.f32 %v6590_v41, %v15955_v58  ;;  %v6894_v21 = vadd.f32 %v6893_v17, %v15959_v32  ;;  %v7141_v8 = vmax.f32 %v6587_v10, 0.0  ;;  %v7143_v19 = vmax.f32 %v6890_v27, 0.0 }
 0xc33   : > { %v7144_v38 = vmax.f32 %v6589_v43, 0.0  ;;  %v7146_v31 = vmax.f32 %v6892_v47, 0.0 }
 0xc34   : > { %v7145_v35 = vmax.f32 %v6591_v5, 0.0  ;;  %v7147_v9 = vmax.f32 %v6894_v21, 0.0 }
 0xc35   : > { %v7325_v52 = vpack.c.bf16 %v7144_v38, %v7140_v48  ;;  %v16065_v30 = vpack.c.bf16 %v7146_v31, %v7142_v63 }
 0xc36   : > { %v7326_v28 = vpack.c.bf16 %v7145_v35, %v7141_v8  ;;  %v16067_v20 = vpack.c.bf16 %v7147_v9, %v7143_v19  ;;  %v6594_v61 = vpop.f32.mrb[144].mxu1  ;;  %v6897_v22 = vpop.f32.mrb[172].mxu0 }
 0xc37   : > { %v6595_v33 = vadd.f32 %v6594_v61, %v15948_v16  ;;  %v6898_v49 = vadd.f32 %v6897_v22, %v15952_v57  ;;  %v6596_v12 = vpop.f32.mrb[145].mxu1  ;;  %v6899_v14 = vpop.f32.mrb[173].mxu0 }
 0xc38   : > { %v6597_v45 = vadd.f32 %v6596_v12, %v15955_v58  ;;  %v6900_v37 = vadd.f32 %v6899_v14, %v15959_v32  ;;  %v6598_v2 = vpop.f32.mrb[146].mxu1  ;;  %v6901_v56 = vpop.f32.mrb[174].mxu0  ;;  %7449 = vmatprep.subr.bf16.mxu0 %v7326_v28 }
 0xc39   : > { %v6599_v59 = vadd.f32 %v6598_v2, %v15948_v16  ;;  %v6902_v54 = vadd.f32 %v6901_v56, %v15952_v57  ;;  %v6600_v11 = vpop.f32.mrb[147].mxu1  ;;  %v6903_v51 = vpop.f32.mrb[175].mxu0  ;;  %7450 = vmatpush1.bf16.msra.mxu0 %v7325_v52  ;;  %v7148_v10 = vmax.f32 %v6595_v33, 0.0  ;;  %v7150_v27 = vmax.f32 %v6898_v49, 0.0 }
 0xc3a   : > { %v6601_v36 = vadd.f32 %v6600_v11, %v15955_v58  ;;  %v6904_v40 = vadd.f32 %v6903_v51, %v15959_v32  ;;  %v7149_v43 = vmax.f32 %v6597_v45, 0.0  ;;  %v7151_v47 = vmax.f32 %v6900_v37, 0.0 }
 0xc3b   : > { %v7152_v46 = vmax.f32 %v6599_v59, 0.0  ;;  %v7154_v23 = vmax.f32 %v6902_v54, 0.0 }
 0xc3c   : > { %v7153_v41 = vmax.f32 %v6601_v36, 0.0  ;;  %v7155_v17 = vmax.f32 %v6904_v40, 0.0 }
 0xc3d   : > { %v7329_v5 = vpack.c.bf16 %v7152_v46, %v7148_v10  ;;  %v16077_v21 = vpack.c.bf16 %v7154_v23, %v7150_v27  ;;  %v10580_v10 = vmov 1966171168  }
 0xc3e   : > { %v7330_v48 = vpack.c.bf16 %v7153_v41, %v7149_v43  ;;  %v16079_v63 = vpack.c.bf16 %v7155_v17, %v7151_v47  ;;  %v6604_v38 = vpop.f32.mrb[148].mxu1  ;;  %v6907_v31 = vpop.f32.mrb[176].mxu0  ;;  %v7411_v27 = vunpack.c.l.s4 %v10580_v10 }
 0xc3f   : > { %v6605_v8 = vadd.f32 %v6604_v38, %v15948_v16  ;;  %v6908_v19 = vadd.f32 %v6907_v31, %v15952_v57  ;;  %v6606_v35 = vpop.f32.mrb[149].mxu1  ;;  %v6909_v9 = vpop.f32.mrb[177].mxu0 }
 0xc40   : > { %v6607_v52 = vadd.f32 %v6606_v35, %v15955_v58  ;;  %v6910_v28 = vadd.f32 %v6909_v9, %v15959_v32  ;;  %v6608_v61 = vpop.f32.mrb[150].mxu1  ;;  %v6911_v22 = vpop.f32.mrb[178].mxu0  ;;  %7451 = vmatprep.subr.bf16.mxu0 %v7330_v48  ;;  %v7412_v48 = vunpack.c.0.s8 %v7411_v27 }
 0xc41   : > { %v6609_v33 = vadd.f32 %v6608_v61, %v15948_v16  ;;  %v6912_v49 = vadd.f32 %v6911_v22, %v15952_v57  ;;  %v6610_v12 = vpop.f32.mrb[151].mxu1  ;;  %v6913_v14 = vpop.f32.mrb[179].mxu0  ;;  %7452 = vmatpush1.bf16.msra.mxu0 %v7329_v5  ;;  %v7156_v45 = vmax.f32 %v6605_v8, 0.0  ;;  %v7158_v37 = vmax.f32 %v6908_v19, 0.0 }
 0xc42   : > { %v6611_v2 = vadd.f32 %v6610_v12, %v15955_v58  ;;  %v6914_v56 = vadd.f32 %v6913_v14, %v15959_v32  ;;  %v7157_v59 = vmax.f32 %v6607_v52, 0.0  ;;  %v7159_v51 = vmax.f32 %v6910_v28, 0.0  ;;  %v16096_v5 = vld.sshfl [vmem:[%s18791_s21] sm:$0x33 pattern:$0x75316420] }
 0xc43   : > { %v7160_v54 = vmax.f32 %v6609_v33, 0.0  ;;  %v7162_v11 = vmax.f32 %v6912_v49, 0.0  ;;  %v7409_v35 = vcombine.high %v16096_v5, %v16096_v5  ;;  %v16105_v22 = vsub.s32 %v7412_v48, %v18788_v62 }
 0xc44   : > { %v7161_v36 = vmax.f32 %v6611_v2, 0.0  ;;  %v7163_v40 = vmax.f32 %v6914_v56, 0.0 }
 0xc45   : > { %v7333_v46 = vpack.c.bf16 %v7160_v54, %v7156_v45  ;;  %v16089_v23 = vpack.c.bf16 %v7162_v11, %v7158_v37 }
 0xc46   : > { %v7334_v43 = vpack.c.bf16 %v7161_v36, %v7157_v59  ;;  %v16091_v47 = vpack.c.bf16 %v7163_v40, %v7159_v51  ;;  %v6614_v41 = vpop.f32.mrb[152].mxu1  ;;  %v6917_v17 = vpop.f32.mrb[180].mxu0  ;;  %v16112_v51 = vrot.slane %v7409_v35, %v16105_v22 }
 0xc47   : > { %v6615_v38 = vadd.f32 %v6614_v41, %v15948_v16  ;;  %v6918_v31 = vadd.f32 %v6917_v17, %v15952_v57  ;;  %v6616_v8 = vpop.f32.mrb[153].mxu1  ;;  %v6919_v19 = vpop.f32.mrb[181].mxu0 }
 0xc48   : > { %v6617_v9 = vadd.f32 %v6616_v8, %v15955_v58  ;;  %v6920_v52 = vadd.f32 %v6919_v19, %v15959_v32  ;;  %v6618_v28 = vpop.f32.mrb[154].mxu1  ;;  %v6921_v61 = vpop.f32.mrb[182].mxu0  ;;  %7453 = vmatprep.subr.bf16.mxu0 %v7334_v43  ;;  %7465 = vmatprep.mubr.bf16.mxu0 %v16112_v51 }
 0xc49   : > { %v6619_v33 = vadd.f32 %v6618_v28, %v15948_v16  ;;  %v6922_v49 = vadd.f32 %v6921_v61, %v15952_v57  ;;  %v6620_v12 = vpop.f32.mrb[155].mxu1  ;;  %v6923_v14 = vpop.f32.mrb[183].mxu0  ;;  %7454 = vmatpush1.bf16.msra.mxu0 %v7333_v46  ;;  %v7164_v45 = vmax.f32 %v6615_v38, 0.0  ;;  %v7166_v37 = vmax.f32 %v6918_v31, 0.0 }
 0xc4a   : > { %v6621_v2 = vadd.f32 %v6620_v12, %v15955_v58  ;;  %v6924_v56 = vadd.f32 %v6923_v14, %v15959_v32  ;;  %v7165_v59 = vmax.f32 %v6617_v9, 0.0  ;;  %v7167_v36 = vmax.f32 %v6920_v52, 0.0 }
 0xc4b   : > { %v7168_v54 = vmax.f32 %v6619_v33, 0.0  ;;  %v7170_v11 = vmax.f32 %v6922_v49, 0.0  ;;  %v16118_v46 = vcombine.high %v16112_v51, %v16112_v51 }
 0xc4c   : > { %v7169_v40 = vmax.f32 %v6621_v2, 0.0  ;;  %v7171_v10 = vmax.f32 %v6924_v56, 0.0 }
 0xc4d   : > { %v7337_v27 = vpack.c.bf16 %v7168_v54, %v7164_v45  ;;  %v16114_v43 = vpack.c.bf16 %v7170_v11, %v7166_v37  ;;  %18792 = vst [vmem:[#allocation121_spill] sm:$0xff] %v16118_v46  ;;  %9032 = vmatprep.mubr.msk.bf16.mxu1 %vm7429_vm5, %v16118_v46 }
 0xc4e   : > { %v7338_v41 = vpack.c.bf16 %v7169_v40, %v7165_v59  ;;  %v16121_v17 = vpack.c.bf16 %v7171_v10, %v7167_v36  ;;  %v6624_v48 = vpop.f32.mrb[156].mxu1  ;;  %v6927_v38 = vpop.f32.mrb[184].mxu0 }
 0xc4f   : > { %v6625_v31 = vadd.f32 %v6624_v48, %v15948_v16  ;;  %v6928_v8 = vadd.f32 %v6927_v38, %v15952_v57  ;;  %v6626_v19 = vpop.f32.mrb[157].mxu1  ;;  %v6929_v35 = vpop.f32.mrb[185].mxu0 }
 0xc50   : > { %v6627_v9 = vadd.f32 %v6626_v19, %v15955_v58  ;;  %v6930_v52 = vadd.f32 %v6929_v35, %v15959_v32  ;;  %v6628_v28 = vpop.f32.mrb[158].mxu1  ;;  %v6931_v61 = vpop.f32.mrb[186].mxu0  ;;  %7455 = vmatprep.subr.bf16.mxu0 %v7338_v41 }
 0xc51   : > { %v6629_v33 = vadd.f32 %v6628_v28, %v15948_v16  ;;  %v6932_v49 = vadd.f32 %v6931_v61, %v15952_v57  ;;  %v6630_v12 = vpop.f32.mrb[159].mxu1  ;;  %v6933_v14 = vpop.f32.mrb[187].mxu0  ;;  %7456 = vmatpush1.bf16.msra.mxu0 %v7337_v27  ;;  %v7172_v2 = vmax.f32 %v6625_v31, 0.0  ;;  %v7174_v56 = vmax.f32 %v6928_v8, 0.0 }
 0xc52   : > { %v6631_v45 = vadd.f32 %v6630_v12, %v15955_v58  ;;  %v6934_v37 = vadd.f32 %v6933_v14, %v15959_v32  ;;  %v7173_v11 = vmax.f32 %v6627_v9, 0.0  ;;  %v7175_v36 = vmax.f32 %v6930_v52, 0.0 }
 0xc53   : > { %v7176_v59 = vmax.f32 %v6629_v33, 0.0  ;;  %v7178_v54 = vmax.f32 %v6932_v49, 0.0 }
 0xc54   : > { %v7177_v40 = vmax.f32 %v6631_v45, 0.0  ;;  %v7179_v10 = vmax.f32 %v6934_v37, 0.0 }
 0xc55   : > { %v7341_v41 = vpack.c.bf16 %v7176_v59, %v7172_v2  ;;  %v16133_v48 = vpack.c.bf16 %v7178_v54, %v7174_v56 }
 0xc56   : > { %v7342_v38 = vpack.c.bf16 %v7177_v40, %v7173_v11  ;;  %v16135_v19 = vpack.c.bf16 %v7179_v10, %v7175_v36  ;;  %v6634_v35 = vpop.f32.mrb[160].mxu1  ;;  %v6937_v27 = vpop.f32.mrb[188].mxu0 }
 0xc57   : > { %v6635_v28 = vadd.f32 %v6634_v35, %v15948_v16  ;;  %v6938_v61 = vadd.f32 %v6937_v27, %v15952_v57  ;;  %v6636_v31 = vpop.f32.mrb[161].mxu1  ;;  %v6939_v8 = vpop.f32.mrb[189].mxu0 }
 0xc58   : > { %v6637_v33 = vadd.f32 %v6636_v31, %v15955_v58  ;;  %v6940_v9 = vadd.f32 %v6939_v8, %v15959_v32  ;;  %v6638_v52 = vpop.f32.mrb[162].mxu1  ;;  %v6941_v49 = vpop.f32.mrb[190].mxu0  ;;  %7457 = vmatprep.subr.bf16.mxu0 %v7342_v38 }
 0xc59   : > { %v6639_v12 = vadd.f32 %v6638_v52, %v15948_v16  ;;  %v6942_v14 = vadd.f32 %v6941_v49, %v15952_v57  ;;  %v6640_v45 = vpop.f32.mrb[163].mxu1  ;;  %v6943_v37 = vpop.f32.mrb[191].mxu0  ;;  %7458 = vmatpush1.bf16.msra.mxu0 %v7341_v41  ;;  %v7180_v59 = vmax.f32 %v6635_v28, 0.0  ;;  %v7182_v54 = vmax.f32 %v6938_v61, 0.0 }
 0xc5a   : > { %v6641_v2 = vadd.f32 %v6640_v45, %v15955_v58  ;;  %v6944_v56 = vadd.f32 %v6943_v37, %v15959_v32  ;;  %v7181_v40 = vmax.f32 %v6637_v33, 0.0  ;;  %v7183_v10 = vmax.f32 %v6940_v9, 0.0 }
 0xc5b   : > { %v7184_v11 = vmax.f32 %v6639_v12, 0.0  ;;  %v7186_v36 = vmax.f32 %v6942_v14, 0.0 }
 0xc5c   : > { %v7185_v35 = vmax.f32 %v6641_v2, 0.0  ;;  %v7187_v27 = vmax.f32 %v6944_v56, 0.0 }
 0xc5d   : > { %v7345_v38 = vpack.c.bf16 %v7184_v11, %v7180_v59  ;;  %v16145_v31 = vpack.c.bf16 %v7186_v36, %v7182_v54 }
 0xc5e   : > { %v7346_v8 = vpack.c.bf16 %v7185_v35, %v7181_v40  ;;  %v16147_v52 = vpack.c.bf16 %v7187_v27, %v7183_v10  ;;  %v6644_v49 = vpop.f32.mrb[164].mxu1  ;;  %v6947_v41 = vpop.f32.mrb[192].mxu0 }
 0xc5f   : > { %v6645_v45 = vadd.f32 %v6644_v49, %v15948_v16  ;;  %v6948_v37 = vadd.f32 %v6947_v41, %v15952_v57  ;;  %v6646_v28 = vpop.f32.mrb[165].mxu1  ;;  %v6949_v61 = vpop.f32.mrb[193].mxu0 }
 0xc60   : > { %v6647_v12 = vadd.f32 %v6646_v28, %v15955_v58  ;;  %v6950_v33 = vadd.f32 %v6949_v61, %v15959_v32  ;;  %v6648_v9 = vpop.f32.mrb[166].mxu1  ;;  %v6951_v14 = vpop.f32.mrb[194].mxu0  ;;  %7459 = vmatprep.subr.bf16.mxu0 %v7346_v8 }
 0xc61   : > { %v6649_v2 = vadd.f32 %v6648_v9, %v15948_v16  ;;  %v6952_v56 = vadd.f32 %v6951_v14, %v15952_v57  ;;  %v6650_v59 = vpop.f32.mrb[167].mxu1  ;;  %v6953_v54 = vpop.f32.mrb[195].mxu0  ;;  %7460 = vmatpush1.bf16.msra.mxu0 %v7345_v38  ;;  %v7188_v40 = vmax.f32 %v6645_v45, 0.0  ;;  %v7190_v10 = vmax.f32 %v6948_v37, 0.0 }
 0xc62   : > { %v6651_v11 = vadd.f32 %v6650_v59, %v15955_v58  ;;  %v6954_v36 = vadd.f32 %v6953_v54, %v15959_v32  ;;  %v7189_v49 = vmax.f32 %v6647_v12, 0.0  ;;  %v7191_v41 = vmax.f32 %v6950_v33, 0.0 }
 0xc63   : > { %v7192_v35 = vmax.f32 %v6649_v2, 0.0  ;;  %v7194_v27 = vmax.f32 %v6952_v56, 0.0 }
 0xc64   : > { %v7193_v28 = vmax.f32 %v6651_v11, 0.0  ;;  %v7195_v61 = vmax.f32 %v6954_v36, 0.0 }
 0xc65   : > { %v7349_v8 = vpack.c.bf16 %v7192_v35, %v7188_v40  ;;  %v16157_v1 = vpack.c.bf16 %v7194_v27, %v7190_v10 }
 0xc66   : > { %v7350_v9 = vpack.c.bf16 %v7193_v28, %v7189_v49  ;;  %v16159_v14 = vpack.c.bf16 %v7195_v61, %v7191_v41  ;;  %v6654_v42 = vpop.f32.mrb[168].mxu1  ;;  %v6957_v38 = vpop.f32.mrb[196].mxu0 }
 0xc67   : > { %v6655_v59 = vadd.f32 %v6654_v42, %v15948_v16  ;;  %v6958_v54 = vadd.f32 %v6957_v38, %v15952_v57  ;;  %v6656_v45 = vpop.f32.mrb[169].mxu1  ;;  %v6959_v37 = vpop.f32.mrb[197].mxu0 }
 0xc68   : > { %v6657_v2 = vadd.f32 %v6656_v45, %v15955_v58  ;;  %v6960_v12 = vadd.f32 %v6959_v37, %v15959_v32  ;;  %v6658_v33 = vpop.f32.mrb[170].mxu1  ;;  %v6961_v56 = vpop.f32.mrb[198].mxu0  ;;  %7461 = vmatprep.subr.bf16.mxu0 %v7350_v9 }
 0xc69   : > { %v6659_v11 = vadd.f32 %v6658_v33, %v15948_v16  ;;  %v6962_v36 = vadd.f32 %v6961_v56, %v15952_v57  ;;  %v6660_v40 = vpop.f32.mrb[171].mxu1  ;;  %v6963_v10 = vpop.f32.mrb[199].mxu0  ;;  %7462 = vmatpush1.bf16.msra.mxu0 %v7349_v8  ;;  %v7196_v27 = vmax.f32 %v6655_v59, 0.0  ;;  %v7198_v49 = vmax.f32 %v6958_v54, 0.0 }
 0xc6a   : > { %v6661_v42 = vadd.f32 %v6660_v40, %v15955_v58  ;;  %v6964_v35 = vadd.f32 %v6963_v10, %v15959_v32  ;;  %v7197_v61 = vmax.f32 %v6657_v2, 0.0  ;;  %v7199_v38 = vmax.f32 %v6960_v12, 0.0 }
 0xc6b   : > { %v7200_v41 = vmax.f32 %v6659_v11, 0.0  ;;  %v7202_v28 = vmax.f32 %v6962_v36, 0.0 }
 0xc6c   : > { %v7201_v45 = vmax.f32 %v6661_v42, 0.0  ;;  %v7203_v37 = vmax.f32 %v6964_v35, 0.0 }
 0xc6d   : > { %v7353_v9 = vpack.c.bf16 %v7200_v41, %v7196_v27  ;;  %v16169_v62 = vpack.c.bf16 %v7202_v28, %v7198_v49  ;;  %v16183_v28 = vrot.slane %v16096_v5, %v16105_v22 }
 0xc6e   : > { %v7354_v33 = vpack.c.bf16 %v7201_v45, %v7197_v61  ;;  %v16171_v56 = vpack.c.bf16 %v7203_v37, %v7199_v38  ;;  %v6664_v7 = vpop.f32.mrb[172].mxu1  ;;  %v6967_v8 = vpop.f32.mrb[200].mxu0 }
 0xc6f   : > { %v6665_v40 = vadd.f32 %v6664_v7, %v15948_v16  ;;  %v6968_v10 = vadd.f32 %v6967_v8, %v15952_v57  ;;  %v6666_v59 = vpop.f32.mrb[173].mxu1  ;;  %v6969_v54 = vpop.f32.mrb[201].mxu0 }
 0xc70   : > { %v6667_v11 = vadd.f32 %v6666_v59, %v15955_v58  ;;  %v6970_v2 = vadd.f32 %v6969_v54, %v15959_v32  ;;  %v6668_v12 = vpop.f32.mrb[174].mxu1  ;;  %v6971_v36 = vpop.f32.mrb[202].mxu0  ;;  %7463 = vmatprep.subr.bf16.mxu0 %v7354_v33 }
 0xc71   : > { %v6669_v42 = vadd.f32 %v6668_v12, %v15948_v16  ;;  %v6972_v35 = vadd.f32 %v6971_v36, %v15952_v57  ;;  %v6670_v27 = vpop.f32.mrb[175].mxu1  ;;  %v6973_v49 = vpop.f32.mrb[203].mxu0  ;;  %7464 = vmatpush1.bf16.msra.mxu0 %v7353_v9  ;;  %v7204_v61 = vmax.f32 %v6665_v40, 0.0  ;;  %v7206_v38 = vmax.f32 %v6968_v10, 0.0 }
 0xc72   : > { %v6671_v7 = vadd.f32 %v6670_v27, %v15955_v58  ;;  %v6974_v41 = vadd.f32 %v6973_v49, %v15959_v32  ;;  %v7205_v33 = vmax.f32 %v6667_v11, 0.0  ;;  %v7207_v8 = vmax.f32 %v6970_v2, 0.0 }
 0xc73   : > { %v7208_v45 = vmax.f32 %v6669_v42, 0.0  ;;  %v7210_v37 = vmax.f32 %v6972_v35, 0.0 }
 0xc74   : > { %v7209_v59 = vmax.f32 %v6671_v7, 0.0  ;;  %v7211_v54 = vmax.f32 %v6974_v41, 0.0  ;;  %7466 = vmatmul.mubr.bf16.vlgmr.msra.gmra.mrb[244].mxu0 %v16183_v28 }
 0xc75   : > { %v7357_v12 = vpack.c.bf16 %v7208_v45, %v7204_v61  ;;  %v16186_v9 = vpack.c.bf16 %v7210_v37, %v7206_v38 }
 0xc76   : > { %v7358_v36 = vpack.c.bf16 %v7209_v59, %v7205_v33  ;;  %v16188_v27 = vpack.c.bf16 %v7211_v54, %v7207_v8  ;;  %v6674_v49 = vpop.f32.mrb[176].mxu1  ;;  %v6977_v60 = vpop.f32.mrb[204].mxu0 }
 0xc77   : > { %v6675_v5 = vadd.f32 %v6674_v49, %v15948_v16  ;;  %v6978_v22 = vadd.f32 %v6977_v60, %v15952_v57  ;;  %v6676_v40 = vpop.f32.mrb[177].mxu1  ;;  %v6979_v10 = vpop.f32.mrb[205].mxu0 }
 0xc78   : > { %v6677_v11 = vadd.f32 %v6676_v40, %v15955_v58  ;;  %v6980_v2 = vadd.f32 %v6979_v10, %v15959_v32  ;;  %v6678_v42 = vpop.f32.mrb[178].mxu1  ;;  %v6981_v35 = vpop.f32.mrb[206].mxu0  ;;  %7474 = vmatprep.subr.bf16.mxu1 %v7358_v36 }
 0xc79   : > { %v6679_v7 = vadd.f32 %v6678_v42, %v15948_v16  ;;  %v6982_v41 = vadd.f32 %v6981_v35, %v15952_v57  ;;  %v6680_v61 = vpop.f32.mrb[179].mxu1  ;;  %v6983_v38 = vpop.f32.mrb[207].mxu0  ;;  %7475 = vmatpush1.bf16.msra.mxu1 %v7357_v12  ;;  %v7212_v37 = vmax.f32 %v6675_v5, 0.0  ;;  %v7214_v33 = vmax.f32 %v6978_v22, 0.0 }
 0xc7a   : > { %v6681_v45 = vadd.f32 %v6680_v61, %v15955_v58  ;;  %v6984_v60 = vadd.f32 %v6983_v38, %v15959_v32  ;;  %v7213_v54 = vmax.f32 %v6677_v11, 0.0  ;;  %v7215_v49 = vmax.f32 %v6980_v2, 0.0 }
 0xc7b   : > { %v7216_v8 = vmax.f32 %v6679_v7, 0.0  ;;  %v7218_v59 = vmax.f32 %v6982_v41, 0.0 }
 0xc7c   : > { %v7217_v40 = vmax.f32 %v6681_v45, 0.0  ;;  %v7219_v10 = vmax.f32 %v6984_v60, 0.0 }
 0xc7d   : > { %v7361_v36 = vpack.c.bf16 %v7216_v8, %v7212_v37  ;;  %v16198_v34 = vpack.c.bf16 %v7218_v59, %v7214_v33 }
 0xc7e   : > { %v7362_v42 = vpack.c.bf16 %v7217_v40, %v7213_v54  ;;  %v16200_v35 = vpack.c.bf16 %v7219_v10, %v7215_v49  ;;  %v6684_v46 = vpop.f32.mrb[180].mxu1  ;;  %v6987_v12 = vpop.f32.mrb[208].mxu0 }
 0xc7f   : > { %18793 = vst [vmem:[#allocation105_spill] sm:$0xff] %v16198_v34  ;;  %v6685_v61 = vadd.f32 %v6684_v46, %v15948_v16  ;;  %v6988_v38 = vadd.f32 %v6987_v12, %v15952_v57  ;;  %v6686_v5 = vpop.f32.mrb[181].mxu1  ;;  %v6989_v22 = vpop.f32.mrb[209].mxu0 }
 0xc80   : > { %18794 = vst [vmem:[#allocation233_spill] sm:$0xff] %v16200_v35  ;;  %v6687_v7 = vadd.f32 %v6686_v5, %v15955_v58  ;;  %v6990_v11 = vadd.f32 %v6989_v22, %v15959_v32  ;;  %v6688_v2 = vpop.f32.mrb[182].mxu1  ;;  %v6991_v41 = vpop.f32.mrb[210].mxu0  ;;  %7476 = vmatprep.subr.bf16.mxu1 %v7362_v42 }
 0xc81   : > { %v6689_v45 = vadd.f32 %v6688_v2, %v15948_v16  ;;  %v6992_v60 = vadd.f32 %v6991_v41, %v15952_v57  ;;  %v6690_v37 = vpop.f32.mrb[183].mxu1  ;;  %v6993_v33 = vpop.f32.mrb[211].mxu0  ;;  %7477 = vmatpush1.bf16.msra.mxu1 %v7361_v36  ;;  %v7220_v59 = vmax.f32 %v6685_v61, 0.0  ;;  %v7222_v54 = vmax.f32 %v6988_v38, 0.0 }
 0xc82   : > { %v6691_v46 = vadd.f32 %v6690_v37, %v15955_v58  ;;  %v6994_v8 = vadd.f32 %v6993_v33, %v15959_v32  ;;  %v7221_v10 = vmax.f32 %v6687_v7, 0.0  ;;  %v7223_v12 = vmax.f32 %v6990_v11, 0.0 }
 0xc83   : > { %v7224_v49 = vmax.f32 %v6689_v45, 0.0  ;;  %v7226_v40 = vmax.f32 %v6992_v60, 0.0 }
 0xc84   : > { %v7225_v5 = vmax.f32 %v6691_v46, 0.0  ;;  %v7227_v22 = vmax.f32 %v6994_v8, 0.0 }
 0xc85   : > { %v7365_v42 = vpack.c.bf16 %v7224_v49, %v7220_v59  ;;  %v16210_v34 = vpack.c.bf16 %v7226_v40, %v7222_v54 }
 0xc86   : > { %v7366_v2 = vpack.c.bf16 %v7225_v5, %v7221_v10  ;;  %v16212_v41 = vpack.c.bf16 %v7227_v22, %v7223_v12  ;;  %v6694_v35 = vpop.f32.mrb[184].mxu1  ;;  %v6997_v36 = vpop.f32.mrb[212].mxu0 }
 0xc87   : > { %18795 = vst [vmem:[#allocation229_spill] sm:$0xff] %v16210_v34  ;;  %v6695_v37 = vadd.f32 %v6694_v35, %v15948_v16  ;;  %v6998_v33 = vadd.f32 %v6997_v36, %v15952_v57  ;;  %v6696_v61 = vpop.f32.mrb[185].mxu1  ;;  %v6999_v38 = vpop.f32.mrb[213].mxu0 }
 0xc88   : > { %18796 = vst [vmem:[#allocation240_spill] sm:$0xff] %v16212_v41  ;;  %v6697_v45 = vadd.f32 %v6696_v61, %v15955_v58  ;;  %v7000_v7 = vadd.f32 %v6999_v38, %v15959_v32  ;;  %v6698_v11 = vpop.f32.mrb[186].mxu1  ;;  %v7001_v60 = vpop.f32.mrb[214].mxu0  ;;  %7478 = vmatprep.subr.bf16.mxu1 %v7366_v2 }
 0xc89   : > { %v6699_v46 = vadd.f32 %v6698_v11, %v15948_v16  ;;  %v7002_v8 = vadd.f32 %v7001_v60, %v15952_v57  ;;  %v6700_v59 = vpop.f32.mrb[187].mxu1  ;;  %v7003_v54 = vpop.f32.mrb[215].mxu0  ;;  %7479 = vmatpush1.bf16.msra.mxu1 %v7365_v42  ;;  %v7228_v40 = vmax.f32 %v6695_v37, 0.0  ;;  %v7230_v10 = vmax.f32 %v6998_v33, 0.0 }
 0xc8a   : > { %v6701_v35 = vadd.f32 %v6700_v59, %v15955_v58  ;;  %v7004_v49 = vadd.f32 %v7003_v54, %v15959_v32  ;;  %v7229_v22 = vmax.f32 %v6697_v45, 0.0  ;;  %v7231_v36 = vmax.f32 %v7000_v7, 0.0 }
 0xc8b   : > { %v7232_v12 = vmax.f32 %v6699_v46, 0.0  ;;  %v7234_v5 = vmax.f32 %v7002_v8, 0.0 }
 0xc8c   : > { %v7233_v61 = vmax.f32 %v6701_v35, 0.0  ;;  %v7235_v38 = vmax.f32 %v7004_v49, 0.0 }
 0xc8d   : > { %v7369_v2 = vpack.c.bf16 %v7232_v12, %v7228_v40  ;;  %v16222_v34 = vpack.c.bf16 %v7234_v5, %v7230_v10 }
 0xc8e   : > { %v7370_v11 = vpack.c.bf16 %v7233_v61, %v7229_v22  ;;  %v16224_v60 = vpack.c.bf16 %v7235_v38, %v7231_v36  ;;  %v6704_v41 = vpop.f32.mrb[188].mxu1  ;;  %v7007_v42 = vpop.f32.mrb[216].mxu0 }
 0xc8f   : > { %18797 = vst [vmem:[#allocation236_spill] sm:$0xff] %v16222_v34  ;;  %v6705_v59 = vadd.f32 %v6704_v41, %v15948_v16  ;;  %v7008_v54 = vadd.f32 %v7007_v42, %v15952_v57  ;;  %v6706_v37 = vpop.f32.mrb[189].mxu1  ;;  %v7009_v33 = vpop.f32.mrb[217].mxu0 }
 0xc90   : > { %18798 = vst [vmem:[#allocation247_spill] sm:$0xff] %v16224_v60  ;;  %v6707_v46 = vadd.f32 %v6706_v37, %v15955_v58  ;;  %v7010_v45 = vadd.f32 %v7009_v33, %v15959_v32  ;;  %v6708_v7 = vpop.f32.mrb[190].mxu1  ;;  %v7011_v8 = vpop.f32.mrb[218].mxu0  ;;  %7480 = vmatprep.subr.bf16.mxu1 %v7370_v11 }
 0xc91   : > { %v6709_v35 = vadd.f32 %v6708_v7, %v15948_v16  ;;  %v7012_v49 = vadd.f32 %v7011_v8, %v15952_v57  ;;  %v6710_v40 = vpop.f32.mrb[191].mxu1  ;;  %v7013_v10 = vpop.f32.mrb[219].mxu0  ;;  %7481 = vmatpush1.bf16.msra.mxu1 %v7369_v2  ;;  %v7236_v5 = vmax.f32 %v6705_v59, 0.0  ;;  %v7238_v22 = vmax.f32 %v7008_v54, 0.0 }
 0xc92   : > { %v6711_v41 = vadd.f32 %v6710_v40, %v15955_v58  ;;  %v7014_v12 = vadd.f32 %v7013_v10, %v15959_v32  ;;  %v7237_v38 = vmax.f32 %v6707_v46, 0.0  ;;  %v7239_v42 = vmax.f32 %v7010_v45, 0.0 }
 0xc93   : > { %v7240_v36 = vmax.f32 %v6709_v35, 0.0  ;;  %v7242_v61 = vmax.f32 %v7012_v49, 0.0 }
 0xc94   : > { %v7241_v37 = vmax.f32 %v6711_v41, 0.0  ;;  %v7243_v33 = vmax.f32 %v7014_v12, 0.0 }
 0xc95   : > { %v7373_v11 = vpack.c.bf16 %v7240_v36, %v7236_v5  ;;  %v16234_v34 = vpack.c.bf16 %v7242_v61, %v7238_v22 }
 0xc96   : > { %v7374_v7 = vpack.c.bf16 %v7241_v37, %v7237_v38  ;;  %v16236_v8 = vpack.c.bf16 %v7243_v33, %v7239_v42  ;;  %v6714_v60 = vpop.f32.mrb[192].mxu1  ;;  %v7017_v2 = vpop.f32.mrb[220].mxu0 }
 0xc97   : > { %18799 = vst [vmem:[#allocation243_spill] sm:$0xff] %v16234_v34  ;;  %v6715_v40 = vadd.f32 %v6714_v60, %v15948_v16  ;;  %v7018_v10 = vadd.f32 %v7017_v2, %v15952_v57  ;;  %v6716_v59 = vpop.f32.mrb[193].mxu1  ;;  %v7019_v54 = vpop.f32.mrb[221].mxu0 }
 0xc98   : > { %18800 = vst [vmem:[#allocation254_spill] sm:$0xff] %v16236_v8  ;;  %v6717_v35 = vadd.f32 %v6716_v59, %v15955_v58  ;;  %v7020_v46 = vadd.f32 %v7019_v54, %v15959_v32  ;;  %v6718_v45 = vpop.f32.mrb[194].mxu1  ;;  %v7021_v49 = vpop.f32.mrb[222].mxu0  ;;  %7482 = vmatprep.subr.bf16.mxu1 %v7374_v7 }
 0xc99   : > { %v6719_v41 = vadd.f32 %v6718_v45, %v15948_v16  ;;  %v7022_v12 = vadd.f32 %v7021_v49, %v15952_v57  ;;  %v6720_v5 = vpop.f32.mrb[195].mxu1  ;;  %v7023_v22 = vpop.f32.mrb[223].mxu0  ;;  %7483 = vmatpush1.bf16.msra.mxu1 %v7373_v11  ;;  %v7244_v61 = vmax.f32 %v6715_v40, 0.0  ;;  %v7246_v38 = vmax.f32 %v7018_v10, 0.0 }
 0xc9a   : > { %v6721_v60 = vadd.f32 %v6720_v5, %v15955_v58  ;;  %v7024_v36 = vadd.f32 %v7023_v22, %v15959_v32  ;;  %v7245_v33 = vmax.f32 %v6717_v35, 0.0  ;;  %v7247_v2 = vmax.f32 %v7020_v46, 0.0 }
 0xc9b   : > { %v7248_v42 = vmax.f32 %v6719_v41, 0.0  ;;  %v7250_v37 = vmax.f32 %v7022_v12, 0.0 }
 0xc9c   : > { %v7249_v59 = vmax.f32 %v6721_v60, 0.0  ;;  %v7251_v54 = vmax.f32 %v7024_v36, 0.0 }
 0xc9d   : > { %v7377_v7 = vpack.c.bf16 %v7248_v42, %v7244_v61  ;;  %v16246_v34 = vpack.c.bf16 %v7250_v37, %v7246_v38 }
 0xc9e   : > { %v7378_v45 = vpack.c.bf16 %v7249_v59, %v7245_v33  ;;  %v16248_v49 = vpack.c.bf16 %v7251_v54, %v7247_v2  ;;  %v6724_v8 = vpop.f32.mrb[196].mxu1  ;;  %v7027_v11 = vpop.f32.mrb[224].mxu0 }
 0xc9f   : > { %18801 = vst [vmem:[#allocation250_spill] sm:$0xff] %v16246_v34  ;;  %v6725_v5 = vadd.f32 %v6724_v8, %v15948_v16  ;;  %v7028_v22 = vadd.f32 %v7027_v11, %v15952_v57  ;;  %v6726_v40 = vpop.f32.mrb[197].mxu1  ;;  %v7029_v10 = vpop.f32.mrb[225].mxu0 }
 0xca0   : > { %18802 = vst [vmem:[#allocation261_spill] sm:$0xff] %v16248_v49  ;;  %v6727_v41 = vadd.f32 %v6726_v40, %v15955_v58  ;;  %v7030_v35 = vadd.f32 %v7029_v10, %v15959_v32  ;;  %v6728_v46 = vpop.f32.mrb[198].mxu1  ;;  %v7031_v12 = vpop.f32.mrb[226].mxu0  ;;  %7484 = vmatprep.subr.bf16.mxu1 %v7378_v45 }
 0xca1   : > { %v6729_v60 = vadd.f32 %v6728_v46, %v15948_v16  ;;  %v7032_v36 = vadd.f32 %v7031_v12, %v15952_v57  ;;  %v6730_v61 = vpop.f32.mrb[199].mxu1  ;;  %v7033_v38 = vpop.f32.mrb[227].mxu0  ;;  %7485 = vmatpush1.bf16.msra.mxu1 %v7377_v7  ;;  %v7252_v37 = vmax.f32 %v6725_v5, 0.0  ;;  %v7254_v33 = vmax.f32 %v7028_v22, 0.0 }
 0xca2   : > { %v6731_v8 = vadd.f32 %v6730_v61, %v15955_v58  ;;  %v7034_v42 = vadd.f32 %v7033_v38, %v15959_v32  ;;  %v7253_v54 = vmax.f32 %v6727_v41, 0.0  ;;  %v7255_v11 = vmax.f32 %v7030_v35, 0.0 }
 0xca3   : > { %v7256_v2 = vmax.f32 %v6729_v60, 0.0  ;;  %v7258_v59 = vmax.f32 %v7032_v36, 0.0 }
 0xca4   : > { %v7257_v40 = vmax.f32 %v6731_v8, 0.0  ;;  %v7259_v10 = vmax.f32 %v7034_v42, 0.0 }
 0xca5   : > { %v7381_v45 = vpack.c.bf16 %v7256_v2, %v7252_v37  ;;  %v16258_v34 = vpack.c.bf16 %v7258_v59, %v7254_v33 }
 0xca6   : > { %v7382_v46 = vpack.c.bf16 %v7257_v40, %v7253_v54  ;;  %v16260_v12 = vpack.c.bf16 %v7259_v10, %v7255_v11  ;;  %v6734_v49 = vpop.f32.mrb[200].mxu1  ;;  %v7037_v7 = vpop.f32.mrb[228].mxu0 }
 0xca7   : > { %18803 = vst [vmem:[#allocation257_spill] sm:$0xff] %v16258_v34  ;;  %v6735_v61 = vadd.f32 %v6734_v49, %v15948_v16  ;;  %v7038_v38 = vadd.f32 %v7037_v7, %v15952_v57  ;;  %v6736_v5 = vpop.f32.mrb[201].mxu1  ;;  %v7039_v22 = vpop.f32.mrb[229].mxu0 }
 0xca8   : > { %18804 = vst [vmem:[#allocation268_spill] sm:$0xff] %v16260_v12  ;;  %v6737_v60 = vadd.f32 %v6736_v5, %v15955_v58  ;;  %v7040_v41 = vadd.f32 %v7039_v22, %v15959_v32  ;;  %v6738_v35 = vpop.f32.mrb[202].mxu1  ;;  %v7041_v36 = vpop.f32.mrb[230].mxu0  ;;  %7486 = vmatprep.subr.bf16.mxu1 %v7382_v46 }
 0xca9   : > { %v6739_v8 = vadd.f32 %v6738_v35, %v15948_v16  ;;  %v7042_v42 = vadd.f32 %v7041_v36, %v15952_v57  ;;  %v6740_v37 = vpop.f32.mrb[203].mxu1  ;;  %v7043_v33 = vpop.f32.mrb[231].mxu0  ;;  %7487 = vmatpush1.bf16.msra.mxu1 %v7381_v45  ;;  %v7260_v59 = vmax.f32 %v6735_v61, 0.0  ;;  %v7262_v54 = vmax.f32 %v7038_v38, 0.0 }
 0xcaa   : > { %v6741_v49 = vadd.f32 %v6740_v37, %v15955_v58  ;;  %v7044_v2 = vadd.f32 %v7043_v33, %v15959_v32  ;;  %v7261_v10 = vmax.f32 %v6737_v60, 0.0  ;;  %v7263_v7 = vmax.f32 %v7040_v41, 0.0 }
 0xcab   : > { %v7264_v11 = vmax.f32 %v6739_v8, 0.0  ;;  %v7266_v40 = vmax.f32 %v7042_v42, 0.0 }
 0xcac   : > { %v7265_v5 = vmax.f32 %v6741_v49, 0.0  ;;  %v7267_v22 = vmax.f32 %v7044_v2, 0.0 }
 0xcad   : > { %v7385_v46 = vpack.c.bf16 %v7264_v11, %v7260_v59  ;;  %v16270_v34 = vpack.c.bf16 %v7266_v40, %v7262_v54 }
 0xcae   : > { %v7386_v35 = vpack.c.bf16 %v7265_v5, %v7261_v10  ;;  %v16272_v36 = vpack.c.bf16 %v7267_v22, %v7263_v7  ;;  %v6744_v12 = vpop.f32.mrb[204].mxu1  ;;  %v7047_v45 = vpop.f32.mrb[232].mxu0 }
 0xcaf   : > { %18805 = vst [vmem:[#allocation264_spill] sm:$0xff] %v16270_v34  ;;  %v6745_v37 = vadd.f32 %v6744_v12, %v15948_v16  ;;  %v7048_v33 = vadd.f32 %v7047_v45, %v15952_v57  ;;  %v6746_v61 = vpop.f32.mrb[205].mxu1  ;;  %v7049_v38 = vpop.f32.mrb[233].mxu0 }
 0xcb0   : > { %18806 = vst [vmem:[#allocation275_spill] sm:$0xff] %v16272_v36  ;;  %v6747_v8 = vadd.f32 %v6746_v61, %v15955_v58  ;;  %v7050_v60 = vadd.f32 %v7049_v38, %v15959_v32  ;;  %v6748_v41 = vpop.f32.mrb[206].mxu1  ;;  %v7051_v42 = vpop.f32.mrb[234].mxu0  ;;  %7488 = vmatprep.subr.bf16.mxu1 %v7386_v35 }
 0xcb1   : > { %v6749_v49 = vadd.f32 %v6748_v41, %v15948_v16  ;;  %v7052_v2 = vadd.f32 %v7051_v42, %v15952_v57  ;;  %v6750_v59 = vpop.f32.mrb[207].mxu1  ;;  %v7053_v54 = vpop.f32.mrb[235].mxu0  ;;  %7489 = vmatpush1.bf16.msra.mxu1 %v7385_v46  ;;  %v7268_v40 = vmax.f32 %v6745_v37, 0.0  ;;  %v7270_v10 = vmax.f32 %v7048_v33, 0.0 }
 0xcb2   : > { %v6751_v12 = vadd.f32 %v6750_v59, %v15955_v58  ;;  %v7054_v11 = vadd.f32 %v7053_v54, %v15959_v32  ;;  %v7269_v22 = vmax.f32 %v6747_v8, 0.0  ;;  %v7271_v45 = vmax.f32 %v7050_v60, 0.0 }
 0xcb3   : > { %v7272_v7 = vmax.f32 %v6749_v49, 0.0  ;;  %v7274_v5 = vmax.f32 %v7052_v2, 0.0 }
 0xcb4   : > { %v7273_v61 = vmax.f32 %v6751_v12, 0.0  ;;  %v7275_v38 = vmax.f32 %v7054_v11, 0.0 }
 0xcb5   : > { %v7389_v35 = vpack.c.bf16 %v7272_v7, %v7268_v40  ;;  %v16282_v34 = vpack.c.bf16 %v7274_v5, %v7270_v10 }
 0xcb6   : > { %v7390_v41 = vpack.c.bf16 %v7273_v61, %v7269_v22  ;;  %v16284_v42 = vpack.c.bf16 %v7275_v38, %v7271_v45  ;;  %v6754_v36 = vpop.f32.mrb[208].mxu1  ;;  %v7057_v46 = vpop.f32.mrb[236].mxu0 }
 0xcb7   : > { %18807 = vst [vmem:[#allocation271_spill] sm:$0xff] %v16282_v34  ;;  %v6755_v59 = vadd.f32 %v6754_v36, %v15948_v16  ;;  %v7058_v54 = vadd.f32 %v7057_v46, %v15952_v57  ;;  %v6756_v37 = vpop.f32.mrb[209].mxu1  ;;  %v7059_v33 = vpop.f32.mrb[237].mxu0 }
 0xcb8   : > { %18808 = vst [vmem:[#allocation109_spill] sm:$0xff] %v16284_v42  ;;  %v6757_v49 = vadd.f32 %v6756_v37, %v15955_v58  ;;  %v7060_v8 = vadd.f32 %v7059_v33, %v15959_v32  ;;  %v6758_v60 = vpop.f32.mrb[210].mxu1  ;;  %v7061_v2 = vpop.f32.mrb[238].mxu0  ;;  %7490 = vmatprep.subr.bf16.mxu1 %v7390_v41 }
 0xcb9   : > { %v6759_v12 = vadd.f32 %v6758_v60, %v15948_v16  ;;  %v7062_v11 = vadd.f32 %v7061_v2, %v15952_v57  ;;  %v6760_v40 = vpop.f32.mrb[211].mxu1  ;;  %v7063_v10 = vpop.f32.mrb[239].mxu0  ;;  %7491 = vmatpush1.bf16.msra.mxu1 %v7389_v35  ;;  %v7276_v5 = vmax.f32 %v6755_v59, 0.0  ;;  %v7278_v22 = vmax.f32 %v7058_v54, 0.0 }
 0xcba   : > { %v6761_v36 = vadd.f32 %v6760_v40, %v15955_v58  ;;  %v7064_v7 = vadd.f32 %v7063_v10, %v15959_v32  ;;  %v7277_v38 = vmax.f32 %v6757_v49, 0.0  ;;  %v7279_v46 = vmax.f32 %v7060_v8, 0.0 }
 0xcbb   : > { %v7280_v45 = vmax.f32 %v6759_v12, 0.0  ;;  %v7282_v61 = vmax.f32 %v7062_v11, 0.0 }
 0xcbc   : > { %v7281_v37 = vmax.f32 %v6761_v36, 0.0  ;;  %v7283_v33 = vmax.f32 %v7064_v7, 0.0 }
 0xcbd   : > { %v7393_v41 = vpack.c.bf16 %v7280_v45, %v7276_v5  ;;  %v16294_v34 = vpack.c.bf16 %v7282_v61, %v7278_v22 }
 0xcbe   : > { %v7394_v60 = vpack.c.bf16 %v7281_v37, %v7277_v38  ;;  %v16296_v2 = vpack.c.bf16 %v7283_v33, %v7279_v46  ;;  %v6764_v42 = vpop.f32.mrb[212].mxu1  ;;  %v7067_v35 = vpop.f32.mrb[240].mxu0 }
 0xcbf   : > { %18809 = vst [vmem:[#allocation144_spill] sm:$0xff] %v16294_v34  ;;  %v6765_v40 = vadd.f32 %v6764_v42, %v15948_v16  ;;  %v7068_v10 = vadd.f32 %v7067_v35, %v15952_v57  ;;  %v6766_v59 = vpop.f32.mrb[213].mxu1  ;;  %v7069_v54 = vpop.f32.mrb[241].mxu0 }
 0xcc0   : > { %v6767_v12 = vadd.f32 %v6766_v59, %v15955_v58  ;;  %v7070_v49 = vadd.f32 %v7069_v54, %v15959_v32  ;;  %v6768_v8 = vpop.f32.mrb[214].mxu1  ;;  %v7071_v11 = vpop.f32.mrb[242].mxu0  ;;  %7492 = vmatprep.subr.bf16.mxu1 %v7394_v60 }
 0xcc1   : > { %v6769_v36 = vadd.f32 %v6768_v8, %v15948_v16  ;;  %v7072_v7 = vadd.f32 %v7071_v11, %v15952_v57  ;;  %v6770_v5 = vpop.f32.mrb[215].mxu1  ;;  %v7073_v22 = vpop.f32.mrb[243].mxu0  ;;  %7493 = vmatpush1.bf16.msra.mxu1 %v7393_v41  ;;  %v7284_v61 = vmax.f32 %v6765_v40, 0.0  ;;  %v7286_v38 = vmax.f32 %v7068_v10, 0.0  ;;  %v10432_v40 = vld [vmem:[%s16789_s15 + $0x30] ss:$8 sps:$4 sm:$0xff]  }
 0xcc2   : > { %v6771_v42 = vadd.f32 %v6770_v5, %v15955_v58  ;;  %v7074_v45 = vadd.f32 %v7073_v22, %v15959_v32  ;;  %v7285_v33 = vmax.f32 %v6767_v12, 0.0  ;;  %v7287_v35 = vmax.f32 %v7070_v49, 0.0  ;;  %v18810_v58 = vld [vmem:[#allocation121_spill] sm:$0xff]  ;;  %v10437_v10 = vld [vmem:[%s16789_s15 + $0x44] ss:$8 sps:$4 sm:$0xff]  }
 0xcc3   : > { %v7288_v46 = vmax.f32 %v6769_v36, 0.0  ;;  %v7290_v37 = vmax.f32 %v7072_v7, 0.0  ;;  %v16310_v41 = vcombine.high %v16183_v28, %v16183_v28  ;;  %v18811_v32 = vld [vmem:[#allocation233_spill] sm:$0xff]  ;;  %v10435_v12 = vld [vmem:[%s16789_s15 + $0x40] ss:$8 sps:$4 sm:$0xff]  }
 0xcc4   : > { %v7289_v59 = vmax.f32 %v6771_v42, 0.0  ;;  %v7291_v54 = vmax.f32 %v7074_v45, 0.0  ;;  %v10440_v49 = vld [vmem:[%s16789_s15 + $0x54] ss:$8 sps:$4 sm:$0xff]   ;;  %v10438_v8 = vld [vmem:[%s16789_s15 + $0x50] ss:$8 sps:$4 sm:$0xff]  }
 0xcc5   : > { %v7397_v60 = vpack.c.bf16 %v7288_v46, %v7284_v61  ;;  %v16306_v34 = vpack.c.bf16 %v7290_v37, %v7286_v38  ;;  %v10443_v11 = vld [vmem:[%s16789_s15 + $0x64] ss:$8 sps:$4 sm:$0xff]   ;;  %v10441_v36 = vld [vmem:[%s16789_s15 + $0x60] ss:$8 sps:$4 sm:$0xff]   ;;  %v10446_v7 = vld [vmem:[%s16789_s15 + $0x74] ss:$8 sps:$4 sm:$0xff]  }
 0xcc6   : > { %v7398_v16 = vpack.c.bf16 %v7289_v59, %v7285_v33  ;;  %v7400_v57 = vpack.c.bf16 %v7291_v54, %v7287_v35  ;;  %v10444_v5 = vld [vmem:[%s16789_s15 + $0x70] ss:$8 sps:$4 sm:$0xff]   ;;  %v10449_v22 = vld [vmem:[%s16789_s15 + $0x84] ss:$8 sps:$4 sm:$0xff]   ;;  %v10447_v42 = vld [vmem:[%s16789_s15 + $0x80] ss:$8 sps:$4 sm:$0xff]  }
 0xcc7   : > { %v10452_v45 = vld [vmem:[%s16789_s15 + $0x94] ss:$8 sps:$4 sm:$0xff]   ;;  %v10450_v61 = vld [vmem:[%s16789_s15 + $0x90] ss:$8 sps:$4 sm:$0xff]   ;;  %v10455_v38 = vld [vmem:[%s16789_s15 + $0xa4] ss:$8 sps:$4 sm:$0xff]  }
 0xcc8   : > { %7494 = vmatprep.subr.bf16.mxu1 %v7398_v16  ;;  %v10453_v46 = vld [vmem:[%s16789_s15 + $0xa0] ss:$8 sps:$4 sm:$0xff]   ;;  %v10458_v37 = vld [vmem:[%s16789_s15 + $0xb4] ss:$8 sps:$4 sm:$0xff]   ;;  %v10456_v33 = vld [vmem:[%s16789_s15 + $0xb0] ss:$8 sps:$4 sm:$0xff]  }
 0xcc9   : > { %7495 = vmatpush1.bf16.msra.mxu1 %v7397_v60  ;;  %v10461_v35 = vld [vmem:[%s16789_s15 + $0xc4] ss:$8 sps:$4 sm:$0xff]   ;;  %v10459_v59 = vld [vmem:[%s16789_s15 + $0xc0] ss:$8 sps:$4 sm:$0xff]   ;;  %v10462_v54 = vld [vmem:[%s16789_s15 + $0xd0] ss:$8 sps:$4 sm:$0xff]  }
 0xcca   : > { %7515 = vmatprep.subr.bf16.mxu1 %v15971_v53  ;;  %v18813_v53 = vld [vmem:[#allocation240_spill] sm:$0xff]  ;;  %v10467_v16 = vld [vmem:[%s16789_s15 + $0xe4] ss:$8 sps:$4 sm:$0xff]  }
 0xccb   : > { %v10464_v60 = vld [vmem:[%s16789_s15 + $0xd4] ss:$8 sps:$4 sm:$0xff]  }
 0xccc   : > { %7507 = vmatmul.mubr.bf16.vlgmr.msra.gmra.mrb[216].mxu1 %v16310_v41 }
 0xccd   : > { %7516 = vmatpush1.bf16.msra.mxu1 %v15969_v3  ;;  %7547 = vmatprep.mubr.bf16.mxu1 %v16112_v51  ;;  %v18812_v3 = vld [vmem:[#allocation105_spill] sm:$0xff] }
 0xcce   : > { %7517 = vmatprep.subr.bf16.mxu1 %v15983_v24  ;;  %v18817_v24 = vld [vmem:[#allocation254_spill] sm:$0xff] }
 0xcd1   : > { %7518 = vmatpush1.bf16.msra.mxu1 %v15981_v26  ;;  %v18815_v26 = vld [vmem:[#allocation247_spill] sm:$0xff] }
 0xcd2   : > { %7519 = vmatprep.subr.bf16.mxu1 %v15995_v25  ;;  %v18819_v25 = vld [vmem:[#allocation261_spill] sm:$0xff] }
 0xcd5   : > { %7520 = vmatpush1.bf16.msra.mxu1 %v15993_v13  ;;  %v18818_v13 = vld [vmem:[#allocation243_spill] sm:$0xff] }
 0xcd6   : > { %7521 = vmatprep.subr.bf16.mxu1 %v16007_v29  ;;  %v18821_v29 = vld [vmem:[#allocation268_spill] sm:$0xff] }
 0xcd9   : > { %7522 = vmatpush1.bf16.msra.mxu1 %v16005_v15  ;;  %v18820_v15 = vld [vmem:[#allocation250_spill] sm:$0xff] }
 0xcda   : > { %7523 = vmatprep.subr.bf16.mxu1 %v16019_v0  ;;  %v18823_v0 = vld [vmem:[#allocation275_spill] sm:$0xff] }
 0xcdd   : > { %7524 = vmatpush1.bf16.msra.mxu1 %v16017_v4  ;;  %v18822_v4 = vld [vmem:[#allocation257_spill] sm:$0xff] }
 0xcde   : > { %7525 = vmatprep.subr.bf16.mxu1 %v16031_v39  ;;  %v18825_v39 = vld [vmem:[#allocation109_spill] sm:$0xff] }
 0xce1   : > { %7526 = vmatpush1.bf16.msra.mxu1 %v16029_v6  ;;  %v18824_v6 = vld [vmem:[#allocation264_spill] sm:$0xff] }
 0xce2   : > { %7527 = vmatprep.subr.bf16.mxu1 %v16043_v44  ;;  %v7667_v44 = vld [vmem:[%s16787_s13] sm:$0xff] }
 0xce5   : > { %7528 = vmatpush1.bf16.msra.mxu1 %v16041_v18  ;;  %v18826_v18 = vld [vmem:[#allocation271_spill] sm:$0xff] }
 0xce6   : > { %7529 = vmatprep.subr.bf16.mxu1 %v16055_v55  ;;  %v9035_v55 = vcombine.high %v7667_v44, %v7667_v44 }
 0xce9   : > { %7530 = vmatpush1.bf16.msra.mxu1 %v16053_v50  ;;  %v18827_v50 = vld [vmem:[#allocation144_spill] sm:$0xff] }
 0xcea   : > { %7531 = vmatprep.subr.bf16.mxu1 %v16067_v20  ;;  %v7668_v20 = vld [vmem:[%s16787_s13 + $0x8] sm:$0xff] }
 0xceb   : > { %v9036_v51 = vcombine.low %v7668_v20, %v7668_v20 }
 0xced   : > { %7532 = vmatpush1.bf16.msra.mxu1 %v16065_v30  ;;  %v9034_v30 = vcombine.low %v7667_v44, %v7667_v44  ;;  %v10528_v44 = vld [vmem:[%s16791_s17 + $0x20] sm:$0xff]  }
 0xcee   : > { %7533 = vmatprep.subr.bf16.mxu1 %v16079_v63  ;;  %v9037_v63 = vcombine.high %v7668_v20, %v7668_v20 }
 0xcf1   : > { %7534 = vmatpush1.bf16.msra.mxu1 %v16077_v21  ;;  %v7707_v21 = vsel %vm7705_vm6, %v9034_v30, 0 }
 0xcf2   : > { %7535 = vmatprep.subr.bf16.mxu1 %v16091_v47  ;;  %v7665_v47 = vld [vmem:[%s609_s26] sm:$0x1] }
 0xcf5   : > { %7536 = vmatpush1.bf16.msra.mxu1 %v16089_v23  ;;  %v18829_v23 = vmov 0  }
 0xcf6   : > { %7537 = vmatprep.subr.bf16.mxu1 %v16121_v17  ;;  %v7713_v17 = vsel %vm7705_vm6, %v9036_v51, 0 }
 0xcf9   : > { %7538 = vmatpush1.bf16.msra.mxu1 %v16114_v43  ;;  %v7666_v43 = vpack.c.bf16 %v7665_v47, %v7665_v47  ;;  %v18830_v47 = vld [vmem:[#allocation84_spill] sm:$0xff] }
 0xcfa   : > { %7539 = vmatprep.subr.bf16.mxu1 %v16135_v19  ;;  %v10428_v19 = vld [vmem:[%s16789_s15 + $0x14] ss:$8 sps:$4 sm:$0xff]  }
 0xcfd   : > { %7540 = vmatpush1.bf16.msra.mxu1 %v16133_v48  ;;  %v10423_v48 = vld [vmem:[%s16789_s15] ss:$8 sps:$4 sm:$0xff]  }
 0xcfe   : > { %7541 = vmatprep.subr.bf16.mxu1 %v16147_v52 }
 0xd01   : > { %7542 = vmatpush1.bf16.msra.mxu1 %v16145_v31 }
 0xd02   : > { %7543 = vmatprep.subr.bf16.mxu1 %v16159_v14  ;;  %v10426_v14 = vld [vmem:[%s16789_s15 + $0x10] ss:$8 sps:$4 sm:$0xff]  }
 0xd05   : > { %7544 = vmatpush1.bf16.msra.mxu1 %v16157_v1  ;;  %v18814_v1 = vld [vmem:[#allocation229_spill] sm:$0xff] }
 0xd06   : > { %7545 = vmatprep.subr.bf16.mxu1 %v16171_v56 }
 0xd09   : > { %7546 = vmatpush1.bf16.msra.mxu1 %v16169_v62  ;;  %v18816_v62 = vld [vmem:[#allocation236_spill] sm:$0xff] }
 0xd0a   : > { %7556 = vmatprep.subr.bf16.mxu1 %v16188_v27  ;;  %v10429_v27 = vld [vmem:[%s16789_s15 + $0x20] ss:$8 sps:$4 sm:$0xff]  }
 0xd0c   : > { %7548 = vmatmul.mubr.bf16.vlgmr.msra.gmra.mrb[220].mxu1 %v16183_v28  ;;  %v10431_v28 = vld [vmem:[%s16789_s15 + $0x24] ss:$8 sps:$4 sm:$0xff]  }
 0xd0d   : > { %7557 = vmatpush1.bf16.msra.mxu1 %v16186_v9  ;;  %9033 = vmatprep.mubr.msk.bf16.mxu1 %vm7429_vm5, %v18810_v58  ;;  %v10468_v58 = vld [vmem:[%s16789_s15 + $0xf0] ss:$8 sps:$4 sm:$0xff]  }
 0xd0e   : > { %7558 = vmatprep.subr.bf16.mxu1 %v18811_v32  ;;  %v10473_v32 = vld [vmem:[%s16789_s15 + $0x104] ss:$8 sps:$4 sm:$0xff]  }
 0xd11   : > { %7559 = vmatpush1.bf16.msra.mxu1 %v18812_v3 }
 0xd12   : > { %7560 = vmatprep.subr.bf16.mxu1 %v18813_v53 }
 0xd15   : > { %7561 = vmatpush1.bf16.msra.mxu1 %v18814_v1 }
 0xd16   : > { %7562 = vmatprep.subr.bf16.mxu1 %v18815_v26 }
 0xd19   : > { %7563 = vmatpush1.bf16.msra.mxu1 %v18816_v62 }
 0xd1a   : > { %7564 = vmatprep.subr.bf16.mxu1 %v18817_v24 }
 0xd1d   : > { %7565 = vmatpush1.bf16.msra.mxu1 %v18818_v13  ;;  %v10519_v13 = vld [vmem:[%s16791_s17 + $0x40] sm:$0xff]  }
 0xd1e   : > { %7566 = vmatprep.subr.bf16.mxu1 %v18819_v25  ;;  %v10520_v25 = vld [vmem:[%s16791_s17] sm:$0xff]   ;;  %9256 = vmatprep.subr.bf16.mxu0 %v10519_v13  ;;  %v10506_v13 = vld [vmem:[%s16789_s15 + $0x1b4] ss:$8 sps:$4 sm:$0xff]  }
 0xd1f   : > { %9257 = vmatpush3.bf16.msra.mxu0 %v10520_v25  ;;  %v10504_v25 = vld [vmem:[%s16789_s15 + $0x1b0] ss:$8 sps:$4 sm:$0xff]  }
 0xd21   : > { %7567 = vmatpush1.bf16.msra.mxu1 %v18820_v15  ;;  %v10521_v15 = vld [vmem:[%s16791_s17 + $0x48] sm:$0xff]  }
 0xd22   : > { %7568 = vmatprep.subr.bf16.mxu1 %v18821_v29  ;;  %v10522_v29 = vld [vmem:[%s16791_s17 + $0x8] sm:$0xff]   ;;  %9258 = vmatprep.subr.bf16.mxu0 %v10521_v15 }
 0xd23   : > { %9259 = vmatpush3.bf16.msra.mxu0 %v10522_v29  ;;  %v10509_v15 = vld [vmem:[%s16789_s15 + $0x1c4] ss:$8 sps:$4 sm:$0xff]   ;;  %v10507_v29 = vld [vmem:[%s16789_s15 + $0x1c0] ss:$8 sps:$4 sm:$0xff]  }
 0xd25   : > { %7569 = vmatpush1.bf16.msra.mxu1 %v18822_v4  ;;  %v10523_v4 = vld [vmem:[%s16791_s17 + $0x50] sm:$0xff]  }
 0xd26   : > { %7570 = vmatprep.subr.bf16.mxu1 %v18823_v0  ;;  %v10524_v0 = vld [vmem:[%s16791_s17 + $0x10] sm:$0xff]   ;;  %9260 = vmatprep.subr.bf16.mxu0 %v10523_v4 }
 0xd27   : > { %9261 = vmatpush3.bf16.msra.mxu0 %v10524_v0  ;;  %v10512_v4 = vld [vmem:[%s16789_s15 + $0x1d4] ss:$8 sps:$4 sm:$0xff]   ;;  %v10510_v0 = vld [vmem:[%s16789_s15 + $0x1d0] ss:$8 sps:$4 sm:$0xff]  }
 0xd29   : > { %7571 = vmatpush1.bf16.msra.mxu1 %v18824_v6  ;;  %v10525_v6 = vld [vmem:[%s16791_s17 + $0x58] sm:$0xff]  }
 0xd2a   : > { %7572 = vmatprep.subr.bf16.mxu1 %v18825_v39  ;;  %v10526_v39 = vld [vmem:[%s16791_s17 + $0x18] sm:$0xff]   ;;  %9262 = vmatprep.subr.bf16.mxu0 %v10525_v6 }
 0xd2b   : > { %9263 = vmatpush3.bf16.msra.mxu0 %v10526_v39 }
 0xd2d   : > { %7573 = vmatpush1.bf16.msra.mxu1 %v18826_v18  ;;  %v10527_v18 = vld [vmem:[%s16791_s17 + $0x60] sm:$0xff]  }
 0xd2e   : > { %7574 = vmatprep.subr.bf16.mxu1 %v16296_v2  ;;  %v10434_v2 = vld [vmem:[%s16789_s15 + $0x34] ss:$8 sps:$4 sm:$0xff]   ;;  %9264 = vmatprep.subr.bf16.mxu0 %v10527_v18  ;;  %v10515_v18 = vld [vmem:[%s16789_s15 + $0x1e4] ss:$8 sps:$4 sm:$0xff]  }
 0xd2f   : > { %9265 = vmatpush3.bf16.msra.mxu0 %v10528_v44  ;;  %v10513_v44 = vld [vmem:[%s16789_s15 + $0x1e0] ss:$8 sps:$4 sm:$0xff]  }
 0xd31   : > { %7575 = vmatpush1.bf16.msra.mxu1 %v18827_v50  ;;  %v10529_v50 = vld [vmem:[%s16791_s17 + $0x68] sm:$0xff]  }
 0xd32   : > { %7576 = vmatprep.subr.bf16.mxu1 %v7400_v57  ;;  %v10465_v57 = vld [vmem:[%s16789_s15 + $0xe0] ss:$8 sps:$4 sm:$0xff]   ;;  %9266 = vmatprep.subr.bf16.mxu0 %v10529_v50 }
 0xd35   : > { %7577 = vmatpush1.bf16.msra.mxu1 %v16306_v34  ;;  %v10425_v34 = vld [vmem:[%s16789_s15 + $0x4] ss:$8 sps:$4 sm:$0xff]  }
 0xd36   : > { %9038 = vmatprep.subr.msk.bf16.mxu1 %vm7705_vm6, %v9035_v55  ;;  %v10530_v55 = vld [vmem:[%s16791_s17 + $0x28] sm:$0xff]  }
 0xd37   : > { %9267 = vmatpush3.bf16.msra.mxu0 %v10530_v55  ;;  %v10518_v55 = vld [vmem:[%s16789_s15 + $0x1f4] ss:$8 sps:$4 sm:$0xff]  }
 0xd38   : > { %7589 = vmatmul.mubr.bf16.vlgmr.msra.gmra.mrb[220].mxu1 %v16310_v41  ;;  %v10470_v41 = vld [vmem:[%s16789_s15 + $0xf4] ss:$8 sps:$4 sm:$0xff]  }
 0xd39   : > { %7719 = vmatpush1.bf16.msra.mxu1 %v7707_v21  ;;  %7750 = vmatprep.mubr.bf16.mxu1 %v18829_v23 }
 0xd3a   : > { %9040 = vmatprep.subr.msk.bf16.mxu1 %vm7705_vm6, %v9037_v63  ;;  %v16535_v63 = vld [vmem:[%s16788_s14] sm:$0xf] }
 0xd3b   : > { %v7684_v51 = vrot.slane %v16535_v63, %v18830_v47 }
 0xd40   : > { %9039 = vmatmul.mubr.msk.bf16.vlgmr.msra.gmra.mrb[224].mxu1 %vm7701_vm7, %v7666_v43 }
 0xd41   : > { %7760 = vmatpush1.bf16.msra.mxu1 %v7713_v17  ;;  %7791 = vmatprep.mubr.bf16.mxu1 %v18829_v23 }
 0xd42   : > { %8204 = vmatprep.subr.bf16.mxu1 %v10425_v34 }
 0xd47   : > { %v16392_v31 = vpop.f32.mrb[244].mxu0 }
 0xd48   : > { %9041 = vmatmul.mubr.msk.bf16.vlgmr.msra.gmra.mrb[228].mxu1 %vm7701_vm7, %v7666_v43  ;;  %v16394_v52 = vpop.f32.mrb[245].mxu0  ;;  %v18831_v43 = vld [vmem:[#allocation68_spill] sm:$0xff] }
 0xd49   : > { %8205 = vmatpush1.bf16.msra.mxu1 %v10423_v48  ;;  %v7471_v56 = vpop.f32.mrb[246].mxu0  ;;  %v7688_v17 = vrot.slane %v16535_v63, %v18831_v43 }
 0xd4a   : > { %8206 = vmatprep.subr.bf16.mxu1 %v10428_v19  ;;  %v7472_v9 = vpop.f32.mrb[247].mxu0 }
 0xd4d   : > { %8207 = vmatpush1.bf16.msra.mxu1 %v10426_v14 }
 0xd4e   : > { %8208 = vmatprep.subr.bf16.mxu1 %v10431_v28 }
 0xd51   : > { %8209 = vmatpush1.bf16.msra.mxu1 %v10429_v27  ;;  %v10471_v27 = vld [vmem:[%s16789_s15 + $0x100] ss:$8 sps:$4 sm:$0xff]  }
 0xd52   : > { %8210 = vmatprep.subr.bf16.mxu1 %v10434_v2  ;;  %v18832_v2 = vld [vmem:[#allocation12_spill] sm:$0xff] }
 0xd53   : > { %v18834_v6 = vsub.s32 2, %v18832_v2 }
 0xd55   : > { %8211 = vmatpush1.bf16.msra.mxu1 %v10432_v40  ;;  %v18833_v40 = vsub.s32 3, %v18832_v2  ;;  %v7692_v39 = vrot.slane %v16535_v63, %v18834_v6 }
 0xd56   : > { %8212 = vmatprep.subr.bf16.mxu1 %v10437_v10 }
 0xd57   : > { %v7696_v10 = vrot.slane %v16535_v63, %v18833_v40 }
 0xd59   : > { %8213 = vmatpush1.bf16.msra.mxu1 %v10435_v12 }
 0xd5a   : > { %8214 = vmatprep.subr.bf16.mxu1 %v10440_v49  ;;  %v10476_v49 = vld [vmem:[%s16789_s15 + $0x114] ss:$8 sps:$4 sm:$0xff]  }
 0xd5d   : > { %8215 = vmatpush1.bf16.msra.mxu1 %v10438_v8 }
 0xd5e   : > { %8216 = vmatprep.subr.bf16.mxu1 %v10443_v11 }
 0xd61   : > { %8217 = vmatpush1.bf16.msra.mxu1 %v10441_v36  ;;  %v10474_v36 = vld [vmem:[%s16789_s15 + $0x110] ss:$8 sps:$4 sm:$0xff]  }
 0xd62   : > { %8218 = vmatprep.subr.bf16.mxu1 %v10446_v7 }
 0xd65   : > { %8219 = vmatpush1.bf16.msra.mxu1 %v10444_v5 }
 0xd66   : > { %8220 = vmatprep.subr.bf16.mxu1 %v10449_v22  ;;  %v10479_v22 = vld [vmem:[%s16789_s15 + $0x124] ss:$8 sps:$4 sm:$0xff]  }
 0xd69   : > { %8221 = vmatpush1.bf16.msra.mxu1 %v10447_v42 }
 0xd6a   : > { %8222 = vmatprep.subr.bf16.mxu1 %v10452_v45 }
 0xd6d   : > { %8223 = vmatpush1.bf16.msra.mxu1 %v10450_v61  ;;  %v10477_v61 = vld [vmem:[%s16789_s15 + $0x120] ss:$8 sps:$4 sm:$0xff]  }
 0xd6e   : > { %8224 = vmatprep.subr.bf16.mxu1 %v10455_v38 }
 0xd71   : > { %8225 = vmatpush1.bf16.msra.mxu1 %v10453_v46  ;;  %v10482_v46 = vld [vmem:[%s16789_s15 + $0x134] ss:$8 sps:$4 sm:$0xff]  }
 0xd72   : > { %8226 = vmatprep.subr.bf16.mxu1 %v10458_v37  ;;  %v10480_v37 = vld [vmem:[%s16789_s15 + $0x130] ss:$8 sps:$4 sm:$0xff]  }
 0xd75   : > { %8227 = vmatpush1.bf16.msra.mxu1 %v10456_v33  ;;  %v10485_v33 = vld [vmem:[%s16789_s15 + $0x144] ss:$8 sps:$4 sm:$0xff]  }
 0xd76   : > { %8228 = vmatprep.subr.bf16.mxu1 %v10461_v35  ;;  %v10483_v35 = vld [vmem:[%s16789_s15 + $0x140] ss:$8 sps:$4 sm:$0xff]  }
 0xd79   : > { %8229 = vmatpush1.bf16.msra.mxu1 %v10459_v59  ;;  %v10488_v59 = vld [vmem:[%s16789_s15 + $0x154] ss:$8 sps:$4 sm:$0xff]  }
 0xd7a   : > { %8230 = vmatprep.subr.bf16.mxu1 %v10464_v60  ;;  %v10491_v60 = vld [vmem:[%s16789_s15 + $0x164] ss:$8 sps:$4 sm:$0xff]  }
 0xd7d   : > { %8231 = vmatpush1.bf16.msra.mxu1 %v10462_v54  ;;  %v10486_v54 = vld [vmem:[%s16789_s15 + $0x150] ss:$8 sps:$4 sm:$0xff]  }
 0xd7e   : > { %8232 = vmatprep.subr.bf16.mxu1 %v10467_v16  ;;  %v10489_v16 = vld [vmem:[%s16789_s15 + $0x160] ss:$8 sps:$4 sm:$0xff]  }
 0xd81   : > { %8233 = vmatpush1.bf16.msra.mxu1 %v10465_v57  ;;  %v10494_v57 = vld [vmem:[%s16789_s15 + $0x174] ss:$8 sps:$4 sm:$0xff]  }
 0xd82   : > { %8234 = vmatprep.subr.bf16.mxu1 %v10470_v41  ;;  %v10492_v41 = vld [vmem:[%s16789_s15 + $0x170] ss:$8 sps:$4 sm:$0xff]  }
 0xd85   : > { %8235 = vmatpush1.bf16.msra.mxu1 %v10468_v58  ;;  %v10497_v58 = vld [vmem:[%s16789_s15 + $0x184] ss:$8 sps:$4 sm:$0xff]  }
 0xd86   : > { %8245 = vmatprep.subr.bf16.mxu1 %v10473_v32  ;;  %v10495_v32 = vld [vmem:[%s16789_s15 + $0x180] ss:$8 sps:$4 sm:$0xff]  }
 0xd9f   : > { %v7508_v3 = vpop.f32.mrb[216].mxu1 }
 0xda0   : > { %v7510_v53 = vpop.f32.mrb[217].mxu1  ;;  %v16487_v1 = vadd.f32 %v7508_v3, %v16392_v31  ;;  %v10500_v3 = vld [vmem:[%s16789_s15 + $0x194] ss:$8 sps:$4 sm:$0xff]  }
 0xda1   : > { %v7512_v26 = vpop.f32.mrb[218].mxu1  ;;  %v16490_v62 = vadd.f32 %v7510_v53, %v16394_v52  ;;  %v10498_v53 = vld [vmem:[%s16789_s15 + $0x190] ss:$8 sps:$4 sm:$0xff]  }
 0xda2   : > { %v7513_v24 = vpop.f32.mrb[219].mxu1  ;;  %v10503_v26 = vld [vmem:[%s16789_s15 + $0x1a4] ss:$8 sps:$4 sm:$0xff]  }
 0xda3   : > { %v10501_v24 = vld [vmem:[%s16789_s15 + $0x1a0] ss:$8 sps:$4 sm:$0xff]  }
 0xe0b   : > { %v16528_v30 = vpop.f32.mrb[220].mxu1 }
 0xe0c   : > { %v16530_v20 = vpop.f32.mrb[221].mxu1 }
 0xe0d   : > { %v7594_v21 = vpop.f32.mrb[222].mxu1 }
 0xe0e   : > { %v7595_v23 = vpop.f32.mrb[223].mxu1  ;;  %v10516_v21 = vld [vmem:[%s16789_s15 + $0x1f0] ss:$8 sps:$4 sm:$0xff]  }
 0xe13   : > { %v7752_v34 = vpop.f32.mrb[224].mxu1 }
 0xe14   : > { %v7753_v48 = vadd.f32 %v7752_v34, %v7684_v51  ;;  %v7754_v19 = vpop.f32.mrb[225].mxu1  ;;  %v10531_v51 = vld [vmem:[%s16791_s17 + $0x70] sm:$0xff]   ;;  %v10533_v34 = vld [vmem:[%s16791_s17 + $0x78] sm:$0xff]  }
 0xe15   : > { %v7755_v31 = vadd.f32 %v7754_v19, %v7688_v17  ;;  %v7756_v52 = vpop.f32.mrb[226].mxu1  ;;  %v10532_v17 = vld [vmem:[%s16791_s17 + $0x30] sm:$0xff]   ;;  %9268 = vmatprep.subr.bf16.mxu0 %v10531_v51  ;;  %v10535_v19 = vld [vmem:[%s16786_s12 + $0x40] sm:$0xff]  }
 0xe16   : > { %v7800_v14 = vmax.f32 %v7753_v48, 0.0  ;;  %v7757_v56 = vpop.f32.mrb[227].mxu1  ;;  %9269 = vmatpush3.bf16.msra.mxu0 %v10532_v17  ;;  %v10534_v48 = vld [vmem:[%s16791_s17 + $0x38] sm:$0xff]  }
 0xe17   : > { %v7801_v28 = vmax.f32 %v7755_v31, 0.0  ;;  %9270 = vmatprep.subr.bf16.mxu0 %v10533_v34  ;;  %v7872_v31 = vld [vmem:[%s16790_s16] sm:$0x3] }
 0xe18   : > { %v7804_v12 = vpack.c.bf16 %v7800_v14, %v7800_v14  ;;  %v8197_v52 = vrot.slane %v7872_v31, %v18830_v47  ;;  %v8201_v14 = vrot.slane %v7872_v31, %v18831_v43  ;;  %v10537_v47 = vld [vmem:[%s16786_s12 + $0x48] sm:$0xff]   ;;  %v7598_v43 = vpack.c.bf16 %v16490_v62, %v16490_v62  ;;  %v10541_v62 = vld [vmem:[%s16786_s12 + $0x58] sm:$0xff]  }
 0xe19   : > { %v7805_v9 = vpack.c.bf16 %v7801_v28, %v7801_v28 }
 0xe1a   : > { %9271 = vmatpush3.bf16.msra.mxu0 %v10534_v48 }
 0xe1b   : > { %8236 = vmatprep.mubr.bf16.mxu1 %v7805_v9  ;;  %v16550_v8 = vpop.f32.mrb[228].mxu1  ;;  %9278 = vmatprep.subr.bf16.mxu0 %v10535_v19 }
 0xe1c   : > { %8237 = vmatmul.mubr.bf16.vlgmr.msra.gmra.mrb[232].mxu1 %v7804_v12  ;;  %v7795_v11 = vpop.f32.mrb[229].mxu1  ;;  %v7794_v50 = vadd.f32 %v16550_v8, %v7692_v39  ;;  %v10536_v8 = vld [vmem:[%s16786_s12] sm:$0xff]  }
 0xe1d   : > { %8246 = vmatpush1.bf16.msra.mxu1 %v10471_v27  ;;  %v7796_v7 = vadd.f32 %v7795_v11, %v7696_v10  ;;  %v7797_v5 = vpop.f32.mrb[230].mxu1 }
 0xe1e   : > { %8247 = vmatprep.subr.bf16.mxu1 %v10476_v49  ;;  %v7798_v42 = vpop.f32.mrb[231].mxu1  ;;  %v7802_v63 = vmax.f32 %v7794_v50, 0.0  ;;  %v10540_v5 = vld [vmem:[%s16786_s12 + $0x10] sm:$0xff]  }
 0xe1f   : > { %v7803_v45 = vmax.f32 %v7796_v7, 0.0  ;;  %v10539_v7 = vld [vmem:[%s16786_s12 + $0x50] sm:$0xff]   ;;  %v10543_v42 = vld [vmem:[%s16786_s12 + $0x60] sm:$0xff]  }
 0xe20   : > { %v7806_v23 = vpack.c.bf16 %v7802_v63, %v7802_v63 }
 0xe21   : > { %8248 = vmatpush1.bf16.msra.mxu1 %v10474_v36  ;;  %v7807_v38 = vpack.c.bf16 %v7803_v45, %v7803_v45  ;;  %v10538_v36 = vld [vmem:[%s16786_s12 + $0x8] sm:$0xff]   ;;  %v10544_v45 = vld [vmem:[%s16786_s12 + $0x20] sm:$0xff]  }
 0xe22   : > { %8249 = vmatprep.subr.bf16.mxu1 %v10479_v22  ;;  %v10542_v22 = vld [vmem:[%s16786_s12 + $0x18] sm:$0xff]  }
 0xe23   : > { %8277 = vmatprep.mubr.bf16.mxu1 %v7807_v38  ;;  %v10546_v38 = vld [vmem:[%s16786_s12 + $0x28] sm:$0xff]  }
 0xe25   : > { %8250 = vmatpush1.bf16.msra.mxu1 %v10477_v61  ;;  %v10545_v61 = vld [vmem:[%s16786_s12 + $0x68] sm:$0xff]  }
 0xe26   : > { %8251 = vmatprep.subr.bf16.mxu1 %v10482_v46  ;;  %v10547_v46 = vld [vmem:[%s16786_s12 + $0x70] sm:$0xff]  }
 0xe29   : > { %8252 = vmatpush1.bf16.msra.mxu1 %v10480_v37  ;;  %v10548_v37 = vld [vmem:[%s16786_s12 + $0x30] sm:$0xff]  }
 0xe2a   : > { %8253 = vmatprep.subr.bf16.mxu1 %v10485_v33  ;;  %v10549_v33 = vld [vmem:[%s16786_s12 + $0x78] sm:$0xff]  }
 0xe2d   : > { %8254 = vmatpush1.bf16.msra.mxu1 %v10483_v35  ;;  %v10550_v35 = vld [vmem:[%s16786_s12 + $0x38] sm:$0xff]  }
 0xe2e   : > { %8255 = vmatprep.subr.bf16.mxu1 %v10488_v59  ;;  %v10551_v59 = vld [vmem:[%s16786_s12 + $0xc0] sm:$0xff]  }
 0xe31   : > { %8256 = vmatpush1.bf16.msra.mxu1 %v10486_v54  ;;  %v10552_v54 = vld [vmem:[%s16786_s12 + $0x80] sm:$0xff]  }
 0xe32   : > { %8257 = vmatprep.subr.bf16.mxu1 %v10491_v60  ;;  %v7597_v60 = vpack.c.bf16 %v16487_v1, %v16487_v1  ;;  %v10555_v1 = vld [vmem:[%s16786_s12 + $0xd0] sm:$0xff]  }
 0xe35   : > { %8258 = vmatpush1.bf16.msra.mxu1 %v10489_v16  ;;  %v10553_v16 = vld [vmem:[%s16786_s12 + $0xc8] sm:$0xff]  }
 0xe36   : > { %8259 = vmatprep.subr.bf16.mxu1 %v10494_v57  ;;  %v7600_v57 = vpack.c.bf16 %v16530_v20, %v16530_v20  ;;  %v10557_v20 = vld [vmem:[%s16786_s12 + $0xd8] sm:$0xff]  }
 0xe39   : > { %8260 = vmatpush1.bf16.msra.mxu1 %v10492_v41  ;;  %v10554_v41 = vld [vmem:[%s16786_s12 + $0x88] sm:$0xff]  }
 0xe3a   : > { %8261 = vmatprep.subr.bf16.mxu1 %v10497_v58  ;;  %v10556_v58 = vld [vmem:[%s16786_s12 + $0x90] sm:$0xff]  }
 0xe3d   : > { %8262 = vmatpush1.bf16.msra.mxu1 %v10495_v32  ;;  %v10558_v32 = vld [vmem:[%s16786_s12 + $0x98] sm:$0xff]  }
 0xe3e   : > { %8263 = vmatprep.subr.bf16.mxu1 %v10500_v3  ;;  %v10559_v3 = vld [vmem:[%s16786_s12 + $0xe0] sm:$0xff]  }
 0xe41   : > { %8264 = vmatpush1.bf16.msra.mxu1 %v10498_v53  ;;  %v10560_v53 = vld [vmem:[%s16786_s12 + $0xa0] sm:$0xff]  }
 0xe42   : > { %8265 = vmatprep.subr.bf16.mxu1 %v10503_v26  ;;  %v10561_v26 = vld [vmem:[%s16786_s12 + $0xe8] sm:$0xff]  }
 0xe45   : > { %8266 = vmatpush1.bf16.msra.mxu1 %v10501_v24  ;;  %v10562_v24 = vld [vmem:[%s16786_s12 + $0xa8] sm:$0xff]  }
 0xe46   : > { %8267 = vmatprep.subr.bf16.mxu1 %v10506_v13  ;;  %v10563_v13 = vld [vmem:[%s16786_s12 + $0xf0] sm:$0xff]  }
 0xe49   : > { %8268 = vmatpush1.bf16.msra.mxu1 %v10504_v25  ;;  %v10564_v25 = vld [vmem:[%s16786_s12 + $0xb0] sm:$0xff]  }
 0xe4a   : > { %8269 = vmatprep.subr.bf16.mxu1 %v10509_v15  ;;  %v10565_v15 = vld [vmem:[%s16786_s12 + $0xf8] sm:$0xff]  }
 0xe4d   : > { %8270 = vmatpush1.bf16.msra.mxu1 %v10507_v29  ;;  %v10566_v29 = vld [vmem:[%s16786_s12 + $0xb8] sm:$0xff]  }
 0xe4e   : > { %8271 = vmatprep.subr.bf16.mxu1 %v10512_v4  ;;  %v7599_v4 = vpack.c.bf16 %v16528_v30, %v16528_v30  ;;  %v8730_v30 = vld [vmem:[%s16792_s18] sm:$0x1] }
 0xe51   : > { %8272 = vmatpush1.bf16.msra.mxu1 %v10510_v0 }
 0xe52   : > { %8273 = vmatprep.subr.bf16.mxu1 %v10515_v18 }
 0xe55   : > { %8274 = vmatpush1.bf16.msra.mxu1 %v10513_v44 }
 0xe56   : > { %8275 = vmatprep.subr.bf16.mxu1 %v10518_v55 }
 0xe59   : > { %8276 = vmatpush1.bf16.msra.mxu1 %v10516_v21 }
 0xe5c   : > { %8278 = vmatmul.mubr.bf16.vlgmr.msra.gmra.mrb[232].mxu1 %v7806_v23 }
 0xf2f   : > { %v8279_v56 = vpop.f32.mrb[232].mxu1 }
 0xf30   : > { %v9740_v28 = vadd.f32 %v8279_v56, %v8197_v52  ;;  %v8281_v9 = vpop.f32.mrb[233].mxu1 }
 0xf31   : > { %v9741_v27 = vadd.f32 %v8281_v9, %v8201_v14  ;;  %v8283_v2 = vpop.f32.mrb[234].mxu1 }
 0xf32   : > { %v8286_v40 = vmax.f32 %v9740_v28, 0.0  ;;  %v8284_v10 = vpop.f32.mrb[235].mxu1 }
 0xf33   : > { %v8287_v12 = vmax.f32 %v9741_v27, 0.0 }
 0xf34   : > { %v8288_v11 = vpack.c.bf16 %v8286_v40, %v8286_v40 }
 0xf35   : > { %v8289_v49 = vpack.c.bf16 %v8287_v12, %v8287_v12 }
 0xf37   : > { %8450 = vmatprep.mubr.bf16.mxu0 %v8289_v49 }
 0xf38   : > { %8451 = vmatmul.mubr.bf16.vlgmr.msra.gmra.mrb[248].mxu0 %v8288_v11 }
 0xf39   : > { %9279 = vmatpush3.bf16.msra.mxu0 %v10536_v8  ;;  %8682 = vmatprep.mubr.bf16.mxu0 %v7598_v43 }
 0xf3a   : > { %9280 = vmatprep.subr.bf16.mxu0 %v10537_v47 }
 0xf3d   : > { %9281 = vmatpush3.bf16.msra.mxu0 %v10538_v36 }
 0xf3e   : > { %9282 = vmatprep.subr.bf16.mxu0 %v10539_v7 }
 0xf41   : > { %9283 = vmatpush3.bf16.msra.mxu0 %v10540_v5 }
 0xf42   : > { %9284 = vmatprep.subr.bf16.mxu0 %v10541_v62 }
 0xf45   : > { %9285 = vmatpush3.bf16.msra.mxu0 %v10542_v22 }
 0xf46   : > { %9286 = vmatprep.subr.bf16.mxu0 %v10543_v42 }
 0xf49   : > { %9287 = vmatpush3.bf16.msra.mxu0 %v10544_v45 }
 0xf4a   : > { %9288 = vmatprep.subr.bf16.mxu0 %v10545_v61 }
 0xf4d   : > { %9289 = vmatpush3.bf16.msra.mxu0 %v10546_v38 }
 0xf4e   : > { %9290 = vmatprep.subr.bf16.mxu0 %v10547_v46 }
 0xf51   : > { %9291 = vmatpush3.bf16.msra.mxu0 %v10548_v37 }
 0xf52   : > { %9292 = vmatprep.subr.bf16.mxu0 %v10549_v33 }
 0xf55   : > { %9293 = vmatpush3.bf16.msra.mxu0 %v10550_v35 }
 0xf56   : > { %9300 = vmatprep.subr.bf16.mxu0 %v10551_v59 }
 0xf58   : > { %8683 = vmatmul.mubr.bf16.vlgmr.msra.gmra.mrb[252].mxu0 %v7597_v60 }
 0xf59   : > { %9301 = vmatpush3.bf16.msra.mxu0 %v10552_v54  ;;  %8722 = vmatprep.mubr.bf16.mxu0 %v7600_v57 }
 0xf5a   : > { %9302 = vmatprep.subr.bf16.mxu0 %v10553_v16 }
 0xf5d   : > { %9303 = vmatpush3.bf16.msra.mxu0 %v10554_v41 }
 0xf5e   : > { %9304 = vmatprep.subr.bf16.mxu0 %v10555_v1 }
 0xf61   : > { %9305 = vmatpush3.bf16.msra.mxu0 %v10556_v58 }
 0xf62   : > { %9306 = vmatprep.subr.bf16.mxu0 %v10557_v20 }
 0xf65   : > { %9307 = vmatpush3.bf16.msra.mxu0 %v10558_v32 }
 0xf66   : > { %9308 = vmatprep.subr.bf16.mxu0 %v10559_v3 }
 0xf69   : > { %9309 = vmatpush3.bf16.msra.mxu0 %v10560_v53 }
 0xf6a   : > { %9310 = vmatprep.subr.bf16.mxu0 %v10561_v26 }
 0xf6d   : > { %9311 = vmatpush3.bf16.msra.mxu0 %v10562_v24 }
 0xf6e   : > { %9312 = vmatprep.subr.bf16.mxu0 %v10563_v13 }
 0xf71   : > { %9313 = vmatpush3.bf16.msra.mxu0 %v10564_v25 }
 0xf72   : > { %9314 = vmatprep.subr.bf16.mxu0 %v10565_v15 }
 0xf75   : > { %9315 = vmatpush3.bf16.msra.mxu0 %v10566_v29 }
 0xf78   : > { %8723 = vmatmul.mubr.bf16.vlgmr.msra.gmra.mrb[0].mxu0 %v7599_v4 }
0x100b   : > { %v9272_v0 = vpop.f32.mrb[248].mxu0 }
0x100c   : > { %v9273_v6 = vpop.f32.mrb[249].mxu0 }
0x100d   : > { %v9274_v39 = vadd.f32 %v9273_v6, %v9272_v0  ;;  %v9275_v18 = vpop.f32.mrb[250].mxu0 }
0x100e   : > { %v9276_v44 = vpop.f32.mrb[251].mxu0 }
0x102b   : > { %v9294_v50 = vpop.f32.mrb[252].mxu0 }
0x102c   : > { %v9295_v55 = vpop.f32.mrb[253].mxu0 }
0x102d   : > { %v9296_v21 = vadd.f32 %v9295_v55, %v9294_v50  ;;  %v9297_v63 = vpop.f32.mrb[254].mxu0 }
0x102e   : > { %v9298_v23 = vpop.f32.mrb[255].mxu0 }
0x102f   : > { %v8685_v51 = vadd.f32 %v9296_v21, %v9274_v39 }
0x104b   : > { %v9316_v17 = vpop.f32.mrb[0].mxu0 }
0x104c   : > { %v9317_v34 = vpop.f32.mrb[1].mxu0 }
0x104d   : > { %v9318_v48 = vadd.f32 %v9317_v34, %v9316_v17  ;;  %v9319_v19 = vpop.f32.mrb[2].mxu0 }
0x104e   : > { %v9320_v31 = vpop.f32.mrb[3].mxu0 }
0x104f   : > { %v8725_v52 = vadd.f32 %v9318_v48, %v8685_v51 }
0x1051   : > { %v8731_v14 = vadd.f32 %v8730_v30, %v8725_v52 }
0x1053   : > { %8732 = vst [vmem:[%s612_s1] sm:$0x1] %v8731_v14 }
0x1054 PF: > { %s29_s0 = sadd.s32 1, %s10575_s0  }
0x1055   : > { %p26_p4 = scmp.ge.s32.totalorder %s29_s0, 4  }
0x1057   :  { %28 = sbr.rel (!%p26_p4) target bundleno = 5 (0x5), region = 129 }

</bundles_post_ra>
